<compile_context>
chip_gen: v6e
topology: v6e:2x2x1
jax: 0.10.0
libtpu: 0.0.40
codegen_flags: <defaults>
</compile_context>

<pallas_src>
import jax
import jax.numpy as jnp
import numpy as np
from jax.experimental import pallas as pl
from jax.experimental.pallas import tpu as pltpu

EPS = 1e-3  # BatchNorm eps from the PyTorch module


# --------------------------------------------------------------------------- #
# Pallas kernel: full CLEEGN forward for G folded batch elements per step
# --------------------------------------------------------------------------- #
def cleegn_kernel(x_ref, w1_ref, b1_ref, w2_ref, b2_ref, w3_ref, b3_ref,
                  w4_ref, b4_ref, w5_ref, b5_ref, out_ref):
    G, C, T = x_ref.shape              # folded batch group, electrodes, time
    F, K = w2_ref.shape                # N_F, temporal kernel length
    GC = G * C
    N = GC * T                         # flat lane axis: lane = (b*C + c)*T + t
    pad_t = (K - 1) // 2               # PyTorch 'same' left pad, time axis
    pad_h = (C - 1) // 2               # PyTorch 'same' left pad, electrode axis
    f32 = jnp.float32

    # ---- per-lane (time, electrode) indices + tap-validity masks (hoisted) --
    t_iota = jax.lax.broadcasted_iota(jnp.int32, (1, T), 1)
    t_idx = jnp.concatenate([t_iota] * GC, axis=1)                      # lane -> t
    c_idx = jnp.concatenate(
        [jnp.full((1, T), c, jnp.int32) for c in range(C)] * G, axis=1)  # lane -> c
    t_valid = [(t_idx >= pad_t - k) & (t_idx < T + pad_t - k) for k in range(K)]
    c_valid = [(c_idx >= pad_h - d) & (c_idx < C + pad_h - d) for d in range(C)]

    def time_tap(h, k):
        """Lane (b,c,t) holds h[b, c, t + k - pad_t]; zero outside [0, T)."""
        if k == pad_t:
            return h
        rolled = pltpu.roll(h, shift=(pad_t - k) % N, axis=1)   # XLU lane rotate
        return jnp.where(t_valid[k], rolled, 0.0)

    def elec_tap(h, dc):
        """Lane (b,c,t) holds h[b, c + dc - pad_h, t]; zero outside [0, C)."""
        if dc == pad_h:
            return h
        rolled = pltpu.roll(h, shift=((pad_h - dc) * T) % N, axis=1)
        return jnp.where(c_valid[dc], rolled, 0.0)

    # ---- conv1 (+BN1 folded): electrode mixing -------------------------------
    # w1 is block-diagonal over the folded batch group, so one matmul covers
    # all G elements.  (G,C,T)->(G*C,T) only merges leading dims (layout-free).
    x2d = x_ref[...].reshape(GC, T)
    h1 = jnp.dot(w1_ref[...], x2d, preferred_element_type=f32) + b1_ref[...]

    # Flatten rows onto lanes once: lane = (b*C + c)*T + t.  (Single hoisted
    # relayout; kept as aligned 128-lane row concats -- low-priority item.)
    h1_flat = jnp.concatenate([h1[r:r + 1, :] for r in range(GC)], axis=1)

    # ---- conv2 (+BN2): 1 -> F channels, K temporal taps: ONE MXU matmul ------
    stack = jnp.concatenate([time_tap(h1_flat, k) for k in range(K)], axis=0)
    h2 = jnp.dot(w2_ref[...], stack, preferred_element_type=f32) + b2_ref[...]

    # ---- conv3 (+BN3): F -> F, K temporal taps: per-tap accumulated matmuls --
    acc = None
    for k in range(K):
        part = jnp.dot(w3_ref[k], time_tap(h2, k), preferred_element_type=f32)
        acc = part if acc is None else acc + part
    h3 = acc + b3_ref[...]                                               # (F, N)

    # ---- conv4 (+BN4): F -> C, C electrode taps ------------------------------
    acc = None
    for dc in range(C):
        part = jnp.dot(w4_ref[dc], elec_tap(h3, dc), preferred_element_type=f32)
        acc = part if acc is None else acc + part
    h4 = acc + b4_ref[...]                                               # (C, N)

    # ---- conv5: C -> 1, C electrode taps -------------------------------------
    acc = None
    for dc in range(C):
        part = jnp.dot(w5_ref[dc], elec_tap(h4, dc), preferred_element_type=f32)
        acc = part if acc is None else acc + part
    y = acc + b5_ref[...]                                                # (1, N)

    out_ref[...] = y[None].astype(out_ref.dtype)                         # (1,1,N)


# --------------------------------------------------------------------------- #
# Wrapper: generation-aware batching, parameter plumbing, pallas_call
# --------------------------------------------------------------------------- #
def _tensorcores_per_chip():
    try:
        kind = jax.devices()[0].device_kind.lower()
    except Exception:
        return 1
    return 2 if ("v7" in kind or "7x" in kind) else 1


def cleegn_forward(x, folded, batch_per_step=None):
    """x: (B, 1, n_chan, T) float32 -> (B, 1, n_chan, T) float32."""
    B, _, C, T = x.shape
    (w1, b1, w2, b2, w3, b3, w4, b4, w5, b5) = folded
    F, K = w2.shape
    CT = C * T

    # Single-TC parts (v5e/v6e): fold all B elements into one grid step.
    # Dual-TC v7x: ceil(B/2) elements per step so both TensorCores get work.
    if batch_per_step is None:
        batch_per_step = max(1, -(-B // _tensorcores_per_chip()))
    G = max(1, min(int(batch_per_step), B))
    steps = -(-B // G)
    B_pad = steps * G
    N = G * CT

    x_sq = x.reshape(B, C, T).astype(jnp.float32)
    if B_pad != B:
        x_sq = jnp.concatenate(
            [x_sq, jnp.zeros((B_pad - B, C, T), jnp.float32)], axis=0)

    # conv1 weight/bias replicated block-diagonally over the fold group.
    w1_blk = jnp.kron(jnp.eye(G, dtype=jnp.float32), w1)        # (G*C, G*C)
    b1_blk = jnp.tile(b1, (G, 1))                                # (G*C, 1)

    flops = 2 * B * (C * C * T + F * K * CT + F * F * K * CT
                     + C * F * C * CT + C * C * CT)
    bytes_accessed = 4 * (2 * B_pad * CT + w1_blk.size + b1_blk.size + w2.size
                          + b2.size + w3.size + b3.size + w4.size + b4.size
                          + w5.size + b5.size)

    grid_spec = pltpu.PrefetchScalarGridSpec(
        num_scalar_prefetch=0,
        grid=(steps,),
        in_specs=[
            pl.BlockSpec((G, C, T), lambda s: (s, 0, 0)),        # x (G per step)
            pl.BlockSpec((G * C, G * C), lambda s: (0, 0)),      # w1 (block-diag)
            pl.BlockSpec((G * C, 1), lambda s: (0, 0)),          # b1
            pl.BlockSpec((F, K), lambda s: (0, 0)),              # w2
            pl.BlockSpec((F, 1), lambda s: (0, 0)),              # b2
            pl.BlockSpec((K, F, F), lambda s: (0, 0, 0)),        # w3 (tap-major)
            pl.BlockSpec((F, 1), lambda s: (0, 0)),              # b3
            pl.BlockSpec((C, C, F), lambda s: (0, 0, 0)),        # w4 (tap-major)
            pl.BlockSpec((C, 1), lambda s: (0, 0)),              # b4
            pl.BlockSpec((C, 1, C), lambda s: (0, 0, 0)),        # w5 (tap-major)
            pl.BlockSpec((1, 1), lambda s: (0, 0)),              # b5
        ],
        out_specs=pl.BlockSpec((1, 1, N), lambda s: (s, 0, 0)),
    )

    out = pl.pallas_call(
        cleegn_kernel,
        grid_spec=grid_spec,
        out_shape=jax.ShapeDtypeStruct((steps, 1, N), jnp.float32),
        compiler_params=pltpu.CompilerParams(dimension_semantics=("parallel",)),
        cost_estimate=pl.CostEstimate(flops=flops, transcendentals=0,
                                      bytes_accessed=bytes_accessed),
    )(x_sq, w1_blk, b1_blk, w2, b2, w3, b3, w4, b4, w5, b5)

    return out.reshape(B_pad, C, T)[:B].reshape(B, 1, C, T)


# --------------------------------------------------------------------------- #
# Deterministic parameter init (PyTorch module shapes) + BN folding
# --------------------------------------------------------------------------- #
def init_params(key, n_chan, N_F, K):
    ks = jax.random.split(key, 26)

    def nrm(k, shape, scale=0.1):
        return scale * jax.random.normal(k, shape, jnp.float32)

    P = {}
    P["W1"] = nrm(ks[0], (n_chan, 1, n_chan, 1)); P["b1"] = nrm(ks[1], (n_chan,))
    P["g1"] = 1.0 + nrm(ks[2], (1,)); P["be1"] = nrm(ks[3], (1,))
    P["m1"] = nrm(ks[4], (1,)); P["v1"] = 0.5 + jnp.abs(nrm(ks[5], (1,), 1.0))

    P["W2"] = nrm(ks[6], (N_F, 1, 1, K)); P["b2"] = nrm(ks[7], (N_F,))
    P["g2"] = 1.0 + nrm(ks[8], (N_F,)); P["be2"] = nrm(ks[9], (N_F,))
    P["m2"] = nrm(ks[10], (N_F,)); P["v2"] = 0.5 + jnp.abs(nrm(ks[11], (N_F,), 1.0))

    P["W3"] = nrm(ks[12], (N_F, N_F, 1, K)); P["b3"] = nrm(ks[13], (N_F,))
    P["g3"] = 1.0 + nrm(ks[14], (N_F,)); P["be3"] = nrm(ks[15], (N_F,))
    P["m3"] = nrm(ks[16], (N_F,)); P["v3"] = 0.5 + jnp.abs(nrm(ks[17], (N_F,), 1.0))

    P["W4"] = nrm(ks[18], (n_chan, N_F, n_chan, 1)); P["b4"] = nrm(ks[19], (n_chan,))
    P["g4"] = 1.0 + nrm(ks[20], (n_chan,)); P["be4"] = nrm(ks[21], (n_chan,))
    P["m4"] = nrm(ks[22], (n_chan,)); P["v4"] = 0.5 + jnp.abs(nrm(ks[23], (n_chan,), 1.0))

    P["W5"] = nrm(ks[24], (1, n_chan, n_chan, 1)); P["b5"] = nrm(ks[25], (1,))
    return P


def fold_params(P, n_chan, N_F):
    """Fold eval-mode BatchNorm into conv weights; lay weights out tap-major
    ((taps, out_ch, in_ch)) for the per-tap accumulated matmuls in the kernel."""
    C, F = n_chan, N_F

    s1 = P["g1"] / jnp.sqrt(P["v1"] + EPS)                      # scalar
    w1 = P["W1"][:, 0, :, 0] * s1                               # (C, C)
    b1 = P["b1"] * s1 + P["be1"] - P["m1"] * s1                 # (C,)

    s2 = P["g2"] / jnp.sqrt(P["v2"] + EPS)                      # (F,)
    w2 = P["W2"][:, 0, 0, :] * s2[:, None]                      # (F, K)
    b2 = P["b2"] * s2 + P["be2"] - P["m2"] * s2

    s3 = P["g3"] / jnp.sqrt(P["v3"] + EPS)
    w3 = P["W3"][:, :, 0, :] * s3[:, None, None]                # (F, F_in, K)
    w3 = jnp.transpose(w3, (2, 0, 1))                           # (K, F, F_in)
    b3 = P["b3"] * s3 + P["be3"] - P["m3"] * s3

    s4 = P["g4"] / jnp.sqrt(P["v4"] + EPS)
    w4 = P["W4"][:, :, :, 0] * s4[:, None, None]                # (C, F, C_k)
    w4 = jnp.transpose(w4, (2, 0, 1))                           # (C_k, C, F)
    b4 = P["b4"] * s4 + P["be4"] - P["m4"] * s4

    w5 = jnp.transpose(P["W5"][:, :, :, 0], (2, 0, 1))          # (C_k, 1, C)
    b5 = P["b5"].reshape(1, 1)

    return (w1, b1.reshape(C, 1), w2, b2.reshape(F, 1),
            w3, b3.reshape(F, 1), w4, b4.reshape(C, 1), w5, b5)


# --------------------------------------------------------------------------- #
# Pure-JAX reference (PyTorch semantics: cross-correlation, 'same' pads
# floor((k-1)/2) at the start, the rest at the end; eval-mode BatchNorm)
# --------------------------------------------------------------------------- #
def _conv2d(x, w, b, padding):
    out = jax.lax.conv_general_dilated(
        x, w, window_strides=(1, 1), padding=padding,
        dimension_numbers=("NCHW", "OIHW", "NCHW"))
    return out + b[None, :, None, None]


def _bn(x, g, be, m, v):
    s = g / jnp.sqrt(v + EPS)
    return x * s[None, :, None, None] + (be - m * s)[None, :, None, None]


def reference_forward(x, P, n_chan, K):
    plt, prt = (K - 1) // 2, (K - 1) - (K - 1) // 2
    plh, prh = (n_chan - 1) // 2, (n_chan - 1) - (n_chan - 1) // 2
    y = _conv2d(x, P["W1"], P["b1"], ((0, 0), (0, 0)))          # (B,C,1,T)
    y = jnp.transpose(y, (0, 2, 1, 3))                          # (B,1,C,T)
    y = _bn(y, P["g1"], P["be1"], P["m1"], P["v1"])
    y = _conv2d(y, P["W2"], P["b2"], ((0, 0), (plt, prt)))
    y = _bn(y, P["g2"], P["be2"], P["m2"], P["v2"])
    y = _conv2d(y, P["W3"], P["b3"], ((0, 0), (plt, prt)))
    y = _bn(y, P["g3"], P["be3"], P["m3"], P["v3"])
    y = _conv2d(y, P["W4"], P["b4"], ((plh, prh), (0, 0)))
    y = _bn(y, P["g4"], P["be4"], P["m4"], P["v4"])
    y = _conv2d(y, P["W5"], P["b5"], ((plh, prh), (0, 0)))
    return y


if __name__ == "__main__":
    B, n_chan, T = 2, 8, 128
    fs, tem_kernelLen = 80, 0.1
    N_F = 16
    K = int(fs * tem_kernelLen)  # 8

    key = jax.random.PRNGKey(0)
    kx, kp = jax.random.split(key)
    x = jax.random.normal(kx, (B, 1, n_chan, T), jnp.float32)

    P = init_params(kp, n_chan, N_F, K)
    folded = fold_params(P, n_chan, N_F)

    out = cleegn_forward(x, folded)
    out = jax.block_until_ready(out)

    ref = reference_forward(x, P, n_chan, K)
    np.testing.assert_allclose(np.asarray(out), np.asarray(ref),
                               rtol=2e-3, atol=2e-3)
    print("KERNEL_OK")
</pallas_src>

<mosaic_0001>
module attributes {stable_mosaic.version = 11 : i64} {
  func.func @cleegn_kernel(%arg0: i32, %arg1: memref<2x8x128xf32, #tpu.memory_space<vmem>>, %arg2: memref<16x16xf32, #tpu.memory_space<vmem>>, %arg3: memref<16x1xf32, #tpu.memory_space<vmem>>, %arg4: memref<16x8xf32, #tpu.memory_space<vmem>>, %arg5: memref<16x1xf32, #tpu.memory_space<vmem>>, %arg6: memref<8x16x16xf32, #tpu.memory_space<vmem>>, %arg7: memref<16x1xf32, #tpu.memory_space<vmem>>, %arg8: memref<8x8x16xf32, #tpu.memory_space<vmem>>, %arg9: memref<8x1xf32, #tpu.memory_space<vmem>>, %arg10: memref<8x1x8xf32, #tpu.memory_space<vmem>>, %arg11: memref<1x1xf32, #tpu.memory_space<vmem>>, %arg12: memref<1x1x2048xf32, #tpu.memory_space<vmem>>) attributes {dimension_semantics = [#tpu.dimension_semantics<parallel>], iteration_bounds = array<i64: 1>, scalar_prefetch = 0 : i64, scratch_operands = 0 : i64, tpu.core_type = #tpu.core_type<tc>, window_params = [{transform_indices = @transform_0, window_bounds = array<i64: 2, 8, 128>}, {pipeline_mode = #tpu.pipeline_mode<synchronous>, transform_indices = @transform_1, window_bounds = array<i64: 16, 16>}, {pipeline_mode = #tpu.pipeline_mode<synchronous>, transform_indices = @transform_2, window_bounds = array<i64: 16, 1>}, {pipeline_mode = #tpu.pipeline_mode<synchronous>, transform_indices = @transform_3, window_bounds = array<i64: 16, 8>}, {pipeline_mode = #tpu.pipeline_mode<synchronous>, transform_indices = @transform_4, window_bounds = array<i64: 16, 1>}, {pipeline_mode = #tpu.pipeline_mode<synchronous>, transform_indices = @transform_5, window_bounds = array<i64: 8, 16, 16>}, {pipeline_mode = #tpu.pipeline_mode<synchronous>, transform_indices = @transform_6, window_bounds = array<i64: 16, 1>}, {pipeline_mode = #tpu.pipeline_mode<synchronous>, transform_indices = @transform_7, window_bounds = array<i64: 8, 8, 16>}, {pipeline_mode = #tpu.pipeline_mode<synchronous>, transform_indices = @transform_8, window_bounds = array<i64: 8, 1>}, {pipeline_mode = #tpu.pipeline_mode<synchronous>, transform_indices = @transform_9, window_bounds = array<i64: 8, 1, 8>}, {pipeline_mode = #tpu.pipeline_mode<synchronous>, transform_indices = @transform_10, window_bounds = array<i64: 1, 1>}, {transform_indices = @transform_11, window_bounds = array<i64: 1, 1, 2048>}]} {
    %0 = tpu.iota {dimensions = array<i32: 1>} : vector<1x128xi32>
    %1 = tpu.concatenate %0, %0, %0, %0, %0, %0, %0, %0, %0, %0, %0, %0, %0, %0, %0, %0 in 1 : vector<1x128xi32>, vector<1x128xi32>, vector<1x128xi32>, vector<1x128xi32>, vector<1x128xi32>, vector<1x128xi32>, vector<1x128xi32>, vector<1x128xi32>, vector<1x128xi32>, vector<1x128xi32>, vector<1x128xi32>, vector<1x128xi32>, vector<1x128xi32>, vector<1x128xi32>, vector<1x128xi32>, vector<1x128xi32> -> vector<1x2048xi32>
    %c0_i32 = arith.constant 0 : i32
    %2 = vector.broadcast %c0_i32 : i32 to vector<1x128xi32>
    %c1_i32 = arith.constant 1 : i32
    %3 = vector.broadcast %c1_i32 : i32 to vector<1x128xi32>
    %c2_i32 = arith.constant 2 : i32
    %4 = vector.broadcast %c2_i32 : i32 to vector<1x128xi32>
    %c3_i32 = arith.constant 3 : i32
    %5 = vector.broadcast %c3_i32 : i32 to vector<1x128xi32>
    %c4_i32 = arith.constant 4 : i32
    %6 = vector.broadcast %c4_i32 : i32 to vector<1x128xi32>
    %c5_i32 = arith.constant 5 : i32
    %7 = vector.broadcast %c5_i32 : i32 to vector<1x128xi32>
    %c6_i32 = arith.constant 6 : i32
    %8 = vector.broadcast %c6_i32 : i32 to vector<1x128xi32>
    %c7_i32 = arith.constant 7 : i32
    %9 = vector.broadcast %c7_i32 : i32 to vector<1x128xi32>
    %10 = tpu.concatenate %2, %3, %4, %5, %6, %7, %8, %9, %2, %3, %4, %5, %6, %7, %8, %9 in 1 : vector<1x128xi32>, vector<1x128xi32>, vector<1x128xi32>, vector<1x128xi32>, vector<1x128xi32>, vector<1x128xi32>, vector<1x128xi32>, vector<1x128xi32>, vector<1x128xi32>, vector<1x128xi32>, vector<1x128xi32>, vector<1x128xi32>, vector<1x128xi32>, vector<1x128xi32>, vector<1x128xi32>, vector<1x128xi32> -> vector<1x2048xi32>
    %c3_i32_0 = arith.constant 3 : i32
    %11 = vector.broadcast %c3_i32_0 : i32 to vector<1x2048xi32>
    %12 = arith.cmpi sge, %1, %11 : vector<1x2048xi32>
    %c131_i32 = arith.constant 131 : i32
    %13 = vector.broadcast %c131_i32 : i32 to vector<1x2048xi32>
    %14 = arith.cmpi slt, %1, %13 : vector<1x2048xi32>
    %15 = arith.andi %12, %14 : vector<1x2048xi1>
    %c2_i32_1 = arith.constant 2 : i32
    %16 = vector.broadcast %c2_i32_1 : i32 to vector<1x2048xi32>
    %17 = arith.cmpi sge, %1, %16 : vector<1x2048xi32>
    %c130_i32 = arith.constant 130 : i32
    %18 = vector.broadcast %c130_i32 : i32 to vector<1x2048xi32>
    %19 = arith.cmpi slt, %1, %18 : vector<1x2048xi32>
    %20 = arith.andi %17, %19 : vector<1x2048xi1>
    %c1_i32_2 = arith.constant 1 : i32
    %21 = vector.broadcast %c1_i32_2 : i32 to vector<1x2048xi32>
    %22 = arith.cmpi sge, %1, %21 : vector<1x2048xi32>
    %c129_i32 = arith.constant 129 : i32
    %23 = vector.broadcast %c129_i32 : i32 to vector<1x2048xi32>
    %24 = arith.cmpi slt, %1, %23 : vector<1x2048xi32>
    %25 = arith.andi %22, %24 : vector<1x2048xi1>
    %c-1_i32 = arith.constant -1 : i32
    %26 = vector.broadcast %c-1_i32 : i32 to vector<1x2048xi32>
    %27 = arith.cmpi sge, %1, %26 : vector<1x2048xi32>
    %c127_i32 = arith.constant 127 : i32
    %28 = vector.broadcast %c127_i32 : i32 to vector<1x2048xi32>
    %29 = arith.cmpi slt, %1, %28 : vector<1x2048xi32>
    %30 = arith.andi %27, %29 : vector<1x2048xi1>
    %c-2_i32 = arith.constant -2 : i32
    %31 = vector.broadcast %c-2_i32 : i32 to vector<1x2048xi32>
    %32 = arith.cmpi sge, %1, %31 : vector<1x2048xi32>
    %c126_i32 = arith.constant 126 : i32
    %33 = vector.broadcast %c126_i32 : i32 to vector<1x2048xi32>
    %34 = arith.cmpi slt, %1, %33 : vector<1x2048xi32>
    %35 = arith.andi %32, %34 : vector<1x2048xi1>
    %c-3_i32 = arith.constant -3 : i32
    %36 = vector.broadcast %c-3_i32 : i32 to vector<1x2048xi32>
    %37 = arith.cmpi sge, %1, %36 : vector<1x2048xi32>
    %c125_i32 = arith.constant 125 : i32
    %38 = vector.broadcast %c125_i32 : i32 to vector<1x2048xi32>
    %39 = arith.cmpi slt, %1, %38 : vector<1x2048xi32>
    %40 = arith.andi %37, %39 : vector<1x2048xi1>
    %c-4_i32 = arith.constant -4 : i32
    %41 = vector.broadcast %c-4_i32 : i32 to vector<1x2048xi32>
    %42 = arith.cmpi sge, %1, %41 : vector<1x2048xi32>
    %c124_i32 = arith.constant 124 : i32
    %43 = vector.broadcast %c124_i32 : i32 to vector<1x2048xi32>
    %44 = arith.cmpi slt, %1, %43 : vector<1x2048xi32>
    %45 = arith.andi %42, %44 : vector<1x2048xi1>
    %c3_i32_3 = arith.constant 3 : i32
    %46 = vector.broadcast %c3_i32_3 : i32 to vector<1x2048xi32>
    %47 = arith.cmpi sge, %10, %46 : vector<1x2048xi32>
    %c11_i32 = arith.constant 11 : i32
    %48 = vector.broadcast %c11_i32 : i32 to vector<1x2048xi32>
    %49 = arith.cmpi slt, %10, %48 : vector<1x2048xi32>
    %50 = arith.andi %47, %49 : vector<1x2048xi1>
    %c2_i32_4 = arith.constant 2 : i32
    %51 = vector.broadcast %c2_i32_4 : i32 to vector<1x2048xi32>
    %52 = arith.cmpi sge, %10, %51 : vector<1x2048xi32>
    %c10_i32 = arith.constant 10 : i32
    %53 = vector.broadcast %c10_i32 : i32 to vector<1x2048xi32>
    %54 = arith.cmpi slt, %10, %53 : vector<1x2048xi32>
    %55 = arith.andi %52, %54 : vector<1x2048xi1>
    %c1_i32_5 = arith.constant 1 : i32
    %56 = vector.broadcast %c1_i32_5 : i32 to vector<1x2048xi32>
    %57 = arith.cmpi sge, %10, %56 : vector<1x2048xi32>
    %c9_i32 = arith.constant 9 : i32
    %58 = vector.broadcast %c9_i32 : i32 to vector<1x2048xi32>
    %59 = arith.cmpi slt, %10, %58 : vector<1x2048xi32>
    %60 = arith.andi %57, %59 : vector<1x2048xi1>
    %c-1_i32_6 = arith.constant -1 : i32
    %61 = vector.broadcast %c-1_i32_6 : i32 to vector<1x2048xi32>
    %62 = arith.cmpi sge, %10, %61 : vector<1x2048xi32>
    %c7_i32_7 = arith.constant 7 : i32
    %63 = vector.broadcast %c7_i32_7 : i32 to vector<1x2048xi32>
    %64 = arith.cmpi slt, %10, %63 : vector<1x2048xi32>
    %65 = arith.andi %62, %64 : vector<1x2048xi1>
    %c-2_i32_8 = arith.constant -2 : i32
    %66 = vector.broadcast %c-2_i32_8 : i32 to vector<1x2048xi32>
    %67 = arith.cmpi sge, %10, %66 : vector<1x2048xi32>
    %c6_i32_9 = arith.constant 6 : i32
    %68 = vector.broadcast %c6_i32_9 : i32 to vector<1x2048xi32>
    %69 = arith.cmpi slt, %10, %68 : vector<1x2048xi32>
    %70 = arith.andi %67, %69 : vector<1x2048xi1>
    %c-3_i32_10 = arith.constant -3 : i32
    %71 = vector.broadcast %c-3_i32_10 : i32 to vector<1x2048xi32>
    %72 = arith.cmpi sge, %10, %71 : vector<1x2048xi32>
    %c5_i32_11 = arith.constant 5 : i32
    %73 = vector.broadcast %c5_i32_11 : i32 to vector<1x2048xi32>
    %74 = arith.cmpi slt, %10, %73 : vector<1x2048xi32>
    %75 = arith.andi %72, %74 : vector<1x2048xi1>
    %c-4_i32_12 = arith.constant -4 : i32
    %76 = vector.broadcast %c-4_i32_12 : i32 to vector<1x2048xi32>
    %77 = arith.cmpi sge, %10, %76 : vector<1x2048xi32>
    %c4_i32_13 = arith.constant 4 : i32
    %78 = vector.broadcast %c4_i32_13 : i32 to vector<1x2048xi32>
    %79 = arith.cmpi slt, %10, %78 : vector<1x2048xi32>
    %80 = arith.andi %77, %79 : vector<1x2048xi1>
    %c0 = arith.constant 0 : index
    %c0_14 = arith.constant 0 : index
    %c0_15 = arith.constant 0 : index
    %81 = vector.load %arg1[%c0, %c0_14, %c0_15] : memref<2x8x128xf32, #tpu.memory_space<vmem>>, vector<2x8x128xf32>
    %82 = vector.shape_cast %81 : vector<2x8x128xf32> to vector<16x128xf32>
    %c0_16 = arith.constant 0 : index
    %c0_17 = arith.constant 0 : index
    %83 = vector.load %arg2[%c0_16, %c0_17] : memref<16x16xf32, #tpu.memory_space<vmem>>, vector<16x16xf32>
    %cst = arith.constant dense<0.000000e+00> : vector<16x128xf32>
    %84 = tpu.matmul %83, %82, %cst {dimension_numbers = #tpu.dot_dimension_numbers<[1], [0], [0], [1], [0, 0, 1, 1], [], []>} : vector<16x16xf32>, vector<16x128xf32>, vector<16x128xf32> -> vector<16x128xf32>
    %c0_18 = arith.constant 0 : index
    %c0_19 = arith.constant 0 : index
    %85 = vector.load %arg3[%c0_18, %c0_19] : memref<16x1xf32, #tpu.memory_space<vmem>>, vector<16x1xf32>
    %86 = vector.broadcast %85 : vector<16x1xf32> to vector<16x128xf32>
    %87 = arith.addf %84, %86 : vector<16x128xf32>
    %88 = vector.extract_strided_slice %87 {offsets = [0, 0], sizes = [1, 128], strides = [1, 1]} : vector<16x128xf32> to vector<1x128xf32>
    %89 = vector.extract_strided_slice %87 {offsets = [1, 0], sizes = [1, 128], strides = [1, 1]} : vector<16x128xf32> to vector<1x128xf32>
    %90 = vector.extract_strided_slice %87 {offsets = [2, 0], sizes = [1, 128], strides = [1, 1]} : vector<16x128xf32> to vector<1x128xf32>
    %91 = vector.extract_strided_slice %87 {offsets = [3, 0], sizes = [1, 128], strides = [1, 1]} : vector<16x128xf32> to vector<1x128xf32>
    %92 = vector.extract_strided_slice %87 {offsets = [4, 0], sizes = [1, 128], strides = [1, 1]} : vector<16x128xf32> to vector<1x128xf32>
    %93 = vector.extract_strided_slice %87 {offsets = [5, 0], sizes = [1, 128], strides = [1, 1]} : vector<16x128xf32> to vector<1x128xf32>
    %94 = vector.extract_strided_slice %87 {offsets = [6, 0], sizes = [1, 128], strides = [1, 1]} : vector<16x128xf32> to vector<1x128xf32>
    %95 = vector.extract_strided_slice %87 {offsets = [7, 0], sizes = [1, 128], strides = [1, 1]} : vector<16x128xf32> to vector<1x128xf32>
    %96 = vector.extract_strided_slice %87 {offsets = [8, 0], sizes = [1, 128], strides = [1, 1]} : vector<16x128xf32> to vector<1x128xf32>
    %97 = vector.extract_strided_slice %87 {offsets = [9, 0], sizes = [1, 128], strides = [1, 1]} : vector<16x128xf32> to vector<1x128xf32>
    %98 = vector.extract_strided_slice %87 {offsets = [10, 0], sizes = [1, 128], strides = [1, 1]} : vector<16x128xf32> to vector<1x128xf32>
    %99 = vector.extract_strided_slice %87 {offsets = [11, 0], sizes = [1, 128], strides = [1, 1]} : vector<16x128xf32> to vector<1x128xf32>
    %100 = vector.extract_strided_slice %87 {offsets = [12, 0], sizes = [1, 128], strides = [1, 1]} : vector<16x128xf32> to vector<1x128xf32>
    %101 = vector.extract_strided_slice %87 {offsets = [13, 0], sizes = [1, 128], strides = [1, 1]} : vector<16x128xf32> to vector<1x128xf32>
    %102 = vector.extract_strided_slice %87 {offsets = [14, 0], sizes = [1, 128], strides = [1, 1]} : vector<16x128xf32> to vector<1x128xf32>
    %103 = vector.extract_strided_slice %87 {offsets = [15, 0], sizes = [1, 128], strides = [1, 1]} : vector<16x128xf32> to vector<1x128xf32>
    %104 = tpu.concatenate %88, %89, %90, %91, %92, %93, %94, %95, %96, %97, %98, %99, %100, %101, %102, %103 in 1 : vector<1x128xf32>, vector<1x128xf32>, vector<1x128xf32>, vector<1x128xf32>, vector<1x128xf32>, vector<1x128xf32>, vector<1x128xf32>, vector<1x128xf32>, vector<1x128xf32>, vector<1x128xf32>, vector<1x128xf32>, vector<1x128xf32>, vector<1x128xf32>, vector<1x128xf32>, vector<1x128xf32>, vector<1x128xf32> -> vector<1x2048xf32>
    %c3_i32_20 = arith.constant 3 : i32
    %105 = tpu.dynamic_rotate %104 by %c3_i32_20 dim 1 : vector<1x2048xf32>, i32 -> vector<1x2048xf32>
    %cst_21 = arith.constant 0.000000e+00 : f32
    %106 = vector.broadcast %cst_21 : f32 to vector<1x2048xf32>
    %107 = arith.select %15, %105, %106 : vector<1x2048xi1>, vector<1x2048xf32>
    %c2_i32_22 = arith.constant 2 : i32
    %108 = tpu.dynamic_rotate %104 by %c2_i32_22 dim 1 : vector<1x2048xf32>, i32 -> vector<1x2048xf32>
    %cst_23 = arith.constant 0.000000e+00 : f32
    %109 = vector.broadcast %cst_23 : f32 to vector<1x2048xf32>
    %110 = arith.select %20, %108, %109 : vector<1x2048xi1>, vector<1x2048xf32>
    %c1_i32_24 = arith.constant 1 : i32
    %111 = tpu.dynamic_rotate %104 by %c1_i32_24 dim 1 : vector<1x2048xf32>, i32 -> vector<1x2048xf32>
    %cst_25 = arith.constant 0.000000e+00 : f32
    %112 = vector.broadcast %cst_25 : f32 to vector<1x2048xf32>
    %113 = arith.select %25, %111, %112 : vector<1x2048xi1>, vector<1x2048xf32>
    %c2047_i32 = arith.constant 2047 : i32
    %114 = tpu.dynamic_rotate %104 by %c2047_i32 dim 1 : vector<1x2048xf32>, i32 -> vector<1x2048xf32>
    %cst_26 = arith.constant 0.000000e+00 : f32
    %115 = vector.broadcast %cst_26 : f32 to vector<1x2048xf32>
    %116 = arith.select %30, %114, %115 : vector<1x2048xi1>, vector<1x2048xf32>
    %c2046_i32 = arith.constant 2046 : i32
    %117 = tpu.dynamic_rotate %104 by %c2046_i32 dim 1 : vector<1x2048xf32>, i32 -> vector<1x2048xf32>
    %cst_27 = arith.constant 0.000000e+00 : f32
    %118 = vector.broadcast %cst_27 : f32 to vector<1x2048xf32>
    %119 = arith.select %35, %117, %118 : vector<1x2048xi1>, vector<1x2048xf32>
    %c2045_i32 = arith.constant 2045 : i32
    %120 = tpu.dynamic_rotate %104 by %c2045_i32 dim 1 : vector<1x2048xf32>, i32 -> vector<1x2048xf32>
    %cst_28 = arith.constant 0.000000e+00 : f32
    %121 = vector.broadcast %cst_28 : f32 to vector<1x2048xf32>
    %122 = arith.select %40, %120, %121 : vector<1x2048xi1>, vector<1x2048xf32>
    %c2044_i32 = arith.constant 2044 : i32
    %123 = tpu.dynamic_rotate %104 by %c2044_i32 dim 1 : vector<1x2048xf32>, i32 -> vector<1x2048xf32>
    %cst_29 = arith.constant 0.000000e+00 : f32
    %124 = vector.broadcast %cst_29 : f32 to vector<1x2048xf32>
    %125 = arith.select %45, %123, %124 : vector<1x2048xi1>, vector<1x2048xf32>
    %126 = tpu.concatenate %107, %110, %113, %104, %116, %119, %122, %125 in 0 : vector<1x2048xf32>, vector<1x2048xf32>, vector<1x2048xf32>, vector<1x2048xf32>, vector<1x2048xf32>, vector<1x2048xf32>, vector<1x2048xf32>, vector<1x2048xf32> -> vector<8x2048xf32>
    %c0_30 = arith.constant 0 : index
    %c0_31 = arith.constant 0 : index
    %127 = vector.load %arg4[%c0_30, %c0_31] : memref<16x8xf32, #tpu.memory_space<vmem>>, vector<16x8xf32>
    %cst_32 = arith.constant dense<0.000000e+00> : vector<16x2048xf32>
    %128 = tpu.matmul %127, %126, %cst_32 {dimension_numbers = #tpu.dot_dimension_numbers<[1], [0], [0], [1], [0, 0, 1, 1], [], []>} : vector<16x8xf32>, vector<8x2048xf32>, vector<16x2048xf32> -> vector<16x2048xf32>
    %c0_33 = arith.constant 0 : index
    %c0_34 = arith.constant 0 : index
    %129 = vector.load %arg5[%c0_33, %c0_34] : memref<16x1xf32, #tpu.memory_space<vmem>>, vector<16x1xf32>
    %130 = vector.broadcast %129 : vector<16x1xf32> to vector<16x2048xf32>
    %131 = arith.addf %128, %130 : vector<16x2048xf32>
    %c0_35 = arith.constant 0 : index
    %c0_36 = arith.constant 0 : index
    %c0_37 = arith.constant 0 : index
    %132 = vector.load %arg6[%c0_35, %c0_36, %c0_37] : memref<8x16x16xf32, #tpu.memory_space<vmem>>, vector<1x16x16xf32>
    %133 = vector.shape_cast %132 : vector<1x16x16xf32> to vector<16x16xf32>
    %c3_i32_38 = arith.constant 3 : i32
    %134 = tpu.dynamic_rotate %131 by %c3_i32_38 dim 1 : vector<16x2048xf32>, i32 -> vector<16x2048xf32>
    %cst_39 = arith.constant 0.000000e+00 : f32
    %135 = vector.shape_cast %15 : vector<1x2048xi1> to vector<1x2048xi1>
    %136 = vector.broadcast %135 : vector<1x2048xi1> to vector<16x2048xi1>
    %137 = vector.broadcast %cst_39 : f32 to vector<16x2048xf32>
    %138 = arith.select %136, %134, %137 : vector<16x2048xi1>, vector<16x2048xf32>
    %cst_40 = arith.constant dense<0.000000e+00> : vector<16x2048xf32>
    %139 = tpu.matmul %133, %138, %cst_40 {dimension_numbers = #tpu.dot_dimension_numbers<[1], [0], [0], [1], [0, 0, 1, 1], [], []>} : vector<16x16xf32>, vector<16x2048xf32>, vector<16x2048xf32> -> vector<16x2048xf32>
    %c1 = arith.constant 1 : index
    %c0_41 = arith.constant 0 : index
    %c0_42 = arith.constant 0 : index
    %140 = vector.load %arg6[%c1, %c0_41, %c0_42] : memref<8x16x16xf32, #tpu.memory_space<vmem>>, vector<1x16x16xf32>
    %141 = vector.shape_cast %140 : vector<1x16x16xf32> to vector<16x16xf32>
    %c2_i32_43 = arith.constant 2 : i32
    %142 = tpu.dynamic_rotate %131 by %c2_i32_43 dim 1 : vector<16x2048xf32>, i32 -> vector<16x2048xf32>
    %cst_44 = arith.constant 0.000000e+00 : f32
    %143 = vector.shape_cast %20 : vector<1x2048xi1> to vector<1x2048xi1>
    %144 = vector.broadcast %143 : vector<1x2048xi1> to vector<16x2048xi1>
    %145 = vector.broadcast %cst_44 : f32 to vector<16x2048xf32>
    %146 = arith.select %144, %142, %145 : vector<16x2048xi1>, vector<16x2048xf32>
    %cst_45 = arith.constant dense<0.000000e+00> : vector<16x2048xf32>
    %147 = tpu.matmul %141, %146, %cst_45 {dimension_numbers = #tpu.dot_dimension_numbers<[1], [0], [0], [1], [0, 0, 1, 1], [], []>} : vector<16x16xf32>, vector<16x2048xf32>, vector<16x2048xf32> -> vector<16x2048xf32>
    %148 = arith.addf %139, %147 : vector<16x2048xf32>
    %c2 = arith.constant 2 : index
    %c0_46 = arith.constant 0 : index
    %c0_47 = arith.constant 0 : index
    %149 = vector.load %arg6[%c2, %c0_46, %c0_47] : memref<8x16x16xf32, #tpu.memory_space<vmem>>, vector<1x16x16xf32>
    %150 = vector.shape_cast %149 : vector<1x16x16xf32> to vector<16x16xf32>
    %c1_i32_48 = arith.constant 1 : i32
    %151 = tpu.dynamic_rotate %131 by %c1_i32_48 dim 1 : vector<16x2048xf32>, i32 -> vector<16x2048xf32>
    %cst_49 = arith.constant 0.000000e+00 : f32
    %152 = vector.shape_cast %25 : vector<1x2048xi1> to vector<1x2048xi1>
    %153 = vector.broadcast %152 : vector<1x2048xi1> to vector<16x2048xi1>
    %154 = vector.broadcast %cst_49 : f32 to vector<16x2048xf32>
    %155 = arith.select %153, %151, %154 : vector<16x2048xi1>, vector<16x2048xf32>
    %cst_50 = arith.constant dense<0.000000e+00> : vector<16x2048xf32>
    %156 = tpu.matmul %150, %155, %cst_50 {dimension_numbers = #tpu.dot_dimension_numbers<[1], [0], [0], [1], [0, 0, 1, 1], [], []>} : vector<16x16xf32>, vector<16x2048xf32>, vector<16x2048xf32> -> vector<16x2048xf32>
    %157 = arith.addf %148, %156 : vector<16x2048xf32>
    %c3 = arith.constant 3 : index
    %c0_51 = arith.constant 0 : index
    %c0_52 = arith.constant 0 : index
    %158 = vector.load %arg6[%c3, %c0_51, %c0_52] : memref<8x16x16xf32, #tpu.memory_space<vmem>>, vector<1x16x16xf32>
    %159 = vector.shape_cast %158 : vector<1x16x16xf32> to vector<16x16xf32>
    %cst_53 = arith.constant dense<0.000000e+00> : vector<16x2048xf32>
    %160 = tpu.matmul %159, %131, %cst_53 {dimension_numbers = #tpu.dot_dimension_numbers<[1], [0], [0], [1], [0, 0, 1, 1], [], []>} : vector<16x16xf32>, vector<16x2048xf32>, vector<16x2048xf32> -> vector<16x2048xf32>
    %161 = arith.addf %157, %160 : vector<16x2048xf32>
    %c4 = arith.constant 4 : index
    %c0_54 = arith.constant 0 : index
    %c0_55 = arith.constant 0 : index
    %162 = vector.load %arg6[%c4, %c0_54, %c0_55] : memref<8x16x16xf32, #tpu.memory_space<vmem>>, vector<1x16x16xf32>
    %163 = vector.shape_cast %162 : vector<1x16x16xf32> to vector<16x16xf32>
    %c2047_i32_56 = arith.constant 2047 : i32
    %164 = tpu.dynamic_rotate %131 by %c2047_i32_56 dim 1 : vector<16x2048xf32>, i32 -> vector<16x2048xf32>
    %cst_57 = arith.constant 0.000000e+00 : f32
    %165 = vector.shape_cast %30 : vector<1x2048xi1> to vector<1x2048xi1>
    %166 = vector.broadcast %165 : vector<1x2048xi1> to vector<16x2048xi1>
    %167 = vector.broadcast %cst_57 : f32 to vector<16x2048xf32>
    %168 = arith.select %166, %164, %167 : vector<16x2048xi1>, vector<16x2048xf32>
    %cst_58 = arith.constant dense<0.000000e+00> : vector<16x2048xf32>
    %169 = tpu.matmul %163, %168, %cst_58 {dimension_numbers = #tpu.dot_dimension_numbers<[1], [0], [0], [1], [0, 0, 1, 1], [], []>} : vector<16x16xf32>, vector<16x2048xf32>, vector<16x2048xf32> -> vector<16x2048xf32>
    %170 = arith.addf %161, %169 : vector<16x2048xf32>
    %c5 = arith.constant 5 : index
    %c0_59 = arith.constant 0 : index
    %c0_60 = arith.constant 0 : index
    %171 = vector.load %arg6[%c5, %c0_59, %c0_60] : memref<8x16x16xf32, #tpu.memory_space<vmem>>, vector<1x16x16xf32>
    %172 = vector.shape_cast %171 : vector<1x16x16xf32> to vector<16x16xf32>
    %c2046_i32_61 = arith.constant 2046 : i32
    %173 = tpu.dynamic_rotate %131 by %c2046_i32_61 dim 1 : vector<16x2048xf32>, i32 -> vector<16x2048xf32>
    %cst_62 = arith.constant 0.000000e+00 : f32
    %174 = vector.shape_cast %35 : vector<1x2048xi1> to vector<1x2048xi1>
    %175 = vector.broadcast %174 : vector<1x2048xi1> to vector<16x2048xi1>
    %176 = vector.broadcast %cst_62 : f32 to vector<16x2048xf32>
    %177 = arith.select %175, %173, %176 : vector<16x2048xi1>, vector<16x2048xf32>
    %cst_63 = arith.constant dense<0.000000e+00> : vector<16x2048xf32>
    %178 = tpu.matmul %172, %177, %cst_63 {dimension_numbers = #tpu.dot_dimension_numbers<[1], [0], [0], [1], [0, 0, 1, 1], [], []>} : vector<16x16xf32>, vector<16x2048xf32>, vector<16x2048xf32> -> vector<16x2048xf32>
    %179 = arith.addf %170, %178 : vector<16x2048xf32>
    %c6 = arith.constant 6 : index
    %c0_64 = arith.constant 0 : index
    %c0_65 = arith.constant 0 : index
    %180 = vector.load %arg6[%c6, %c0_64, %c0_65] : memref<8x16x16xf32, #tpu.memory_space<vmem>>, vector<1x16x16xf32>
    %181 = vector.shape_cast %180 : vector<1x16x16xf32> to vector<16x16xf32>
    %c2045_i32_66 = arith.constant 2045 : i32
    %182 = tpu.dynamic_rotate %131 by %c2045_i32_66 dim 1 : vector<16x2048xf32>, i32 -> vector<16x2048xf32>
    %cst_67 = arith.constant 0.000000e+00 : f32
    %183 = vector.shape_cast %40 : vector<1x2048xi1> to vector<1x2048xi1>
    %184 = vector.broadcast %183 : vector<1x2048xi1> to vector<16x2048xi1>
    %185 = vector.broadcast %cst_67 : f32 to vector<16x2048xf32>
    %186 = arith.select %184, %182, %185 : vector<16x2048xi1>, vector<16x2048xf32>
    %cst_68 = arith.constant dense<0.000000e+00> : vector<16x2048xf32>
    %187 = tpu.matmul %181, %186, %cst_68 {dimension_numbers = #tpu.dot_dimension_numbers<[1], [0], [0], [1], [0, 0, 1, 1], [], []>} : vector<16x16xf32>, vector<16x2048xf32>, vector<16x2048xf32> -> vector<16x2048xf32>
    %188 = arith.addf %179, %187 : vector<16x2048xf32>
    %c7 = arith.constant 7 : index
    %c0_69 = arith.constant 0 : index
    %c0_70 = arith.constant 0 : index
    %189 = vector.load %arg6[%c7, %c0_69, %c0_70] : memref<8x16x16xf32, #tpu.memory_space<vmem>>, vector<1x16x16xf32>
    %190 = vector.shape_cast %189 : vector<1x16x16xf32> to vector<16x16xf32>
    %c2044_i32_71 = arith.constant 2044 : i32
    %191 = tpu.dynamic_rotate %131 by %c2044_i32_71 dim 1 : vector<16x2048xf32>, i32 -> vector<16x2048xf32>
    %cst_72 = arith.constant 0.000000e+00 : f32
    %192 = vector.shape_cast %45 : vector<1x2048xi1> to vector<1x2048xi1>
    %193 = vector.broadcast %192 : vector<1x2048xi1> to vector<16x2048xi1>
    %194 = vector.broadcast %cst_72 : f32 to vector<16x2048xf32>
    %195 = arith.select %193, %191, %194 : vector<16x2048xi1>, vector<16x2048xf32>
    %cst_73 = arith.constant dense<0.000000e+00> : vector<16x2048xf32>
    %196 = tpu.matmul %190, %195, %cst_73 {dimension_numbers = #tpu.dot_dimension_numbers<[1], [0], [0], [1], [0, 0, 1, 1], [], []>} : vector<16x16xf32>, vector<16x2048xf32>, vector<16x2048xf32> -> vector<16x2048xf32>
    %197 = arith.addf %188, %196 : vector<16x2048xf32>
    %c0_74 = arith.constant 0 : index
    %c0_75 = arith.constant 0 : index
    %198 = vector.load %arg7[%c0_74, %c0_75] : memref<16x1xf32, #tpu.memory_space<vmem>>, vector<16x1xf32>
    %199 = vector.broadcast %198 : vector<16x1xf32> to vector<16x2048xf32>
    %200 = arith.addf %197, %199 : vector<16x2048xf32>
    %c0_76 = arith.constant 0 : index
    %c0_77 = arith.constant 0 : index
    %c0_78 = arith.constant 0 : index
    %201 = vector.load %arg8[%c0_76, %c0_77, %c0_78] : memref<8x8x16xf32, #tpu.memory_space<vmem>>, vector<1x8x16xf32>
    %202 = vector.shape_cast %201 : vector<1x8x16xf32> to vector<8x16xf32>
    %c384_i32 = arith.constant 384 : i32
    %203 = tpu.dynamic_rotate %200 by %c384_i32 dim 1 : vector<16x2048xf32>, i32 -> vector<16x2048xf32>
    %cst_79 = arith.constant 0.000000e+00 : f32
    %204 = vector.shape_cast %50 : vector<1x2048xi1> to vector<1x2048xi1>
    %205 = vector.broadcast %204 : vector<1x2048xi1> to vector<16x2048xi1>
    %206 = vector.broadcast %cst_79 : f32 to vector<16x2048xf32>
    %207 = arith.select %205, %203, %206 : vector<16x2048xi1>, vector<16x2048xf32>
    %cst_80 = arith.constant dense<0.000000e+00> : vector<8x2048xf32>
    %208 = tpu.matmul %202, %207, %cst_80 {dimension_numbers = #tpu.dot_dimension_numbers<[1], [0], [0], [1], [0, 0, 1, 1], [], []>} : vector<8x16xf32>, vector<16x2048xf32>, vector<8x2048xf32> -> vector<8x2048xf32>
    %c1_81 = arith.constant 1 : index
    %c0_82 = arith.constant 0 : index
    %c0_83 = arith.constant 0 : index
    %209 = vector.load %arg8[%c1_81, %c0_82, %c0_83] : memref<8x8x16xf32, #tpu.memory_space<vmem>>, vector<1x8x16xf32>
    %210 = vector.shape_cast %209 : vector<1x8x16xf32> to vector<8x16xf32>
    %c256_i32 = arith.constant 256 : i32
    %211 = tpu.dynamic_rotate %200 by %c256_i32 dim 1 : vector<16x2048xf32>, i32 -> vector<16x2048xf32>
    %cst_84 = arith.constant 0.000000e+00 : f32
    %212 = vector.shape_cast %55 : vector<1x2048xi1> to vector<1x2048xi1>
    %213 = vector.broadcast %212 : vector<1x2048xi1> to vector<16x2048xi1>
    %214 = vector.broadcast %cst_84 : f32 to vector<16x2048xf32>
    %215 = arith.select %213, %211, %214 : vector<16x2048xi1>, vector<16x2048xf32>
    %cst_85 = arith.constant dense<0.000000e+00> : vector<8x2048xf32>
    %216 = tpu.matmul %210, %215, %cst_85 {dimension_numbers = #tpu.dot_dimension_numbers<[1], [0], [0], [1], [0, 0, 1, 1], [], []>} : vector<8x16xf32>, vector<16x2048xf32>, vector<8x2048xf32> -> vector<8x2048xf32>
    %217 = arith.addf %208, %216 : vector<8x2048xf32>
    %c2_86 = arith.constant 2 : index
    %c0_87 = arith.constant 0 : index
    %c0_88 = arith.constant 0 : index
    %218 = vector.load %arg8[%c2_86, %c0_87, %c0_88] : memref<8x8x16xf32, #tpu.memory_space<vmem>>, vector<1x8x16xf32>
    %219 = vector.shape_cast %218 : vector<1x8x16xf32> to vector<8x16xf32>
    %c128_i32 = arith.constant 128 : i32
    %220 = tpu.dynamic_rotate %200 by %c128_i32 dim 1 : vector<16x2048xf32>, i32 -> vector<16x2048xf32>
    %cst_89 = arith.constant 0.000000e+00 : f32
    %221 = vector.shape_cast %60 : vector<1x2048xi1> to vector<1x2048xi1>
    %222 = vector.broadcast %221 : vector<1x2048xi1> to vector<16x2048xi1>
    %223 = vector.broadcast %cst_89 : f32 to vector<16x2048xf32>
    %224 = arith.select %222, %220, %223 : vector<16x2048xi1>, vector<16x2048xf32>
    %cst_90 = arith.constant dense<0.000000e+00> : vector<8x2048xf32>
    %225 = tpu.matmul %219, %224, %cst_90 {dimension_numbers = #tpu.dot_dimension_numbers<[1], [0], [0], [1], [0, 0, 1, 1], [], []>} : vector<8x16xf32>, vector<16x2048xf32>, vector<8x2048xf32> -> vector<8x2048xf32>
    %226 = arith.addf %217, %225 : vector<8x2048xf32>
    %c3_91 = arith.constant 3 : index
    %c0_92 = arith.constant 0 : index
    %c0_93 = arith.constant 0 : index
    %227 = vector.load %arg8[%c3_91, %c0_92, %c0_93] : memref<8x8x16xf32, #tpu.memory_space<vmem>>, vector<1x8x16xf32>
    %228 = vector.shape_cast %227 : vector<1x8x16xf32> to vector<8x16xf32>
    %cst_94 = arith.constant dense<0.000000e+00> : vector<8x2048xf32>
    %229 = tpu.matmul %228, %200, %cst_94 {dimension_numbers = #tpu.dot_dimension_numbers<[1], [0], [0], [1], [0, 0, 1, 1], [], []>} : vector<8x16xf32>, vector<16x2048xf32>, vector<8x2048xf32> -> vector<8x2048xf32>
    %230 = arith.addf %226, %229 : vector<8x2048xf32>
    %c4_95 = arith.constant 4 : index
    %c0_96 = arith.constant 0 : index
    %c0_97 = arith.constant 0 : index
    %231 = vector.load %arg8[%c4_95, %c0_96, %c0_97] : memref<8x8x16xf32, #tpu.memory_space<vmem>>, vector<1x8x16xf32>
    %232 = vector.shape_cast %231 : vector<1x8x16xf32> to vector<8x16xf32>
    %c1920_i32 = arith.constant 1920 : i32
    %233 = tpu.dynamic_rotate %200 by %c1920_i32 dim 1 : vector<16x2048xf32>, i32 -> vector<16x2048xf32>
    %cst_98 = arith.constant 0.000000e+00 : f32
    %234 = vector.shape_cast %65 : vector<1x2048xi1> to vector<1x2048xi1>
    %235 = vector.broadcast %234 : vector<1x2048xi1> to vector<16x2048xi1>
    %236 = vector.broadcast %cst_98 : f32 to vector<16x2048xf32>
    %237 = arith.select %235, %233, %236 : vector<16x2048xi1>, vector<16x2048xf32>
    %cst_99 = arith.constant dense<0.000000e+00> : vector<8x2048xf32>
    %238 = tpu.matmul %232, %237, %cst_99 {dimension_numbers = #tpu.dot_dimension_numbers<[1], [0], [0], [1], [0, 0, 1, 1], [], []>} : vector<8x16xf32>, vector<16x2048xf32>, vector<8x2048xf32> -> vector<8x2048xf32>
    %239 = arith.addf %230, %238 : vector<8x2048xf32>
    %c5_100 = arith.constant 5 : index
    %c0_101 = arith.constant 0 : index
    %c0_102 = arith.constant 0 : index
    %240 = vector.load %arg8[%c5_100, %c0_101, %c0_102] : memref<8x8x16xf32, #tpu.memory_space<vmem>>, vector<1x8x16xf32>
    %241 = vector.shape_cast %240 : vector<1x8x16xf32> to vector<8x16xf32>
    %c1792_i32 = arith.constant 1792 : i32
    %242 = tpu.dynamic_rotate %200 by %c1792_i32 dim 1 : vector<16x2048xf32>, i32 -> vector<16x2048xf32>
    %cst_103 = arith.constant 0.000000e+00 : f32
    %243 = vector.shape_cast %70 : vector<1x2048xi1> to vector<1x2048xi1>
    %244 = vector.broadcast %243 : vector<1x2048xi1> to vector<16x2048xi1>
    %245 = vector.broadcast %cst_103 : f32 to vector<16x2048xf32>
    %246 = arith.select %244, %242, %245 : vector<16x2048xi1>, vector<16x2048xf32>
    %cst_104 = arith.constant dense<0.000000e+00> : vector<8x2048xf32>
    %247 = tpu.matmul %241, %246, %cst_104 {dimension_numbers = #tpu.dot_dimension_numbers<[1], [0], [0], [1], [0, 0, 1, 1], [], []>} : vector<8x16xf32>, vector<16x2048xf32>, vector<8x2048xf32> -> vector<8x2048xf32>
    %248 = arith.addf %239, %247 : vector<8x2048xf32>
    %c6_105 = arith.constant 6 : index
    %c0_106 = arith.constant 0 : index
    %c0_107 = arith.constant 0 : index
    %249 = vector.load %arg8[%c6_105, %c0_106, %c0_107] : memref<8x8x16xf32, #tpu.memory_space<vmem>>, vector<1x8x16xf32>
    %250 = vector.shape_cast %249 : vector<1x8x16xf32> to vector<8x16xf32>
    %c1664_i32 = arith.constant 1664 : i32
    %251 = tpu.dynamic_rotate %200 by %c1664_i32 dim 1 : vector<16x2048xf32>, i32 -> vector<16x2048xf32>
    %cst_108 = arith.constant 0.000000e+00 : f32
    %252 = vector.shape_cast %75 : vector<1x2048xi1> to vector<1x2048xi1>
    %253 = vector.broadcast %252 : vector<1x2048xi1> to vector<16x2048xi1>
    %254 = vector.broadcast %cst_108 : f32 to vector<16x2048xf32>
    %255 = arith.select %253, %251, %254 : vector<16x2048xi1>, vector<16x2048xf32>
    %cst_109 = arith.constant dense<0.000000e+00> : vector<8x2048xf32>
    %256 = tpu.matmul %250, %255, %cst_109 {dimension_numbers = #tpu.dot_dimension_numbers<[1], [0], [0], [1], [0, 0, 1, 1], [], []>} : vector<8x16xf32>, vector<16x2048xf32>, vector<8x2048xf32> -> vector<8x2048xf32>
    %257 = arith.addf %248, %256 : vector<8x2048xf32>
    %c7_110 = arith.constant 7 : index
    %c0_111 = arith.constant 0 : index
    %c0_112 = arith.constant 0 : index
    %258 = vector.load %arg8[%c7_110, %c0_111, %c0_112] : memref<8x8x16xf32, #tpu.memory_space<vmem>>, vector<1x8x16xf32>
    %259 = vector.shape_cast %258 : vector<1x8x16xf32> to vector<8x16xf32>
    %c1536_i32 = arith.constant 1536 : i32
    %260 = tpu.dynamic_rotate %200 by %c1536_i32 dim 1 : vector<16x2048xf32>, i32 -> vector<16x2048xf32>
    %cst_113 = arith.constant 0.000000e+00 : f32
    %261 = vector.shape_cast %80 : vector<1x2048xi1> to vector<1x2048xi1>
    %262 = vector.broadcast %261 : vector<1x2048xi1> to vector<16x2048xi1>
    %263 = vector.broadcast %cst_113 : f32 to vector<16x2048xf32>
    %264 = arith.select %262, %260, %263 : vector<16x2048xi1>, vector<16x2048xf32>
    %cst_114 = arith.constant dense<0.000000e+00> : vector<8x2048xf32>
    %265 = tpu.matmul %259, %264, %cst_114 {dimension_numbers = #tpu.dot_dimension_numbers<[1], [0], [0], [1], [0, 0, 1, 1], [], []>} : vector<8x16xf32>, vector<16x2048xf32>, vector<8x2048xf32> -> vector<8x2048xf32>
    %266 = arith.addf %257, %265 : vector<8x2048xf32>
    %c0_115 = arith.constant 0 : index
    %c0_116 = arith.constant 0 : index
    %267 = vector.load %arg9[%c0_115, %c0_116] : memref<8x1xf32, #tpu.memory_space<vmem>>, vector<8x1xf32>
    %268 = vector.broadcast %267 : vector<8x1xf32> to vector<8x2048xf32>
    %269 = arith.addf %266, %268 : vector<8x2048xf32>
    %c0_117 = arith.constant 0 : index
    %c0_118 = arith.constant 0 : index
    %c0_119 = arith.constant 0 : index
    %270 = vector.load %arg10[%c0_117, %c0_118, %c0_119] : memref<8x1x8xf32, #tpu.memory_space<vmem>>, vector<1x1x8xf32>
    %271 = vector.shape_cast %270 : vector<1x1x8xf32> to vector<1x8xf32>
    %c384_i32_120 = arith.constant 384 : i32
    %272 = tpu.dynamic_rotate %269 by %c384_i32_120 dim 1 : vector<8x2048xf32>, i32 -> vector<8x2048xf32>
    %cst_121 = arith.constant 0.000000e+00 : f32
    %273 = vector.shape_cast %50 : vector<1x2048xi1> to vector<1x2048xi1>
    %274 = vector.broadcast %273 : vector<1x2048xi1> to vector<8x2048xi1>
    %275 = vector.broadcast %cst_121 : f32 to vector<8x2048xf32>
    %276 = arith.select %274, %272, %275 : vector<8x2048xi1>, vector<8x2048xf32>
    %cst_122 = arith.constant dense<0.000000e+00> : vector<1x2048xf32>
    %277 = tpu.matmul %271, %276, %cst_122 {dimension_numbers = #tpu.dot_dimension_numbers<[1], [0], [0], [1], [0, 0, 1, 1], [], []>} : vector<1x8xf32>, vector<8x2048xf32>, vector<1x2048xf32> -> vector<1x2048xf32>
    %c1_123 = arith.constant 1 : index
    %c0_124 = arith.constant 0 : index
    %c0_125 = arith.constant 0 : index
    %278 = vector.load %arg10[%c1_123, %c0_124, %c0_125] : memref<8x1x8xf32, #tpu.memory_space<vmem>>, vector<1x1x8xf32>
    %279 = vector.shape_cast %278 : vector<1x1x8xf32> to vector<1x8xf32>
    %c256_i32_126 = arith.constant 256 : i32
    %280 = tpu.dynamic_rotate %269 by %c256_i32_126 dim 1 : vector<8x2048xf32>, i32 -> vector<8x2048xf32>
    %cst_127 = arith.constant 0.000000e+00 : f32
    %281 = vector.shape_cast %55 : vector<1x2048xi1> to vector<1x2048xi1>
    %282 = vector.broadcast %281 : vector<1x2048xi1> to vector<8x2048xi1>
    %283 = vector.broadcast %cst_127 : f32 to vector<8x2048xf32>
    %284 = arith.select %282, %280, %283 : vector<8x2048xi1>, vector<8x2048xf32>
    %cst_128 = arith.constant dense<0.000000e+00> : vector<1x2048xf32>
    %285 = tpu.matmul %279, %284, %cst_128 {dimension_numbers = #tpu.dot_dimension_numbers<[1], [0], [0], [1], [0, 0, 1, 1], [], []>} : vector<1x8xf32>, vector<8x2048xf32>, vector<1x2048xf32> -> vector<1x2048xf32>
    %286 = arith.addf %277, %285 : vector<1x2048xf32>
    %c2_129 = arith.constant 2 : index
    %c0_130 = arith.constant 0 : index
    %c0_131 = arith.constant 0 : index
    %287 = vector.load %arg10[%c2_129, %c0_130, %c0_131] : memref<8x1x8xf32, #tpu.memory_space<vmem>>, vector<1x1x8xf32>
    %288 = vector.shape_cast %287 : vector<1x1x8xf32> to vector<1x8xf32>
    %c128_i32_132 = arith.constant 128 : i32
    %289 = tpu.dynamic_rotate %269 by %c128_i32_132 dim 1 : vector<8x2048xf32>, i32 -> vector<8x2048xf32>
    %cst_133 = arith.constant 0.000000e+00 : f32
    %290 = vector.shape_cast %60 : vector<1x2048xi1> to vector<1x2048xi1>
    %291 = vector.broadcast %290 : vector<1x2048xi1> to vector<8x2048xi1>
    %292 = vector.broadcast %cst_133 : f32 to vector<8x2048xf32>
    %293 = arith.select %291, %289, %292 : vector<8x2048xi1>, vector<8x2048xf32>
    %cst_134 = arith.constant dense<0.000000e+00> : vector<1x2048xf32>
    %294 = tpu.matmul %288, %293, %cst_134 {dimension_numbers = #tpu.dot_dimension_numbers<[1], [0], [0], [1], [0, 0, 1, 1], [], []>} : vector<1x8xf32>, vector<8x2048xf32>, vector<1x2048xf32> -> vector<1x2048xf32>
    %295 = arith.addf %286, %294 : vector<1x2048xf32>
    %c3_135 = arith.constant 3 : index
    %c0_136 = arith.constant 0 : index
    %c0_137 = arith.constant 0 : index
    %296 = vector.load %arg10[%c3_135, %c0_136, %c0_137] : memref<8x1x8xf32, #tpu.memory_space<vmem>>, vector<1x1x8xf32>
    %297 = vector.shape_cast %296 : vector<1x1x8xf32> to vector<1x8xf32>
    %cst_138 = arith.constant dense<0.000000e+00> : vector<1x2048xf32>
    %298 = tpu.matmul %297, %269, %cst_138 {dimension_numbers = #tpu.dot_dimension_numbers<[1], [0], [0], [1], [0, 0, 1, 1], [], []>} : vector<1x8xf32>, vector<8x2048xf32>, vector<1x2048xf32> -> vector<1x2048xf32>
    %299 = arith.addf %295, %298 : vector<1x2048xf32>
    %c4_139 = arith.constant 4 : index
    %c0_140 = arith.constant 0 : index
    %c0_141 = arith.constant 0 : index
    %300 = vector.load %arg10[%c4_139, %c0_140, %c0_141] : memref<8x1x8xf32, #tpu.memory_space<vmem>>, vector<1x1x8xf32>
    %301 = vector.shape_cast %300 : vector<1x1x8xf32> to vector<1x8xf32>
    %c1920_i32_142 = arith.constant 1920 : i32
    %302 = tpu.dynamic_rotate %269 by %c1920_i32_142 dim 1 : vector<8x2048xf32>, i32 -> vector<8x2048xf32>
    %cst_143 = arith.constant 0.000000e+00 : f32
    %303 = vector.shape_cast %65 : vector<1x2048xi1> to vector<1x2048xi1>
    %304 = vector.broadcast %303 : vector<1x2048xi1> to vector<8x2048xi1>
    %305 = vector.broadcast %cst_143 : f32 to vector<8x2048xf32>
    %306 = arith.select %304, %302, %305 : vector<8x2048xi1>, vector<8x2048xf32>
    %cst_144 = arith.constant dense<0.000000e+00> : vector<1x2048xf32>
    %307 = tpu.matmul %301, %306, %cst_144 {dimension_numbers = #tpu.dot_dimension_numbers<[1], [0], [0], [1], [0, 0, 1, 1], [], []>} : vector<1x8xf32>, vector<8x2048xf32>, vector<1x2048xf32> -> vector<1x2048xf32>
    %308 = arith.addf %299, %307 : vector<1x2048xf32>
    %c5_145 = arith.constant 5 : index
    %c0_146 = arith.constant 0 : index
    %c0_147 = arith.constant 0 : index
    %309 = vector.load %arg10[%c5_145, %c0_146, %c0_147] : memref<8x1x8xf32, #tpu.memory_space<vmem>>, vector<1x1x8xf32>
    %310 = vector.shape_cast %309 : vector<1x1x8xf32> to vector<1x8xf32>
    %c1792_i32_148 = arith.constant 1792 : i32
    %311 = tpu.dynamic_rotate %269 by %c1792_i32_148 dim 1 : vector<8x2048xf32>, i32 -> vector<8x2048xf32>
    %cst_149 = arith.constant 0.000000e+00 : f32
    %312 = vector.shape_cast %70 : vector<1x2048xi1> to vector<1x2048xi1>
    %313 = vector.broadcast %312 : vector<1x2048xi1> to vector<8x2048xi1>
    %314 = vector.broadcast %cst_149 : f32 to vector<8x2048xf32>
    %315 = arith.select %313, %311, %314 : vector<8x2048xi1>, vector<8x2048xf32>
    %cst_150 = arith.constant dense<0.000000e+00> : vector<1x2048xf32>
    %316 = tpu.matmul %310, %315, %cst_150 {dimension_numbers = #tpu.dot_dimension_numbers<[1], [0], [0], [1], [0, 0, 1, 1], [], []>} : vector<1x8xf32>, vector<8x2048xf32>, vector<1x2048xf32> -> vector<1x2048xf32>
    %317 = arith.addf %308, %316 : vector<1x2048xf32>
    %c6_151 = arith.constant 6 : index
    %c0_152 = arith.constant 0 : index
    %c0_153 = arith.constant 0 : index
    %318 = vector.load %arg10[%c6_151, %c0_152, %c0_153] : memref<8x1x8xf32, #tpu.memory_space<vmem>>, vector<1x1x8xf32>
    %319 = vector.shape_cast %318 : vector<1x1x8xf32> to vector<1x8xf32>
    %c1664_i32_154 = arith.constant 1664 : i32
    %320 = tpu.dynamic_rotate %269 by %c1664_i32_154 dim 1 : vector<8x2048xf32>, i32 -> vector<8x2048xf32>
    %cst_155 = arith.constant 0.000000e+00 : f32
    %321 = vector.shape_cast %75 : vector<1x2048xi1> to vector<1x2048xi1>
    %322 = vector.broadcast %321 : vector<1x2048xi1> to vector<8x2048xi1>
    %323 = vector.broadcast %cst_155 : f32 to vector<8x2048xf32>
    %324 = arith.select %322, %320, %323 : vector<8x2048xi1>, vector<8x2048xf32>
    %cst_156 = arith.constant dense<0.000000e+00> : vector<1x2048xf32>
    %325 = tpu.matmul %319, %324, %cst_156 {dimension_numbers = #tpu.dot_dimension_numbers<[1], [0], [0], [1], [0, 0, 1, 1], [], []>} : vector<1x8xf32>, vector<8x2048xf32>, vector<1x2048xf32> -> vector<1x2048xf32>
    %326 = arith.addf %317, %325 : vector<1x2048xf32>
    %c7_157 = arith.constant 7 : index
    %c0_158 = arith.constant 0 : index
    %c0_159 = arith.constant 0 : index
    %327 = vector.load %arg10[%c7_157, %c0_158, %c0_159] : memref<8x1x8xf32, #tpu.memory_space<vmem>>, vector<1x1x8xf32>
    %328 = vector.shape_cast %327 : vector<1x1x8xf32> to vector<1x8xf32>
    %c1536_i32_160 = arith.constant 1536 : i32
    %329 = tpu.dynamic_rotate %269 by %c1536_i32_160 dim 1 : vector<8x2048xf32>, i32 -> vector<8x2048xf32>
    %cst_161 = arith.constant 0.000000e+00 : f32
    %330 = vector.shape_cast %80 : vector<1x2048xi1> to vector<1x2048xi1>
    %331 = vector.broadcast %330 : vector<1x2048xi1> to vector<8x2048xi1>
    %332 = vector.broadcast %cst_161 : f32 to vector<8x2048xf32>
    %333 = arith.select %331, %329, %332 : vector<8x2048xi1>, vector<8x2048xf32>
    %cst_162 = arith.constant dense<0.000000e+00> : vector<1x2048xf32>
    %334 = tpu.matmul %328, %333, %cst_162 {dimension_numbers = #tpu.dot_dimension_numbers<[1], [0], [0], [1], [0, 0, 1, 1], [], []>} : vector<1x8xf32>, vector<8x2048xf32>, vector<1x2048xf32> -> vector<1x2048xf32>
    %335 = arith.addf %326, %334 : vector<1x2048xf32>
    %c0_163 = arith.constant 0 : index
    %c0_164 = arith.constant 0 : index
    %336 = vector.load %arg11[%c0_163, %c0_164] : memref<1x1xf32, #tpu.memory_space<vmem>>, vector<1x1xf32>
    %337 = vector.broadcast %336 : vector<1x1xf32> to vector<1x2048xf32>
    %338 = arith.addf %335, %337 : vector<1x2048xf32>
    %339 = vector.shape_cast %338 : vector<1x2048xf32> to vector<1x1x2048xf32>
    %c0_165 = arith.constant 0 : index
    %c0_166 = arith.constant 0 : index
    %c0_167 = arith.constant 0 : index
    %340 = vector.load %arg12[%c0_165, %c0_166, %c0_167] : memref<1x1x2048xf32, #tpu.memory_space<vmem>>, vector<1x1x2048xf32>
    tpu.vector_store %arg12[%c0_165, %c0_166, %c0_167], %339 {strides = array<i32>} : memref<1x1x2048xf32, #tpu.memory_space<vmem>>, vector<1x1x2048xf32>,
    return
  }
  func.func @transform_0(%arg0: i32) -> (i32, i32, i32) {
    %c0_i32 = arith.constant 0 : i32
    %c0_i32_0 = arith.constant 0 : i32
    %c0_i32_1 = arith.constant 0 : i32
    return %arg0, %c0_i32, %c0_i32_0 : i32, i32, i32
  }
  func.func @transform_1(%arg0: i32) -> (i32, i32) {
    %c0_i32 = arith.constant 0 : i32
    %c0_i32_0 = arith.constant 0 : i32
    %c0_i32_1 = arith.constant 0 : i32
    return %c0_i32, %c0_i32_0 : i32, i32
  }
  func.func @transform_2(%arg0: i32) -> (i32, i32) {
    %c0_i32 = arith.constant 0 : i32
    %c0_i32_0 = arith.constant 0 : i32
    %c0_i32_1 = arith.constant 0 : i32
    return %c0_i32, %c0_i32_0 : i32, i32
  }
  func.func @transform_3(%arg0: i32) -> (i32, i32) {
    %c0_i32 = arith.constant 0 : i32
    %c0_i32_0 = arith.constant 0 : i32
    %c0_i32_1 = arith.constant 0 : i32
    return %c0_i32, %c0_i32_0 : i32, i32
  }
  func.func @transform_4(%arg0: i32) -> (i32, i32) {
    %c0_i32 = arith.constant 0 : i32
    %c0_i32_0 = arith.constant 0 : i32
    %c0_i32_1 = arith.constant 0 : i32
    return %c0_i32, %c0_i32_0 : i32, i32
  }
  func.func @transform_5(%arg0: i32) -> (i32, i32, i32) {
    %c0_i32 = arith.constant 0 : i32
    %c0_i32_0 = arith.constant 0 : i32
    %c0_i32_1 = arith.constant 0 : i32
    %c0_i32_2 = arith.constant 0 : i32
    return %c0_i32, %c0_i32_0, %c0_i32_1 : i32, i32, i32
  }
  func.func @transform_6(%arg0: i32) -> (i32, i32) {
    %c0_i32 = arith.constant 0 : i32
    %c0_i32_0 = arith.constant 0 : i32
    %c0_i32_1 = arith.constant 0 : i32
    return %c0_i32, %c0_i32_0 : i32, i32
  }
  func.func @transform_7(%arg0: i32) -> (i32, i32, i32) {
    %c0_i32 = arith.constant 0 : i32
    %c0_i32_0 = arith.constant 0 : i32
    %c0_i32_1 = arith.constant 0 : i32
    %c0_i32_2 = arith.constant 0 : i32
    return %c0_i32, %c0_i32_0, %c0_i32_1 : i32, i32, i32
  }
  func.func @transform_8(%arg0: i32) -> (i32, i32) {
    %c0_i32 = arith.constant 0 : i32
    %c0_i32_0 = arith.constant 0 : i32
    %c0_i32_1 = arith.constant 0 : i32
    return %c0_i32, %c0_i32_0 : i32, i32
  }
  func.func @transform_9(%arg0: i32) -> (i32, i32, i32) {
    %c0_i32 = arith.constant 0 : i32
    %c0_i32_0 = arith.constant 0 : i32
    %c0_i32_1 = arith.constant 0 : i32
    %c0_i32_2 = arith.constant 0 : i32
    return %c0_i32, %c0_i32_0, %c0_i32_1 : i32, i32, i32
  }
  func.func @transform_10(%arg0: i32) -> (i32, i32) {
    %c0_i32 = arith.constant 0 : i32
    %c0_i32_0 = arith.constant 0 : i32
    %c0_i32_1 = arith.constant 0 : i32
    return %c0_i32, %c0_i32_0 : i32, i32
  }
  func.func @transform_11(%arg0: i32) -> (i32, i32, i32) {
    %c0_i32 = arith.constant 0 : i32
    %c0_i32_0 = arith.constant 0 : i32
    %c0_i32_1 = arith.constant 0 : i32
    return %arg0, %c0_i32, %c0_i32_0 : i32, i32, i32
  }
}

</mosaic_0001>

<bundles_post_ra>
// kernel: tpu_custom_call.1
= control target key start
LH: loop header
LB: loop body
LE: loop exit
PB: predicated region body
PF: predicated region fallthrough
CT: control target
= control target key end

     0   :  { %s24540_s0 = inlined_call_operand.vmem [shape: f32[2,8,128], index: 0, kind: input, shape index: {}]   ;;  %s24541_s1 = inlined_call_operand.vmem [shape: f32[16,16], index: 1, kind: input, shape index: {}]   ;;  %s24542_s2 = inlined_call_operand.vmem [shape: f32[16,1], index: 2, kind: input, shape index: {}]   ;;  %s24543_s3 = inlined_call_operand.vmem [shape: f32[16,8], index: 3, kind: input, shape index: {}]   ;;  %s24544_s4 = inlined_call_operand.vmem [shape: f32[16,1], index: 4, kind: input, shape index: {}]   ;;  %s24545_s5 = inlined_call_operand.hbm [shape: f32[8,16,16], index: 5, kind: input, shape index: {}]   ;;  %s24546_s6 = inlined_call_operand.vmem [shape: f32[16,1], index: 6, kind: input, shape index: {}]   ;;  %s24547_s7 = inlined_call_operand.vmem [shape: f32[8,8,16], index: 7, kind: input, shape index: {}]   ;;  %s24548_s8 = inlined_call_operand.vmem [shape: f32[8,1], index: 8, kind: input, shape index: {}]   ;;  %s24549_s9 = inlined_call_operand.hbm [shape: f32[8,1,8], index: 9, kind: input, shape index: {}]   ;;  %s24550_s10 = inlined_call_operand.<no memory space> [shape: f32[1,1], index: 10, kind: input, shape index: {}]   ;;  %s24551_s11 = inlined_call_operand.hbm [shape: f32[1,1,2048], index: 11, kind: output, shape index: {}]  }
   0x1   :  { %v16_v0 = vstv %s24550_s10 }
   0x2   :  { %17 = vst [vmem:[#allocation2] sm:$0x1] %v16_v0 }
   0x3   :  { %18 = vsyncpa [#allocation4], 0 }
   0x4   :  { %19 = vsyncpa [#allocation7], 0 }
   0x5   :  { %20 = vsyncpa [#allocation5], 0  ;;  %s18391_s19 = smov [#allocation3]  }
   0x6   :  { %s36_s20 = sshll.u32 %s18391_s19, 4  ;;  %s37_s20 = int_to_ptr.vmem [resolvable:$true] %s36_s20 }
   0x7   :  { %s18333_s21 = scalar_lea.vmem %s37_s20, 2048  ;;  %p18338_p1 = scmp.lt.s32.totalorder %s37_s20, %s37_s20 }
   0x8   :  { %p18334_p0 = scmp.ne.s32.totalorder %s37_s20, %s18333_s21  ;;  %p18339_p2 = scmp.lt.s32.totalorder %s18333_s21, %s18333_s21 }
   0xa   :  { %p18340_p3 = por %p18339_p2, %p18338_p1 }
   0xc   :  { %p18341_p4 = pnand %p18340_p3, %p18334_p0 }
   0xe   :  { %18344 = shalt.err (!%p18341_p4)
}
   0xf   :  { %s18392_s22 = smov 128   ;;  %s18393_s23 = smov 8  }
  0x10   :  { %42 = dma.hbm_to_vmem [thread:$0]  %s24545_s5, 2048, %s37_s20, [#allocation4], %s18392_s22, %s18392_s22, %s18393_s23  }
  0x11   :  { %s18394_s10 = smov [#allocation6]  }
  0x12   :  { %s54_s26 = sshll.u32 %s18394_s10, 4  ;;  %s55_s26 = int_to_ptr.vmem [resolvable:$true] %s54_s26 }
  0x13   :  { %s18353_s27 = scalar_lea.vmem %s55_s26, 128  ;;  %p18358_p6 = scmp.lt.s32.totalorder %s55_s26, %s55_s26 }
  0x14   :  { %p18354_p5 = scmp.ne.s32.totalorder %s55_s26, %s18353_s27  ;;  %p18359_p7 = scmp.lt.s32.totalorder %s18353_s27, %s18353_s27 }
  0x16   :  { %p18360_p8 = por %p18359_p7, %p18358_p6 }
  0x18   :  { %p18361_p9 = pnand %p18360_p8, %p18354_p5 }
  0x1a   :  { %18364 = shalt.err (!%p18361_p9)
}
  0x1b   :  { %s18395_s28 = smov 16   ;;  %s18396_s29 = smov 1  }
  0x1c   :  { %60 = dma.hbm_to_vmem [thread:$0]  %s24549_s9, 128, %s55_s26, [#allocation7], %s18395_s28, %s18395_s28, %s18396_s29  }
  0x1d   :  { %18385 = dma.done.wait [#allocation4], 2048  }
  0x1e   :  { %18386 = vsyncadd [#allocation4], 4294965248 }
  0x1f   :  { %18387 = dma.done.wait [#allocation7], 128  }
  0x20   :  { %18388 = vsyncadd [#allocation7], 4294967168  ;;  %v24552_v1 = vmov 0   ;;  %vm24584_vm0 = vcmask 130048   ;;  %v93_v2 = vld [vmem:[%s24540_s0 + $0x8] sm:$0xff]  ;;  %v92_v3 = vld [vmem:[%s24540_s0] sm:$0xff] }
  0x21   :  { %18323 = vset.pattern.permute.xlu0 %v24552_v1  ;;  %18324 = vset.pattern.permute.xlu1 %v24552_v1  ;;  %v94_v4 = vld [vmem:[%s24541_s1] sm:$0xff]  ;;  %v95_v6 = vld [vmem:[%s24541_s1 + $0x8] sm:$0xff]  ;;  %s18398_s22 = smov 126   ;;  %s18399_s1 = smov 127   ;;  %v24554_v44 = vmov 0.0   ;;  %vm24585_vm11 = vcmask 1040384  }
  0x22   :  { %18131 = vmatprep.subr.mxu0 %v93_v2  ;;  %18135 = vmatprep.mubr.msk.f32.mxu0 %vm24584_vm0, %v94_v4  ;;  %v96_v5 = vld [vmem:[%s24542_s2] sm:$0xff]  ;;  %v97_v7 = vld [vmem:[%s24542_s2 + $0x8] sm:$0xff]  ;;  %s18400_s23 = smov 124   ;;  %s18401_s2 = smov 125   ;;  %vm1004_vm12 = vcmask 1041408   ;;  %vm1021_vm13 = vcmask 1042432  }
  0x23   :  { %18132 = vmatpush3.msra.mxu0 %v93_v2  ;;  %100 = vperm.xlu0 %18323, %v96_v5   ;;  %s18402_s24 = smov 2   ;;  %s18403_s25 = smov 3   ;;  %vm1038_vm14 = vcmask 1043456   ;;  %vm1055_vm15 = vcmask 1044480  }
  0x24   :  { %18133 = vmatprep.subr.mxu0 %v92_v3  ;;  %1191 = vmatprep.mubr.f32.mxu1 %v24554_v44 }
  0x25   :  { %18134 = vmatpush3.msra.mxu0 %v92_v3 }
  0x26   :  { %18136 = vmatmul.mubr.msk.f32.vlgmr.msra.gmra.mxu0 %vm24584_vm0, %v95_v6  ;;  %vm1072_vm0 = vcmask 1045504  }
  0x27   :  { %105 = vperm.xlu0 %18323, %v97_v7   ;;  %1268 = vmatprep.mubr.f32.mxu0 %v24554_v44 }
  0x9e   :  { %v101_v8 = vpop.permute.xlu0 %100 }
  0xa2   :  { %v106_v9 = vpop.permute.xlu0 %105 }
  0xe6   :  { %v18137_v10 = vpop.f32.mrf.mxu0 }
  0xe7   :  { %v18500_v11 = vadd.f32 %v18137_v10, %v106_v9 }
  0xe8   :  { %v181_v16 = vpop.f32.mrf.mxu0 }
  0xe9   :  { %495 = vrot.lane.b32.xlu0 %v18500_v11, %s18398_s22  ;;  %431 = vrot.lane.b32.xlu1 %v18500_v11, %s18399_s1  ;;  %v18511_v12 = vrot.slane %v18500_v11, 3  ;;  %v18518_v13 = vrot.slane %v18500_v11, 2  ;;  %v18525_v14 = vrot.slane %v18500_v11, 1  ;;  %v18544_v15 = vrot.slane %v18500_v11, 4 }
  0xea   :  { %v18566_v17 = vadd.f32 %v181_v16, %v101_v8  ;;  %v18569_v18 = vrot.slane %v18500_v11, 7  ;;  %v18576_v19 = vrot.slane %v18500_v11, 6  ;;  %v18587_v20 = vrot.slane %v18500_v11, 5 }
  0xeb   :  { %24719 = vst [vmem:[#allocation12_spill] sm:$0xff] %v18525_v14  ;;  %24720 = vst [vmem:[#allocation13_spill] sm:$0xff] %v18544_v15 }
  0xec   :  { %24721 = vst [vmem:[#allocation14_spill] sm:$0xff] %v18576_v19  ;;  %24722 = vst [vmem:[#allocation15_spill] sm:$0xff] %v18587_v20  ;;  %v18618_v21 = vrot.slane %v18566_v17, 1  ;;  %v18625_v22 = vrot.slane %v18566_v17, 3  ;;  %v18640_v23 = vrot.slane %v18566_v17, 2  ;;  %v18643_v24 = vrot.slane %v18566_v17, 4 }
  0xed   :  { %623 = vrot.lane.b32.xlu0 %v18500_v11, %s18400_s23  ;;  %559 = vrot.lane.b32.xlu1 %v18500_v11, %s18401_s2  ;;  %v18690_v35 = vrot.slane %v18566_v17, 7  ;;  %v18701_v38 = vrot.slane %v18566_v17, 6  ;;  %v18720_v43 = vrot.slane %v18566_v17, 5 }
  0xee   :  { %24723 = vst [vmem:[#allocation16_spill] sm:$0xff] %v18643_v24 }
  0xf1   :  { %301 = vrot.lane.b32.xlu0 %v18500_v11, %s18402_s24  ;;  %307 = vrot.lane.b32.xlu1 %v18511_v12, %s18402_s24 }
  0xf5   :  { %370 = vrot.lane.b32.xlu1 %v18518_v13, %s18396_s29  ;;  %305 = vrot.lane.b32.xlu0 %v18518_v13, %s18402_s24 }
  0xf9   :  { %240 = vrot.lane.b32.xlu1 %v18518_v13, %s18403_s25  ;;  %303 = vrot.lane.b32.xlu0 %v18525_v14, %s18402_s24 }
  0xfd   :  { %368 = vrot.lane.b32.xlu1 %v18525_v14, %s18396_s29  ;;  %372 = vrot.lane.b32.xlu0 %v18511_v12, %s18396_s29 }
 0x101   :  { %437 = vrot.lane.b32.xlu1 %v18511_v12, %s18399_s1  ;;  %242 = vrot.lane.b32.xlu0 %v18511_v12, %s18403_s25 }
 0x105   :  { %435 = vrot.lane.b32.xlu1 %v18518_v13, %s18399_s1  ;;  %238 = vrot.lane.b32.xlu0 %v18525_v14, %s18403_s25 }
 0x109   :  { %503 = vrot.lane.b32.xlu1 %v18544_v15, %s18398_s22  ;;  %439 = vrot.lane.b32.xlu0 %v18544_v15, %s18399_s1 }
 0x10d   :  { %565 = vrot.lane.b32.xlu1 %v18511_v12, %s18401_s2  ;;  %501 = vrot.lane.b32.xlu0 %v18511_v12, %s18398_s22 }
 0x111   :  { %563 = vrot.lane.b32.xlu1 %v18518_v13, %s18401_s2  ;;  %499 = vrot.lane.b32.xlu0 %v18518_v13, %s18398_s22 }
 0x115   :  { %631 = vrot.lane.b32.xlu1 %v18544_v15, %s18400_s23  ;;  %567 = vrot.lane.b32.xlu0 %v18544_v15, %s18401_s2 }
 0x119   :  { %627 = vrot.lane.b32.xlu1 %v18518_v13, %s18400_s23  ;;  %629 = vrot.lane.b32.xlu0 %v18511_v12, %s18400_s23 }
 0x11d   :  { %315 = vrot.lane.b32.xlu1 %v18569_v18, %s18402_s24  ;;  %285 = vrot.lane.b32.xlu0 %v18566_v17, %s18402_s24 }
 0x121   :  { %220 = vrot.lane.b32.xlu1 %v18566_v17, %s18403_s25  ;;  %313 = vrot.lane.b32.xlu0 %v18576_v19, %s18402_s24 }
 0x125   :  { %378 = vrot.lane.b32.xlu1 %v18576_v19, %s18396_s29  ;;  %350 = vrot.lane.b32.xlu0 %v18566_v17, %s18396_s29 }
 0x129   :  { %248 = vrot.lane.b32.xlu1 %v18576_v19, %s18403_s25  ;;  %311 = vrot.lane.b32.xlu0 %v18587_v20, %s18402_s24 }
 0x12d   :  { %376 = vrot.lane.b32.xlu1 %v18587_v20, %s18396_s29  ;;  %380 = vrot.lane.b32.xlu0 %v18569_v18, %s18396_s29 }
 0x131   :  { %246 = vrot.lane.b32.xlu1 %v18587_v20, %s18403_s25  ;;  %250 = vrot.lane.b32.xlu0 %v18569_v18, %s18403_s25 }
 0x135   :  { %445 = vrot.lane.b32.xlu1 %v18569_v18, %s18399_s1  ;;  %415 = vrot.lane.b32.xlu0 %v18566_v17, %s18399_s1 }
 0x139   :  { %443 = vrot.lane.b32.xlu1 %v18576_v19, %s18399_s1  ;;  %479 = vrot.lane.b32.xlu0 %v18566_v17, %s18398_s22 }
 0x13d   :  { %509 = vrot.lane.b32.xlu1 %v18569_v18, %s18398_s22  ;;  %543 = vrot.lane.b32.xlu0 %v18566_v17, %s18401_s2 }
 0x141   :  { %507 = vrot.lane.b32.xlu1 %v18576_v19, %s18398_s22  ;;  %607 = vrot.lane.b32.xlu0 %v18566_v17, %s18400_s23 }
 0x145   :  { %573 = vrot.lane.b32.xlu1 %v18569_v18, %s18401_s2  ;;  %287 = vrot.lane.b32.xlu0 %v18618_v21, %s18402_s24 }
 0x149   :  { %571 = vrot.lane.b32.xlu1 %v18576_v19, %s18401_s2  ;;  %356 = vrot.lane.b32.xlu0 %v18625_v22, %s18396_s29 }
 0x14d   :  { %637 = vrot.lane.b32.xlu1 %v18569_v18, %s18400_s23  ;;  %226 = vrot.lane.b32.xlu0 %v18625_v22, %s18403_s25 }
 0x151   :  { %635 = vrot.lane.b32.xlu1 %v18576_v19, %s18400_s23  ;;  %222 = vrot.lane.b32.xlu0 %v18618_v21, %s18403_s25 }
 0x155   :  { %289 = vrot.lane.b32.xlu1 %v18640_v23, %s18402_s24  ;;  %423 = vrot.lane.b32.xlu0 %v18643_v24, %s18399_s1 }
 0x159   :  { %291 = vrot.lane.b32.xlu1 %v18625_v22, %s18402_s24  ;;  %485 = vrot.lane.b32.xlu0 %v18625_v22, %s18398_s22 }
 0x15b   :  { %v18653_v25 = vpop.permute.xlu0 %495  ;;  %v18655_v26 = vpop.permute.xlu1 %431 }
 0x15c   :  { %24724 = vst [vmem:[#allocation17_spill] sm:$0xff] %v18653_v25  ;;  %24725 = vst [vmem:[#allocation18_spill] sm:$0xff] %v18655_v26  ;;  %v1109_v26 = vld [vmem:[%s24544_s4 + $0x8] sm:$0xff] }
 0x15d   :  { %354 = vrot.lane.b32.xlu1 %v18640_v23, %s18396_s29  ;;  %483 = vrot.lane.b32.xlu0 %v18640_v23, %s18398_s22 }
 0x15f   :  { %v18661_v27 = vpop.permute.xlu0 %623  ;;  %v18663_v28 = vpop.permute.xlu1 %559 }
 0x160   :  { %24726 = vst [vmem:[#allocation19_spill] sm:$0xff] %v18661_v27  ;;  %24727 = vst [vmem:[#allocation20_spill] sm:$0xff] %v18663_v28  ;;  %v24566_v28 = vlaneseq }
 0x161   :  { %224 = vrot.lane.b32.xlu1 %v18640_v23, %s18403_s25  ;;  %551 = vrot.lane.b32.xlu0 %v18643_v24, %s18401_s2 }
 0x163   :  { %v18669_v29 = vpop.permute.xlu0 %301  ;;  %v18671_v30 = vpop.permute.xlu1 %307 }
 0x164   :  { %24728 = vst [vmem:[#allocation21_spill] sm:$0xff] %v18671_v30 }
 0x165   :  { %352 = vrot.lane.b32.xlu1 %v18618_v21, %s18396_s29  ;;  %613 = vrot.lane.b32.xlu0 %v18625_v22, %s18400_s23 }
 0x167   :  { %v18677_v31 = vpop.permute.xlu1 %370  ;;  %v18679_v32 = vpop.permute.xlu0 %305 }
 0x169   :  { %421 = vrot.lane.b32.xlu1 %v18625_v22, %s18399_s1  ;;  %611 = vrot.lane.b32.xlu0 %v18640_v23, %s18400_s23 }
 0x16b   :  { %v18685_v33 = vpop.permute.xlu1 %240  ;;  %v18687_v34 = vpop.permute.xlu0 %303 }
 0x16d   :  { %419 = vrot.lane.b32.xlu1 %v18640_v23, %s18399_s1  ;;  %299 = vrot.lane.b32.xlu0 %v18690_v35, %s18402_s24 }
 0x16f   :  { %v18696_v36 = vpop.permute.xlu1 %368  ;;  %v18698_v37 = vpop.permute.xlu0 %372 }
 0x170   :  { %24729 = vst [vmem:[#allocation22_spill] sm:$0xff] %v18696_v36  ;;  %24730 = vst [vmem:[#allocation23_spill] sm:$0xff] %v18698_v37 }
 0x171   :  { %487 = vrot.lane.b32.xlu1 %v18643_v24, %s18398_s22  ;;  %362 = vrot.lane.b32.xlu0 %v18701_v38, %s18396_s29 }
 0x173   :  { %v18707_v39 = vpop.permute.xlu1 %437  ;;  %v18709_v40 = vpop.permute.xlu0 %242 }
 0x174   :  { %24731 = vst [vmem:[#allocation24_spill] sm:$0xff] %v18709_v40 }
 0x175   :  { %549 = vrot.lane.b32.xlu1 %v18625_v22, %s18401_s2  ;;  %232 = vrot.lane.b32.xlu0 %v18701_v38, %s18403_s25 }
 0x177   :  { %v18715_v41 = vpop.permute.xlu1 %435  ;;  %v18717_v42 = vpop.permute.xlu0 %238 }
 0x178   :  { %24732 = vst [vmem:[#allocation25_spill] sm:$0xff] %v18717_v42 }
 0x179   :  { %547 = vrot.lane.b32.xlu1 %v18640_v23, %s18401_s2  ;;  %360 = vrot.lane.b32.xlu0 %v18720_v43, %s18396_s29 }
 0x17b   :  { %v18728_v45 = vpop.permute.xlu1 %503  ;;  %v18730_v46 = vpop.permute.xlu0 %439 }
 0x17c   :  { %24733 = vst [vmem:[#allocation26_spill] sm:$0xff] %v18728_v45  ;;  %24734 = vst [vmem:[#allocation27_spill] sm:$0xff] %v18730_v46 }
 0x17d   :  { %615 = vrot.lane.b32.xlu1 %v18643_v24, %s18400_s23  ;;  %429 = vrot.lane.b32.xlu0 %v18690_v35, %s18399_s1 }
 0x17f   :  { %v18736_v47 = vpop.permute.xlu1 %565  ;;  %v18738_v48 = vpop.permute.xlu0 %501 }
 0x181   :  { %297 = vrot.lane.b32.xlu1 %v18701_v38, %s18402_s24  ;;  %427 = vrot.lane.b32.xlu0 %v18701_v38, %s18399_s1 }
 0x183   :  { %v18744_v49 = vpop.permute.xlu1 %563  ;;  %v18746_v50 = vpop.permute.xlu0 %499 }
 0x185   :  { %295 = vrot.lane.b32.xlu1 %v18720_v43, %s18402_s24  ;;  %557 = vrot.lane.b32.xlu0 %v18690_v35, %s18401_s2 }
 0x187   :  { %v18752_v51 = vpop.permute.xlu1 %631  ;;  %v18754_v52 = vpop.permute.xlu0 %567 }
 0x188   :  { %24735 = vst [vmem:[#allocation28_spill] sm:$0xff] %v18752_v51  ;;  %24736 = vst [vmem:[#allocation29_spill] sm:$0xff] %v18754_v52 }
 0x189   :  { %364 = vrot.lane.b32.xlu1 %v18690_v35, %s18396_s29  ;;  %555 = vrot.lane.b32.xlu0 %v18701_v38, %s18401_s2 }
 0x18b   :  { %v18760_v53 = vpop.permute.xlu1 %627  ;;  %v18762_v54 = vpop.permute.xlu0 %629 }
 0x18c   :  { %24737 = vst [vmem:[#allocation30_spill] sm:$0xff] %v18760_v53 }
 0x18d   :  { %234 = vrot.lane.b32.xlu1 %v18690_v35, %s18403_s25  ;;  %236 = vrot.lane.b32.xlu0 %v18500_v11, %s18403_s25 }
 0x18f   :  { %v18768_v55 = vpop.permute.xlu1 %315  ;;  %v18770_v56 = vpop.permute.xlu0 %285 }
 0x191   :  { %230 = vrot.lane.b32.xlu1 %v18720_v43, %s18403_s25  ;;  %497 = vrot.lane.b32.xlu0 %v18525_v14, %s18398_s22 }
 0x193   :  { %v18776_v57 = vpop.permute.xlu1 %220  ;;  %v18778_v58 = vpop.permute.xlu0 %313 }
 0x194   :  { %24738 = vst [vmem:[#allocation31_spill] sm:$0xff] %v18776_v57  ;;  %v775_v57 = vrot.slane %v18518_v13, 5 }
 0x195   :  { %493 = vrot.lane.b32.xlu1 %v18690_v35, %s18398_s22  ;;  %417 = vrot.lane.b32.xlu0 %v18618_v21, %s18399_s1 }
 0x197   :  { %v18784_v59 = vpop.permute.xlu1 %378  ;;  %v18786_v60 = vpop.permute.xlu0 %350 }
 0x199   :  { %491 = vrot.lane.b32.xlu1 %v18701_v38, %s18398_s22  ;;  %481 = vrot.lane.b32.xlu0 %v18618_v21, %s18398_s22 }
 0x19b   :  { %v18792_v61 = vpop.permute.xlu1 %248  ;;  %v18794_v62 = vpop.permute.xlu0 %311 }
 0x19c   :  { %24739 = vst [vmem:[#allocation32_spill] sm:$0xff] %v18792_v61  ;;  %24740 = vst [vmem:[#allocation33_spill] sm:$0xff] %v18794_v62 }
 0x19d   :  { %621 = vrot.lane.b32.xlu1 %v18690_v35, %s18400_s23  ;;  %545 = vrot.lane.b32.xlu0 %v18618_v21, %s18401_s2 }
 0x19f   :  { %v18800_v63 = vpop.permute.xlu1 %376  ;;  %v18802_v0 = vpop.permute.xlu0 %380 }
 0x1a0   :  { %24741 = vst [vmem:[#allocation34_spill] sm:$0xff] %v18800_v63 }
 0x1a1   :  { %619 = vrot.lane.b32.xlu1 %v18701_v38, %s18400_s23  ;;  %609 = vrot.lane.b32.xlu0 %v18618_v21, %s18400_s23 }
 0x1a3   :  { %v18808_v2 = vpop.permute.xlu1 %246  ;;  %v18810_v3 = vpop.permute.xlu0 %250 }
 0x1a4   :  { %24742 = vst [vmem:[#allocation35_spill] sm:$0xff] %v18808_v2  ;;  %24743 = vst [vmem:[#allocation36_spill] sm:$0xff] %v18810_v3 }
 0x1a5   :  { %366 = vrot.lane.b32.xlu1 %v18500_v11, %s18396_s29  ;;  %293 = vrot.lane.b32.xlu0 %v18643_v24, %s18402_s24 }
 0x1a7   :  { %v18816_v4 = vpop.permute.xlu1 %445  ;;  %v18818_v5 = vpop.permute.xlu0 %415 }
 0x1a8   :  { %24744 = vst [vmem:[#allocation37_spill] sm:$0xff] %v18816_v4  ;;  %24745 = vst [vmem:[#allocation38_spill] sm:$0xff] %v18818_v5 }
 0x1a9   :  { %433 = vrot.lane.b32.xlu1 %v18525_v14, %s18399_s1  ;;  %358 = vrot.lane.b32.xlu0 %v18643_v24, %s18396_s29 }
 0x1ab   :  { %v18824_v6 = vpop.permute.xlu1 %443  ;;  %v18826_v7 = vpop.permute.xlu0 %479 }
 0x1ac   :  { %24746 = vst [vmem:[#allocation39_spill] sm:$0xff] %v18824_v6  ;;  %24747 = vst [vmem:[#allocation40_spill] sm:$0xff] %v18826_v7 }
 0x1ad   :  { %561 = vrot.lane.b32.xlu1 %v18525_v14, %s18401_s2  ;;  %425 = vrot.lane.b32.xlu0 %v18720_v43, %s18399_s1 }
 0x1af   :  { %v18832_v8 = vpop.permute.xlu1 %509  ;;  %v18834_v9 = vpop.permute.xlu0 %543 }
 0x1b0   :  { %24748 = vst [vmem:[#allocation41_spill] sm:$0xff] %v18832_v8  ;;  %24749 = vst [vmem:[#allocation42_spill] sm:$0xff] %v18834_v9 }
 0x1b1   :  { %228 = vrot.lane.b32.xlu1 %v18643_v24, %s18403_s25  ;;  %553 = vrot.lane.b32.xlu0 %v18720_v43, %s18401_s2 }
 0x1b3   :  { %v18840_v10 = vpop.permute.xlu1 %507  ;;  %v18842_v11 = vpop.permute.xlu0 %607 }
 0x1b4   :  { %24750 = vst [vmem:[#allocation43_spill] sm:$0xff] %v18840_v10  ;;  %24751 = vst [vmem:[#allocation44_spill] sm:$0xff] %v18842_v11  ;;  %v1108_v10 = vld [vmem:[%s24544_s4] sm:$0xff] }
 0x1b5   :  { %489 = vrot.lane.b32.xlu1 %v18720_v43, %s18398_s22  ;;  %625 = vrot.lane.b32.xlu0 %v18525_v14, %s18400_s23 }
 0x1b7   :  { %v18848_v16 = vpop.permute.xlu1 %573  ;;  %v18850_v17 = vpop.permute.xlu0 %287 }
 0x1b8   :  { %24752 = vst [vmem:[#allocation45_spill] sm:$0xff] %v18848_v16 }
 0x1b9   :  { %617 = vrot.lane.b32.xlu1 %v18720_v43, %s18400_s23  ;;  %374 = vrot.lane.b32.xlu0 %v18544_v15, %s18396_s29 }
 0x1bb   :  { %v18856_v1 = vpop.permute.xlu1 %571  ;;  %v18858_v44 = vpop.permute.xlu0 %356 }
 0x1bc   :  { %24753 = vst [vmem:[#allocation46_spill] sm:$0xff] %v18856_v1 }
 0x1bd   :  { %309 = vrot.lane.b32.xlu1 %v18544_v15, %s18402_s24  ;;  %441 = vrot.lane.b32.xlu0 %v18587_v20, %s18399_s1 }
 0x1bf   :  { %v18864_v27 = vpop.permute.xlu1 %637  ;;  %v18866_v25 = vpop.permute.xlu0 %226 }
 0x1c0   :  { %24754 = vst [vmem:[#allocation47_spill] sm:$0xff] %v18864_v27  ;;  %24755 = vst [vmem:[#allocation48_spill] sm:$0xff] %v18866_v25  ;;  %v18882_v27 = vand.u32 127, %v24566_v28 }
 0x1c1   :  { %244 = vrot.lane.b32.xlu1 %v18544_v15, %s18403_s25  ;;  %569 = vrot.lane.b32.xlu0 %v18587_v20, %s18401_s2 }
 0x1c2   :  { %vm24591_vm1 = vcmp.lt.s32.totalorder %v18882_v27, 2  ;;  %vm24607_vm2 = vcmp.lt.s32.totalorder %v18882_v27, 1  ;;  %vm71_vm3 = vcmp.ge.s32.totalorder %v18882_v27, 3  ;;  %vm24590_vm4 = vcmp.ge.s32.totalorder %v18882_v27, 2 }
 0x1c3   :  { %v18875_v11 = vpop.permute.xlu1 %635  ;;  %v18877_v1 = vpop.permute.xlu0 %222  ;;  %vm24606_vm5 = vcmp.lt.s32.totalorder %v18882_v27, 3  ;;  %vm77_vm6 = vcmp.ge.s32.totalorder %v18882_v27, 1  ;;  %vm81_vm7 = vcmp.lt.s32.totalorder %v18882_v27, 127  ;;  %vm24602_vm8 = vcmp.lt.s32.totalorder %v18882_v27, 126 }
 0x1c4   :  { %24756 = vst [vmem:[#allocation49_spill] sm:$0xff] %v18875_v11  ;;  %v323_v11 = vsel %vm24591_vm1, %v18687_v34, %v18679_v32  ;;  %v258_v8 = vsel %vm24606_vm5, %v18717_v42, %v18685_v33  ;;  %vm87_vm9 = vcmp.lt.s32.totalorder %v18882_v27, 125  ;;  %v388_v6 = vsel %vm24607_vm2, %v18696_v36, %v18677_v31 }
 0x1c5   :  { %505 = vrot.lane.b32.xlu1 %v18587_v20, %s18398_s22  ;;  %1117 = vperm.xlu0 %18323, %v1109_v26   ;;  %v344_v7 = vsel %vm24590_vm4, %v323_v11, 0.0  ;;  %vm90_vm10 = vcmp.lt.s32.totalorder %v18882_v27, 124  ;;  %v279_v2 = vsel %vm71_vm3, %v258_v8, 0.0  ;;  %v322_v4 = vsel %vm24591_vm1, %v18679_v32, %v18671_v30 }
 0x1c6   :  { %v697_v19 = vrot.slane %v344_v7, 7  ;;  %v409_v3 = vsel %vm77_vm6, %v388_v6, 0.0  ;;  %v387_v8 = vsel %vm24607_vm2, %v18677_v31, %v18698_v37  ;;  %v257_v32 = vsel %vm24606_vm5, %v18685_v33, %v18709_v40 }
 0x1c7   :  { %v18884_v16 = vpop.permute.xlu1 %289  ;;  %v18886_v9 = vpop.permute.xlu0 %423  ;;  %v451_v6 = vsel %vm81_vm7, %v18715_v41, %v18707_v39  ;;  %v345_v13 = vsel %vm24590_vm4, %v322_v4, 0.0  ;;  %v515_v33 = vsel %vm24602_vm8, %v18746_v50, %v18738_v48  ;;  %v280_v36 = vsel %vm71_vm3, %v257_v32, 0.0 }
 0x1c8   :  { %24757 = vst [vmem:[#allocation50_spill] sm:$0xff] %v18886_v9  ;;  %v998_v7 = vsel %vm24585_vm11, %v279_v2, %v697_v19  ;;  %v410_v19 = vsel %vm77_vm6, %v387_v8, 0.0  ;;  %v450_v61 = vsel %vm81_vm7, %v18707_v39, %v18730_v46  ;;  %v698_v15 = vrot.slane %v345_v13, 7 }
 0x1c9   :  { %633 = vrot.lane.b32.xlu1 %v18587_v20, %s18400_s23  ;;  %v514_v8 = vsel %vm24602_vm8, %v18738_v48, %v18728_v45  ;;  %v579_v32 = vsel %vm87_vm9, %v18744_v49, %v18736_v47  ;;  %v324_v39 = vsel %vm24591_vm1, %v18669_v29, %v18687_v34  ;;  %v746_v13 = vrot.slane %v410_v19, 6 }
 0x1ca   :  { %v578_v48 = vsel %vm87_vm9, %v18736_v47, %v18754_v52  ;;  %v999_v2 = vsel %vm24585_vm11, %v280_v36, %v698_v15  ;;  %v474_v40 = vsel %vm81_vm7, %v450_v61, 0.0  ;;  %v538_v46 = vsel %vm24602_vm8, %v514_v8, 0.0 }
 0x1cb   :  { %v18896_v26 = vpop.permute.xlu1 %291  ;;  %v18898_v28 = vpop.permute.xlu0 %485  ;;  %v601_v34 = vsel %vm87_vm9, %v579_v32, 0.0  ;;  %v642_v47 = vsel %vm90_vm10, %v18762_v54, %v18752_v51  ;;  %v19017_v15 = vsel %vm24590_vm4, %v324_v39, 0.0  ;;  %v602_v36 = vsel %vm87_vm9, %v578_v48, 0.0 }
 0x1cc   :  { %v822_v8 = vrot.slane %v474_v40, 4  ;;  %vm1089_vm11 = vcmask 1046528   ;;  %v870_v32 = vrot.slane %v538_v46, 3  ;;  %v666_v39 = vsel %vm90_vm10, %v642_v47, 0.0 }
 0x1cd   :  { %1112 = vperm.xlu1 %18324, %v1108_v10   ;;  %v745_v10 = vrot.slane %v409_v3, 6  ;;  %v473_v3 = vsel %vm81_vm7, %v451_v6, 0.0  ;;  %v537_v6 = vsel %vm24602_vm8, %v515_v33, 0.0  ;;  %v918_v52 = vrot.slane %v602_v36, 2 }
 0x1ce   :  { %v821_v45 = vrot.slane %v473_v3, 4  ;;  %v869_v19 = vrot.slane %v537_v6, 3  ;;  %v917_v6 = vrot.slane %v601_v34, 2  ;;  %v333_v40 = vsel %vm24591_vm1, %v18768_v55, %v18770_v56 }
 0x1cf   :  { %v18923_v5 = vpop.permute.xlu1 %354  ;;  %v18925_v42 = vpop.permute.xlu0 %483  ;;  %v1015_v4 = vsel %vm1004_vm12, %v998_v7, %v745_v10  ;;  %v318_v46 = vsel %vm24591_vm1, %v18778_v58, %v18768_v55  ;;  %v331_v47 = vsel %vm24591_vm1, %v18850_v17, %v18884_v16 }
 0x1d0   :  { %v1032_v33 = vsel %vm1021_vm13, %v1015_v4, %v775_v57  ;;  %v643_v57 = vsel %vm90_vm10, %v18760_v53, %v18762_v54  ;;  %v1016_v4 = vsel %vm1004_vm12, %v999_v2, %v746_v13 }
 0x1d1   :  { %v1049_v48 = vsel %vm1038_vm14, %v1032_v33, %v821_v45  ;;  %v665_v54 = vsel %vm90_vm10, %v643_v57, 0.0  ;;  %v319_v45 = vsel %vm24591_vm1, %v18794_v62, %v18778_v58  ;;  %v24759_v33 = vrot.slane %v18511_v12, 5 }
 0x1d2   :  { %v1066_v30 = vsel %vm1055_vm15, %v1049_v48, %v869_v19  ;;  %v966_v19 = vrot.slane %v666_v39, 1  ;;  %v965_v36 = vrot.slane %v665_v54, 1  ;;  %v330_v12 = vsel %vm24591_vm1, %v18884_v16, %v18896_v26 }
 0x1d3   :  { %v18957_v11 = vpop.permute.xlu1 %224  ;;  %v18959_v31 = vpop.permute.xlu0 %551  ;;  %v1033_v34 = vsel %vm1021_vm13, %v1016_v4, %v24759_v33  ;;  %v1083_v4 = vsel %vm1072_vm0, %v1066_v30, %v917_v6  ;;  %v19071_v39 = vsel %vm24590_vm4, %v333_v40, 0.0  ;;  %v19075_v48 = vsel %vm24590_vm4, %v318_v46, 0.0 }
 0x1d4   :  { %24758 = vst [vmem:[#allocation51_spill] sm:$0xff] %v18959_v31  ;;  %v1050_v58 = vsel %vm1038_vm14, %v1033_v34, %v822_v8  ;;  %v19079_v8 = vsel %vm24590_vm4, %v319_v45, 0.0  ;;  %v336_v16 = vsel %vm24590_vm4, %v331_v47, 0.0  ;;  %v265_v30 = vsel %vm24606_vm5, %v18957_v11, %v18866_v25 }
 0x1d5   :  { %v1067_v57 = vsel %vm1055_vm15, %v1050_v58, %v870_v32  ;;  %v266_v32 = vsel %vm24606_vm5, %v18877_v1, %v18957_v11  ;;  %v395_v45 = vsel %vm24607_vm2, %v18923_v5, %v18858_v44  ;;  %v19114_v58 = vsel %vm1089_vm11, %v1083_v4, %v965_v36 }
 0x1d6   :  { %v1084_v54 = vsel %vm1072_vm0, %v1067_v57, %v918_v52  ;;  %v337_v52 = vsel %vm24590_vm4, %v330_v12, 0.0  ;;  %v689_v12 = vrot.slane %v336_v16, 7  ;;  %v272_v57 = vsel %vm71_vm3, %v265_v30, 0.0 }
 0x1d7   :  { %v18991_v10 = vpop.permute.xlu1 %352  ;;  %v18993_v7 = vpop.permute.xlu0 %613  ;;  %v19108_v11 = vsel %vm1089_vm11, %v1084_v54, %v966_v19  ;;  %v690_v62 = vrot.slane %v337_v52, 7  ;;  %v402_v19 = vsel %vm77_vm6, %v395_v45, 0.0  ;;  %v384_v30 = vsel %vm24607_vm2, %v18800_v63, %v18784_v59 }
 0x1d8   :  { %v396_v55 = vsel %vm24607_vm2, %v18991_v10, %v18923_v5  ;;  %v271_v5 = vsel %vm71_vm3, %v266_v32, 0.0  ;;  %v383_v32 = vsel %vm24607_vm2, %v18784_v59, %v18802_v0  ;;  %v523_v52 = vsel %vm24602_vm8, %v18925_v42, %v18898_v28 }
 0x1d9   :  { %v401_v6 = vsel %vm77_vm6, %v396_v55, 0.0  ;;  %vm24761_vm4 = vcmask 1040384   ;;  %v738_v34 = vrot.slane %v402_v19, 6  ;;  %v19159_v37 = vsel %vm77_vm6, %v384_v30, 0.0 }
 0x1da   :  { %v737_v51 = vrot.slane %v401_v6, 6  ;;  %v990_v45 = vsel %vm24761_vm4, %v271_v5, %v689_v12  ;;  %vm24762_vm1 = vmmov %vm24761_vm4  ;;  %v24764_v12 = vld [vmem:[#allocation35_spill] sm:$0xff]  ;;  %v749_v24 = vrot.slane %v19159_v37, 6  ;;  %v414_v53 = vsel %vm77_vm6, %v383_v32, 0.0 }
 0x1db   :  { %v422_v61 = vpop.permute.xlu1 %421  ;;  %v19025_v3 = vpop.permute.xlu0 %611  ;;  %v24784_v25 = vrot.slane %v19071_v39, 7 }
 0x1dc   :  { %v458_v54 = vsel %vm81_vm7, %v422_v61, %v18886_v9 }
 0x1dd   :  { %v466_v47 = vsel %vm81_vm7, %v458_v54, 0.0  ;;  %v529_v54 = vsel %vm24602_vm8, %v523_v52, 0.0 }
 0x1df   :  { %v19047_v2 = vpop.permute.xlu1 %419  ;;  %v19049_v13 = vpop.permute.xlu0 %299 }
 0x1e0   :  { %v459_v33 = vsel %vm81_vm7, %v19047_v2, %v422_v61  ;;  %v398_v61 = vsel %vm24607_vm2, %v18802_v0, %v18786_v60  ;;  %v1007_v0 = vsel %vm1004_vm12, %v990_v45, %v737_v51  ;;  %v814_v45 = vrot.slane %v466_v47, 4 }
 0x1e1   :  { %v465_v36 = vsel %vm81_vm7, %v459_v33, 0.0  ;;  %v991_v33 = vsel %vm24762_vm1, %v272_v57, %v690_v62  ;;  %v24763_v62 = vld [vmem:[#allocation32_spill] sm:$0xff]  ;;  %vm24605_vm1 = vcmask 64512  }
 0x1e2   :  { %v813_v55 = vrot.slane %v465_v36, 4  ;;  %v254_v5 = vsel %vm24606_vm5, %v24764_v12, %v24763_v62  ;;  %v1008_v36 = vsel %vm1004_vm12, %v991_v33, %v738_v34  ;;  %v24765_v12 = vrot.slane %v18640_v23, 5  ;;  %v24766_v33 = vld [vmem:[#allocation36_spill] sm:$0xff] }
 0x1e3   :  { %v19094_v40 = vpop.permute.xlu1 %487  ;;  %v19096_v46 = vpop.permute.xlu0 %362  ;;  %v861_v23 = vrot.slane %v529_v54, 3 }
 0x1e4   :  { %24760 = vst [vmem:[#allocation52_spill] sm:$0xff] %v19094_v40  ;;  %v522_v6 = vsel %vm24602_vm8, %v18898_v28, %v19094_v40  ;;  %v19163_v28 = vsel %vm77_vm6, %v398_v61, 0.0  ;;  %v1024_v52 = vsel %vm1021_vm13, %v1007_v0, %v24765_v12 }
 0x1e5   :  { %v530_v51 = vsel %vm24602_vm8, %v522_v6, 0.0  ;;  %v651_v6 = vsel %vm90_vm10, %v19025_v3, %v18993_v7 }
 0x1e6   :  { %v862_v47 = vrot.slane %v530_v51, 3 }
 0x1e7   :  { %v550_v4 = vpop.permute.xlu1 %549  ;;  %v19127_v16 = vpop.permute.xlu0 %232 }
 0x1e8   :  { %v586_v59 = vsel %vm87_vm9, %v550_v4, %v18959_v31 }
 0x1e9   :  { %v594_v30 = vsel %vm87_vm9, %v586_v59, 0.0  ;;  %v253_v59 = vsel %vm24606_vm5, %v24763_v62, %v24766_v33  ;;  %v657_v62 = vsel %vm90_vm10, %v651_v6, 0.0  ;;  %v24769_v6 = vld [vmem:[#allocation38_spill] sm:$0xff] }
 0x1ea   :  { %v910_v40 = vrot.slane %v594_v30, 2  ;;  %v284_v51 = vsel %vm71_vm3, %v253_v59, 0.0 }
 0x1eb   :  { %v19171_v57 = vpop.permute.xlu1 %547  ;;  %v19173_v19 = vpop.permute.xlu0 %360 }
 0x1ec   :  { %v587_v61 = vsel %vm87_vm9, %v19171_v57, %v550_v4  ;;  %v1041_v4 = vsel %vm1038_vm14, %v1024_v52, %v813_v55  ;;  %v24768_v55 = vrot.slane %v18625_v22, 5  ;;  %v24770_v52 = vld [vmem:[#allocation37_spill] sm:$0xff] }
 0x1ed   :  { %v593_v34 = vsel %vm87_vm9, %v587_v61, 0.0  ;;  %v283_v61 = vsel %vm71_vm3, %v254_v5, 0.0  ;;  %v1058_v30 = vsel %vm1055_vm15, %v1041_v4, %v861_v23  ;;  %v957_v4 = vrot.slane %v657_v62, 1 }
 0x1ee   :  { %v909_v63 = vrot.slane %v593_v34, 2  ;;  %v1025_v32 = vsel %vm1021_vm13, %v1008_v36, %v24768_v55  ;;  %v462_v34 = vsel %vm81_vm7, %v24770_v52, %v24769_v6  ;;  %v24771_v55 = vld [vmem:[#allocation31_spill] sm:$0xff] }
 0x1ef   :  { %v19200_v0 = vpop.permute.xlu1 %615  ;;  %v19202_v12 = vpop.permute.xlu0 %429  ;;  %v1042_v5 = vsel %vm1038_vm14, %v1025_v32, %v814_v45  ;;  %v268_v59 = vsel %vm24606_vm5, %v24766_v33, %v24771_v55 }
 0x1f0   :  { %24767 = vst [vmem:[#allocation32_spill] sm:$0xff] %v19200_v0  ;;  %v650_v37 = vsel %vm90_vm10, %v18993_v7, %v19200_v0  ;;  %v1059_v22 = vsel %vm1055_vm15, %v1042_v5, %v862_v47  ;;  %v1075_v36 = vsel %vm1072_vm0, %v1058_v30, %v909_v63  ;;  %v24773_v47 = vrot.slane %v19079_v8, 7  ;;  %v24774_v5 = vld [vmem:[#allocation40_spill] sm:$0xff]  ;;  %v24775_v30 = vld [vmem:[#allocation41_spill] sm:$0xff]  ;;  %v24776_v0 = vld [vmem:[#allocation43_spill] sm:$0xff] }
 0x1f1   :  { %v658_v54 = vsel %vm90_vm10, %v650_v37, 0.0  ;;  %v24772_v37 = vld [vmem:[#allocation39_spill] sm:$0xff]  ;;  %v526_v33 = vsel %vm24602_vm8, %v24775_v30, %v24774_v5  ;;  %v511_v62 = vsel %vm24602_vm8, %v24776_v0, %v24775_v30  ;;  %v24777_v8 = vrot.slane %v19075_v48, 7 }
 0x1f2   :  { %v958_v7 = vrot.slane %v658_v54, 1  ;;  %v447_v45 = vsel %vm81_vm7, %v24772_v37, %v24770_v52  ;;  %v1076_v54 = vsel %vm1072_vm0, %v1059_v22, %v910_v40  ;;  %v1002_v63 = vsel %vm24761_vm4, %v283_v61, %v24773_v47  ;;  %v19255_v40 = vld [vmem:[%s24543_s3] sm:$0xff]  ;;  %v24778_v47 = vld [vmem:[#allocation42_spill] sm:$0xff] }
 0x1f3   :  { %v19235_v23 = vpop.permute.xlu1 %297  ;;  %v19237_v32 = vpop.permute.xlu0 %427  ;;  %v1003_v61 = vsel %vm24761_vm4, %v284_v51, %v24777_v8  ;;  %v478_v22 = vsel %vm81_vm7, %v462_v34, 0.0  ;;  %v24779_v37 = vld [vmem:[#allocation45_spill] sm:$0xff]  ;;  %v750_v30 = vrot.slane %v414_v53, 6  ;;  %v269_v0 = vsel %vm71_vm3, %v268_v59, 0.0  ;;  %v24782_v53 = vld [vmem:[#allocation47_spill] sm:$0xff] }
 0x1f4   :  { %v1093_v52 = vsel %vm1089_vm11, %v1076_v54, %v958_v7  ;;  %v590_v31 = vsel %vm87_vm9, %v24779_v37, %v24778_v47  ;;  %v1092_v7 = vsel %vm1089_vm11, %v1075_v36, %v957_v4  ;;  %v735_v54 = vrot.slane %v19163_v28, 6  ;;  %v24781_v28 = vld [vmem:[#allocation44_spill] sm:$0xff] }
 0x1f5   :  { %1234 = vmatprep.subr.mxu0 %v1093_v52  ;;  %v477_v48 = vsel %vm81_vm7, %v447_v45, 0.0  ;;  %v542_v51 = vsel %vm24602_vm8, %v526_v33, 0.0  ;;  %v541_v34 = vsel %vm24602_vm8, %v511_v62, 0.0  ;;  %v24780_v52 = vld [vmem:[#allocation46_spill] sm:$0xff]  ;;  %v654_v59 = vsel %vm90_vm10, %v24782_v53, %v24781_v28 }
 0x1f6   :  { %1235 = vmatpush1.msra.mxu0 %v1092_v7  ;;  %v575_v36 = vsel %vm87_vm9, %v24780_v52, %v24779_v37  ;;  %v1019_v33 = vsel %vm1004_vm12, %v1002_v63, %v749_v24  ;;  %v1020_v62 = vsel %vm1004_vm12, %v1003_v61, %v750_v30  ;;  %v826_v8 = vrot.slane %v478_v22, 4  ;;  %v19298_v52 = vld [vmem:[%s24543_s3 + $0x8] sm:$0xff] }
 0x1f7   :  { %v19284_v4 = vpop.permute.xlu1 %295  ;;  %17558 = vmatmul.mubr.msk.f32.vlgmr.msra.gmra.mxu0 %vm24605_vm1, %v19255_v40  ;;  %v19288_v45 = vpop.permute.xlu0 %557  ;;  %v606_v37 = vsel %vm87_vm9, %v590_v31, 0.0  ;;  %v24783_v7 = vmov 0.0   ;;  %v988_v14 = vsel %vm24761_vm4, %v269_v0, %v24784_v25  ;;  %v825_v9 = vrot.slane %v477_v48, 4  ;;  %v24786_v25 = vld [vmem:[#allocation14_spill] sm:$0xff] }
 0x1f8   :  { %1274 = vmatprep.mubr.f32.mxu0 %v24783_v7  ;;  %vm24785_vm8 = vcmp.lt.s32.totalorder %v18882_v27, 2  ;;  %v397_v31 = vsel %vm24607_vm2, %v18786_v60, %v18991_v10  ;;  %v874_v63 = vrot.slane %v542_v51, 3  ;;  %v873_v61 = vrot.slane %v541_v34, 3 }
 0x1f9   :  { %v332_v24 = vsel %vm24785_vm8, %v18770_v56, %v18850_v17  ;;  %v605_v22 = vsel %vm87_vm9, %v575_v36, 0.0  ;;  %v670_v39 = vsel %vm90_vm10, %v654_v59, 0.0  ;;  %v24787_v0 = vrot.slane %v24786_v25, 5  ;;  %v24788_v56 = vld [vmem:[#allocation49_spill] sm:$0xff] }
 0x1fa   :  { %v922_v48 = vrot.slane %v606_v37, 2  ;;  %v639_v17 = vsel %vm90_vm10, %v24788_v56, %v24782_v53  ;;  %v24789_v10 = vrot.slane %v18569_v18, 5  ;;  %vm24790_vm8 = vcmp.ge.s32.totalorder %v18882_v27, 2 }
 0x1fb   :  { %v1036_v30 = vsel %vm1021_vm13, %v1019_v33, %v24787_v0  ;;  %v19322_v20 = vpop.permute.xlu1 %364  ;;  %17559 = vmatmul.mubr.msk.f32.gmra.mxu0 %vm24605_vm1, %v19298_v52  ;;  %v19326_v60 = vpop.permute.xlu0 %555  ;;  %v335_v34 = vsel %vm24790_vm8, %v332_v24, 0.0  ;;  %v267_v36 = vsel %vm24606_vm5, %v24771_v55, %v18877_v1  ;;  %v400_v53 = vsel %vm77_vm6, %v397_v31, 0.0 }
 0x1fc   :  { %v1037_v51 = vsel %vm1021_vm13, %v1020_v62, %v24789_v10  ;;  %1422 = vmatprep.mubr.f32.mxu0 %v24783_v7  ;;  %v1053_v33 = vsel %vm1038_vm14, %v1036_v30, %v825_v9  ;;  %v921_v18 = vrot.slane %v605_v22, 2  ;;  %v970_v37 = vrot.slane %v670_v39, 1 }
 0x1fd   :  { %v1054_v59 = vsel %vm1038_vm14, %v1037_v51, %v826_v8  ;;  %vm24791_vm4 = vcmp.lt.s32.totalorder %v18882_v27, 2  ;;  %v1005_v24 = vsel %vm1004_vm12, %v988_v14, %v735_v54  ;;  %v669_v1 = vsel %vm90_vm10, %v639_v17, 0.0 }
 0x1fe   :  { %v326_v62 = vsel %vm24791_vm4, %v19235_v23, %v19049_v13  ;;  %v1071_v55 = vsel %vm1055_vm15, %v1054_v59, %v874_v63  ;;  %v1070_v31 = vsel %vm1055_vm15, %v1053_v33, %v873_v61  ;;  %v688_v25 = vrot.slane %v335_v34, 7 }
 0x1ff   :  { %v270_v9 = vsel %vm71_vm3, %v267_v36, 0.0  ;;  %v736_v8 = vrot.slane %v400_v53, 6  ;;  %v235_v22 = vpop.permute.xlu1 %234  ;;  %v237_v39 = vpop.permute.xlu0 %236  ;;  %v1088_v0 = vsel %vm1072_vm0, %v1071_v55, %v922_v48  ;;  %v341_v30 = vsel %vm24790_vm8, %v326_v62, 0.0  ;;  %v24793_v53 = vld [vmem:[#allocation18_spill] sm:$0xff] }
 0x200   :  { %v327_v14 = vsel %vm24791_vm4, %v19284_v4, %v19235_v23  ;;  %v391_v54 = vsel %vm24607_vm2, %v19096_v46, %v19322_v20  ;;  %v261_v63 = vsel %vm24606_vm5, %v19127_v16, %v235_v22  ;;  %v969_v61 = vrot.slane %v669_v1, 1 }
 0x201   :  { %v19369_v48 = vsel %vm1021_vm13, %v1005_v24, %v18720_v43  ;;  %v19372_v17 = vsel %vm1089_vm11, %v1088_v0, %v970_v37  ;;  %v1087_v10 = vsel %vm1072_vm0, %v1070_v31, %v921_v18  ;;  %vm24792_vm8 = vcmask 1040384   ;;  %v24795_v24 = vld [vmem:[#allocation20_spill] sm:$0xff] }
 0x202   :  { %v989_v23 = vsel %vm24792_vm8, %v270_v9, %v688_v25  ;;  %v325_v51 = vsel %vm24791_vm4, %v19049_v13, %v18669_v29  ;;  %v392_v34 = vsel %vm24607_vm2, %v19173_v19, %v19096_v46  ;;  %v276_v36 = vsel %vm71_vm3, %v261_v63, 0.0 }
 0x203   :  { %v454_v59 = vsel %vm81_vm7, %v19202_v12, %v24793_v53  ;;  %v694_v33 = vrot.slane %v341_v30, 7  ;;  %vm24794_vm8 = vcmp.ge.s32.totalorder %v18882_v27, 2  ;;  %v406_v29 = vsel %vm77_vm6, %v391_v54, 0.0  ;;  %v19394_v13 = vpop.permute.xlu1 %230  ;;  %v498_v37 = vpop.permute.xlu0 %497 }
 0x204   :  { %v340_v18 = vsel %vm24794_vm8, %v327_v14, 0.0  ;;  %v1006_v46 = vsel %vm1004_vm12, %v989_v23, %v736_v8  ;;  %v455_v62 = vsel %vm81_vm7, %v19237_v32, %v19202_v12  ;;  %v582_v1 = vsel %vm87_vm9, %v19288_v45, %v24795_v24  ;;  %vm24796_vm4 = vmmov %vm24794_vm8 }
 0x205   :  { %v262_v55 = vsel %vm24606_vm5, %v19394_v13, %v19127_v16  ;;  %v19411_v31 = vsel %vm24796_vm4, %v325_v51, 0.0  ;;  %v583_v25 = vsel %vm87_vm9, %v19326_v60, %v19288_v45  ;;  %vm24797_vm8 = vcmask 1040384  }
 0x206   :  { %v995_v12 = vsel %vm24797_vm8, %v276_v36, %v694_v33  ;;  %v275_v9 = vsel %vm71_vm3, %v262_v55, 0.0  ;;  %v405_v8 = vsel %vm77_vm6, %v392_v34, 0.0  ;;  %v470_v16 = vsel %vm81_vm7, %v454_v59, 0.0  ;;  %vm24799_vm4 = vmmov %vm24797_vm8  ;;  %v24803_v55 = vld [vmem:[#allocation25_spill] sm:$0xff] }
 0x207   :  { %v693_v0 = vrot.slane %v340_v18, 7  ;;  %v742_v30 = vrot.slane %v406_v29, 6  ;;  %v469_v14 = vsel %vm81_vm7, %v455_v62, 0.0  ;;  %v598_v54 = vsel %vm87_vm9, %v582_v1, 0.0  ;;  %v494_v45 = vpop.permute.xlu1 %493  ;;  %v418_v63 = vpop.permute.xlu0 %417  ;;  %v24800_v18 = vld [vmem:[#allocation17_spill] sm:$0xff] }
 0x208   :  { %v24798_v23 = vrot.slane %v18618_v21, 5  ;;  %v19434_v34 = vsel %vm1089_vm11, %v1087_v10, %v969_v61  ;;  %v19438_v36 = vsel %vm87_vm9, %v583_v25, 0.0  ;;  %vm24801_vm8 = vcmp.lt.s32.totalorder %v18882_v27, 126 }
 0x209   :  { %v1012_v59 = vsel %vm1004_vm12, %v995_v12, %v742_v30  ;;  %v994_v33 = vsel %vm24799_vm4, %v275_v9, %v693_v0  ;;  %v518_v29 = vsel %vm24801_vm8, %v494_v45, %v24800_v18  ;;  %v695_v21 = vrot.slane %v19411_v31, 7  ;;  %vm24802_vm1 = vmmov %vm24801_vm8 }
 0x20a   :  { %v19431_v51 = vsel %vm1021_vm13, %v1006_v46, %v24798_v23  ;;  %v741_v62 = vrot.slane %v405_v8, 6  ;;  %v818_v46 = vrot.slane %v470_v16, 4  ;;  %v534_v61 = vsel %vm24802_vm1, %v518_v29, 0.0  ;;  %vm24805_vm4 = vmmov %vm24802_vm1 }
 0x20b   :  { %v817_v10 = vrot.slane %v469_v14, 4  ;;  %v914_v1 = vrot.slane %v598_v54, 2  ;;  %v259_v25 = vsel %vm24606_vm5, %v237_v39, %v24803_v55  ;;  %v260_v12 = vsel %vm24606_vm5, %v235_v22, %v237_v39  ;;  %v19455_v23 = vpop.permute.xlu1 %491  ;;  %v482_v8 = vpop.permute.xlu0 %481  ;;  %vm24806_vm8 = vmmov %vm24802_vm1 }
 0x20c   :  { %v913_v9 = vrot.slane %v19438_v36, 2  ;;  %v1011_v0 = vsel %vm1004_vm12, %v994_v33, %v741_v62  ;;  %v866_v30 = vrot.slane %v534_v61, 3  ;;  %v24804_v16 = vrot.slane %v18690_v35, 5  ;;  %vm24807_vm5 = vmmov %vm24802_vm1 }
 0x20d   :  { %v460_v54 = vsel %vm81_vm7, %v418_v63, %v19047_v2  ;;  %v461_v22 = vsel %vm81_vm7, %v24769_v6, %v418_v63  ;;  %v519_v39 = vsel %vm24802_vm1, %v19455_v23, %v494_v45  ;;  %v525_v33 = vsel %vm24805_vm4, %v24774_v5, %v482_v8  ;;  %vm24809_vm4 = vmmov %vm24802_vm1 }
 0x20e   :  { %v1029_v14 = vsel %vm1021_vm13, %v1012_v59, %v24804_v16  ;;  %v19474_v35 = vsel %vm71_vm3, %v260_v12, 0.0  ;;  %v19478_v59 = vsel %vm71_vm3, %v259_v25, 0.0  ;;  %v516_v2 = vsel %vm24806_vm8, %v498_v37, %v18746_v50  ;;  %vm24811_vm8 = vmmov %vm24802_vm1 }
 0x20f   :  { %v524_v6 = vsel %vm24807_vm5, %v482_v8, %v18925_v42  ;;  %v24808_v45 = vrot.slane %v18701_v38, 5  ;;  %v517_v63 = vsel %vm24802_vm1, %v24800_v18, %v498_v37  ;;  %v533_v29 = vsel %vm24809_vm4, %v519_v39, 0.0  ;;  %vm24810_vm5 = vmmov %vm24802_vm1  ;;  %v622_v42 = vpop.permute.xlu1 %621  ;;  %v546_v55 = vpop.permute.xlu0 %545  ;;  %v24812_v18 = vld [vmem:[#allocation19_spill] sm:$0xff] }
 0x210   :  { %v1046_v62 = vsel %vm1038_vm14, %v1029_v14, %v818_v46  ;;  %v463_v50 = vsel %vm81_vm7, %v461_v22, 0.0  ;;  %v464_v61 = vsel %vm81_vm7, %v460_v54, 0.0  ;;  %v527_v38 = vsel %vm24810_vm5, %v525_v33, 0.0  ;;  %vm24813_vm4 = vmmov %vm24802_vm1 }
 0x211   :  { %v1028_v5 = vsel %vm1021_vm13, %v1011_v0, %v24808_v45  ;;  %v1063_v25 = vsel %vm1055_vm15, %v1046_v62, %v866_v30  ;;  %v528_v37 = vsel %vm24811_vm8, %v524_v6, 0.0  ;;  %v646_v46 = vsel %vm90_vm10, %v622_v42, %v24812_v18 }
 0x212   :  { %v588_v12 = vsel %vm87_vm9, %v546_v55, %v19171_v57  ;;  %v589_v0 = vsel %vm87_vm9, %v24778_v47, %v546_v55  ;;  %v19515_v8 = vsel %vm24802_vm1, %v517_v63, 0.0  ;;  %v865_v30 = vrot.slane %v533_v29, 3 }
 0x213   :  { %v662_v16 = vsel %vm90_vm10, %v646_v46, 0.0  ;;  %v1045_v14 = vsel %vm1038_vm14, %v1028_v5, %v817_v10  ;;  %v811_v54 = vrot.slane %v463_v50, 4  ;;  %v812_v22 = vrot.slane %v464_v61, 4  ;;  %v19525_v63 = vpop.permute.xlu1 %619  ;;  %v610_v29 = vpop.permute.xlu0 %609 }
 0x214   :  { %v962_v39 = vrot.slane %v662_v16, 1  ;;  %v1080_v33 = vsel %vm1072_vm0, %v1063_v25, %v914_v1  ;;  %v859_v57 = vrot.slane %v527_v38, 3  ;;  %v860_v6 = vrot.slane %v528_v37, 3 }
 0x215   :  { %v591_v47 = vsel %vm87_vm9, %v589_v0, 0.0  ;;  %v592_v45 = vsel %vm87_vm9, %v588_v12, 0.0  ;;  %v647_v10 = vsel %vm90_vm10, %v19525_v63, %v622_v42  ;;  %v652_v5 = vsel %vm90_vm10, %v610_v29, %v19025_v3 }
 0x216   :  { %v653_v1 = vsel %vm90_vm10, %v24781_v28, %v610_v29  ;;  %v1097_v62 = vsel %vm1089_vm11, %v1080_v33, %v962_v39  ;;  %v661_v50 = vsel %vm90_vm10, %v647_v10, 0.0  ;;  %v656_v38 = vsel %vm90_vm10, %v652_v5, 0.0  ;;  %v24814_v33 = vld [vmem:[#allocation22_spill] sm:$0xff] }
 0x217   :  { %v655_v61 = vsel %vm90_vm10, %v653_v1, 0.0  ;;  %1388 = vmatprep.subr.mxu0 %v1097_v62  ;;  %v1062_v42 = vsel %vm1055_vm15, %v1045_v14, %v865_v30  ;;  %v19546_v3 = vsel %vm24813_vm4, %v516_v2, 0.0  ;;  %v907_v55 = vrot.slane %v591_v47, 2  ;;  %v367_v12 = vpop.permute.xlu1 %366  ;;  %v294_v0 = vpop.permute.xlu0 %293 }
 0x218   :  { %v908_v28 = vrot.slane %v592_v45, 2  ;;  %v1040_v25 = vsel %vm1038_vm14, %v19431_v51, %v812_v22  ;;  %v961_v37 = vrot.slane %v661_v50, 1  ;;  %v955_v46 = vrot.slane %v655_v61, 1 }
 0x219   :  { %v956_v16 = vrot.slane %v656_v38, 1  ;;  %v1039_v39 = vsel %vm1038_vm14, %v19369_v48, %v811_v54  ;;  %v389_v30 = vsel %vm24607_vm2, %v367_v12, %v24814_v33  ;;  %v390_v2 = vsel %vm24607_vm2, %v19322_v20, %v367_v12 }
 0x21a   :  { %v1057_v14 = vsel %vm1055_vm15, %v1040_v25, %v860_v6  ;;  %v1079_v51 = vsel %vm1072_vm0, %v1062_v42, %v913_v9  ;;  %v407_v22 = vsel %vm77_vm6, %v390_v2, 0.0  ;;  %v408_v48 = vsel %vm77_vm6, %v389_v30, 0.0 }
 0x21b   :  { %vm24815_vm5 = vcmp.lt.s32.totalorder %v18882_v27, 2  ;;  %v1056_v47 = vsel %vm1055_vm15, %v1039_v39, %v859_v57  ;;  %v743_v45 = vrot.slane %v407_v22, 6  ;;  %v1074_v36 = vsel %vm1072_vm0, %v1057_v14, %v908_v28  ;;  %v434_v1 = vpop.permute.xlu1 %433 }
 0x21c   :  { %v329_v54 = vsel %vm24815_vm5, %v18896_v26, %v294_v0  ;;  %vm24816_vm8 = vmmov %vm24815_vm5  ;;  %v1073_v9 = vsel %vm1072_vm0, %v1056_v47, %v907_v55  ;;  %v744_v6 = vrot.slane %v408_v48, 6  ;;  %v1091_v29 = vsel %vm1089_vm11, %v1074_v36, %v956_v16  ;;  %v359_v26 = vpop.permute.xlu0 %358  ;;  %v24824_v16 = vld [vmem:[#allocation15_spill] sm:$0xff]  ;;  %v24831_v36 = vld [vmem:[#allocation48_spill] sm:$0xff] }
 0x21d   :  { %v328_v20 = vsel %vm24816_vm8, %v294_v0, %v19284_v4  ;;  %v1096_v10 = vsel %vm1089_vm11, %v1079_v51, %v961_v37  ;;  %v1090_v5 = vsel %vm1089_vm11, %v1073_v9, %v955_v46  ;;  %vm24817_vm1 = vcmask 1040384   ;;  %1157 = vmatprep.subr.mxu1 %v1091_v29  ;;  %v24833_v29 = vld [vmem:[#allocation51_spill] sm:$0xff] }
 0x21e   :  { %v996_v57 = vsel %vm24817_vm1, %v19474_v35, %v695_v21  ;;  %v24818_v4 = vrot.slane %v19017_v15, 7  ;;  %vm24819_vm4 = vmmov %vm24817_vm1  ;;  %vm24820_vm5 = vcmp.ge.s32.totalorder %v18882_v27, 2  ;;  %1389 = vmatpush1.msra.mxu0 %v1096_v10  ;;  %v452_v61 = vsel %vm81_vm7, %v434_v1, %v18715_v41  ;;  %1158 = vmatpush1.msra.mxu1 %v1090_v5 }
 0x21f   :  { %v338_v50 = vsel %vm24820_vm5, %v329_v54, 0.0  ;;  %v867_v38 = vrot.slane %v19515_v8, 3  ;;  %v868_v31 = vrot.slane %v19546_v3, 3  ;;  %vm24821_vm8 = vcmask 64512   ;;  %vm24822_vm1 = vmmov %vm24820_vm5  ;;  %1542 = vmatprep.subr.mxu0 %v19108_v11  ;;  %v562_v28 = vpop.permute.xlu1 %561  ;;  %v24845_v3 = vld [vmem:[#allocation32_spill] sm:$0xff] }
 0x220   :  { %v997_v62 = vsel %vm24819_vm4, %v19478_v59, %v24818_v4  ;;  %17562 = vmatmul.mubr.msk.f32.vlgmr.msra.gmra.mxu0 %vm24821_vm8, %v19255_v40  ;;  %v453_v15 = vsel %vm81_vm7, %v24793_v53, %v434_v1  ;;  %v393_v21 = vsel %vm24607_vm2, %v359_v26, %v19173_v19  ;;  %v1013_v35 = vsel %vm1004_vm12, %v996_v57, %v743_v45  ;;  %vm24823_vm4 = vmmov %vm24821_vm8  ;;  %v426_v25 = vpop.permute.xlu0 %425 }
 0x221   :  { %v339_v41 = vsel %vm24822_vm1, %v328_v20, 0.0  ;;  %v471_v59 = vsel %vm81_vm7, %v453_v15, 0.0  ;;  %v394_v42 = vsel %vm24607_vm2, %v18858_v44, %v359_v26  ;;  %17556 = vmatmul.mubr.msk.f32.vlgmr.msra.gmra.mxu1 %vm24823_vm4, %v19255_v40  ;;  %v1014_v53 = vsel %vm1004_vm12, %v997_v62, %v744_v6  ;;  %1543 = vmatpush1.msra.mxu0 %v19114_v58  ;;  %vm24825_vm5 = vmmov %vm24823_vm4 }
 0x222   :  { %v691_v19 = vrot.slane %v338_v50, 7  ;;  %v472_v55 = vsel %vm81_vm7, %v452_v61, 0.0  ;;  %v404_v11 = vsel %vm77_vm6, %v393_v21, 0.0  ;;  %1428 = vmatprep.mubr.f32.mxu0 %v24783_v7  ;;  %v403_v44 = vsel %vm77_vm6, %v394_v42, 0.0  ;;  %1696 = vmatprep.subr.mxu0 %v19372_v17  ;;  %v24826_v17 = vld [vmem:[#allocation50_spill] sm:$0xff]  ;;  %vm24827_vm8 = vmmov %vm24823_vm4  ;;  %v24837_v42 = vld [vmem:[#allocation52_spill] sm:$0xff] }
 0x223   :  { %1197 = vmatprep.mubr.f32.mxu1 %v24783_v7  ;;  %v580_v37 = vsel %vm87_vm9, %v562_v28, %v18744_v49  ;;  %v581_v58 = vsel %vm87_vm9, %v24795_v24, %v562_v28  ;;  %v456_v46 = vsel %vm81_vm7, %v426_v25, %v19237_v32  ;;  %v692_v12 = vrot.slane %v339_v41, 7  ;;  %v24828_v32 = vld [vmem:[#allocation12_spill] sm:$0xff]  ;;  %v229_v47 = vpop.permute.xlu1 %228 }
 0x224   :  { %v819_v0 = vrot.slane %v471_v59, 4  ;;  %v1030_v39 = vsel %vm1021_vm13, %v1013_v35, %v24824_v16  ;;  %17563 = vmatmul.mubr.msk.f32.gmra.mxu0 %vm24825_vm5, %v19298_v52  ;;  %v457_v49 = vsel %vm81_vm7, %v24826_v17, %v426_v25  ;;  %v820_v33 = vrot.slane %v472_v55, 4  ;;  %v554_v45 = vpop.permute.xlu0 %553 }
 0x225   :  { %v740_v30 = vrot.slane %v404_v11, 6  ;;  %v599_v24 = vsel %vm87_vm9, %v581_v58, 0.0  ;;  %17557 = vmatmul.mubr.msk.f32.gmra.mxu1 %vm24827_vm8, %v19298_v52  ;;  %1576 = vmatprep.mubr.f32.mxu0 %v24783_v7  ;;  %v24829_v2 = vrot.slane %v24828_v32, 5  ;;  %v739_v51 = vrot.slane %v403_v44, 6  ;;  %v24847_v32 = vld [vmem:[#allocation23_spill] sm:$0xff] }
 0x226   :  { %v19649_v22 = vsel %vm87_vm9, %v580_v37, 0.0  ;;  %v19653_v48 = vsel %vm81_vm7, %v457_v49, 0.0  ;;  %v19657_v54 = vsel %vm81_vm7, %v456_v46, 0.0  ;;  %1345 = vmatprep.mubr.f32.mxu1 %v24783_v7  ;;  %vm24830_vm1 = vcmp.lt.s32.totalorder %v18882_v27, 3 }
 0x227   :  { %v1031_v14 = vsel %vm1021_vm13, %v1014_v53, %v24829_v2  ;;  %v263_v20 = vsel %vm24830_vm1, %v229_v47, %v19394_v13  ;;  %vm24832_vm4 = vmmov %vm24830_vm1  ;;  %v584_v6 = vsel %vm87_vm9, %v554_v45, %v19326_v60  ;;  %v585_v10 = vsel %vm87_vm9, %v24833_v29, %v554_v45  ;;  %v490_v21 = vpop.permute.xlu1 %489 }
 0x228   :  { %v264_v9 = vsel %vm24832_vm4, %v24831_v36, %v229_v47  ;;  %v1047_v5 = vsel %vm1038_vm14, %v1030_v39, %v819_v0  ;;  %v915_v1 = vrot.slane %v599_v24, 2  ;;  %17566 = vmatmul.mubr.msk.f32.vlgmr.msra.gmra.mxu0 %vm24825_vm5, %v19255_v40  ;;  %v274_v26 = vsel %vm71_vm3, %v263_v20, 0.0  ;;  %v626_v35 = vpop.permute.xlu0 %625 }
 0x229   :  { %v273_v13 = vsel %vm71_vm3, %v264_v9, 0.0  ;;  %v916_v57 = vrot.slane %v19649_v22, 2  ;;  %v815_v60 = vrot.slane %v19653_v48, 4  ;;  %1697 = vmatpush1.msra.mxu0 %v19434_v34  ;;  %vm24834_vm8 = vcmask 1040384   ;;  %1582 = vmatprep.mubr.f32.mxu0 %v24783_v7 }
 0x22a   :  { %v992_v4 = vsel %vm24834_vm8, %v273_v13, %v691_v19  ;;  %v19685_v62 = vsel %vm87_vm9, %v585_v10, 0.0  ;;  %v816_v50 = vrot.slane %v19657_v54, 4  ;;  %vm24835_vm1 = vmmov %vm24834_vm8  ;;  %v19692_v15 = vsel %vm87_vm9, %v584_v6, 0.0  ;;  %v24839_v19 = vld [vmem:[#allocation30_spill] sm:$0xff]  ;;  %v24850_v13 = vld [vmem:[#allocation33_spill] sm:$0xff] }
 0x22b   :  { %v993_v61 = vsel %vm24835_vm1, %v274_v26, %v692_v12  ;;  %v1048_v34 = vsel %vm1038_vm14, %v1031_v14, %v820_v33  ;;  %v1009_v41 = vsel %vm1004_vm12, %v992_v4, %v739_v51  ;;  %vm24836_vm4 = vcmp.lt.s32.totalorder %v18882_v27, 126  ;;  %v24843_v12 = vld [vmem:[#allocation16_spill] sm:$0xff]  ;;  %v618_v17 = vpop.permute.xlu1 %617  ;;  %v24852_v4 = vld [vmem:[#allocation21_spill] sm:$0xff] }
 0x22c   :  { %v520_v59 = vsel %vm24836_vm4, %v490_v21, %v19455_v23  ;;  %vm24838_vm5 = vmmov %vm24836_vm4  ;;  %v644_v55 = vsel %vm90_vm10, %v626_v35, %v24839_v19  ;;  %v911_v11 = vrot.slane %v19685_v62, 2  ;;  %vm24840_vm8 = vcmask 64512   ;;  %v375_v49 = vpop.permute.xlu0 %374 }
 0x22d   :  { %v521_v53 = vsel %vm24838_vm5, %v24837_v42, %v490_v21  ;;  %17567 = vmatmul.mubr.msk.f32.gmra.mxu0 %vm24840_vm8, %v19298_v52  ;;  %vm24841_vm1 = vmmov %vm24836_vm4  ;;  %v645_v23 = vsel %vm90_vm10, %v24812_v18, %v626_v35  ;;  %v1064_v25 = vsel %vm1055_vm15, %v1047_v5, %v867_v38  ;;  %v1010_v44 = vsel %vm1004_vm12, %v993_v61, %v740_v30  ;;  %v24846_v30 = vld [vmem:[#allocation34_spill] sm:$0xff] }
 0x22e   :  { %v531_v28 = vsel %vm24841_vm1, %v521_v53, 0.0  ;;  %v912_v37 = vrot.slane %v19692_v15, 2  ;;  %vm24842_vm4 = vmmov %vm24841_vm1  ;;  %1730 = vmatprep.mubr.f32.mxu0 %v24783_v7  ;;  %v1065_v46 = vsel %vm1055_vm15, %v1048_v34, %v868_v31  ;;  %v24844_v0 = vrot.slane %v24843_v12, 5  ;;  %v24858_v34 = vld [vmem:[#allocation27_spill] sm:$0xff] }
 0x22f   :  { %v532_v58 = vsel %vm24842_vm4, %v520_v59, 0.0  ;;  %v863_v8 = vrot.slane %v531_v28, 3  ;;  %v663_v38 = vsel %vm90_vm10, %v645_v23, 0.0  ;;  %v664_v39 = vsel %vm90_vm10, %v644_v55, 0.0  ;;  %vm24848_vm5 = vmmov %vm24840_vm8  ;;  %v310_v36 = vpop.permute.xlu1 %309 }
 0x230   :  { %v1026_v18 = vsel %vm1021_vm13, %v1009_v41, %v24844_v0  ;;  %v648_v33 = vsel %vm90_vm10, %v618_v17, %v19525_v63  ;;  %v649_v31 = vsel %vm90_vm10, %v24845_v3, %v618_v17  ;;  %v385_v24 = vsel %vm24607_vm2, %v375_v49, %v24846_v30  ;;  %v442_v9 = vpop.permute.xlu0 %441  ;;  %vm24854_vm4 = vmmov %vm24848_vm5 }
 0x231   :  { %v386_v2 = vsel %vm24607_vm2, %v24847_v32, %v375_v49  ;;  %v864_v14 = vrot.slane %v532_v58, 3  ;;  %17570 = vmatmul.mubr.msk.f32.vlgmr.msra.gmra.mxu0 %vm24848_vm5, %v19255_v40  ;;  %v659_v51 = vsel %vm90_vm10, %v649_v31, 0.0  ;;  %v660_v63 = vsel %vm90_vm10, %v648_v33, 0.0  ;;  %v24859_v58 = vld [vmem:[#allocation35_spill] sm:$0xff]  ;;  %v24865_v31 = vld [vmem:[#allocation46_spill] sm:$0xff] }
 0x232   :  { %v1081_v22 = vsel %vm1072_vm0, %v1064_v25, %v915_v1  ;;  %v963_v48 = vrot.slane %v663_v38, 1  ;;  %v964_v54 = vrot.slane %v664_v39, 1  ;;  %v411_v47 = vsel %vm77_vm6, %v386_v2, 0.0  ;;  %1736 = vmatprep.mubr.f32.mxu0 %v24783_v7 }
 0x233   :  { %v412_v45 = vsel %vm77_vm6, %v385_v24, 0.0  ;;  %v959_v20 = vrot.slane %v659_v51, 1  ;;  %v24849_v6 = vrot.slane %v18720_v43, 5  ;;  %v1043_v10 = vsel %vm1038_vm14, %v1026_v18, %v815_v60  ;;  %v24857_v60 = vld [vmem:[#allocation39_spill] sm:$0xff]  ;;  %v245_v23 = vpop.permute.xlu1 %244  ;;  %v24866_v24 = vld [vmem:[#allocation29_spill] sm:$0xff] }
 0x234   :  { %v1082_v5 = vsel %vm1072_vm0, %v1065_v46, %v916_v57  ;;  %v960_v1 = vrot.slane %v660_v63, 1  ;;  %vm24851_vm8 = vcmp.lt.s32.totalorder %v18882_v27, 2  ;;  %v1060_v61 = vsel %vm1055_vm15, %v1043_v10, %v863_v8  ;;  %v570_v0 = vpop.permute.xlu0 %569  ;;  %v24867_v51 = vld [vmem:[#allocation13_spill] sm:$0xff] }
 0x235   :  { %v1027_v29 = vsel %vm1021_vm13, %v1010_v44, %v24849_v6  ;;  %v320_v26 = vsel %vm24851_vm8, %v310_v36, %v24850_v13  ;;  %vm24853_vm1 = vmmov %vm24851_vm8  ;;  %v747_v15 = vrot.slane %v411_v47, 6  ;;  %v748_v21 = vrot.slane %v412_v45, 6  ;;  %17571 = vmatmul.mubr.msk.f32.gmra.mxu0 %vm24854_vm4, %v19298_v52  ;;  %v24872_v47 = vld [vmem:[#allocation26_spill] sm:$0xff] }
 0x236   :  { %v321_v62 = vsel %vm24853_vm1, %v24852_v4, %v310_v36  ;;  %vm24855_vm5 = vcmp.ge.s32.totalorder %v18882_v27, 2  ;;  %v448_v35 = vsel %vm81_vm7, %v442_v9, %v24857_v60  ;;  %v449_v41 = vsel %vm81_vm7, %v24858_v34, %v442_v9  ;;  %2163 = vmatprep.mubr.f32.mxu0 %v24783_v7 }
 0x237   :  { %v346_v43 = vsel %vm24855_vm5, %v321_v62, 0.0  ;;  %vm24856_vm2 = vmmov %vm24855_vm5  ;;  %v1044_v59 = vsel %vm1038_vm14, %v1027_v29, %v816_v50  ;;  %v1099_v42 = vsel %vm1089_vm11, %v1082_v5, %v964_v54  ;;  %v1077_v28 = vsel %vm1072_vm0, %v1060_v61, %v911_v11  ;;  %v24861_v50 = vld [vmem:[#allocation24_spill] sm:$0xff]  ;;  %v506_v2 = vpop.permute.xlu1 %505 }
 0x238   :  { %v347_v57 = vsel %vm24856_vm2, %v320_v26, 0.0  ;;  %v699_v53 = vrot.slane %v346_v43, 7  ;;  %v1061_v55 = vsel %vm1055_vm15, %v1044_v59, %v864_v14  ;;  %v1094_v44 = vsel %vm1089_vm11, %v1077_v28, %v959_v20  ;;  %v24878_v61 = vld [vmem:[#allocation28_spill] sm:$0xff] }
 0x239   :  { %v700_v19 = vrot.slane %v347_v57, 7  ;;  %v1078_v25 = vsel %vm1072_vm0, %v1061_v55, %v912_v37  ;;  %vm24860_vm2 = vcmp.lt.s32.totalorder %v18882_v27, 3  ;;  %v475_v18 = vsel %vm81_vm7, %v449_v41, 0.0 }
 0x23a   :  { %v255_v46 = vsel %vm24860_vm2, %v245_v23, %v24859_v58  ;;  %vm24862_vm8 = vmmov %vm24860_vm2  ;;  %v1095_v8 = vsel %vm1089_vm11, %v1078_v25, %v960_v1  ;;  %v476_v38 = vsel %vm81_vm7, %v448_v35, 0.0  ;;  %vm24863_vm1 = vcmask 1040384  }
 0x23b   :  { %v256_v12 = vsel %vm24862_vm8, %v24861_v50, %v245_v23  ;;  %v282_v37 = vsel %vm71_vm3, %v255_v46, 0.0  ;;  %1311 = vmatprep.subr.mxu1 %v1095_v8  ;;  %vm24864_vm4 = vmmov %vm24863_vm1  ;;  %v1098_v49 = vsel %vm1089_vm11, %v1081_v22, %v963_v48  ;;  %v576_v30 = vsel %vm87_vm9, %v570_v0, %v24865_v31  ;;  %v24870_v22 = vld [vmem:[#allocation43_spill] sm:$0xff]  ;;  %v634_v26 = vpop.permute.xlu1 %633 }
 0x23c   :  { %v281_v11 = vsel %vm71_vm3, %v256_v12, 0.0  ;;  %v1001_v17 = vsel %vm24864_vm4, %v282_v37, %v700_v19  ;;  %1312 = vmatpush1.msra.mxu1 %v1094_v44  ;;  %v577_v32 = vsel %vm87_vm9, %v24866_v24, %v570_v0  ;;  %v823_v14 = vrot.slane %v475_v18, 4 }
 0x23d   :  { %v1000_v39 = vsel %vm24863_vm1, %v281_v11, %v699_v53  ;;  %v1018_v3 = vsel %vm1004_vm12, %v1001_v17, %v748_v21  ;;  %v24868_v63 = vrot.slane %v24867_v51, 5  ;;  %vm24869_vm5 = vcmask 64512   ;;  %1465 = vmatprep.subr.mxu1 %v1099_v42 }
 0x23e   :  { %v1017_v33 = vsel %vm1004_vm12, %v1000_v39, %v747_v15  ;;  %17560 = vmatmul.mubr.msk.f32.vlgmr.msra.gmra.mxu1 %vm24869_vm5, %v19255_v40  ;;  %vm24871_vm12 = vcmp.lt.s32.totalorder %v18882_v27, 126  ;;  %v824_v20 = vrot.slane %v476_v38, 4  ;;  %v24876_v6 = vrot.slane %v24824_v16, 5  ;;  %vm24877_vm4 = vmmov %vm24869_vm5 }
 0x23f   :  { %v1034_v54 = vsel %vm1021_vm13, %v1017_v33, %v24868_v63  ;;  %v512_v48 = vsel %vm24871_vm12, %v506_v2, %v24870_v22  ;;  %vm24873_vm2 = vmmov %vm24871_vm12  ;;  %1466 = vmatpush1.msra.mxu1 %v1098_v49  ;;  %1351 = vmatprep.mubr.f32.mxu1 %v24783_v7  ;;  %v603_v10 = vsel %vm87_vm9, %v577_v32, 0.0  ;;  %v604_v5 = vsel %vm87_vm9, %v576_v30, 0.0 }
 0x240   :  { %v513_v45 = vsel %vm24873_vm2, %v24872_v47, %v506_v2  ;;  %vm24874_vm8 = vmmov %vm24873_vm2  ;;  %v1035_v29 = vsel %vm1021_vm13, %v1018_v3, %v24876_v6  ;;  %v1051_v62 = vsel %vm1038_vm14, %v1034_v54, %v823_v14  ;;  %v640_v16 = vsel %vm90_vm10, %v634_v26, %v24788_v56  ;;  %v19900_v12 = vpop.permute.xlu0 %1117 }
 0x241   :  { %v539_v36 = vsel %vm24874_vm8, %v513_v45, 0.0  ;;  %vm24875_vm1 = vmmov %vm24873_vm2  ;;  %v1052_v4 = vsel %vm1038_vm14, %v1035_v29, %v824_v20  ;;  %v641_v15 = vsel %vm90_vm10, %v24878_v61, %v634_v26  ;;  %v919_v57 = vrot.slane %v603_v10, 2 }
 0x242   :  { %v540_v9 = vsel %vm24875_vm1, %v512_v48, 0.0  ;;  %v871_v1 = vrot.slane %v539_v36, 3  ;;  %17561 = vmatmul.mubr.msk.f32.gmra.mxu1 %vm24877_vm4, %v19298_v52  ;;  %v920_v60 = vrot.slane %v604_v5, 2  ;;  %v667_v35 = vsel %vm90_vm10, %v641_v15, 0.0  ;;  %vm24879_vm13 = vmmov %vm24877_vm4 }
 0x243   :  { %v872_v13 = vrot.slane %v540_v9, 3  ;;  %1499 = vmatprep.mubr.f32.mxu1 %v24783_v7  ;;  %v668_v34 = vsel %vm90_vm10, %v640_v16, 0.0  ;;  %v967_v41 = vrot.slane %v667_v35, 1  ;;  %vm24880_vm14 = vmmov %vm24877_vm4  ;;  %vm24907_vm12 = vcmp.lt.s32.totalorder %v18882_v27, 2 }
 0x244   :  { %v1068_v43 = vsel %vm1055_vm15, %v1051_v62, %v871_v1  ;;  %v968_v56 = vrot.slane %v668_v34, 1  ;;  %vm24909_vm2 = vmmov %vm24907_vm12 }
 0x245   :  { %v1069_v21 = vsel %vm1055_vm15, %v1052_v4, %v872_v13  ;;  %v1085_v42 = vsel %vm1072_vm0, %v1068_v43, %v919_v57  ;;  %vm24881_vm15 = vmmov %vm24877_vm4 }
 0x246   :  { %v1086_v59 = vsel %vm1072_vm0, %v1069_v21, %v920_v60  ;;  %17564 = vmatmul.mubr.msk.f32.vlgmr.msra.gmra.mxu1 %vm24879_vm13, %v19255_v40  ;;  %v1102_v19 = vsel %vm1089_vm11, %v1085_v42, %v967_v41  ;;  %vm24882_vm0 = vmmov %vm24877_vm4  ;;  %vm24916_vm13 = vcmask 130048  }
 0x247   :  { %v1103_v53 = vsel %vm1089_vm11, %v1086_v59, %v968_v56  ;;  %1505 = vmatprep.mubr.f32.mxu1 %v24783_v7  ;;  %vm24900_vm11 = vcmp.ge.s32.totalorder %v18882_v27, 2  ;;  %vm24910_vm8 = vmmov %vm24909_vm2 }
 0x248   :  { %1619 = vmatprep.subr.mxu1 %v1103_v53  ;;  %v19868_v55 = vpop.permute.xlu1 %1112  ;;  %vm24912_vm1 = vmmov %vm24909_vm2 }
 0x249   :  { %1620 = vmatpush1.msra.mxu1 %v1102_v19  ;;  %vm24913_vm4 = vmmov %vm24912_vm1 }
 0x24a   :  { %17565 = vmatmul.mubr.msk.f32.gmra.mxu1 %vm24880_vm14, %v19298_v52  ;;  %vm24917_vm14 = vmmov %vm24916_vm13 }
 0x24b   :  { %1653 = vmatprep.mubr.f32.mxu1 %v24783_v7 }
 0x24e   :  { %17568 = vmatmul.mubr.msk.f32.vlgmr.msra.gmra.mxu1 %vm24881_vm15, %v19255_v40  ;;  %vm24931_vm15 = vmmov %vm24912_vm1 }
 0x24f   :  { %1659 = vmatprep.mubr.f32.mxu1 %v24783_v7 }
 0x252   :  { %17569 = vmatmul.mubr.msk.f32.gmra.mxu1 %vm24882_vm0, %v19298_v52  ;;  %vm24932_vm0 = vmmov %vm24912_vm1 }
 0x253   :  { %2086 = vmatprep.mubr.f32.mxu1 %v24783_v7 }
 0x2b7   :  { %v1270_v28 = vpop.f32.mrf.mxu0 }
 0x2b8   :  { %v19871_v23 = vadd.f32 %v1270_v28, %v19868_v55 }
 0x2b9   :  { %v1272_v58 = vpop.f32.mrf.mxu0 }
 0x2ba   :  { %1890 = vrot.lane.b32.xlu0 %v19871_v23, %s18402_s24  ;;  %v19898_v50 = vadd.f32 %v1272_v58, %v19868_v55 }
 0x2bb   :  { %v1276_v18 = vpop.f32.mrf.mxu0 }
 0x2bc   :  { %v19910_v8 = vadd.f32 %v1276_v18, %v19900_v12 }
 0x2bd   :  { %v1278_v38 = vpop.f32.mrf.mxu0 }
 0x2be   :  { %1753 = vrot.lane.b32.xlu0 %v19871_v23, %s18403_s25  ;;  %v19934_v39 = vadd.f32 %v1278_v38, %v19900_v12  ;;  %v24899_v38 = vmov 0  }
 0x2c2   :  { %3271 = vrot.lane.b32.xlu0 %v19871_v23, %s18396_s29 }
 0x2e0   :  { %v1424_v33 = vpop.f32.mrf.mxu0 }
 0x2e1   :  { %v1193_v40 = vpop.f32.mrf.mxu1  ;;  %v19954_v3 = vadd.f32 %v1424_v33, %v19868_v55 }
 0x2e2   :  { %v19880_v52 = vadd.f32 %v1193_v40, %v19868_v55  ;;  %v1426_v24 = vpop.f32.mrf.mxu0  ;;  %v24894_v40 = vlaneseq }
 0x2e3   :  { %v1195_v25 = vpop.f32.mrf.mxu1  ;;  %v19970_v32 = vadd.f32 %v1426_v24, %v19868_v55 }
 0x2e4   :  { %v19883_v44 = vadd.f32 %v1195_v25, %v19868_v55  ;;  %1882 = vrot.lane.b32.xlu1 %v19880_v52, %s18402_s24  ;;  %v1430_v51 = vpop.f32.mrf.mxu0  ;;  %v20109_v25 = vshrl.u32 %v24894_v40, 7 }
 0x2e5   :  { %v1199_v46 = vpop.f32.mrf.mxu1  ;;  %24883 = vst [vmem:[#allocation36_spill] sm:$0xff] %v19970_v32  ;;  %v19990_v63 = vadd.f32 %v1430_v51, %v19900_v12 }
 0x2e6   :  { %1886 = vrot.lane.b32.xlu0 %v19883_v44, %s18402_s24  ;;  %v19903_v0 = vadd.f32 %v1199_v46, %v19900_v12  ;;  %v1432_v48 = vpop.f32.mrf.mxu0  ;;  %24895 = vst [vmem:[#allocation49_spill] sm:$0xff] %v20109_v25  ;;  %v20120_v18 = vsub.s32 0, %v20109_v25  ;;  %v20187_v25 = vld [vmem:[#allocation3 + $0x10] sm:$0xff] }
 0x2e7   :  { %v1201_v11 = vpop.f32.mrf.mxu1  ;;  %v20006_v47 = vadd.f32 %v1432_v48, %v19900_v12 }
 0x2e8   :  { %1745 = vrot.lane.b32.xlu1 %v19880_v52, %s18403_s25  ;;  %v19927_v37 = vadd.f32 %v1201_v11, %v19900_v12  ;;  %v1578_v36 = vpop.f32.mrf.mxu0  ;;  %24898 = vst [vmem:[#allocation17_spill] sm:$0xff] %v20120_v18 }
 0x2e9   :  { %v20026_v9 = vadd.f32 %v1578_v36, %v19868_v55 }
 0x2ea   :  { %1749 = vrot.lane.b32.xlu0 %v19883_v44, %s18403_s25  ;;  %v1580_v5 = vpop.f32.mrf.mxu0 }
 0x2eb   :  { %v20046_v13 = vadd.f32 %v1580_v5, %v19868_v55 }
 0x2ec   :  { %3263 = vrot.lane.b32.xlu1 %v19880_v52, %s18396_s29 }
 0x2ed   :  { %v1584_v15 = vpop.f32.mrf.mxu0 }
 0x2ee   :  { %3267 = vrot.lane.b32.xlu0 %v19883_v44, %s18396_s29  ;;  %v20074_v43 = vadd.f32 %v1584_v15, %v19900_v12 }
 0x2ef   :  { %v1586_v59 = vpop.f32.mrf.mxu0 }
 0x2f0   :  { %1894 = vrot.lane.b32.xlu1 %v19898_v50, %s18402_s24  ;;  %v20100_v53 = vadd.f32 %v1586_v59, %v19900_v12 }
 0x2f2   :  { %1884 = vrot.lane.b32.xlu0 %v19903_v0, %s18402_s24  ;;  %24892 = vst [vmem:[#allocation47_spill] sm:$0xff] %v20100_v53 }
 0x2f4   :  { %1757 = vrot.lane.b32.xlu1 %v19898_v50, %s18403_s25 }
 0x2f6   :  { %1892 = vrot.lane.b32.xlu0 %v19910_v8, %s18402_s24 }
 0x2f8   :  { %3275 = vrot.lane.b32.xlu1 %v19898_v50, %s18396_s29 }
 0x2fa   :  { %1747 = vrot.lane.b32.xlu0 %v19903_v0, %s18403_s25 }
 0x2fc   :  { %4715 = vrot.lane.b32.xlu1 %v19883_v44, %s18399_s1 }
 0x2fe   :  { %1755 = vrot.lane.b32.xlu0 %v19910_v8, %s18403_s25  ;;  %v1347_v17 = vpop.f32.mrf.mxu1 }
 0x2ff   :  { %v19947_v49 = vadd.f32 %v1347_v17, %v19868_v55  ;;  %v1978_v17 = vsel %vm24900_vm11, 1, %v24899_v38  ;;  %vm24934_vm11 = vmmov %vm24932_vm0 }
 0x300   :  { %4721 = vrot.lane.b32.xlu1 %v19910_v8, %s18399_s1  ;;  %v1349_v31 = vpop.f32.mrf.mxu1 }
 0x301   :  { %v19963_v30 = vadd.f32 %v1349_v31, %v19868_v55 }
 0x302   :  { %3265 = vrot.lane.b32.xlu0 %v19903_v0, %s18396_s29  ;;  %v1353_v2 = vpop.f32.mrf.mxu1 }
 0x303   :  { %v19983_v14 = vadd.f32 %v1353_v2, %v19900_v12  ;;  %v1982_v2 = vrot.slane %v1978_v17, %v20120_v18 }
 0x304   :  { %1888 = vrot.lane.b32.xlu1 %v19927_v37, %s18402_s24  ;;  %v1355_v54 = vpop.f32.mrf.mxu1 }
 0x305   :  { %v19999_v22 = vadd.f32 %v1355_v54, %v19900_v12  ;;  %vm20145_vm5 = vcmp.eq.s32.totalorder %v1982_v2, 1 }
 0x306   :  { %3273 = vrot.lane.b32.xlu0 %v19910_v8, %s18396_s29  ;;  %v1501_v45 = vpop.f32.mrf.mxu1 }
 0x307   :  { %v20019_v20 = vadd.f32 %v1501_v45, %v19868_v55  ;;  %v1732_v45 = vpop.f32.mrf.mxu0 }
 0x308   :  { %1896 = vrot.lane.b32.xlu1 %v19934_v39, %s18402_s24  ;;  %v1503_v29 = vpop.f32.mrf.mxu1  ;;  %v20161_v59 = vadd.f32 %v1732_v45, %v19868_v55 }
 0x309   :  { %v20037_v10 = vadd.f32 %v1503_v29, %v19868_v55  ;;  %v1734_v15 = vpop.f32.mrf.mxu0 }
 0x30a   :  { %4713 = vrot.lane.b32.xlu0 %v19903_v0, %s18399_s1  ;;  %v1507_v4 = vpop.f32.mrf.mxu1 }
 0x30b   :  { %24884 = vst [vmem:[#allocation38_spill] sm:$0xff] %v20037_v10  ;;  %v20063_v16 = vadd.f32 %v1507_v4, %v19900_v12  ;;  %v1738_v45 = vpop.f32.mrf.mxu0 }
 0x30c   :  { %1751 = vrot.lane.b32.xlu1 %v19927_v37, %s18403_s25  ;;  %v1509_v35 = vpop.f32.mrf.mxu1 }
 0x30d   :  { %v20089_v41 = vadd.f32 %v1509_v35, %v19900_v12 }
 0x30e   :  { %4717 = vrot.lane.b32.xlu0 %v19927_v37, %s18399_s1  ;;  %v1655_v11 = vpop.f32.mrf.mxu1 }
 0x30f   :  { %24891 = vst [vmem:[#allocation44_spill] sm:$0xff] %v20089_v41  ;;  %v20130_v31 = vadd.f32 %v1655_v11, %v19868_v55 }
 0x310   :  { %1759 = vrot.lane.b32.xlu1 %v19934_v39, %s18403_s25  ;;  %v1657_v36 = vpop.f32.mrf.mxu1 }
 0x312   :  { %1898 = vrot.lane.b32.xlu0 %v19947_v49, %s18402_s24  ;;  %v1661_v35 = vpop.f32.mrf.mxu1 }
 0x313   :  { %v20171_v17 = vadd.f32 %v1661_v35, %v19900_v12 }
 0x314   :  { %3269 = vrot.lane.b32.xlu1 %v19927_v37, %s18396_s29 }
 0x316   :  { %1906 = vrot.lane.b32.xlu0 %v19954_v3, %s18402_s24 }
 0x318   :  { %3277 = vrot.lane.b32.xlu1 %v19934_v39, %s18396_s29 }
 0x31a   :  { %1761 = vrot.lane.b32.xlu0 %v19947_v49, %s18403_s25 }
 0x31c   :  { %1902 = vrot.lane.b32.xlu1 %v19963_v30, %s18402_s24 }
 0x31e   :  { %1769 = vrot.lane.b32.xlu0 %v19954_v3, %s18403_s25 }
 0x320   :  { %1910 = vrot.lane.b32.xlu1 %v19970_v32, %s18402_s24 }
 0x322   :  { %3279 = vrot.lane.b32.xlu0 %v19947_v49, %s18396_s29 }
 0x324   :  { %1765 = vrot.lane.b32.xlu1 %v19963_v30, %s18403_s25 }
 0x326   :  { %3287 = vrot.lane.b32.xlu0 %v19954_v3, %s18396_s29 }
 0x328   :  { %1773 = vrot.lane.b32.xlu1 %v19970_v32, %s18403_s25 }
 0x32a   :  { %1900 = vrot.lane.b32.xlu0 %v19983_v14, %s18402_s24 }
 0x32c   :  { %3283 = vrot.lane.b32.xlu1 %v19963_v30, %s18396_s29  ;;  %v20032_v6 = vpop.permute.xlu0 %1890 }
 0x32e   :  { %1908 = vrot.lane.b32.xlu0 %v19990_v63, %s18402_s24 }
 0x330   :  { %3291 = vrot.lane.b32.xlu1 %v19970_v32, %s18396_s29  ;;  %v20043_v1 = vpop.permute.xlu0 %1753 }
 0x331   :  { %24885 = vst [vmem:[#allocation37_spill] sm:$0xff] %v20043_v1 }
 0x332   :  { %1763 = vrot.lane.b32.xlu0 %v19983_v14, %s18403_s25 }
 0x334   :  { %1904 = vrot.lane.b32.xlu1 %v19999_v22, %s18402_s24  ;;  %v20054_v26 = vpop.permute.xlu0 %3271 }
 0x335   :  { %24886 = vst [vmem:[#allocation31_spill] sm:$0xff] %v20054_v26 }
 0x336   :  { %1771 = vrot.lane.b32.xlu0 %v19990_v63, %s18403_s25 }
 0x338   :  { %1912 = vrot.lane.b32.xlu1 %v20006_v47, %s18402_s24 }
 0x33a   :  { %3281 = vrot.lane.b32.xlu0 %v19983_v14, %s18396_s29 }
 0x33c   :  { %1767 = vrot.lane.b32.xlu1 %v19999_v22, %s18403_s25 }
 0x33e   :  { %3289 = vrot.lane.b32.xlu0 %v19990_v63, %s18396_s29 }
 0x340   :  { %1775 = vrot.lane.b32.xlu1 %v20006_v47, %s18403_s25 }
 0x342   :  { %1914 = vrot.lane.b32.xlu0 %v20019_v20, %s18402_s24 }
 0x344   :  { %3285 = vrot.lane.b32.xlu1 %v19999_v22, %s18396_s29 }
 0x346   :  { %1922 = vrot.lane.b32.xlu0 %v20026_v9, %s18402_s24 }
 0x348   :  { %3293 = vrot.lane.b32.xlu1 %v20006_v47, %s18396_s29 }
 0x34a   :  { %1777 = vrot.lane.b32.xlu0 %v20019_v20, %s18403_s25 }
 0x34c   :  { %1918 = vrot.lane.b32.xlu1 %v20037_v10, %s18402_s24 }
 0x34e   :  { %1785 = vrot.lane.b32.xlu0 %v20026_v9, %s18403_s25 }
 0x350   :  { %1926 = vrot.lane.b32.xlu1 %v20046_v13, %s18402_s24 }
 0x352   :  { %3295 = vrot.lane.b32.xlu0 %v20019_v20, %s18396_s29 }
 0x354   :  { %1781 = vrot.lane.b32.xlu1 %v20037_v10, %s18403_s25 }
 0x356   :  { %3303 = vrot.lane.b32.xlu0 %v20026_v9, %s18396_s29  ;;  %v20060_v62 = vpop.permute.xlu1 %1882 }
 0x358   :  { %v20065_v61 = vpop.permute.xlu0 %1886  ;;  %1789 = vrot.lane.b32.xlu1 %v20046_v13, %s18403_s25 }
 0x35a   :  { %1916 = vrot.lane.b32.xlu0 %v20063_v16, %s18402_s24  ;;  %v20071_v21 = vpop.permute.xlu1 %1745 }
 0x35b   :  { %24887 = vst [vmem:[#allocation40_spill] sm:$0xff] %v20071_v21 }
 0x35c   :  { %v20076_v57 = vpop.permute.xlu0 %1749  ;;  %3299 = vrot.lane.b32.xlu1 %v20037_v10, %s18396_s29 }
 0x35d   :  { %24888 = vst [vmem:[#allocation41_spill] sm:$0xff] %v20076_v57 }
 0x35e   :  { %1924 = vrot.lane.b32.xlu0 %v20074_v43, %s18402_s24  ;;  %v20082_v60 = vpop.permute.xlu1 %3263 }
 0x35f   :  { %24889 = vst [vmem:[#allocation42_spill] sm:$0xff] %v20082_v60 }
 0x360   :  { %v20084_v34 = vpop.permute.xlu0 %3267  ;;  %3307 = vrot.lane.b32.xlu1 %v20046_v13, %s18396_s29 }
 0x361   :  { %24890 = vst [vmem:[#allocation45_spill] sm:$0xff] %v20084_v34 }
 0x362   :  { %1779 = vrot.lane.b32.xlu0 %v20063_v16, %s18403_s25  ;;  %v20093_v56 = vpop.permute.xlu1 %1894 }
 0x363   :  { %v1970_v35 = vsel %vm24912_vm1, %v20032_v6, %v20093_v56  ;;  %vm24953_vm1 = vmmov %vm24932_vm0 }
 0x364   :  { %v20095_v42 = vpop.permute.xlu0 %1884  ;;  %1920 = vrot.lane.b32.xlu1 %v20089_v41, %s18402_s24 }
 0x366   :  { %1787 = vrot.lane.b32.xlu0 %v20074_v43, %s18403_s25  ;;  %v20104_v19 = vpop.permute.xlu1 %1757 }
 0x367   :  { %24893 = vst [vmem:[#allocation14_spill] sm:$0xff] %v20104_v19 }
 0x368   :  { %v1893_v28 = vpop.permute.xlu0 %1892  ;;  %1928 = vrot.lane.b32.xlu1 %v20100_v53, %s18402_s24 }
 0x36a   :  { %3297 = vrot.lane.b32.xlu0 %v20063_v16, %s18396_s29  ;;  %v20113_v58 = vpop.permute.xlu1 %3275 }
 0x36b   :  { %24896 = vst [vmem:[#allocation18_spill] sm:$0xff] %v20113_v58 }
 0x36c   :  { %v20115_v46 = vpop.permute.xlu0 %1747  ;;  %1783 = vrot.lane.b32.xlu1 %v20089_v41, %s18403_s25 }
 0x36d   :  { %24897 = vst [vmem:[#allocation20_spill] sm:$0xff] %v20115_v46 }
 0x36e   :  { %3305 = vrot.lane.b32.xlu0 %v20074_v43, %s18396_s29  ;;  %v20127_v33 = vpop.permute.xlu1 %4715 }
 0x36f   :  { %24901 = vst [vmem:[#allocation25_spill] sm:$0xff] %v20127_v33 }
 0x370   :  { %v20132_v24 = vpop.permute.xlu0 %1755  ;;  %1791 = vrot.lane.b32.xlu1 %v20100_v53, %s18403_s25 }
 0x371   :  { %24902 = vst [vmem:[#allocation19_spill] sm:$0xff] %v20132_v24 }
 0x372   :  { %1930 = vrot.lane.b32.xlu0 %v20130_v31, %s18402_s24  ;;  %v20139_v51 = vpop.permute.xlu1 %4721 }
 0x373   :  { %24903 = vst [vmem:[#allocation22_spill] sm:$0xff] %v20139_v51 }
 0x374   :  { %v20141_v54 = vpop.permute.xlu0 %3265  ;;  %3301 = vrot.lane.b32.xlu1 %v20089_v41, %s18396_s29 }
 0x375   :  { %24904 = vst [vmem:[#allocation15_spill] sm:$0xff] %v20141_v54 }
 0x376   :  { %1793 = vrot.lane.b32.xlu0 %v20130_v31, %s18403_s25  ;;  %v1889_v29 = vpop.permute.xlu1 %1888 }
 0x377   :  { %v1975_v5 = vsel %vm24907_vm12, %v20095_v42, %v1889_v29  ;;  %v1973_v2 = vsel %vm24910_vm8, %v1889_v29, %v1893_v28  ;;  %vm24935_vm12 = vmmov %vm24932_vm0 }
 0x378   :  { %v20154_v4 = vpop.permute.xlu0 %3273  ;;  %3309 = vrot.lane.b32.xlu1 %v20100_v53, %s18396_s29  ;;  %17572 = vmatprep.subr.msk.mxu1 %vm20145_vm5, %v1975_v5 }
 0x379   :  { %24908 = vst [vmem:[#allocation50_spill] sm:$0xff] %v20154_v4 }
 0x37a   :  { %3311 = vrot.lane.b32.xlu0 %v20130_v31, %s18396_s29  ;;  %v20165_v40 = vpop.permute.xlu1 %1896 }
 0x37b   :  { %v1971_v11 = vsel %vm24909_vm2, %v1893_v28, %v20165_v40  ;;  %v1972_v28 = vsel %vm24913_vm4, %v20065_v61, %v20032_v6  ;;  %v20211_v6 = vld [vmem:[#allocation3 + $0x18] sm:$0xff]  ;;  %vm24938_vm2 = vmmov %vm24916_vm13 }
 0x37c   :  { %v20175_v5 = vpop.permute.xlu0 %4713  ;;  %1938 = vrot.lane.b32.xlu1 %v20161_v59, %s18402_s24  ;;  %17578 = vmatprep.subr.msk.mxu0 %vm20145_vm5, %v1971_v11  ;;  %v20202_v11 = vadd.f32 %v1738_v45, %v19900_v12  ;;  %v20225_v45 = vadd.f32 %v1734_v15, %v19868_v55  ;;  %vm24940_vm8 = vmmov %vm24938_vm2 }
 0x37d   :  { %24911 = vst [vmem:[#allocation12_spill] sm:$0xff] %v20175_v5  ;;  %17579 = vmatpush1.msk.msra.mxu0 %vm20145_vm5, %v1973_v2  ;;  %vm24954_vm4 = vmmov %vm24932_vm0 }
 0x37e   :  { %1932 = vrot.lane.b32.xlu0 %v20171_v17, %s18402_s24  ;;  %17580 = vmatprep.subr.msk.mxu0 %vm20145_vm5, %v1970_v35  ;;  %v20197_v29 = vpop.permute.xlu1 %1751 }
 0x37f   :  { %24914 = vst [vmem:[#allocation48_spill] sm:$0xff] %v20197_v29  ;;  %17581 = vmatpush1.msk.msra.mxu0 %vm20145_vm5, %v1972_v28 }
 0x380   :  { %v20204_v2 = vpop.permute.xlu0 %4717  ;;  %1801 = vrot.lane.b32.xlu1 %v20161_v59, %s18403_s25  ;;  %17582 = vmatmul.mubr.msk.f32.vlgmr.msra.gmra.mxu0 %vm24916_vm13, %v20187_v25  ;;  %vm24956_vm13 = vmmov %vm24932_vm0 }
 0x381   :  { %24915 = vst [vmem:[#allocation51_spill] sm:$0xff] %v20204_v2  ;;  %2169 = vmatprep.mubr.f32.mxu0 %v24783_v7  ;;  %v20234_v2 = vadd.f32 %v1657_v36, %v19868_v55  ;;  %v1740_v55 = vpop.f32.mrf.mxu0 }
 0x382   :  { %1940 = vrot.lane.b32.xlu0 %v20202_v11, %s18402_s24  ;;  %v20215_v35 = vpop.permute.xlu1 %1759  ;;  %v20257_v26 = vadd.f32 %v1740_v55, %v19900_v12 }
 0x383   :  { %24919 = vst [vmem:[#allocation30_spill] sm:$0xff] %v20234_v2 }
 0x384   :  { %v20217_v28 = vpop.permute.xlu0 %1898  ;;  %3319 = vrot.lane.b32.xlu1 %v20161_v59, %s18396_s29  ;;  %17583 = vmatmul.mubr.msk.f32.gmra.mxu0 %vm24917_vm14, %v20211_v6  ;;  %vm24957_vm14 = vmmov %vm24932_vm0 }
 0x385   :  { %2317 = vmatprep.mubr.f32.mxu0 %v24783_v7 }
 0x386   :  { %1795 = vrot.lane.b32.xlu0 %v20171_v17, %s18403_s25  ;;  %v20229_v33 = vpop.permute.xlu1 %3269 }
 0x387   :  { %24918 = vst [vmem:[#allocation52_spill] sm:$0xff] %v20229_v33 }
 0x388   :  { %v1907_v5 = vpop.permute.xlu0 %1906  ;;  %1942 = vrot.lane.b32.xlu1 %v20225_v45, %s18402_s24 }
 0x38a   :  { %1803 = vrot.lane.b32.xlu0 %v20202_v11, %s18403_s25  ;;  %v20238_v51 = vpop.permute.xlu1 %3277 }
 0x38b   :  { %24920 = vst [vmem:[#allocation16_spill] sm:$0xff] %v20238_v51 }
 0x38c   :  { %v20240_v60 = vpop.permute.xlu0 %1761  ;;  %1934 = vrot.lane.b32.xlu1 %v20234_v2, %s18402_s24 }
 0x38d   :  { %24921 = vst [vmem:[#allocation32_spill] sm:$0xff] %v20240_v60 }
 0x38e   :  { %3313 = vrot.lane.b32.xlu0 %v20171_v17, %s18396_s29  ;;  %v20246_v15 = vpop.permute.xlu1 %1902 }
 0x38f   :  { %v1964_v21 = vsel %vm24935_vm12, %v20246_v15, %v1907_v5  ;;  %vm24975_vm12 = vmmov %vm24953_vm1 }
 0x390   :  { %v20248_v34 = vpop.permute.xlu0 %1769  ;;  %1805 = vrot.lane.b32.xlu1 %v20225_v45, %s18403_s25 }
 0x391   :  { %24922 = vst [vmem:[#allocation34_spill] sm:$0xff] %v20248_v34 }
 0x392   :  { %3321 = vrot.lane.b32.xlu0 %v20202_v11, %s18396_s29  ;;  %v20254_v36 = vpop.permute.xlu1 %1910 }
 0x394   :  { %v20259_v58 = vpop.permute.xlu0 %3279  ;;  %1797 = vrot.lane.b32.xlu1 %v20234_v2, %s18403_s25 }
 0x395   :  { %24923 = vst [vmem:[#allocation23_spill] sm:$0xff] %v20259_v58 }
 0x396   :  { %1944 = vrot.lane.b32.xlu0 %v20257_v26, %s18402_s24  ;;  %v20265_v54 = vpop.permute.xlu1 %1765 }
 0x397   :  { %24924 = vst [vmem:[#allocation33_spill] sm:$0xff] %v20265_v54 }
 0x398   :  { %v20267_v33 = vpop.permute.xlu0 %3287  ;;  %3323 = vrot.lane.b32.xlu1 %v20225_v45, %s18396_s29 }
 0x399   :  { %24925 = vst [vmem:[#allocation21_spill] sm:$0xff] %v20267_v33 }
 0x39a   :  { %4719 = vrot.lane.b32.xlu0 %v19871_v23, %s18399_s1  ;;  %v20273_v55 = vpop.permute.xlu1 %1773 }
 0x39b   :  { %24926 = vst [vmem:[#allocation39_spill] sm:$0xff] %v20273_v55 }
 0x39c   :  { %v20275_v4 = vpop.permute.xlu0 %1900  ;;  %3315 = vrot.lane.b32.xlu1 %v20234_v2, %s18396_s29 }
 0x39e   :  { %4725 = vrot.lane.b32.xlu0 %v19934_v39, %s18399_s1  ;;  %v20281_v58 = vpop.permute.xlu1 %3283 }
 0x39f   :  { %24927 = vst [vmem:[#allocation27_spill] sm:$0xff] %v20281_v58 }
 0x3a0   :  { %v1909_v51 = vpop.permute.xlu0 %1908  ;;  %4711 = vrot.lane.b32.xlu1 %v19880_v52, %s18399_s1 }
 0x3a2   :  { %4723 = vrot.lane.b32.xlu0 %v19898_v50, %s18399_s1  ;;  %v20287_v33 = vpop.permute.xlu1 %3291 }
 0x3a3   :  { %24928 = vst [vmem:[#allocation35_spill] sm:$0xff] %v20287_v33 }
 0x3a4   :  { %v20289_v60 = vpop.permute.xlu0 %1763  ;;  %4729 = vrot.lane.b32.xlu1 %v19983_v14, %s18399_s1 }
 0x3a5   :  { %24929 = vst [vmem:[#allocation24_spill] sm:$0xff] %v20289_v60 }
 0x3a6   :  { %4733 = vrot.lane.b32.xlu0 %v19999_v22, %s18399_s1  ;;  %v20295_v54 = vpop.permute.xlu1 %1904 }
 0x3a7   :  { %v1965_v55 = vsel %vm24932_vm0, %v20295_v54, %v1909_v51  ;;  %vm24962_vm0 = vmmov %vm24938_vm2 }
 0x3a8   :  { %v20297_v58 = vpop.permute.xlu0 %1771  ;;  %4727 = vrot.lane.b32.xlu1 %v19947_v49, %s18399_s1 }
 0x3a9   :  { %24930 = vst [vmem:[#allocation46_spill] sm:$0xff] %v20297_v58  ;;  %v1962_v58 = vsel %vm24934_vm11, %v1907_v5, %v20254_v36  ;;  %vm24974_vm11 = vmmov %vm24953_vm1 }
 0x3aa   :  { %4731 = vrot.lane.b32.xlu0 %v19963_v30, %s18399_s1  ;;  %v20303_v34 = vpop.permute.xlu1 %1912 }
 0x3ab   :  { %v1963_v33 = vsel %vm24931_vm15, %v1909_v51, %v20303_v34  ;;  %vm24960_vm15 = vmmov %vm24938_vm2 }
 0x3ac   :  { %v20311_v60 = vpop.permute.xlu0 %3281  ;;  %4737 = vrot.lane.b32.xlu1 %v19990_v63, %s18399_s1  ;;  %17590 = vmatprep.subr.msk.mxu0 %vm20145_vm5, %v1963_v33 }
 0x3ad   :  { %24933 = vst [vmem:[#allocation29_spill] sm:$0xff] %v20311_v60  ;;  %17591 = vmatpush1.msk.msra.mxu0 %vm20145_vm5, %v1965_v55 }
 0x3ae   :  { %4741 = vrot.lane.b32.xlu0 %v20006_v47, %s18399_s1  ;;  %17592 = vmatprep.subr.msk.mxu0 %vm20145_vm5, %v1962_v58  ;;  %v20329_v51 = vpop.permute.xlu1 %1767  ;;  %v1663_v58 = vpop.f32.mrf.mxu1 }
 0x3af   :  { %24936 = vst [vmem:[#allocation13_spill] sm:$0xff] %v20329_v51  ;;  %17593 = vmatpush1.msk.msra.mxu0 %vm20145_vm5, %v1964_v21  ;;  %v20352_v21 = vadd.f32 %v1663_v58, %v19900_v12 }
 0x3b0   :  { %v20333_v33 = vpop.permute.xlu0 %3289  ;;  %4735 = vrot.lane.b32.xlu1 %v19954_v3, %s18399_s1  ;;  %17594 = vmatmul.mubr.msk.f32.vlgmr.msra.gmra.mxu0 %vm24938_vm2, %v20187_v25  ;;  %vm24976_vm2 = vmmov %vm24953_vm1 }
 0x3b1   :  { %24937 = vst [vmem:[#allocation43_spill] sm:$0xff] %v20333_v33  ;;  %2323 = vmatprep.mubr.f32.mxu0 %v24783_v7 }
 0x3b2   :  { %4739 = vrot.lane.b32.xlu0 %v19970_v32, %s18399_s1  ;;  %v20342_v5 = vpop.permute.xlu1 %1775 }
 0x3b3   :  { %24939 = vst [vmem:[#allocation26_spill] sm:$0xff] %v20342_v5 }
 0x3b4   :  { %v20344_v55 = vpop.permute.xlu0 %1914  ;;  %4745 = vrot.lane.b32.xlu1 %v20063_v16, %s18399_s1  ;;  %17595 = vmatmul.mubr.msk.f32.gmra.mxu0 %vm24940_vm8, %v20211_v6  ;;  %vm24977_vm8 = vmmov %vm24953_vm1 }
 0x3b5   :  { %2471 = vmatprep.mubr.f32.mxu0 %v24783_v7 }
 0x3b6   :  { %1807 = vrot.lane.b32.xlu0 %v20257_v26, %s18403_s25  ;;  %v20356_v60 = vpop.permute.xlu1 %3285 }
 0x3b7   :  { %24941 = vst [vmem:[#allocation28_spill] sm:$0xff] %v20356_v60 }
 0x3b8   :  { %v1923_v33 = vpop.permute.xlu0 %1922  ;;  %1936 = vrot.lane.b32.xlu1 %v20352_v21, %s18402_s24 }
 0x3ba   :  { %4749 = vrot.lane.b32.xlu0 %v20089_v41, %s18399_s1  ;;  %v20362_v51 = vpop.permute.xlu1 %3293 }
 0x3bb   :  { %24942 = vst [vmem:[#allocation53_spill] sm:$0xff] %v20362_v51 }
 0x3bc   :  { %v20364_v5 = vpop.permute.xlu0 %1777  ;;  %4743 = vrot.lane.b32.xlu1 %v20019_v20, %s18399_s1 }
 0x3bd   :  { %24943 = vst [vmem:[#allocation54_spill] sm:$0xff] %v20364_v5 }
 0x3be   :  { %4747 = vrot.lane.b32.xlu0 %v20037_v10, %s18399_s1  ;;  %v20370_v12 = vpop.permute.xlu1 %1918 }
 0x3bf   :  { %v1956_v24 = vsel %vm24957_vm14, %v20370_v12, %v1923_v33  ;;  %vm24980_vm14 = vmmov %vm24953_vm1 }
 0x3c0   :  { %v20372_v58 = vpop.permute.xlu0 %1785  ;;  %4753 = vrot.lane.b32.xlu1 %v20074_v43, %s18399_s1 }
 0x3c1   :  { %24944 = vst [vmem:[#allocation55_spill] sm:$0xff] %v20372_v58 }
 0x3c2   :  { %4757 = vrot.lane.b32.xlu0 %v20100_v53, %s18399_s1  ;;  %v20378_v60 = vpop.permute.xlu1 %1926 }
 0x3c4   :  { %v20380_v51 = vpop.permute.xlu0 %3295  ;;  %4751 = vrot.lane.b32.xlu1 %v20026_v9, %s18399_s1 }
 0x3c5   :  { %24945 = vst [vmem:[#allocation56_spill] sm:$0xff] %v20380_v51 }
 0x3c6   :  { %4755 = vrot.lane.b32.xlu0 %v20046_v13, %s18399_s1  ;;  %v20386_v5 = vpop.permute.xlu1 %1781 }
 0x3c7   :  { %24946 = vst [vmem:[#allocation57_spill] sm:$0xff] %v20386_v5 }
 0x3c8   :  { %v20388_v57 = vpop.permute.xlu0 %3303  ;;  %4761 = vrot.lane.b32.xlu1 %v20171_v17, %s18399_s1 }
 0x3c9   :  { %24947 = vst [vmem:[#allocation58_spill] sm:$0xff] %v20388_v57 }
 0x3ca   :  { %4763 = vrot.lane.b32.xlu0 %v20234_v2, %s18399_s1  ;;  %v20394_v58 = vpop.permute.xlu1 %1789 }
 0x3cb   :  { %24948 = vst [vmem:[#allocation59_spill] sm:$0xff] %v20394_v58 }
 0x3cc   :  { %v20396_v1 = vpop.permute.xlu0 %1916  ;;  %4759 = vrot.lane.b32.xlu1 %v20130_v31, %s18399_s1 }
 0x3ce   :  { %5508 = vrot.lane.b32.xlu0 %v19927_v37, %s18398_s22  ;;  %v20402_v51 = vpop.permute.xlu1 %3299 }
 0x3cf   :  { %24949 = vst [vmem:[#allocation60_spill] sm:$0xff] %v20402_v51 }
 0x3d0   :  { %v1925_v5 = vpop.permute.xlu0 %1924  ;;  %4769 = vrot.lane.b32.xlu1 %v20202_v11, %s18399_s1 }
 0x3d2   :  { %5504 = vrot.lane.b32.xlu0 %v19903_v0, %s18398_s22  ;;  %v20408_v57 = vpop.permute.xlu1 %3307 }
 0x3d3   :  { %24950 = vst [vmem:[#allocation61_spill] sm:$0xff] %v20408_v57 }
 0x3d4   :  { %v20410_v58 = vpop.permute.xlu0 %1779  ;;  %4767 = vrot.lane.b32.xlu1 %v20161_v59, %s18399_s1 }
 0x3d5   :  { %24951 = vst [vmem:[#allocation62_spill] sm:$0xff] %v20410_v58 }
 0x3d6   :  { %3325 = vrot.lane.b32.xlu0 %v20257_v26, %s18396_s29  ;;  %v20416_v19 = vpop.permute.xlu1 %1920 }
 0x3d7   :  { %v1957_v58 = vsel %vm24954_vm4, %v20416_v19, %v1925_v5  ;;  %vm24978_vm4 = vmmov %vm24953_vm1 }
 0x3d8   :  { %v20418_v51 = vpop.permute.xlu0 %1787  ;;  %1799 = vrot.lane.b32.xlu1 %v20352_v21, %s18403_s25 }
 0x3d9   :  { %24952 = vst [vmem:[#allocation63_spill] sm:$0xff] %v20418_v51  ;;  %v1954_v51 = vsel %vm24956_vm13, %v1923_v33, %v20378_v60  ;;  %vm24979_vm13 = vmmov %vm24962_vm0 }
 0x3da   :  { %5510 = vrot.lane.b32.xlu0 %v19871_v23, %s18398_s22  ;;  %v20424_v46 = vpop.permute.xlu1 %1928 }
 0x3db   :  { %v1955_v57 = vsel %vm24953_vm1, %v1925_v5, %v20424_v46 }
 0x3dc   :  { %v20432_v29 = vpop.permute.xlu0 %3297  ;;  %4771 = vrot.lane.b32.xlu1 %v20225_v45, %s18399_s1  ;;  %17602 = vmatprep.subr.msk.mxu0 %vm20145_vm5, %v1955_v57 }
 0x3dd   :  { %24955 = vst [vmem:[#allocation64_spill] sm:$0xff] %v20432_v29  ;;  %17603 = vmatpush1.msk.msra.mxu0 %vm20145_vm5, %v1957_v58 }
 0x3de   :  { %5516 = vrot.lane.b32.xlu0 %v19934_v39, %s18398_s22  ;;  %17604 = vmatprep.subr.msk.mxu0 %vm20145_vm5, %v1954_v51  ;;  %v20450_v5 = vpop.permute.xlu1 %1783 }
 0x3df   :  { %24958 = vst [vmem:[#allocation65_spill] sm:$0xff] %v20450_v5  ;;  %17605 = vmatpush1.msk.msra.mxu0 %vm20145_vm5, %v1956_v24 }
 0x3e0   :  { %v20454_v57 = vpop.permute.xlu0 %3305  ;;  %5512 = vrot.lane.b32.xlu1 %v19910_v8, %s18398_s22  ;;  %17606 = vmatmul.mubr.msk.f32.vlgmr.msra.gmra.mxu0 %vm24960_vm15, %v20187_v25  ;;  %vm24981_vm15 = vmmov %vm24953_vm1 }
 0x3e1   :  { %24959 = vst [vmem:[#allocation66_spill] sm:$0xff] %v20454_v57  ;;  %2477 = vmatprep.mubr.f32.mxu0 %v24783_v7 }
 0x3e2   :  { %5514 = vrot.lane.b32.xlu0 %v19898_v50, %s18398_s22  ;;  %v20463_v33 = vpop.permute.xlu1 %1791 }
 0x3e3   :  { %24961 = vst [vmem:[#allocation67_spill] sm:$0xff] %v20463_v33 }
 0x3e4   :  { %v20465_v51 = vpop.permute.xlu0 %1930  ;;  %5506 = vrot.lane.b32.xlu1 %v19883_v44, %s18398_s22  ;;  %17607 = vmatmul.mubr.msk.f32.gmra.mxu0 %vm24962_vm0, %v20211_v6  ;;  %vm24982_vm0 = vmmov %vm24953_vm1 }
 0x3e5   :  { %2625 = vmatprep.mubr.f32.mxu0 %v24783_v7 }
 0x3e6   :  { %5524 = vrot.lane.b32.xlu0 %v19999_v22, %s18398_s22  ;;  %v20474_v24 = vpop.permute.xlu1 %3301 }
 0x3e7   :  { %24963 = vst [vmem:[#allocation68_spill] sm:$0xff] %v20474_v24 }
 0x3e8   :  { %v20476_v58 = vpop.permute.xlu0 %1793  ;;  %5502 = vrot.lane.b32.xlu1 %v19880_v52, %s18398_s22 }
 0x3e9   :  { %24964 = vst [vmem:[#allocation69_spill] sm:$0xff] %v20476_v58 }
 0x3ea   :  { %5522 = vrot.lane.b32.xlu0 %v19963_v30, %s18398_s22  ;;  %v20482_v29 = vpop.permute.xlu1 %3309 }
 0x3eb   :  { %24965 = vst [vmem:[#allocation70_spill] sm:$0xff] %v20482_v29 }
 0x3ec   :  { %v20484_v57 = vpop.permute.xlu0 %3311  ;;  %5520 = vrot.lane.b32.xlu1 %v19983_v14, %s18398_s22 }
 0x3ed   :  { %24966 = vst [vmem:[#allocation71_spill] sm:$0xff] %v20484_v57 }
 0x3ee   :  { %5532 = vrot.lane.b32.xlu0 %v20006_v47, %s18398_s22  ;;  %v20490_v5 = vpop.permute.xlu1 %1938 }
 0x3f0   :  { %v20492_v24 = vpop.permute.xlu0 %1932  ;;  %5518 = vrot.lane.b32.xlu1 %v19947_v49, %s18398_s22 }
 0x3f2   :  { %5530 = vrot.lane.b32.xlu0 %v19970_v32, %s18398_s22  ;;  %v20498_v58 = vpop.permute.xlu1 %1801 }
 0x3f3   :  { %24967 = vst [vmem:[#allocation72_spill] sm:$0xff] %v20498_v58 }
 0x3f4   :  { %v20500_v29 = vpop.permute.xlu0 %1940  ;;  %5528 = vrot.lane.b32.xlu1 %v19990_v63, %s18398_s22 }
 0x3f6   :  { %5540 = vrot.lane.b32.xlu0 %v20089_v41, %s18398_s22  ;;  %v20506_v57 = vpop.permute.xlu1 %3319 }
 0x3f7   :  { %24968 = vst [vmem:[#allocation73_spill] sm:$0xff] %v20506_v57 }
 0x3f8   :  { %v20508_v33 = vpop.permute.xlu0 %1795  ;;  %3317 = vrot.lane.b32.xlu1 %v20352_v21, %s18396_s29 }
 0x3f9   :  { %24969 = vst [vmem:[#allocation74_spill] sm:$0xff] %v20508_v33 }
 0x3fa   :  { %5538 = vrot.lane.b32.xlu0 %v20037_v10, %s18398_s22  ;;  %v20514_v32 = vpop.permute.xlu1 %1942 }
 0x3fc   :  { %v20516_v58 = vpop.permute.xlu0 %1803  ;;  %5526 = vrot.lane.b32.xlu1 %v19954_v3, %s18398_s22 }
 0x3fd   :  { %24970 = vst [vmem:[#allocation75_spill] sm:$0xff] %v20516_v58 }
 0x3fe   :  { %5548 = vrot.lane.b32.xlu0 %v20100_v53, %s18398_s22  ;;  %v20522_v41 = vpop.permute.xlu1 %1934 }
 0x400   :  { %v20524_v57 = vpop.permute.xlu0 %3313  ;;  %5536 = vrot.lane.b32.xlu1 %v20063_v16, %s18398_s22 }
 0x401   :  { %24971 = vst [vmem:[#allocation76_spill] sm:$0xff] %v20524_v57 }
 0x402   :  { %5546 = vrot.lane.b32.xlu0 %v20046_v13, %s18398_s22  ;;  %v20530_v33 = vpop.permute.xlu1 %1805 }
 0x404   :  { %v20532_v10 = vpop.permute.xlu0 %3321  ;;  %5534 = vrot.lane.b32.xlu1 %v20019_v20, %s18398_s22 }
 0x405   :  { %24972 = vst [vmem:[#allocation77_spill] sm:$0xff] %v20532_v10 }
 0x406   :  { %5554 = vrot.lane.b32.xlu0 %v20234_v2, %s18398_s22  ;;  %v20538_v53 = vpop.permute.xlu1 %1797 }
 0x407   :  { %24973 = vst [vmem:[#allocation78_spill] sm:$0xff] %v20538_v53  ;;  %v1974_v53 = vsel %vm24976_vm2, %v20060_v62, %v20065_v61  ;;  %v1967_v61 = vsel %vm24953_vm1, %v20275_v4, %v20295_v54  ;;  %v1968_v54 = vsel %vm24981_vm15, %v20093_v56, %v20217_v28  ;;  %vm24987_vm1 = vmmov %vm24982_vm0 }
 0x408   :  { %v1945_v58 = vpop.permute.xlu0 %1944  ;;  %5544 = vrot.lane.b32.xlu1 %v20074_v43, %s18398_s22  ;;  %vm24998_vm15 = vmmov %vm24982_vm0 }
 0x409   :  { %v1977_v57 = vsel %vm24974_vm11, %v1945_v58, %v20095_v42  ;;  %v1947_v10 = vsel %vm24975_vm12, %v20500_v29, %v1945_v58  ;;  %v1976_v42 = vsel %vm24977_vm8, %v20514_v32, %v20060_v62  ;;  %vm24983_vm11 = vmmov %vm24979_vm13 }
 0x40a   :  { %6299 = vrot.lane.b32.xlu0 %v19927_v37, %s18401_s2  ;;  %17573 = vmatpush1.msk.msra.mxu1 %vm20145_vm5, %v1977_v57  ;;  %v20552_v2 = vpop.permute.xlu1 %3323  ;;  %vm24984_vm12 = vmmov %vm24982_vm0 }
 0x40b   :  { %17614 = vmatprep.subr.msk.mxu0 %vm20145_vm5, %v1947_v10  ;;  %17574 = vmatprep.subr.msk.mxu1 %vm20145_vm5, %v1974_v53  ;;  %v1969_v10 = vsel %vm24978_vm4, %v20165_v40, %v20275_v4  ;;  %v1966_v53 = vsel %vm24980_vm14, %v20217_v28, %v20246_v15  ;;  %v1959_v40 = vsel %vm24982_vm0, %v20396_v1, %v20416_v19  ;;  %vm24985_vm2 = vmmov %vm24983_vm11 }
 0x40c   :  { %v20566_v58 = vpop.permute.xlu0 %4719  ;;  %5542 = vrot.lane.b32.xlu1 %v20026_v9, %s18398_s22  ;;  %17575 = vmatpush1.msk.msra.mxu1 %vm20145_vm5, %v1976_v42  ;;  %v1961_v19 = vsel %vm24984_vm12, %v20303_v34, %v20396_v1  ;;  %vm24986_vm8 = vmmov %vm24982_vm0  ;;  %v1960_v1 = vsel %vm24987_vm1, %v20254_v36, %v20344_v55 }
 0x40d   :  { %17576 = vmatmul.mubr.msk.f32.vlgmr.msra.gmra.mxu1 %vm24979_vm13, %v20187_v25  ;;  %17584 = vmatprep.subr.msk.mxu1 %vm20145_vm5, %v1967_v61  ;;  %v1958_v15 = vsel %vm24986_vm8, %v20344_v55, %v20370_v12  ;;  %vm24989_vm4 = vmmov %vm24985_vm2 }
 0x40e   :  { %6295 = vrot.lane.b32.xlu0 %v19903_v0, %s18401_s2  ;;  %17585 = vmatpush1.msk.msra.mxu1 %vm20145_vm5, %v1969_v10  ;;  %v20588_v62 = vpop.permute.xlu1 %3315  ;;  %vm24991_vm13 = vmmov %vm24985_vm2 }
 0x40f   :  { %17586 = vmatprep.subr.msk.mxu1 %vm20145_vm5, %v1966_v53  ;;  %2092 = vmatprep.mubr.f32.mxu1 %v24783_v7  ;;  %vm24994_vm14 = vmmov %vm24985_vm2 }
 0x410   :  { %v20601_v4 = vpop.permute.xlu0 %4725  ;;  %5552 = vrot.lane.b32.xlu1 %v20171_v17, %s18398_s22  ;;  %17587 = vmatpush1.msk.msra.mxu1 %vm20145_vm5, %v1968_v54  ;;  %v1841_v54 = vsel %vm71_vm3, 1, %v24899_v38  ;;  %vm24999_vm3 = vmmov %vm24982_vm0 }
 0x411   :  { %17577 = vmatmul.mubr.msk.f32.gmra.mxu1 %vm24983_vm11, %v20211_v6  ;;  %17596 = vmatprep.subr.msk.mxu1 %vm20145_vm5, %v1959_v40  ;;  %vm25001_vm11 = vmmov %vm24982_vm0 }
 0x412   :  { %6301 = vrot.lane.b32.xlu0 %v19871_v23, %s18401_s2  ;;  %v20617_v56 = vpop.permute.xlu1 %4711  ;;  %2240 = vmatprep.mubr.f32.mxu1 %v24783_v7  ;;  %vm25005_vm8 = vmmov %vm24982_vm0 }
 0x413   :  { %vm25007_vm1 = vmmov %vm24982_vm0 }
 0x414   :  { %v20620_v28 = vpop.permute.xlu0 %4723  ;;  %5550 = vrot.lane.b32.xlu1 %v20130_v31, %s18398_s22 }
 0x415   :  { %17588 = vmatmul.mubr.msk.f32.vlgmr.msra.gmra.mxu1 %vm24985_vm2, %v20187_v25  ;;  %vm25004_vm2 = vmmov %vm24982_vm0 }
 0x416   :  { %17597 = vmatpush1.msk.msra.mxu1 %vm20145_vm5, %v1961_v19  ;;  %6307 = vrot.lane.b32.xlu0 %v19934_v39, %s18401_s2  ;;  %v20638_v57 = vpop.permute.xlu1 %4729  ;;  %v1845_v19 = vrot.slane %v1841_v54, %v20120_v18 }
 0x417   :  { %17598 = vmatprep.subr.msk.mxu1 %vm20145_vm5, %v1958_v15  ;;  %2246 = vmatprep.mubr.f32.mxu1 %v24783_v7 }
 0x418   :  { %17599 = vmatpush1.msk.msra.mxu1 %vm20145_vm5, %v1960_v1  ;;  %v20649_v34 = vpop.permute.xlu0 %4733  ;;  %5560 = vrot.lane.b32.xlu1 %v20202_v11, %s18398_s22  ;;  %vm20724_vm12 = vcmp.eq.s32.totalorder %v1845_v19, 1 }
 0x419   :  { %24988 = vst [vmem:[#allocation79_spill] sm:$0xff] %v20649_v34  ;;  %17589 = vmatmul.mubr.msk.f32.gmra.mxu1 %vm24989_vm4, %v20211_v6 }
 0x41a   :  { %4765 = vrot.lane.b32.xlu0 %v20352_v21, %s18399_s1  ;;  %v20657_v36 = vpop.permute.xlu1 %4727  ;;  %2394 = vmatprep.mubr.f32.mxu1 %v24783_v7 }
 0x41c   :  { %v20660_v55 = vpop.permute.xlu0 %4731  ;;  %5558 = vrot.lane.b32.xlu1 %v20161_v59, %s18398_s22 }
 0x41d   :  { %24990 = vst [vmem:[#allocation80_spill] sm:$0xff] %v20660_v55  ;;  %17600 = vmatmul.mubr.msk.f32.vlgmr.msra.gmra.mxu1 %vm24991_vm13, %v20187_v25  ;;  %vm25009_vm13 = vcmp.lt.s32.totalorder %v18882_v27, 3 }
 0x41e   :  { %4773 = vrot.lane.b32.xlu0 %v20257_v26, %s18399_s1  ;;  %v20668_v12 = vpop.permute.xlu1 %4737  ;;  %2400 = vmatprep.mubr.f32.mxu1 %v24783_v7 }
 0x41f   :  { %24992 = vst [vmem:[#allocation81_spill] sm:$0xff] %v20668_v12 }
 0x420   :  { %v20671_v42 = vpop.permute.xlu0 %4741  ;;  %5562 = vrot.lane.b32.xlu1 %v20225_v45, %s18398_s22 }
 0x421   :  { %24993 = vst [vmem:[#allocation82_spill] sm:$0xff] %v20671_v42  ;;  %17601 = vmatmul.mubr.msk.f32.gmra.mxu1 %vm24994_vm14, %v20211_v6  ;;  %v25145_v42 = vld [vmem:[#allocation27_spill] sm:$0xff] }
 0x422   :  { %5556 = vrot.lane.b32.xlu0 %v20352_v21, %s18398_s22  ;;  %v20679_v61 = vpop.permute.xlu1 %4735  ;;  %2548 = vmatprep.mubr.f32.mxu1 %v24783_v7 }
 0x423   :  { %24995 = vst [vmem:[#allocation83_spill] sm:$0xff] %v20679_v61  ;;  %v1953_v61 = vsel %vm24999_vm3, %v20424_v46, %v20492_v24 }
 0x424   :  { %v20682_v10 = vpop.permute.xlu0 %4739  ;;  %6303 = vrot.lane.b32.xlu1 %v19910_v8, %s18401_s2 }
 0x425   :  { %24996 = vst [vmem:[#allocation84_spill] sm:$0xff] %v20682_v10 }
 0x426   :  { %5564 = vrot.lane.b32.xlu0 %v20257_v26, %s18398_s22  ;;  %v20688_v53 = vpop.permute.xlu1 %4745 }
 0x427   :  { %24997 = vst [vmem:[#allocation85_spill] sm:$0xff] %v20688_v53 }
 0x428   :  { %v20693_v40 = vpop.permute.xlu0 %1807  ;;  %6297 = vrot.lane.b32.xlu1 %v19883_v44, %s18401_s2 }
 0x42a   :  { %6305 = vrot.lane.b32.xlu0 %v19898_v50, %s18401_s2  ;;  %v1937_v15 = vpop.permute.xlu1 %1936 }
 0x42b   :  { %v1949_v1 = vsel %vm24998_vm15, %v1937_v15, %v20500_v29  ;;  %v1951_v55 = vsel %vm24982_vm0, %v20492_v24, %v1937_v15  ;;  %v1946_v29 = vsel %vm25001_vm11, %v20490_v5, %v20514_v32  ;;  %v1948_v24 = vsel %vm25004_vm2, %v20522_v41, %v20490_v5  ;;  %vm25016_vm0 = vmmov %vm24989_vm4 }
 0x42c   :  { %v20710_v10 = vpop.permute.xlu0 %4749  ;;  %6293 = vrot.lane.b32.xlu1 %v19880_v52, %s18401_s2  ;;  %17608 = vmatprep.subr.msk.mxu1 %vm20145_vm5, %v1951_v55  ;;  %v1950_v32 = vsel %vm25005_vm8, %v20465_v51, %v20522_v41  ;;  %v25008_v41 = vld [vmem:[#allocation19_spill] sm:$0xff] }
 0x42d   :  { %25000 = vst [vmem:[#allocation86_spill] sm:$0xff] %v20710_v10  ;;  %17615 = vmatpush1.msk.msra.mxu0 %vm20145_vm5, %v1949_v1  ;;  %17609 = vmatpush1.msk.msra.mxu1 %vm20145_vm5, %v1953_v61  ;;  %v1952_v61 = vsel %vm25007_vm1, %v20378_v60, %v20465_v51  ;;  %v1834_v5 = vsel %vm25009_vm13, %v25008_v41, %v20215_v35  ;;  %v25011_v60 = vld [vmem:[#allocation48_spill] sm:$0xff]  ;;  %vm25028_vm1 = vmmov %vm25016_vm0  ;;  %v25068_v10 = vld [vmem:[#allocation59_spill] sm:$0xff] }
 0x42e   :  { %17616 = vmatprep.subr.msk.mxu0 %vm20145_vm5, %v1946_v29  ;;  %6315 = vrot.lane.b32.xlu0 %v19999_v22, %s18401_s2  ;;  %v20740_v55 = vpop.permute.xlu1 %4743  ;;  %v25012_v51 = vld [vmem:[#allocation20_spill] sm:$0xff]  ;;  %v25018_v29 = vld [vmem:[#allocation14_spill] sm:$0xff] }
 0x42f   :  { %25006 = vst [vmem:[#allocation87_spill] sm:$0xff] %v20740_v55  ;;  %17610 = vmatprep.subr.msk.mxu1 %vm20145_vm5, %v1950_v32  ;;  %17617 = vmatpush1.msk.msra.mxu0 %vm20145_vm5, %v1948_v24  ;;  %v25019_v24 = vld [vmem:[#allocation37_spill] sm:$0xff] }
 0x430   :  { %17611 = vmatpush1.msk.msra.mxu1 %vm20145_vm5, %v1952_v61  ;;  %17618 = vmatmul.mubr.msk.f32.vlgmr.msra.gmra.mxu0 %vm24989_vm4, %v20187_v25  ;;  %v20758_v54 = vpop.permute.xlu0 %4747  ;;  %vm25013_vm5 = vmmov %vm25009_vm13  ;;  %v25022_v61 = vld [vmem:[#allocation40_spill] sm:$0xff] }
 0x431   :  { %25010 = vst [vmem:[#allocation19_spill] sm:$0xff] %v20758_v54  ;;  %17626 = vmatprep.subr.msk.mxu0 %vm20724_vm12, %v1834_v5  ;;  %6311 = vrot.lane.b32.xlu1 %v19983_v14, %s18401_s2  ;;  %v1838_v48 = vsel %vm25013_vm5, %v25012_v51, %v25011_v60  ;;  %vm25014_vm14 = vmmov %vm25013_vm5 }
 0x432   :  { %v1836_v19 = vsel %vm25014_vm14, %v25011_v60, %v25008_v41  ;;  %vm25015_vm15 = vmmov %vm25013_vm5  ;;  %17612 = vmatmul.mubr.msk.f32.vlgmr.msra.gmra.mxu1 %vm25016_vm0, %v20187_v25  ;;  %17620 = vmatprep.subr.msk.mxu1 %vm20724_vm12, %v1838_v48  ;;  %v20780_v1 = vpop.permute.xlu1 %4753  ;;  %v25021_v25 = vld [vmem:[#allocation41_spill] sm:$0xff] }
 0x433   :  { %v1840_v15 = vsel %vm25015_vm15, %v20693_v40, %v25012_v51  ;;  %25017 = vst [vmem:[#allocation48_spill] sm:$0xff] %v20780_v1  ;;  %17627 = vmatpush1.msk.msra.mxu0 %vm20724_vm12, %v1836_v19  ;;  %vm25020_vm3 = vmmov %vm25013_vm5  ;;  %6313 = vrot.lane.b32.xlu0 %v19963_v30, %s18401_s2  ;;  %v25029_v19 = vld [vmem:[#allocation26_spill] sm:$0xff] }
 0x434   :  { %17621 = vmatpush1.msk.msra.mxu1 %vm20724_vm12, %v1840_v15  ;;  %v1833_v32 = vsel %vm25020_vm3, %v25019_v24, %v25018_v29  ;;  %vm25023_vm11 = vmmov %vm25020_vm3  ;;  %v20798_v5 = vpop.permute.xlu0 %4757  ;;  %2631 = vmatprep.mubr.f32.mxu0 %v24783_v7  ;;  %v25030_v15 = vld [vmem:[#allocation46_spill] sm:$0xff] }
 0x435   :  { %17628 = vmatprep.subr.msk.mxu0 %vm20724_vm12, %v1833_v32  ;;  %v1837_v41 = vsel %vm25023_vm11, %v25022_v61, %v25021_v25  ;;  %25024 = vst [vmem:[#allocation20_spill] sm:$0xff] %v20798_v5  ;;  %vm25025_vm2 = vmmov %vm25020_vm3  ;;  %2554 = vmatprep.mubr.f32.mxu1 %v24783_v7  ;;  %v25032_v32 = vld [vmem:[#allocation13_spill] sm:$0xff] }
 0x436   :  { %v1835_v60 = vsel %vm25025_vm2, %v25021_v25, %v25019_v24  ;;  %17622 = vmatprep.subr.msk.mxu1 %vm20724_vm12, %v1837_v41  ;;  %vm25026_vm8 = vmmov %vm25025_vm2  ;;  %v20814_v48 = vpop.permute.xlu1 %4751  ;;  %17619 = vmatmul.mubr.msk.f32.gmra.mxu0 %vm25028_vm1, %v20211_v6  ;;  %v25033_v25 = vld [vmem:[#allocation24_spill] sm:$0xff]  ;;  %v20832_v41 = vld [vmem:[#allocation3] sm:$0xff] }
 0x437   :  { %v1839_v51 = vsel %vm25026_vm8, %v20530_v33, %v25022_v61  ;;  %17629 = vmatpush1.msk.msra.mxu0 %vm20724_vm12, %v1835_v60  ;;  %25027 = vst [vmem:[#allocation14_spill] sm:$0xff] %v20814_v48  ;;  %vm25031_vm4 = vmmov %vm25025_vm2  ;;  %6309 = vrot.lane.b32.xlu1 %v19947_v49, %s18401_s2  ;;  %v25071_v5 = vld [vmem:[#allocation57_spill] sm:$0xff] }
 0x438   :  { %17623 = vmatpush1.msk.msra.mxu1 %vm20724_vm12, %v1839_v51  ;;  %v1826_v24 = vsel %vm25031_vm4, %v25030_v15, %v25029_v19  ;;  %vm25034_vm13 = vmmov %vm25025_vm2  ;;  %v20834_v60 = vpop.permute.xlu0 %4755  ;;  %6323 = vrot.lane.b32.xlu0 %v20006_v47, %s18401_s2 }
 0x439   :  { %17638 = vmatprep.subr.msk.mxu0 %vm20724_vm12, %v1826_v24  ;;  %v1830_v61 = vsel %vm25034_vm13, %v25033_v25, %v25032_v32  ;;  %25035 = vst [vmem:[#allocation37_spill] sm:$0xff] %v20834_v60  ;;  %vm25036_vm5 = vmmov %vm25016_vm0  ;;  %2785 = vmatprep.mubr.f32.mxu0 %v24783_v7 }
 0x43a   :  { %17613 = vmatmul.mubr.msk.f32.gmra.mxu1 %vm25036_vm5, %v20211_v6  ;;  %17632 = vmatprep.subr.msk.mxu1 %vm20724_vm12, %v1830_v61  ;;  %v20843_v51 = vpop.permute.xlu1 %4761  ;;  %vm25038_vm14 = vmmov %vm25025_vm2  ;;  %v25040_v6 = vld [vmem:[#allocation39_spill] sm:$0xff]  ;;  %v25041_v61 = vld [vmem:[#allocation34_spill] sm:$0xff] }
 0x43b   :  { %25037 = vst [vmem:[#allocation41_spill] sm:$0xff] %v20843_v51  ;;  %v1828_v24 = vsel %vm25038_vm14, %v25032_v32, %v25030_v15  ;;  %2708 = vmatprep.mubr.f32.mxu1 %v24783_v7  ;;  %vm25039_vm15 = vmmov %vm25016_vm0  ;;  %6319 = vrot.lane.b32.xlu1 %v19990_v63, %s18401_s2  ;;  %v25044_v15 = vld [vmem:[#allocation33_spill] sm:$0xff] }
 0x43c   :  { %17630 = vmatmul.mubr.msk.f32.vlgmr.msra.gmra.mxu0 %vm25039_vm15, %v20832_v41  ;;  %vm25042_vm0 = vmmov %vm25025_vm2  ;;  %v20860_v48 = vpop.permute.xlu0 %4763 }
 0x43d   :  { %17639 = vmatpush1.msk.msra.mxu0 %vm20724_vm12, %v1828_v24  ;;  %v1825_v54 = vsel %vm25042_vm0, %v25041_v61, %v25040_v6  ;;  %25043 = vst [vmem:[#allocation40_spill] sm:$0xff] %v20860_v48  ;;  %vm25045_vm3 = vmmov %vm25042_vm0  ;;  %v25048_v48 = vld [vmem:[#allocation32_spill] sm:$0xff]  ;;  %2791 = vmatprep.mubr.f32.mxu0 %v24783_v7 }
 0x43e   :  { %v1827_v32 = vsel %vm25045_vm3, %v25044_v15, %v25041_v61  ;;  %vm25046_vm11 = vmmov %vm25042_vm0  ;;  %17640 = vmatprep.subr.msk.mxu0 %vm20724_vm12, %v1825_v54  ;;  %v20882_v61 = vpop.permute.xlu1 %4759  ;;  %v25052_v54 = vld [vmem:[#allocation36_spill] sm:$0xff] }
 0x43f   :  { %v1832_v24 = vsel %vm25046_vm11, %v20215_v35, %v25033_v25  ;;  %vm25047_vm2 = vmmov %vm25028_vm1  ;;  %17641 = vmatpush1.msk.msra.mxu0 %vm20724_vm12, %v1827_v32  ;;  %25050 = vst [vmem:[#allocation26_spill] sm:$0xff] %v20882_v61  ;;  %6321 = vrot.lane.b32.xlu0 %v25052_v54, %s18401_s2  ;;  %v20892_v25 = vld [vmem:[#allocation3 + $0x8] sm:$0xff]  ;;  %v25054_v32 = vld [vmem:[#allocation63_spill] sm:$0xff] }
 0x440   :  { %17624 = vmatmul.mubr.msk.f32.vlgmr.msra.gmra.mxu1 %vm25047_vm2, %v20832_v41  ;;  %vm25049_vm8 = vmmov %vm25042_vm0  ;;  %v20901_v61 = vpop.permute.xlu0 %5508  ;;  %6317 = vrot.lane.b32.xlu1 %v19954_v3, %s18401_s2 }
 0x441   :  { %17633 = vmatpush1.msk.msra.mxu1 %vm20724_vm12, %v1832_v24  ;;  %v1829_v60 = vsel %vm25049_vm8, %v25048_v48, %v25044_v15  ;;  %vm25051_vm1 = vmmov %vm25042_vm0  ;;  %v25053_v15 = vld [vmem:[#allocation67_spill] sm:$0xff]  ;;  %25056 = vst [vmem:[#allocation46_spill] sm:$0xff] %v20901_v61  ;;  %2714 = vmatprep.mubr.f32.mxu1 %v24783_v7 }
 0x442   :  { %v1831_v35 = vsel %vm25051_vm1, %v25018_v29, %v25048_v48  ;;  %17634 = vmatprep.subr.msk.mxu1 %vm20724_vm12, %v1829_v60  ;;  %vm25055_vm4 = vmmov %vm25042_vm0  ;;  %v25057_v29 = vld [vmem:[#allocation65_spill] sm:$0xff]  ;;  %v25058_v48 = vld [vmem:[#allocation62_spill] sm:$0xff] }
 0x443   :  { %17635 = vmatpush1.msk.msra.mxu1 %vm20724_vm12, %v1831_v35  ;;  %v1818_v24 = vsel %vm25055_vm4, %v25054_v32, %v25053_v15  ;;  %vm25059_vm13 = vmmov %vm25042_vm0  ;;  %v20914_v35 = vpop.permute.xlu1 %4769 }
 0x444   :  { %17650 = vmatprep.subr.msk.mxu0 %vm20724_vm12, %v1818_v24  ;;  %v1822_v60 = vsel %vm25059_vm13, %v25058_v48, %v25057_v29  ;;  %vm25060_vm5 = vmmov %vm25047_vm2  ;;  %25061 = vst [vmem:[#allocation13_spill] sm:$0xff] %v20914_v35  ;;  %v25063_v24 = vld [vmem:[#allocation44_spill] sm:$0xff]  ;;  %v20923_v61 = vpop.permute.xlu0 %5504  ;;  %6327 = vrot.lane.b32.xlu1 %v20063_v16, %s18401_s2 }
 0x445   :  { %17631 = vmatmul.mubr.msk.f32.gmra.mxu0 %vm25060_vm5, %v20892_v25  ;;  %17644 = vmatprep.subr.msk.mxu1 %vm20724_vm12, %v1822_v60  ;;  %vm25062_vm14 = vmmov %vm25047_vm2  ;;  %25064 = vst [vmem:[#allocation24_spill] sm:$0xff] %v20923_v61  ;;  %v25069_v61 = vld [vmem:[#allocation55_spill] sm:$0xff] }
 0x446   :  { %17625 = vmatmul.mubr.msk.f32.gmra.mxu1 %vm25062_vm14, %v20892_v25  ;;  %6331 = vrot.lane.b32.xlu0 %v25063_v24, %s18401_s2  ;;  %vm25065_vm15 = vmmov %vm25042_vm0 }
 0x447   :  { %2939 = vmatprep.mubr.f32.mxu0 %v24783_v7  ;;  %2862 = vmatprep.mubr.f32.mxu1 %v24783_v7  ;;  %v1820_v60 = vsel %vm25065_vm15, %v25057_v29, %v25054_v32  ;;  %vm25066_vm0 = vmmov %vm25047_vm2  ;;  %v20932_v35 = vpop.permute.xlu1 %4767 }
 0x448   :  { %25067 = vst [vmem:[#allocation39_spill] sm:$0xff] %v20932_v35  ;;  %vm25070_vm3 = vmmov %vm25051_vm1  ;;  %v25075_v35 = vld [vmem:[#allocation54_spill] sm:$0xff]  ;;  %6325 = vrot.lane.b32.xlu1 %v20019_v20, %s18401_s2 }
 0x449   :  { %17642 = vmatmul.mubr.msk.f32.vlgmr.msra.gmra.mxu0 %vm25066_vm0, %v20832_v41  ;;  %v1817_v1 = vsel %vm25070_vm3, %v25069_v61, %v25068_v10  ;;  %vm25072_vm11 = vmmov %vm25051_vm1 }
 0x44a   :  { %17651 = vmatpush1.msk.msra.mxu0 %vm20724_vm12, %v1820_v60  ;;  %v1819_v32 = vsel %vm25072_vm11, %v25071_v5, %v25069_v61  ;;  %vm25073_vm2 = vmmov %vm25051_vm1  ;;  %v20954_v60 = vpop.permute.xlu0 %3325  ;;  %v1821_v61 = vsel %vm25051_vm1, %v25075_v35, %v25071_v5  ;;  %2945 = vmatprep.mubr.f32.mxu0 %v24783_v7  ;;  %v25078_v5 = vld [vmem:[#allocation75_spill] sm:$0xff] }
 0x44b   :  { %v1824_v29 = vsel %vm25073_vm2, %v25029_v19, %v25058_v48  ;;  %vm25074_vm8 = vmmov %vm25066_vm0  ;;  %17652 = vmatprep.subr.msk.mxu0 %vm20724_vm12, %v1817_v1  ;;  %v25077_v1 = vld [vmem:[#allocation38_spill] sm:$0xff]  ;;  %v1800_v48 = vpop.permute.xlu1 %1799 }
 0x44c   :  { %17636 = vmatmul.mubr.msk.f32.vlgmr.msra.gmra.mxu1 %vm25074_vm8, %v20832_v41  ;;  %17653 = vmatpush1.msk.msra.mxu0 %vm20724_vm12, %v1819_v32  ;;  %vm25076_vm4 = vmmov %vm25051_vm1 }
 0x44d   :  { %17645 = vmatpush1.msk.msra.mxu1 %vm20724_vm12, %v1824_v29  ;;  %v1823_v19 = vsel %vm25076_vm4, %v25040_v6, %v25075_v35  ;;  %6329 = vrot.lane.b32.xlu0 %v25077_v1, %s18401_s2  ;;  %vm25079_vm13 = vmmov %vm25051_vm1  ;;  %v25082_v35 = vld [vmem:[#allocation74_spill] sm:$0xff] }
 0x44e   :  { %17646 = vmatprep.subr.msk.mxu1 %vm20724_vm12, %v1821_v61  ;;  %v1810_v32 = vsel %vm25079_vm13, %v25078_v5, %v20693_v40  ;;  %2868 = vmatprep.mubr.f32.mxu1 %v24783_v7  ;;  %v20982_v6 = vpop.permute.xlu0 %5510  ;;  %vm25081_vm5 = vmmov %vm25066_vm0  ;;  %v25085_v40 = vld [vmem:[#allocation47_spill] sm:$0xff] }
 0x44f   :  { %17647 = vmatpush1.msk.msra.mxu1 %vm20724_vm12, %v1823_v19  ;;  %17662 = vmatprep.subr.msk.mxu0 %vm20724_vm12, %v1810_v32  ;;  %25080 = vst [vmem:[#allocation34_spill] sm:$0xff] %v20982_v6  ;;  %vm25083_vm14 = vmmov %vm25051_vm1  ;;  %v20995_v61 = vpop.permute.xlu1 %4771  ;;  %v3359_v19 = vsel %vm77_vm6, 1, %v24899_v38 }
 0x450   :  { %17643 = vmatmul.mubr.msk.f32.gmra.mxu0 %vm25081_vm5, %v20892_v25  ;;  %v1814_v29 = vsel %vm25083_vm14, %v25082_v35, %v1800_v48  ;;  %vm25084_vm15 = vmmov %vm25066_vm0  ;;  %25086 = vst [vmem:[#allocation33_spill] sm:$0xff] %v20995_v61  ;;  %6335 = vrot.lane.b32.xlu1 %v20074_v43, %s18401_s2 }
 0x451   :  { %17637 = vmatmul.mubr.msk.f32.gmra.mxu1 %vm25084_vm15, %v20892_v25  ;;  %6339 = vrot.lane.b32.xlu0 %v25085_v40, %s18401_s2  ;;  %vm25088_vm3 = vmmov %vm25051_vm1  ;;  %vm25107_vm15 = vcmp.lt.s32.totalorder %v18882_v27, 1 }
 0x452   :  { %3093 = vmatprep.mubr.f32.mxu0 %v24783_v7  ;;  %3016 = vmatprep.mubr.f32.mxu1 %v24783_v7  ;;  %v21004_v32 = vpop.permute.xlu0 %5516  ;;  %v1812_v6 = vsel %vm25088_vm3, %v1800_v48, %v25078_v5  ;;  %vm25089_vm11 = vmmov %vm25066_vm0 }
 0x453   :  { %17656 = vmatprep.subr.msk.mxu1 %vm20724_vm12, %v1814_v29  ;;  %25087 = vst [vmem:[#allocation32_spill] sm:$0xff] %v21004_v32  ;;  %v21017_v61 = vpop.permute.xlu1 %5512  ;;  %v3363_v29 = vrot.slane %v3359_v19, %v20120_v18  ;;  %vm25091_vm6 = vmmov %vm25051_vm1 }
 0x454   :  { %17654 = vmatmul.mubr.msk.f32.vlgmr.msra.gmra.mxu0 %vm25066_vm0, %v20832_v41  ;;  %25090 = vst [vmem:[#allocation36_spill] sm:$0xff] %v21017_v61  ;;  %v1816_v51 = vsel %vm25091_vm6, %v25053_v15, %v25082_v35  ;;  %vm25093_vm2 = vmmov %vm25066_vm0  ;;  %6333 = vrot.lane.b32.xlu1 %v20026_v9, %s18401_s2  ;;  %v25094_v15 = vld [vmem:[#allocation72_spill] sm:$0xff] }
 0x455   :  { %17648 = vmatmul.mubr.msk.f32.vlgmr.msra.gmra.mxu1 %vm25089_vm11, %v20832_v41  ;;  %6337 = vrot.lane.b32.xlu0 %v20046_v13, %s18401_s2  ;;  %vm25095_vm8 = vmmov %vm25051_vm1  ;;  %vm21050_vm13 = vcmp.eq.s32.totalorder %v3363_v29, 1 }
 0x456   :  { %3099 = vmatprep.mubr.f32.mxu0 %v24783_v7  ;;  %3022 = vmatprep.mubr.f32.mxu1 %v24783_v7  ;;  %v21030_v48 = vpop.permute.xlu0 %5514  ;;  %v1809_v5 = vsel %vm25095_vm8, %v25094_v15, %v20530_v33  ;;  %vm25096_vm1 = vmmov %vm25066_vm0 }
 0x457   :  { %17663 = vmatpush1.msk.msra.mxu0 %vm20724_vm12, %v1812_v6  ;;  %17657 = vmatpush1.msk.msra.mxu1 %vm20724_vm12, %v1816_v51  ;;  %25092 = vst [vmem:[#allocation67_spill] sm:$0xff] %v21030_v48  ;;  %v25097_v51 = vld [vmem:[#allocation78_spill] sm:$0xff]  ;;  %v25098_v6 = vld [vmem:[#allocation69_spill] sm:$0xff]  ;;  %vm25099_vm4 = vmmov %vm25088_vm3  ;;  %v21048_v19 = vpop.permute.xlu1 %5506 }
 0x458   :  { %17655 = vmatmul.mubr.msk.f32.gmra.mxu0 %vm25093_vm2, %v20892_v25  ;;  %17664 = vmatprep.subr.msk.mxu0 %vm20724_vm12, %v1809_v5  ;;  %v1813_v35 = vsel %vm25099_vm4, %v25098_v6, %v25097_v51  ;;  %25100 = vst [vmem:[#allocation63_spill] sm:$0xff] %v21048_v19  ;;  %vm25103_vm5 = vmmov %vm25088_vm3  ;;  %vm25123_vm4 = vcmp.lt.s32.totalorder %v18882_v27, 126 }
 0x459   :  { %17649 = vmatmul.mubr.msk.f32.gmra.mxu1 %vm25096_vm1, %v20892_v25  ;;  %v1811_v33 = vsel %vm25103_vm5, %v25097_v51, %v25094_v15  ;;  %6347 = vrot.lane.b32.xlu0 %v20352_v21, %s18401_s2  ;;  %vm25104_vm14 = vmmov %vm25088_vm3  ;;  %v25105_v15 = vld [vmem:[#allocation16_spill] sm:$0xff]  ;;  %v25106_v51 = vld [vmem:[#allocation50_spill] sm:$0xff] }
 0x45a   :  { %17658 = vmatprep.subr.msk.mxu1 %vm20724_vm12, %v1813_v35  ;;  %v1815_v5 = vsel %vm25104_vm14, %v25068_v10, %v25098_v6  ;;  %17665 = vmatpush1.msk.msra.mxu0 %vm20724_vm12, %v1811_v33  ;;  %v5525_v29 = vpop.permute.xlu0 %5524  ;;  %v3352_v35 = vsel %vm25107_vm15, %v25106_v51, %v25105_v15  ;;  %v25109_v6 = vld [vmem:[#allocation52_spill] sm:$0xff]  ;;  %vm25110_vm3 = vmmov %vm25107_vm15  ;;  %v25112_v33 = vld [vmem:[#allocation15_spill] sm:$0xff] }
 0x45b   :  { %3247 = vmatprep.mubr.f32.mxu0 %v24783_v7  ;;  %17659 = vmatpush1.msk.msra.mxu1 %vm20724_vm12, %v1815_v5  ;;  %v21080_v10 = vpop.permute.xlu1 %5502  ;;  %v3354_v46 = vsel %vm25110_vm3, %v25109_v6, %v25106_v51  ;;  %vm25111_vm12 = vmmov %vm25066_vm0  ;;  %v25115_v51 = vld [vmem:[#allocation18_spill] sm:$0xff] }
 0x45c   :  { %3170 = vmatprep.mubr.f32.mxu1 %v24783_v7  ;;  %17666 = vmatmul.mubr.msk.f32.vlgmr.msra.gmra.mxu0 %vm25066_vm0, %v20832_v41  ;;  %25108 = vst [vmem:[#allocation65_spill] sm:$0xff] %v21080_v10  ;;  %vm25113_vm11 = vmmov %vm25110_vm3  ;;  %v25116_v10 = vld [vmem:[#allocation31_spill] sm:$0xff] }
 0x45d   :  { %17674 = vmatprep.subr.msk.mxu0 %vm21050_vm13, %v3352_v35  ;;  %6343 = vrot.lane.b32.xlu1 %v20171_v17, %s18401_s2  ;;  %v3356_v5 = vsel %vm25113_vm11, %v25112_v33, %v25109_v6  ;;  %vm25114_vm6 = vmmov %vm25110_vm3  ;;  %v25118_v6 = vld [vmem:[#allocation45_spill] sm:$0xff] }
 0x45e   :  { %17660 = vmatmul.mubr.msk.f32.vlgmr.msra.gmra.mxu1 %vm25111_vm12, %v20832_v41  ;;  %v3358_v35 = vsel %vm25114_vm6, %v20954_v60, %v25112_v33  ;;  %17668 = vmatprep.subr.msk.mxu1 %vm21050_vm13, %v3356_v5  ;;  %vm25117_vm2 = vmmov %vm25110_vm3  ;;  %v21106_v19 = vpop.permute.xlu0 %5522  ;;  %v25121_v5 = vld [vmem:[#allocation42_spill] sm:$0xff] }
 0x45f   :  { %17675 = vmatpush1.msk.msra.mxu0 %vm21050_vm13, %v3354_v46  ;;  %v3351_v41 = vsel %vm25117_vm2, %v25116_v10, %v25115_v51  ;;  %17669 = vmatpush1.msk.msra.mxu1 %vm21050_vm13, %v3358_v35  ;;  %vm25119_vm8 = vmmov %vm25117_vm2  ;;  %v25120_v46 = vld [vmem:[#allocation30_spill] sm:$0xff]  ;;  %v5521_v34 = vpop.permute.xlu1 %5520 }
 0x460   :  { %17676 = vmatprep.subr.msk.mxu0 %vm21050_vm13, %v3351_v41  ;;  %v3353_v33 = vsel %vm25119_vm8, %v25118_v6, %v25116_v10  ;;  %6345 = vrot.lane.b32.xlu0 %v25120_v46, %s18401_s2  ;;  %vm25122_vm1 = vmmov %vm25117_vm2  ;;  %v21129_v10 = vsel %vm25123_vm4, %v5521_v34, %v5525_v29 }
 0x461   :  { %3253 = vmatprep.mubr.f32.mxu0 %v24783_v7  ;;  %v3355_v55 = vsel %vm25122_vm1, %v25121_v5, %v25118_v6  ;;  %17677 = vmatpush1.msk.msra.mxu0 %vm21050_vm13, %v3353_v33  ;;  %25124 = vst [vmem:[#allocation62_spill] sm:$0xff] %v21129_v10  ;;  %vm25125_vm5 = vmmov %vm25123_vm4  ;;  %v25130_v6 = vld [vmem:[#allocation43_spill] sm:$0xff] }
 0x462   :  { %17670 = vmatprep.subr.msk.mxu1 %vm21050_vm13, %v3355_v55  ;;  %v21134_v35 = vsel %vm25125_vm5, %v21004_v32, %v5521_v34  ;;  %vm25127_vm14 = vmmov %vm25122_vm1  ;;  %3176 = vmatprep.mubr.f32.mxu1 %v24783_v7  ;;  %v25129_v55 = vld [vmem:[#allocation53_spill] sm:$0xff]  ;;  %v21147_v10 = vpop.permute.xlu0 %5532  ;;  %v25134_v34 = vld [vmem:[#allocation28_spill] sm:$0xff] }
 0x463   :  { %25126 = vst [vmem:[#allocation44_spill] sm:$0xff] %v21134_v35  ;;  %v3357_v41 = vsel %vm25127_vm14, %v20552_v2, %v25121_v5  ;;  %vm25128_vm15 = vmmov %vm25066_vm0  ;;  %6341 = vrot.lane.b32.xlu1 %v20130_v31, %s18401_s2  ;;  %v25135_v5 = vld [vmem:[#allocation29_spill] sm:$0xff]  ;;  %v5519_v12 = vpop.permute.xlu1 %5518 }
 0x464   :  { %17667 = vmatmul.mubr.msk.f32.gmra.mxu0 %vm25128_vm15, %v20892_v25  ;;  %vm25131_vm0 = vmmov %vm25122_vm1  ;;  %25132 = vst [vmem:[#allocation59_spill] sm:$0xff] %v21147_v10  ;;  %17671 = vmatpush1.msk.msra.mxu1 %vm21050_vm13, %v3357_v41  ;;  %v21161_v35 = vld [vmem:[#allocation3 + $0x20] sm:$0xff] }
 0x465   :  { %v3344_v33 = vsel %vm25131_vm0, %v25130_v6, %v25129_v55  ;;  %vm25133_vm3 = vmmov %vm25111_vm12  ;;  %6355 = vrot.lane.b32.xlu0 %v20257_v26, %s18401_s2  ;;  %3544 = vmatprep.mubr.f32.mxu0 %v24783_v7 }
 0x466   :  { %17686 = vmatprep.subr.msk.mxu0 %vm21050_vm13, %v3344_v33  ;;  %17661 = vmatmul.mubr.msk.f32.gmra.mxu1 %vm25133_vm3, %v20892_v25  ;;  %vm25136_vm12 = vmmov %vm25131_vm0  ;;  %v21179_v33 = vpop.permute.xlu0 %5530 }
 0x467   :  { %v3348_v32 = vsel %vm25136_vm12, %v25135_v5, %v25134_v34  ;;  %vm25137_vm11 = vmmov %vm25123_vm4  ;;  %3467 = vmatprep.mubr.f32.mxu1 %v24783_v7  ;;  %25141 = vst [vmem:[#allocation54_spill] sm:$0xff] %v21179_v33  ;;  %6351 = vrot.lane.b32.xlu1 %v20202_v11, %s18401_s2 }
 0x468   :  { %17680 = vmatprep.subr.msk.mxu1 %vm21050_vm13, %v3348_v32  ;;  %v21170_v41 = vsel %vm25137_vm11, %v5519_v12, %v21106_v19  ;;  %vm25139_vm6 = vmmov %vm25123_vm4 }
 0x469   :  { %25138 = vst [vmem:[#allocation55_spill] sm:$0xff] %v21170_v41  ;;  %v21175_v25 = vsel %vm25139_vm6, %v21030_v48, %v5519_v12  ;;  %vm25142_vm2 = vmmov %vm25131_vm0  ;;  %v25144_v41 = vld [vmem:[#allocation21_spill] sm:$0xff]  ;;  %7090 = vrot.lane.b32.xlu0 %v19927_v37, %s18400_s23 }
 0x46a   :  { %25140 = vst [vmem:[#allocation57_spill] sm:$0xff] %v21175_v25  ;;  %v3346_v32 = vsel %vm25142_vm2, %v25134_v34, %v25130_v6  ;;  %vm25143_vm8 = vmmov %vm25133_vm3  ;;  %v25147_v25 = vld [vmem:[#allocation35_spill] sm:$0xff]  ;;  %v5529_v6 = vpop.permute.xlu1 %5528 }
 0x46b   :  { %17678 = vmatmul.mubr.msk.f32.vlgmr.msra.gmra.mxu0 %vm25143_vm8, %v21161_v35  ;;  %vm25146_vm1 = vmmov %vm25131_vm0  ;;  %6349 = vrot.lane.b32.xlu1 %v20161_v59, %s18401_s2 }
 0x46c   :  { %v3345_v12 = vsel %vm25146_vm1, %v25145_v42, %v25144_v41  ;;  %17687 = vmatpush1.msk.msra.mxu0 %vm21050_vm13, %v3346_v32  ;;  %vm25148_vm4 = vmmov %vm25131_vm0  ;;  %3550 = vmatprep.mubr.f32.mxu0 %v24783_v7 }
 0x46d   :  { %v3343_v48 = vsel %vm25148_vm4, %v25144_v41, %v25147_v25  ;;  %vm25149_vm5 = vmmov %vm25131_vm0  ;;  %7086 = vrot.lane.b32.xlu0 %v19903_v0, %s18400_s23 }
 0x46e   :  { %v3350_v34 = vsel %vm25149_vm5, %v25105_v15, %v25135_v5  ;;  %vm25150_vm14 = vmmov %vm25133_vm3  ;;  %17688 = vmatprep.subr.msk.mxu0 %vm21050_vm13, %v3343_v48  ;;  %v25155_v15 = vld [vmem:[#allocation23_spill] sm:$0xff]  ;;  %v21224_v48 = vpop.permute.xlu0 %5540 }
 0x46f   :  { %17672 = vmatmul.mubr.msk.f32.vlgmr.msra.gmra.mxu1 %vm25150_vm14, %v21161_v35  ;;  %vm25151_vm15 = vmmov %vm25139_vm6  ;;  %17689 = vmatpush1.msk.msra.mxu0 %vm21050_vm13, %v3345_v12  ;;  %v25159_v12 = vld [vmem:[#allocation66_spill] sm:$0xff] }
 0x470   :  { %v21210_v32 = vsel %vm25151_vm15, %v5529_v6, %v21147_v10  ;;  %vm25153_vm0 = vmmov %vm25139_vm6  ;;  %17681 = vmatpush1.msk.msra.mxu1 %vm21050_vm13, %v3350_v34  ;;  %v3318_v34 = vpop.permute.xlu1 %3317  ;;  %3473 = vmatprep.mubr.f32.mxu1 %v24783_v7 }
 0x471   :  { %25152 = vst [vmem:[#allocation38_spill] sm:$0xff] %v21210_v32  ;;  %v21214_v41 = vsel %vm25153_vm0, %v5525_v29, %v5529_v6  ;;  %vm25156_vm3 = vmmov %vm25146_vm1  ;;  %v21234_v29 = vld [vmem:[#allocation3 + $0x28] sm:$0xff]  ;;  %6353 = vrot.lane.b32.xlu1 %v20225_v45, %s18401_s2  ;;  %7092 = vrot.lane.b32.xlu0 %v19871_v23, %s18400_s23 }
 0x472   :  { %25154 = vst [vmem:[#allocation75_spill] sm:$0xff] %v21214_v41  ;;  %v3347_v5 = vsel %vm25156_vm3, %v25155_v15, %v25145_v42  ;;  %vm25157_vm12 = vmmov %vm25146_vm1  ;;  %v25158_v42 = vld [vmem:[#allocation70_spill] sm:$0xff] }
 0x473   :  { %v3349_v32 = vsel %vm25157_vm12, %v25115_v51, %v25155_v15  ;;  %17682 = vmatprep.subr.msk.mxu1 %vm21050_vm13, %v3347_v5  ;;  %vm25160_vm11 = vmmov %vm25146_vm1  ;;  %v25161_v51 = vld [vmem:[#allocation68_spill] sm:$0xff] }
 0x474   :  { %17683 = vmatpush1.msk.msra.mxu1 %vm21050_vm13, %v3349_v32  ;;  %v3336_v6 = vsel %vm25160_vm11, %v25159_v12, %v25158_v42  ;;  %v25162_v15 = vld [vmem:[#allocation64_spill] sm:$0xff]  ;;  %vm25163_vm6 = vmmov %vm25146_vm1  ;;  %v21254_v32 = vpop.permute.xlu0 %5538 }
 0x475   :  { %17698 = vmatprep.subr.msk.mxu0 %vm21050_vm13, %v3336_v6  ;;  %v3340_v5 = vsel %vm25163_vm6, %v25162_v15, %v25161_v51  ;;  %vm25164_vm2 = vmmov %vm25143_vm8  ;;  %v5527_v6 = vpop.permute.xlu1 %5526  ;;  %7094 = vrot.lane.b32.xlu1 %v19910_v8, %s18400_s23 }
 0x476   :  { %17679 = vmatmul.mubr.msk.f32.gmra.mxu0 %vm25164_vm2, %v21234_v29  ;;  %17692 = vmatprep.subr.msk.mxu1 %vm21050_vm13, %v3340_v5  ;;  %vm25165_vm8 = vmmov %vm25164_vm2 }
 0x477   :  { %17673 = vmatmul.mubr.msk.f32.gmra.mxu1 %vm25165_vm8, %v21234_v29  ;;  %3698 = vmatprep.mubr.f32.mxu0 %v24783_v7  ;;  %vm25166_vm1 = vmmov %vm25153_vm0 }
 0x478   :  { %3621 = vmatprep.mubr.f32.mxu1 %v24783_v7  ;;  %v21267_v5 = vsel %vm25166_vm1, %v5527_v6, %v21179_v33  ;;  %vm25168_vm4 = vmmov %vm25153_vm0  ;;  %v21280_v53 = vpop.permute.xlu0 %5548  ;;  %v25173_v33 = vld [vmem:[#allocation58_spill] sm:$0xff]  ;;  %7098 = vrot.lane.b32.xlu0 %v19934_v39, %s18400_s23 }
 0x479   :  { %25167 = vst [vmem:[#allocation74_spill] sm:$0xff] %v21267_v5  ;;  %v21272_v41 = vsel %vm25168_vm4, %v21106_v19, %v5527_v6  ;;  %vm25170_vm5 = vmmov %vm25156_vm3  ;;  %v25172_v5 = vld [vmem:[#allocation61_spill] sm:$0xff]  ;;  %v25175_v6 = vld [vmem:[#allocation60_spill] sm:$0xff]  ;;  %7088 = vrot.lane.b32.xlu1 %v19883_v44, %s18400_s23 }
 0x47a   :  { %25169 = vst [vmem:[#allocation47_spill] sm:$0xff] %v21272_v41  ;;  %v3338_v10 = vsel %vm25170_vm5, %v25161_v51, %v25159_v12  ;;  %vm25171_vm14 = vmmov %vm25164_vm2  ;;  %v25179_v41 = vld [vmem:[#allocation56_spill] sm:$0xff] }
 0x47b   :  { %17690 = vmatmul.mubr.msk.f32.vlgmr.msra.gmra.mxu0 %vm25171_vm14, %v21161_v35  ;;  %vm25174_vm15 = vmmov %vm25156_vm3 }
 0x47c   :  { %17699 = vmatpush1.msk.msra.mxu0 %vm21050_vm13, %v3338_v10  ;;  %v3335_v19 = vsel %vm25174_vm15, %v25173_v33, %v25172_v5  ;;  %vm25176_vm0 = vmmov %vm25156_vm3  ;;  %v21302_v10 = vpop.permute.xlu1 %5536  ;;  %3704 = vmatprep.mubr.f32.mxu0 %v24783_v7 }
 0x47d   :  { %v3337_v12 = vsel %vm25176_vm0, %v25175_v6, %v25173_v33  ;;  %vm25177_vm3 = vmmov %vm25176_vm0  ;;  %17700 = vmatprep.subr.msk.mxu0 %vm21050_vm13, %v3335_v19  ;;  %v21326_v19 = vpop.permute.xlu0 %5546  ;;  %7096 = vrot.lane.b32.xlu0 %v19898_v50, %s18400_s23 }
 0x47e   :  { %v3342_v51 = vsel %vm25177_vm3, %v25129_v55, %v25162_v15  ;;  %vm25178_vm12 = vmmov %vm25164_vm2  ;;  %17701 = vmatpush1.msk.msra.mxu0 %vm21050_vm13, %v3337_v12  ;;  %7084 = vrot.lane.b32.xlu1 %v19880_v52, %s18400_s23 }
 0x47f   :  { %17684 = vmatmul.mubr.msk.f32.vlgmr.msra.gmra.mxu1 %vm25178_vm12, %v21161_v35  ;;  %vm25180_vm11 = vmmov %vm25176_vm0 }
 0x480   :  { %17693 = vmatpush1.msk.msra.mxu1 %vm21050_vm13, %v3342_v51  ;;  %v3339_v33 = vsel %vm25180_vm11, %v25179_v41, %v25175_v6  ;;  %vm25181_vm6 = vmmov %vm25166_vm1  ;;  %v25184_v6 = vld [vmem:[#allocation77_spill] sm:$0xff]  ;;  %3627 = vmatprep.mubr.f32.mxu1 %v24783_v7 }
 0x481   :  { %v21316_v55 = vsel %vm25181_vm6, %v21302_v10, %v21224_v48  ;;  %vm25183_vm2 = vmmov %vm25176_vm0  ;;  %17694 = vmatprep.subr.msk.mxu1 %vm21050_vm13, %v3339_v33  ;;  %v21357_v33 = vpop.permute.xlu0 %5554  ;;  %7106 = vrot.lane.b32.xlu0 %v19999_v22, %s18400_s23 }
 0x482   :  { %25182 = vst [vmem:[#allocation72_spill] sm:$0xff] %v21316_v55  ;;  %v3341_v15 = vsel %vm25183_vm2, %v25147_v25, %v25179_v41  ;;  %vm25185_vm8 = vmmov %vm25176_vm0  ;;  %v21338_v25 = vpop.permute.xlu1 %5534  ;;  %v25187_v41 = vld [vmem:[#allocation76_spill] sm:$0xff]  ;;  %7102 = vrot.lane.b32.xlu1 %v19983_v14, %s18400_s23 }
 0x483   :  { %17695 = vmatpush1.msk.msra.mxu1 %vm21050_vm13, %v3341_v15  ;;  %v3328_v12 = vsel %vm25185_vm8, %v25184_v6, %v20954_v60  ;;  %vm25186_vm1 = vmmov %vm25178_vm12 }
 0x484   :  { %17710 = vmatprep.subr.msk.mxu0 %vm21050_vm13, %v3328_v12  ;;  %17691 = vmatmul.mubr.msk.f32.gmra.mxu0 %vm25186_vm1, %v21234_v29  ;;  %vm25188_vm4 = vmmov %vm25176_vm0  ;;  %v3330_v12 = vsel %vm25176_vm0, %v3318_v34, %v25184_v6 }
 0x485   :  { %v3332_v51 = vsel %vm25188_vm4, %v25187_v41, %v3318_v34  ;;  %vm25189_vm5 = vmmov %vm25181_vm6  ;;  %3852 = vmatprep.mubr.f32.mxu0 %v24783_v7  ;;  %7104 = vrot.lane.b32.xlu0 %v19963_v30, %s18400_s23 }
 0x486   :  { %v21351_v60 = vsel %vm25189_vm5, %v21338_v25, %v21254_v32  ;;  %vm25191_vm14 = vmmov %vm25186_vm1  ;;  %17704 = vmatprep.subr.msk.mxu1 %vm21050_vm13, %v3332_v51  ;;  %v21363_v15 = vpop.permute.xlu1 %5544  ;;  %v21382_v51 = vpop.permute.xlu0 %6299  ;;  %7100 = vrot.lane.b32.xlu1 %v19947_v49, %s18400_s23 }
 0x487   :  { %25190 = vst [vmem:[#allocation78_spill] sm:$0xff] %v21351_v60  ;;  %17685 = vmatmul.mubr.msk.f32.gmra.mxu1 %vm25191_vm14, %v21234_v29  ;;  %vm25192_vm15 = vmmov %vm25186_vm1 }
 0x488   :  { %3775 = vmatprep.mubr.f32.mxu1 %v24783_v7  ;;  %17702 = vmatmul.mubr.msk.f32.vlgmr.msra.gmra.mxu0 %vm25192_vm15, %v21161_v35  ;;  %vm25193_vm3 = vmmov %vm25189_vm5  ;;  %25195 = vst [vmem:[#allocation69_spill] sm:$0xff] %v21382_v51 }
 0x489   :  { %v21376_v60 = vsel %vm25193_vm3, %v21363_v15, %v21280_v53  ;;  %vm25194_vm12 = vmmov %vm25186_vm1  ;;  %3858 = vmatprep.mubr.f32.mxu0 %v24783_v7  ;;  %17711 = vmatpush1.msk.msra.mxu0 %vm21050_vm13, %v3330_v12 }
 0x48a   :  { %vm25196_vm11 = vmmov %vm25176_vm0  ;;  %v21394_v34 = vpop.permute.xlu1 %5542  ;;  %v21412_v12 = vpop.permute.xlu0 %6295  ;;  %7114 = vrot.lane.b32.xlu0 %v20006_v47, %s18400_s23  ;;  %7110 = vrot.lane.b32.xlu1 %v19990_v63, %s18400_s23 }
 0x48b   :  { %17696 = vmatmul.mubr.msk.f32.vlgmr.msra.gmra.mxu1 %vm25194_vm12, %v21161_v35  ;;  %v3334_v55 = vsel %vm25196_vm11, %v25158_v42, %v25187_v41  ;;  %vm25197_vm6 = vmmov %vm25186_vm1  ;;  %v25198_v42 = vld [vmem:[#allocation73_spill] sm:$0xff] }
 0x48c   :  { %3781 = vmatprep.mubr.f32.mxu1 %v24783_v7  ;;  %17705 = vmatpush1.msk.msra.mxu1 %vm21050_vm13, %v3334_v55  ;;  %vm25199_vm2 = vmmov %vm25176_vm0  ;;  %v25201_v55 = vld [vmem:[#allocation71_spill] sm:$0xff] }
 0x48d   :  { %17703 = vmatmul.mubr.msk.f32.gmra.mxu0 %vm25197_vm6, %v21234_v29  ;;  %v3327_v6 = vsel %vm25199_vm2, %v25198_v42, %v20552_v2  ;;  %vm25200_vm8 = vmmov %vm25186_vm1 }
 0x48e   :  { %17712 = vmatprep.subr.msk.mxu0 %vm21050_vm13, %v3327_v6  ;;  %vm25202_vm1 = vmmov %vm25176_vm0  ;;  %4006 = vmatprep.mubr.f32.mxu0 %v24783_v7  ;;  %v21429_v6 = vpop.permute.xlu1 %5552 }
 0x48f   :  { %17697 = vmatmul.mubr.msk.f32.gmra.mxu1 %vm25200_vm8, %v21234_v29  ;;  %v3331_v41 = vsel %vm25202_vm1, %v25201_v55, %v20588_v62  ;;  %vm25203_vm4 = vmmov %vm25176_vm0  ;;  %7112 = vrot.lane.b32.xlu0 %v25052_v54, %s18400_s23 }
 0x490   :  { %v3329_v51 = vsel %vm25203_vm4, %v20588_v62, %v25198_v42  ;;  %17706 = vmatprep.subr.msk.mxu1 %vm21050_vm13, %v3331_v41  ;;  %vm25204_vm5 = vmmov %vm25176_vm0  ;;  %3929 = vmatprep.mubr.f32.mxu1 %v24783_v7  ;;  %v21437_v62 = vpop.permute.xlu0 %6301 }
 0x491   :  { %v3333_v2 = vsel %vm25204_vm5, %v25172_v5, %v25201_v55  ;;  %17713 = vmatpush1.msk.msra.mxu0 %vm21050_vm13, %v3329_v51  ;;  %vm25205_vm14 = vmmov %vm25197_vm6  ;;  %7108 = vrot.lane.b32.xlu1 %v19954_v3, %s18400_s23  ;;  %v25223_v5 = vld [vmem:[#allocation51_spill] sm:$0xff] }
 0x492   :  { %17707 = vmatpush1.msk.msra.mxu1 %vm21050_vm13, %v3333_v2  ;;  %17714 = vmatmul.mubr.msk.f32.vlgmr.msra.gmra.mxu0 %vm25205_vm14, %v21161_v35  ;;  %vm25206_vm15 = vmmov %vm25197_vm6  ;;  %v21445_v61 = vpop.permute.xlu1 %5550  ;;  %v25228_v2 = vld [vmem:[#allocation25_spill] sm:$0xff] }
 0x493   :  { %4165 = vmatprep.subr.mxu0 %v19934_v39  ;;  %17708 = vmatmul.mubr.msk.f32.vlgmr.msra.gmra.mxu1 %vm25206_vm15, %v21161_v35  ;;  %vm25207_vm13 = vmmov %vm25193_vm3 }
 0x494   :  { %4088 = vmatprep.subr.mxu1 %v19927_v37  ;;  %4166 = vmatpush1.msra.mxu0 %v19910_v8  ;;  %v21453_v39 = vsel %vm25207_vm13, %v21445_v61, %v21357_v33  ;;  %v21458_v37 = vpop.permute.xlu0 %6307  ;;  %vm25208_vm0 = vmmov %vm25197_vm6 }
 0x495   :  { %4089 = vmatpush1.msra.mxu1 %v19903_v0  ;;  %4167 = vmatprep.subr.mxu0 %v19898_v50  ;;  %vm25209_vm3 = vmmov %vm25208_vm0 }
 0x496   :  { %4012 = vmatprep.mubr.f32.mxu0 %v24783_v7  ;;  %4090 = vmatprep.subr.mxu1 %v19883_v44  ;;  %v21465_v50 = vpop.permute.xlu1 %5560  ;;  %v21473_v44 = vld [vmem:[#allocation3 + $0x30] sm:$0xff]  ;;  %vm25210_vm12 = vmmov %vm25208_vm0 }
 0x497   :  { %4168 = vmatpush1.msra.mxu0 %v19871_v23  ;;  %3935 = vmatprep.mubr.f32.mxu1 %v24783_v7  ;;  %vm25211_vm11 = vmmov %vm25208_vm0 }
 0x498   :  { %17715 = vmatmul.mubr.msk.f32.gmra.mxu0 %vm25208_vm0, %v21234_v29  ;;  %4091 = vmatpush1.msra.mxu1 %v19880_v52  ;;  %v21475_v23 = vpop.permute.xlu0 %4765  ;;  %vm25212_vm6 = vmmov %vm25208_vm0 }
 0x499   :  { %4319 = vmatprep.subr.mxu0 %v20006_v47  ;;  %17709 = vmatmul.mubr.msk.f32.gmra.mxu1 %vm25209_vm3, %v21234_v29  ;;  %vm25213_vm2 = vmmov %vm25208_vm0  ;;  %v25222_v29 = vld [vmem:[#allocation22_spill] sm:$0xff] }
 0x49a   :  { %4242 = vmatprep.subr.mxu1 %v19999_v22  ;;  %4201 = vmatprep.mubr.f32.mxu0 %v24783_v7  ;;  %v21482_v52 = vpop.permute.xlu1 %5558  ;;  %v21501_v22 = vld [vmem:[#allocation3 + $0x38] sm:$0xff]  ;;  %vm25214_vm8 = vmmov %vm25208_vm0  ;;  %v4800_v55 = vsel %vm81_vm7, %v25222_v29, %v20601_v4 }
 0x49b   :  { %4124 = vmatprep.mubr.f32.mxu1 %v24783_v7  ;;  %7122 = vrot.lane.b32.xlu0 %v25063_v24, %s18400_s23  ;;  %vm25215_vm1 = vmmov %vm25208_vm0 }
 0x49c   :  { %17718 = vmatmul.mubr.msk.f32.vlgmr.msra.gmra.mxu0 %vm25210_vm12, %v21473_v44  ;;  %v21489_v0 = vpop.permute.xlu0 %4773  ;;  %7118 = vrot.lane.b32.xlu1 %v20063_v16, %s18400_s23  ;;  %vm25216_vm4 = vmmov %vm25208_vm0 }
 0x49d   :  { %4320 = vmatpush1.msra.mxu0 %v19990_v63  ;;  %17716 = vmatmul.mubr.msk.f32.vlgmr.msra.gmra.mxu1 %vm25211_vm11, %v21473_v44  ;;  %vm25217_vm5 = vmmov %vm25208_vm0 }
 0x49e   :  { %4321 = vmatprep.subr.mxu0 %v25052_v54  ;;  %4243 = vmatpush1.msra.mxu1 %v19983_v14  ;;  %v21496_v8 = vpop.permute.xlu1 %5562  ;;  %vm25218_vm14 = vmmov %vm25208_vm0 }
 0x49f   :  { %4322 = vmatpush1.msra.mxu0 %v19954_v3  ;;  %4244 = vmatprep.subr.mxu1 %v19963_v30  ;;  %vm25219_vm15 = vmmov %vm25208_vm0 }
 0x4a0   :  { %4207 = vmatprep.mubr.f32.mxu0 %v24783_v7  ;;  %4245 = vmatpush1.msra.mxu1 %v19947_v49  ;;  %v21505_v63 = vpop.permute.xlu0 %5556  ;;  %vm25224_vm3 = vmmov %vm25208_vm0 }
 0x4a1   :  { %4473 = vmatprep.subr.mxu0 %v25085_v40  ;;  %4130 = vmatprep.mubr.f32.mxu1 %v24783_v7  ;;  %vm25225_vm12 = vmmov %vm25208_vm0 }
 0x4a2   :  { %17719 = vmatmul.mubr.msk.f32.gmra.mxu0 %vm25212_vm6, %v21501_v22  ;;  %4396 = vmatprep.subr.mxu1 %v25063_v24  ;;  %v21512_v30 = vpop.permute.xlu1 %6303  ;;  %vm25227_vm11 = vmmov %vm25208_vm0 }
 0x4a3   :  { %17717 = vmatmul.mubr.msk.f32.gmra.mxu1 %vm25213_vm2, %v21501_v22  ;;  %4355 = vmatprep.mubr.f32.mxu0 %v24783_v7  ;;  %vm25233_vm6 = vmmov %vm25208_vm0 }
 0x4a4   :  { %v21521_v49 = vpop.permute.xlu0 %5564  ;;  %4278 = vmatprep.mubr.f32.mxu1 %v24783_v7  ;;  %7120 = vrot.lane.b32.xlu0 %v25077_v1, %s18400_s23  ;;  %vm25234_vm2 = vmmov %vm25208_vm0 }
 0x4a5   :  { %7116 = vrot.lane.b32.xlu1 %v20019_v20, %s18400_s23 }
 0x4a6   :  { %17722 = vmatmul.mubr.msk.f32.vlgmr.msra.gmra.mxu0 %vm25214_vm8, %v21473_v44  ;;  %v21526_v14 = vpop.permute.xlu1 %6297  ;;  %vm25235_vm8 = vmmov %vm25208_vm0 }
 0x4a7   :  { %4474 = vmatpush1.msra.mxu0 %v20074_v43  ;;  %17720 = vmatmul.mubr.msk.f32.vlgmr.msra.gmra.mxu1 %vm25215_vm1, %v21473_v44  ;;  %vm25239_vm1 = vmmov %vm25208_vm0 }
 0x4a8   :  { %4475 = vmatprep.subr.mxu0 %v20046_v13  ;;  %v21534_v3 = vpop.permute.xlu0 %6305  ;;  %4397 = vmatpush1.msra.mxu1 %v20063_v16  ;;  %v4807_v16 = vsel %vm81_vm7, 1, %v24899_v38 }
 0x4a9   :  { %4476 = vmatpush1.msra.mxu0 %v20026_v9  ;;  %4398 = vmatprep.subr.mxu1 %v25077_v1  ;;  %v4811_v24 = vrot.slane %v4807_v16, %v20120_v18  ;;  %v4801_v16 = vsel %vm81_vm7, %v25228_v2, %v20566_v58 }
 0x4aa   :  { %v21541_v47 = vpop.permute.xlu1 %6293  ;;  %4361 = vmatprep.mubr.f32.mxu0 %v24783_v7  ;;  %4399 = vmatpush1.msra.mxu1 %v20019_v20 }
 0x4ab   :  { %4627 = vmatprep.subr.mxu0 %v20257_v26  ;;  %4284 = vmatprep.mubr.f32.mxu1 %v24783_v7  ;;  %vm21576_vm13 = vcmp.eq.s32.totalorder %v4811_v24, 1 }
 0x4ac   :  { %v21547_v54 = vpop.permute.xlu0 %6315  ;;  %17723 = vmatmul.mubr.msk.f32.gmra.mxu0 %vm25216_vm4, %v21501_v22  ;;  %4550 = vmatprep.subr.mxu1 %v20352_v21  ;;  %vm25246_vm4 = vmmov %vm25208_vm0 }
 0x4ad   :  { %17721 = vmatmul.mubr.msk.f32.gmra.mxu1 %vm25217_vm5, %v21501_v22  ;;  %7130 = vrot.lane.b32.xlu0 %v25085_v40, %s18400_s23  ;;  %vm25247_vm5 = vmmov %vm25208_vm0 }
 0x4ae   :  { %4509 = vmatprep.mubr.f32.mxu0 %v24783_v7  ;;  %4432 = vmatprep.mubr.f32.mxu1 %v24783_v7  ;;  %v21564_v1 = vpop.permute.xlu1 %6311 }
 0x4af   :  { %7126 = vrot.lane.b32.xlu1 %v20074_v43, %s18400_s23  ;;  %v4798_v43 = vsel %vm81_vm7, %v20601_v4, %v20638_v57  ;;  %v4799_v4 = vsel %vm81_vm7, %v20566_v58, %v20620_v28  ;;  %v25229_v58 = vld [vmem:[#allocation85_spill] sm:$0xff] }
 0x4b0   :  { %17726 = vmatmul.mubr.msk.f32.vlgmr.msra.gmra.mxu0 %vm25218_vm14, %v21473_v44  ;;  %v21571_v20 = vpop.permute.xlu0 %6313  ;;  %vm25249_vm14 = vmmov %vm25208_vm0 }
 0x4b1   :  { %4628 = vmatpush1.msra.mxu0 %v20202_v11  ;;  %17724 = vmatmul.mubr.msk.f32.vlgmr.msra.gmra.mxu1 %vm25219_vm15, %v21473_v44  ;;  %vm25253_vm15 = vmmov %vm25208_vm0 }
 0x4b2   :  { %4629 = vmatprep.subr.mxu0 %v20225_v45  ;;  %4551 = vmatpush1.msra.mxu1 %v20171_v17  ;;  %v21591_v35 = vpop.permute.xlu1 %6309 }
 0x4b3   :  { %4630 = vmatpush1.msra.mxu0 %v20161_v59  ;;  %4552 = vmatprep.subr.mxu1 %v25120_v46 }
 0x4b4   :  { %7128 = vrot.lane.b32.xlu0 %v20046_v13, %s18400_s23  ;;  %4515 = vmatprep.mubr.f32.mxu0 %v24783_v7  ;;  %v4802_v13 = vsel %vm81_vm7, %v25223_v5, %v25222_v29  ;;  %v21604_v51 = vpop.permute.xlu0 %6323  ;;  %v25231_v29 = vld [vmem:[#allocation81_spill] sm:$0xff] }
 0x4b5   :  { %4553 = vmatpush1.msra.mxu1 %v20130_v31  ;;  %17738 = vmatprep.subr.msk.mxu0 %vm21576_vm13, %v4798_v43 }
 0x4b6   :  { %4438 = vmatprep.mubr.f32.mxu1 %v24783_v7  ;;  %17727 = vmatmul.mubr.msk.f32.gmra.mxu0 %vm25208_vm0, %v21501_v22  ;;  %v21614_v42 = vpop.permute.xlu1 %6319  ;;  %vm25256_vm0 = vcmp.lt.s32.totalorder %v18882_v27, 126 }
 0x4b7   :  { %17732 = vmatprep.subr.msk.mxu1 %vm21576_vm13, %v4802_v13  ;;  %7124 = vrot.lane.b32.xlu1 %v20026_v9, %s18400_s23  ;;  %v4797_v9 = vsel %vm81_vm7, %v20620_v28, %v20657_v36  ;;  %v4803_v28 = vsel %vm81_vm7, %v20617_v56, %v25228_v2  ;;  %v21684_v13 = vld [vmem:[#allocation3 + $0x40] sm:$0xff] }
 0x4b8   :  { %17725 = vmatmul.mubr.msk.f32.gmra.mxu1 %vm25224_vm3, %v21501_v22  ;;  %7138 = vrot.lane.b32.xlu0 %v20352_v21, %s18400_s23  ;;  %v25226_v21 = vld [vmem:[#allocation12_spill] sm:$0xff]  ;;  %vm25258_vm3 = vmmov %vm25239_vm1 }
 0x4b9   :  { %4663 = vmatprep.mubr.f32.mxu0 %v24783_v7  ;;  %4586 = vmatprep.mubr.f32.mxu1 %v24783_v7  ;;  %v4804_v41 = vsel %vm81_vm7, %v25226_v21, %v25223_v5  ;;  %v25232_v5 = vld [vmem:[#allocation79_spill] sm:$0xff] }
 0x4ba   :  { %17730 = vmatmul.mubr.msk.f32.vlgmr.msra.gmra.mxu0 %vm25225_vm12, %v21473_v44  ;;  %v21667_v43 = vpop.permute.xlu1 %6317  ;;  %v4796_v2 = vsel %vm81_vm7, %v20638_v57, %v25232_v5  ;;  %vm25260_vm12 = vmmov %vm25239_vm1 }
 0x4bb   :  { %17739 = vmatpush1.msk.msra.mxu0 %vm21576_vm13, %v4800_v55  ;;  %7134 = vrot.lane.b32.xlu1 %v20171_v17, %s18400_s23  ;;  %v21642_v17 = vpop.permute.xlu0 %6321 }
 0x4bc   :  { %17728 = vmatmul.mubr.msk.f32.vlgmr.msra.gmra.mxu1 %vm25227_vm11, %v21473_v44  ;;  %17740 = vmatprep.subr.msk.mxu0 %vm21576_vm13, %v4797_v9  ;;  %v25230_v44 = vld [vmem:[#allocation82_spill] sm:$0xff]  ;;  %vm25262_vm11 = vmmov %vm25239_vm1 }
 0x4bd   :  { %17733 = vmatpush1.msk.msra.mxu1 %vm21576_vm13, %v4804_v41  ;;  %17741 = vmatpush1.msk.msra.mxu0 %vm21576_vm13, %v4799_v4  ;;  %v4790_v24 = vsel %vm81_vm7, %v25230_v44, %v25229_v58  ;;  %v7873_v4 = vld [vmem:[%s24546_s6 + $0x8] sm:$0xff] }
 0x4be   :  { %17734 = vmatprep.subr.msk.mxu1 %vm21576_vm13, %v4801_v16  ;;  %7136 = vrot.lane.b32.xlu0 %v25120_v46, %s18400_s23  ;;  %v4794_v46 = vsel %vm81_vm7, %v25232_v5, %v25231_v29  ;;  %v21691_v9 = vpop.permute.xlu1 %6327  ;;  %v25238_v16 = vld [vmem:[#allocation83_spill] sm:$0xff] }
 0x4bf   :  { %4669 = vmatprep.mubr.f32.mxu0 %v24783_v7  ;;  %17735 = vmatpush1.msk.msra.mxu1 %vm21576_vm13, %v4803_v28  ;;  %v21686_v55 = vpop.permute.xlu0 %6331 }
 0x4c0   :  { %17750 = vmatprep.subr.msk.mxu0 %vm21576_vm13, %v4790_v24  ;;  %4592 = vmatprep.mubr.f32.mxu1 %v24783_v7 }
 0x4c1   :  { %17731 = vmatmul.mubr.msk.f32.gmra.mxu0 %vm25233_vm6, %v21501_v22  ;;  %17744 = vmatprep.subr.msk.mxu1 %vm21576_vm13, %v4794_v46  ;;  %v25241_v46 = vld [vmem:[#allocation41_spill] sm:$0xff] }
 0x4c2   :  { %7132 = vrot.lane.b32.xlu1 %v20130_v31, %s18400_s23  ;;  %17729 = vmatmul.mubr.msk.f32.gmra.mxu1 %vm25234_vm2, %v21501_v22  ;;  %v4792_v31 = vsel %vm81_vm7, %v25231_v29, %v25230_v44  ;;  %v25237_v22 = vld [vmem:[#allocation84_spill] sm:$0xff]  ;;  %v21739_v29 = vld [vmem:[#allocation3 + $0x48] sm:$0xff]  ;;  %v21741_v5 = vpop.permute.xlu1 %6325  ;;  %vm25269_vm2 = vmmov %vm25239_vm1 }
 0x4c3   :  { %7146 = vrot.lane.b32.xlu0 %v20257_v26, %s18400_s23  ;;  %4992 = vmatprep.mubr.f32.mxu0 %v24783_v7  ;;  %v25236_v26 = vld [vmem:[#allocation87_spill] sm:$0xff]  ;;  %v4791_v28 = vsel %vm81_vm7, %v25238_v16, %v25237_v22  ;;  %v21731_v57 = vpop.permute.xlu0 %6329 }
 0x4c4   :  { %4915 = vmatprep.mubr.f32.mxu1 %v24783_v7  ;;  %v4789_v41 = vsel %vm81_vm7, %v25237_v22, %v25236_v26 }
 0x4c5   :  { %17742 = vmatmul.mubr.msk.f32.vlgmr.msra.gmra.mxu0 %vm25235_vm8, %v21684_v13  ;;  %vm25277_vm8 = vmmov %vm25256_vm0 }
 0x4c6   :  { %17751 = vmatpush1.msk.msra.mxu0 %vm21576_vm13, %v4792_v31  ;;  %7142 = vrot.lane.b32.xlu1 %v20202_v11, %s18400_s23  ;;  %v25240_v11 = vld [vmem:[#allocation80_spill] sm:$0xff] }
 0x4c7   :  { %17736 = vmatmul.mubr.msk.f32.vlgmr.msra.gmra.mxu1 %vm25239_vm1, %v21684_v13  ;;  %17752 = vmatprep.subr.msk.mxu0 %vm21576_vm13, %v4789_v41  ;;  %v4793_v44 = vsel %vm81_vm7, %v25240_v11, %v25238_v16  ;;  %v4795_v24 = vsel %vm81_vm7, %v20657_v36, %v25240_v11  ;;  %v25242_v31 = vld [vmem:[#allocation20_spill] sm:$0xff]  ;;  %v21750_v41 = vpop.f32.mrf.mxu0  ;;  %v21773_v11 = vpop.permute.xlu0 %6339 }
 0x4c8   :  { %17745 = vmatpush1.msk.msra.mxu1 %vm21576_vm13, %v4796_v2  ;;  %17753 = vmatpush1.msk.msra.mxu0 %vm21576_vm13, %v4791_v28  ;;  %v4782_v22 = vsel %vm81_vm7, %v25242_v31, %v25241_v46  ;;  %25243 = vst [vmem:[#allocation16_spill] sm:$0xff] %v21750_v41  ;;  %v25244_v36 = vld [vmem:[#allocation48_spill] sm:$0xff]  ;;  %v21770_v28 = vpop.permute.xlu1 %6335 }
 0x4c9   :  { %17746 = vmatprep.subr.msk.mxu1 %vm21576_vm13, %v4793_v44  ;;  %7881 = vperm.xlu0 %18323, %v7873_v4   ;;  %v25245_v4 = vld [vmem:[#allocation86_spill] sm:$0xff]  ;;  %v12663_v16 = vld [vmem:[%s24548_s8] sm:$0xff]  ;;  %v21775_v44 = vpop.f32.mrf.mxu0 }
 0x4ca   :  { %4998 = vmatprep.mubr.f32.mxu0 %v24783_v7  ;;  %17747 = vmatpush1.msk.msra.mxu1 %vm21576_vm13, %v4795_v24  ;;  %v4786_v2 = vsel %vm81_vm7, %v25245_v4, %v25244_v36  ;;  %25248 = vst [vmem:[#allocation50_spill] sm:$0xff] %v21775_v44  ;;  %v4784_v24 = vsel %vm81_vm7, %v25244_v36, %v25242_v31  ;;  %v25252_v31 = vld [vmem:[#allocation14_spill] sm:$0xff] }
 0x4cb   :  { %17762 = vmatprep.subr.msk.mxu0 %vm21576_vm13, %v4782_v22  ;;  %4921 = vmatprep.mubr.f32.mxu1 %v24783_v7  ;;  %v25251_v22 = vld [vmem:[#allocation37_spill] sm:$0xff] }
 0x4cc   :  { %17743 = vmatmul.mubr.msk.f32.gmra.mxu0 %vm25246_vm4, %v21739_v29  ;;  %17756 = vmatprep.subr.msk.mxu1 %vm21576_vm13, %v4786_v2  ;;  %v4783_v36 = vsel %vm81_vm7, %v25252_v31, %v25251_v22  ;;  %vm25285_vm4 = vmmov %vm25269_vm2 }
 0x4cd   :  { %7140 = vrot.lane.b32.xlu1 %v20161_v59, %s18400_s23  ;;  %17737 = vmatmul.mubr.msk.f32.gmra.mxu1 %vm25247_vm5, %v21739_v29  ;;  %v25250_v59 = vld [vmem:[#allocation26_spill] sm:$0xff]  ;;  %vm25287_vm5 = vmmov %vm25256_vm0 }
 0x4ce   :  { %12666 = vperm.xlu0 %18323, %v12663_v16   ;;  %5146 = vmatprep.mubr.f32.mxu0 %v24783_v7  ;;  %v4781_v2 = vsel %vm81_vm7, %v25251_v22, %v25250_v59  ;;  %v4788_v16 = vsel %vm81_vm7, %v25229_v58, %v25245_v4  ;;  %v25255_v58 = vld [vmem:[#allocation19_spill] sm:$0xff] }
 0x4cf   :  { %5069 = vmatprep.mubr.f32.mxu1 %v24783_v7  ;;  %v4785_v4 = vsel %vm81_vm7, %v25255_v58, %v25252_v31  ;;  %v4787_v22 = vsel %vm81_vm7, %v25236_v26, %v25255_v58  ;;  %v21830_v31 = vpop.permute.xlu0 %6337  ;;  %v5598_v26 = vsel %vm25256_vm0, 1, %v24899_v38 }
 0x4d0   :  { %17754 = vmatmul.mubr.msk.f32.vlgmr.msra.gmra.mxu0 %vm25249_vm14, %v21684_v13  ;;  %vm25288_vm14 = vmmov %vm25269_vm2 }
 0x4d1   :  { %17763 = vmatpush1.msk.msra.mxu0 %vm21576_vm13, %v4784_v24  ;;  %7144 = vrot.lane.b32.xlu1 %v20225_v45, %s18400_s23  ;;  %v21804_v45 = vpop.permute.xlu1 %6333  ;;  %v21806_v24 = vpop.f32.mrf.mxu0 }
 0x4d2   :  { %17748 = vmatmul.mubr.msk.f32.vlgmr.msra.gmra.mxu1 %vm25253_vm15, %v21684_v13  ;;  %17764 = vmatprep.subr.msk.mxu0 %vm21576_vm13, %v4781_v2  ;;  %25254 = vst [vmem:[#allocation52_spill] sm:$0xff] %v21806_v24  ;;  %v4806_v2 = vsel %vm81_vm7, %v21489_v0, %v25226_v21  ;;  %v25257_v21 = vld [vmem:[#allocation13_spill] sm:$0xff]  ;;  %vm25291_vm15 = vmmov %vm25256_vm0 }
 0x4d3   :  { %17757 = vmatpush1.msk.msra.mxu1 %vm21576_vm13, %v4788_v16  ;;  %17765 = vmatpush1.msk.msra.mxu0 %vm21576_vm13, %v4783_v36  ;;  %v7872_v16 = vld [vmem:[%s24546_s6] sm:$0xff]  ;;  %v4778_v36 = vsel %vm81_vm7, %v21475_v23, %v25257_v21  ;;  %v21846_v58 = vpop.f32.mrf.mxu0 }
 0x4d4   :  { %17758 = vmatprep.subr.msk.mxu1 %vm21576_vm13, %v4785_v4  ;;  %5152 = vmatprep.mubr.f32.mxu0 %v24783_v7  ;;  %25259 = vst [vmem:[#allocation15_spill] sm:$0xff] %v21846_v58  ;;  %v21850_v4 = vpop.f32.mrf.mxu1  ;;  %v25265_v58 = vld [vmem:[#allocation33_spill] sm:$0xff] }
 0x4d5   :  { %17759 = vmatpush1.msk.msra.mxu1 %vm21576_vm13, %v4787_v22  ;;  %17774 = vmatprep.subr.msk.mxu0 %vm21576_vm13, %v4806_v2  ;;  %v5602_v22 = vrot.slane %v5598_v26, %v20120_v18  ;;  %v17394_v2 = vld [vmem:[#allocation2] sm:$0x1]  ;;  %v21856_v44 = vpop.permute.xlu1 %6343  ;;  %v21867_v26 = vpop.permute.xlu0 %6347 }
 0x4d6   :  { %5075 = vmatprep.mubr.f32.mxu1 %v24783_v7  ;;  %17755 = vmatmul.mubr.msk.f32.gmra.mxu0 %vm25258_vm3, %v21739_v29  ;;  %v21859_v24 = vpop.f32.mrf.mxu1  ;;  %25263 = vst [vmem:[#allocation31_spill] sm:$0xff] %v21867_v26  ;;  %vm25296_vm3 = vmmov %vm25256_vm0 }
 0x4d7   :  { %17768 = vmatprep.subr.msk.mxu1 %vm21576_vm13, %v4778_v36  ;;  %7876 = vperm.xlu1 %18324, %v7872_v16   ;;  %25261 = vst [vmem:[#allocation18_spill] sm:$0xff] %v21859_v24  ;;  %v4776_v16 = vsel %vm81_vm7, %v25257_v21, %v21489_v0  ;;  %v21869_v36 = vpop.f32.mrf.mxu0  ;;  %v4805_v24 = vsel %vm81_vm7, %v25265_v58, %v20617_v56  ;;  %vm21879_vm6 = vcmp.eq.s32.totalorder %v5602_v22, 1  ;;  %v25268_v21 = vld [vmem:[#allocation39_spill] sm:$0xff]  ;;  %v25270_v56 = vld [vmem:[#allocation40_spill] sm:$0xff] }
 0x4d8   :  { %17749 = vmatmul.mubr.msk.f32.gmra.mxu1 %vm25260_vm12, %v21739_v29  ;;  %5300 = vmatprep.mubr.f32.mxu0 %v24783_v7  ;;  %25264 = vst [vmem:[#allocation45_spill] sm:$0xff] %v21869_v36  ;;  %v21877_v41 = vpop.f32.mrf.mxu1  ;;  %v4775_v36 = vsel %vm81_vm7, %v25268_v21, %v25265_v58  ;;  %v4777_v22 = vsel %vm81_vm7, %v25270_v56, %v25268_v21  ;;  %v25276_v21 = vld [vmem:[#allocation46_spill] sm:$0xff]  ;;  %vm25298_vm12 = vmmov %vm25256_vm0 }
 0x4d9   :  { %5223 = vmatprep.mubr.f32.mxu1 %v24783_v7 }
 0x4da   :  { %17766 = vmatmul.mubr.msk.f32.vlgmr.msra.gmra.mxu0 %vm25262_vm11, %v21684_v13  ;;  %v21903_v58 = vpop.f32.mrf.mxu1  ;;  %vm25300_vm11 = vmmov %vm25269_vm2 }
 0x4db   :  { %17775 = vmatpush1.msk.msra.mxu0 %vm21576_vm13, %v4776_v16  ;;  %17397 = vperm.xlu1 %18324, %v17394_v2   ;;  %v4780_v2 = vsel %vm81_vm7, %v25241_v46, %v21475_v23  ;;  %25271 = vst [vmem:[#allocation30_spill] sm:$0xff] %v21903_v58  ;;  %v4779_v23 = vsel %vm81_vm7, %v25250_v59, %v25270_v56  ;;  %v21912_v46 = vpop.permute.xlu1 %6341  ;;  %v25273_v16 = vld [vmem:[#allocation44_spill] sm:$0xff]  ;;  %vm25274_vm7 = vmmov %vm25239_vm1  ;;  %v21930_v56 = vpop.permute.xlu0 %6345 }
 0x4dc   :  { %17760 = vmatmul.mubr.msk.f32.vlgmr.msra.gmra.mxu1 %vm25269_vm2, %v21684_v13  ;;  %17776 = vmatprep.subr.msk.mxu0 %vm21576_vm13, %v4805_v24  ;;  %v21914_v24 = vpop.f32.mrf.mxu0  ;;  %v25275_v59 = vld [vmem:[#allocation36_spill] sm:$0xff]  ;;  %25278 = vst [vmem:[#allocation53_spill] sm:$0xff] %v21930_v56  ;;  %v25290_v56 = vld [vmem:[#allocation34_spill] sm:$0xff] }
 0x4dd   :  { %17769 = vmatpush1.msk.msra.mxu1 %vm21576_vm13, %v4780_v2  ;;  %17777 = vmatpush1.msk.msra.mxu0 %vm21576_vm13, %v4775_v36  ;;  %25272 = vst [vmem:[#allocation42_spill] sm:$0xff] %v21914_v24  ;;  %v21921_v36 = vpop.f32.mrf.mxu1  ;;  %v5593_v2 = vsel %vm25277_vm8, %v25276_v21, %v25275_v59  ;;  %vm25307_vm8 = vmmov %vm25256_vm0 }
 0x4de   :  { %17770 = vmatprep.subr.msk.mxu1 %vm21576_vm13, %v4777_v22  ;;  %5306 = vmatprep.mubr.f32.mxu0 %v24783_v7  ;;  %v21940_v22 = vpop.f32.mrf.mxu0 }
 0x4df   :  { %17771 = vmatpush1.msk.msra.mxu1 %vm21576_vm13, %v4779_v23  ;;  %17786 = vmatprep.subr.msk.mxu0 %vm21879_vm6, %v25273_v16  ;;  %vm25279_vm13 = vmmov %vm25239_vm1  ;;  %v21936_v40 = vpop.f32.mrf.mxu1  ;;  %25281 = vst [vmem:[#allocation28_spill] sm:$0xff] %v21940_v22  ;;  %v21942_v23 = vpop.permute.xlu1 %6351  ;;  %v25283_v16 = vld [vmem:[#allocation32_spill] sm:$0xff]  ;;  %v25289_v22 = vld [vmem:[#allocation67_spill] sm:$0xff] }
 0x4e0   :  { %5229 = vmatprep.mubr.f32.mxu1 %v24783_v7  ;;  %17767 = vmatmul.mubr.msk.f32.gmra.mxu0 %vm25274_vm7, %v21739_v29  ;;  %25280 = vst [vmem:[#allocation43_spill] sm:$0xff] %v21936_v40  ;;  %25282 = vst [vmem:[#allocation29_spill] sm:$0xff] %v21942_v23  ;;  %v25286_v40 = vld [vmem:[#allocation24_spill] sm:$0xff]  ;;  %v21973_v26 = vpop.permute.xlu0 %6355  ;;  %v25295_v23 = vld [vmem:[#allocation65_spill] sm:$0xff] }
 0x4e1   :  { %17780 = vmatprep.subr.msk.mxu1 %vm21879_vm6, %v5593_v2  ;;  %17761 = vmatmul.mubr.msk.f32.gmra.mxu1 %vm25279_vm13, %v21739_v29  ;;  %vm25284_vm1 = vmmov %vm25256_vm0  ;;  %v21950_v2 = vpop.f32.mrf.mxu1  ;;  %v5595_v58 = vsel %vm25287_vm5, %v25286_v40, %v25276_v21  ;;  %v25293_v21 = vld [vmem:[#allocation63_spill] sm:$0xff] }
 0x4e2   :  { %5454 = vmatprep.mubr.f32.mxu0 %v24783_v7  ;;  %5377 = vmatprep.mubr.f32.mxu1 %v24783_v7  ;;  %v5591_v24 = vsel %vm25284_vm1, %v25275_v59, %v25283_v16  ;;  %v5590_v59 = vsel %vm25291_vm15, %v25290_v56, %v25289_v22  ;;  %v25292_v16 = vld [vmem:[#allocation57_spill] sm:$0xff]  ;;  %v5594_v22 = vsel %vm25296_vm3, %v25295_v23, %v25293_v21  ;;  %vm25304_vm7 = vmmov %vm25269_vm2 }
 0x4e3   :  { %vm25309_vm13 = vmmov %vm25269_vm2 }
 0x4e4   :  { %17778 = vmatmul.mubr.msk.f32.vlgmr.msra.gmra.mxu0 %vm25285_vm4, %v21684_v13  ;;  %vm25314_vm1 = vmmov %vm25256_vm0 }
 0x4e5   :  { %17787 = vmatpush1.msk.msra.mxu0 %vm21879_vm6, %v5591_v24  ;;  %17772 = vmatmul.mubr.msk.f32.vlgmr.msra.gmra.mxu1 %vm25288_vm14, %v21684_v13  ;;  %v5592_v24 = vsel %vm25256_vm0, %v25293_v21, %v25290_v56  ;;  %v21975_v13 = vpop.f32.mrf.mxu0  ;;  %v21997_v21 = vpop.permute.xlu1 %6349  ;;  %vm25317_vm4 = vmmov %vm25256_vm0 }
 0x4e6   :  { %17781 = vmatpush1.msk.msra.mxu1 %vm21879_vm6, %v5595_v58  ;;  %17788 = vmatprep.subr.msk.mxu0 %vm21879_vm6, %v25292_v16  ;;  %25294 = vst [vmem:[#allocation21_spill] sm:$0xff] %v21975_v13  ;;  %v25297_v58 = vld [vmem:[#allocation59_spill] sm:$0xff]  ;;  %v21992_v16 = vpop.f32.mrf.mxu1  ;;  %v25306_v13 = vld [vmem:[#allocation54_spill] sm:$0xff]  ;;  %vm25318_vm5 = vmmov %vm25269_vm2 }
 0x4e7   :  { %17782 = vmatprep.subr.msk.mxu1 %vm21879_vm6, %v5592_v24  ;;  %17789 = vmatpush1.msk.msra.mxu0 %vm21879_vm6, %v5590_v59  ;;  %v5581_v56 = vsel %vm25298_vm12, %v25297_v58, %v21302_v10  ;;  %25299 = vst [vmem:[#allocation27_spill] sm:$0xff] %v21992_v16  ;;  %v25301_v59 = vld [vmem:[#allocation75_spill] sm:$0xff]  ;;  %v22004_v10 = vpop.f32.mrf.mxu0  ;;  %v25308_v16 = vld [vmem:[#allocation38_spill] sm:$0xff]  ;;  %vm25319_vm14 = vmmov %vm25269_vm2 }
 0x4e8   :  { %5460 = vmatprep.mubr.f32.mxu0 %v24783_v7  ;;  %17783 = vmatpush1.msk.msra.mxu1 %vm21879_vm6, %v5594_v22  ;;  %25302 = vst [vmem:[#allocation35_spill] sm:$0xff] %v22004_v10  ;;  %v22009_v24 = vld [vmem:[#allocation3 + $0x50] sm:$0xff]  ;;  %v22012_v22 = vpop.permute.xlu0 %7090  ;;  %v22014_v58 = vpop.f32.mrf.mxu1  ;;  %v25310_v10 = vld [vmem:[#allocation62_spill] sm:$0xff]  ;;  %vm25321_vm15 = vmmov %vm25269_vm2 }
 0x4e9   :  { %17798 = vmatprep.subr.msk.mxu0 %vm21879_vm6, %v5581_v56  ;;  %5383 = vmatprep.mubr.f32.mxu1 %v24783_v7  ;;  %25303 = vst [vmem:[#allocation23_spill] sm:$0xff] %v22012_v22  ;;  %v22016_v56 = vpop.permute.xlu1 %6353  ;;  %v25312_v22 = vld [vmem:[#allocation47_spill] sm:$0xff]  ;;  %vm25323_vm3 = vmmov %vm25269_vm2 }
 0x4ea   :  { %17779 = vmatmul.mubr.msk.f32.gmra.mxu0 %vm25300_vm11, %v21739_v29  ;;  %17792 = vmatprep.subr.msk.mxu1 %vm21879_vm6, %v25301_v59  ;;  %v22020_v59 = vpop.f32.mrf.mxu0  ;;  %vm25324_vm12 = vmmov %vm25256_vm0 }
 0x4eb   :  { %17773 = vmatmul.mubr.msk.f32.gmra.mxu1 %vm25269_vm2, %v21739_v29  ;;  %5783 = vmatprep.mubr.f32.mxu0 %v24783_v7  ;;  %25305 = vst [vmem:[#allocation70_spill] sm:$0xff] %v22020_v59  ;;  %v5580_v29 = vsel %vm25307_vm8, %v25306_v13, %v21338_v25  ;;  %v22036_v59 = vpop.f32.mrf.mxu1  ;;  %v25313_v25 = vld [vmem:[#allocation74_spill] sm:$0xff]  ;;  %v22044_v13 = vld [vmem:[#allocation3 + $0x58] sm:$0xff]  ;;  %vm25325_vm11 = vmmov %vm25256_vm0 }
 0x4ec   :  { %5706 = vmatprep.mubr.f32.mxu1 %v24783_v7  ;;  %25311 = vst [vmem:[#allocation66_spill] sm:$0xff] %v22036_v59  ;;  %vm25327_vm2 = vmmov %vm25256_vm0 }
 0x4ed   :  { %vm25332_vm8 = vmmov %vm25323_vm3 }
 0x4ee   :  { %17790 = vmatmul.mubr.msk.f32.vlgmr.msra.gmra.mxu0 %vm25304_vm7, %v22009_v24  ;;  %vm25330_vm7 = vmmov %vm25256_vm0 }
 0x4ef   :  { %17799 = vmatpush1.msk.msra.mxu0 %vm21879_vm6, %v25308_v16  ;;  %17784 = vmatmul.mubr.msk.f32.vlgmr.msra.gmra.mxu1 %vm25309_vm13, %v22009_v24  ;;  %v5573_v16 = vsel %vm25314_vm1, %v21280_v53, %v21429_v6  ;;  %v22065_v53 = vpop.permute.xlu1 %7094  ;;  %vm25333_vm13 = vmmov %vm25323_vm3 }
 0x4f0   :  { %17793 = vmatpush1.msk.msra.mxu1 %vm21879_vm6, %v25310_v10  ;;  %17800 = vmatprep.subr.msk.mxu0 %vm21879_vm6, %v5580_v29  ;;  %v25315_v10 = vld [vmem:[#allocation55_spill] sm:$0xff]  ;;  %v22054_v29 = vpop.permute.xlu0 %7086  ;;  %vm25335_vm1 = vmmov %vm25256_vm0 }
 0x4f1   :  { %17794 = vmatprep.subr.msk.mxu1 %vm21879_vm6, %v25312_v22  ;;  %17801 = vmatpush1.msk.msra.mxu0 %vm21879_vm6, %v25313_v25  ;;  %v22056_v22 = vpop.f32.mrf.mxu0  ;;  %v5577_v25 = vsel %vm25317_vm4, %v21224_v48, %v21363_v15  ;;  %vm25336_vm4 = vmmov %vm25323_vm3 }
 0x4f2   :  { %5789 = vmatprep.mubr.f32.mxu0 %v24783_v7  ;;  %17795 = vmatpush1.msk.msra.mxu1 %vm21879_vm6, %v25315_v10  ;;  %25316 = vst [vmem:[#allocation68_spill] sm:$0xff] %v22056_v22  ;;  %v22071_v10 = vpop.f32.mrf.mxu1  ;;  %v25326_v22 = vld [vmem:[#allocation72_spill] sm:$0xff] }
 0x4f3   :  { %17810 = vmatprep.subr.msk.mxu0 %vm21879_vm6, %v5573_v16  ;;  %5712 = vmatprep.mubr.f32.mxu1 %v24783_v7  ;;  %v22077_v48 = vpop.f32.mrf.mxu0  ;;  %v22079_v15 = vpop.permute.xlu1 %7088 }
 0x4f4   :  { %17791 = vmatmul.mubr.msk.f32.gmra.mxu0 %vm25318_vm5, %v22044_v13  ;;  %17804 = vmatprep.subr.msk.mxu1 %vm21879_vm6, %v5577_v25  ;;  %25320 = vst [vmem:[#allocation64_spill] sm:$0xff] %v22077_v48  ;;  %v22083_v16 = vpop.permute.xlu0 %7092  ;;  %v22085_v59 = vpop.f32.mrf.mxu1  ;;  %v5572_v25 = vsel %vm25256_vm0, %v21326_v19, %v21445_v61  ;;  %v5574_v48 = vsel %vm25324_vm12, %v21394_v34, %v21326_v19  ;;  %v25328_v19 = vld [vmem:[#allocation78_spill] sm:$0xff]  ;;  %vm25337_vm5 = vmmov %vm25256_vm0 }
 0x4f5   :  { %17785 = vmatmul.mubr.msk.f32.gmra.mxu1 %vm25319_vm14, %v22044_v13  ;;  %5937 = vmatprep.mubr.f32.mxu0 %v24783_v7  ;;  %25322 = vst [vmem:[#allocation61_spill] sm:$0xff] %v22085_v59  ;;  %v5576_v59 = vsel %vm25325_vm11, %v21254_v32, %v21394_v34  ;;  %v5597_v32 = vsel %vm25327_vm2, %v21521_v49, %v25286_v40  ;;  %vm25338_vm14 = vmmov %vm25256_vm0 }
 0x4f6   :  { %5860 = vmatprep.mubr.f32.mxu1 %v24783_v7  ;;  %v22125_v61 = vpop.f32.mrf.mxu1  ;;  %vm25344_vm12 = vmmov %vm25335_vm1 }
 0x4f7   :  { %v22123_v34 = vpop.permute.xlu1 %7084  ;;  %vm25347_vm11 = vmmov %vm25336_vm4 }
 0x4f8   :  { %17802 = vmatmul.mubr.msk.f32.vlgmr.msra.gmra.mxu0 %vm25321_vm15, %v22009_v24  ;;  %25329 = vst [vmem:[#allocation58_spill] sm:$0xff] %v22123_v34  ;;  %vm25339_vm15 = vmmov %vm25323_vm3 }
 0x4f9   :  { %17811 = vmatpush1.msk.msra.mxu0 %vm21879_vm6, %v21376_v60  ;;  %17796 = vmatmul.mubr.msk.f32.vlgmr.msra.gmra.mxu1 %vm25323_vm3, %v22009_v24  ;;  %v22109_v60 = vpop.f32.mrf.mxu0  ;;  %vm25343_vm3 = vmmov %vm25335_vm1 }
 0x4fa   :  { %17805 = vmatpush1.msk.msra.mxu1 %vm21879_vm6, %v25326_v22  ;;  %17812 = vmatprep.subr.msk.mxu0 %vm21879_vm6, %v5572_v25  ;;  %v5569_v22 = vsel %vm25330_vm7, %v21505_v63, %v21465_v50  ;;  %v22148_v25 = vpop.f32.mrf.mxu1  ;;  %vm25349_vm2 = vmmov %vm25336_vm4 }
 0x4fb   :  { %17806 = vmatprep.subr.msk.mxu1 %vm21879_vm6, %v5576_v59  ;;  %17813 = vmatpush1.msk.msra.mxu0 %vm21879_vm6, %v5574_v48  ;;  %v6389_v59 = vsel %vm87_vm9, 1, %v24899_v38  ;;  %v22137_v40 = vpop.f32.mrf.mxu0  ;;  %v22143_v48 = vpop.permute.xlu0 %7098  ;;  %25334 = vst [vmem:[#allocation56_spill] sm:$0xff] %v22148_v25  ;;  %v5596_v25 = vsel %vm25337_vm5, %v21496_v8, %v25295_v23  ;;  %v5568_v23 = vsel %vm25343_vm3, %v21357_v33, %v21482_v52  ;;  %vm25350_vm7 = vmmov %vm25349_vm2 }
 0x4fc   :  { %5943 = vmatprep.mubr.f32.mxu0 %v24783_v7  ;;  %17807 = vmatpush1.msk.msra.mxu1 %vm21879_vm6, %v25328_v19  ;;  %25331 = vst [vmem:[#allocation60_spill] sm:$0xff] %v22137_v40  ;;  %v22160_v40 = vpop.permute.xlu1 %7102 }
 0x4fd   :  { %17822 = vmatprep.subr.msk.mxu0 %vm21879_vm6, %v5597_v32  ;;  %5866 = vmatprep.mubr.f32.mxu1 %v24783_v7  ;;  %v6393_v32 = vrot.slane %v6389_v59, %v20120_v18  ;;  %v22152_v19 = vpop.f32.mrf.mxu0  ;;  %v5571_v59 = vsel %vm25338_vm14, %v21429_v6, %v21505_v63  ;;  %v5566_v6 = vsel %vm25344_vm12, %v21482_v52, %v21496_v8  ;;  %v25346_v8 = vld [vmem:[#allocation69_spill] sm:$0xff] }
 0x4fe   :  { %17803 = vmatmul.mubr.msk.f32.gmra.mxu0 %vm25332_vm8, %v22044_v13  ;;  %17816 = vmatprep.subr.msk.mxu1 %vm21879_vm6, %v5569_v22  ;;  %v5567_v22 = vsel %vm25335_vm1, %v21465_v50, %v21521_v49  ;;  %v22174_v50 = vpop.f32.mrf.mxu1  ;;  %v6380_v52 = vsel %vm87_vm9, %v21458_v37, %v21564_v1  ;;  %vm25351_vm8 = vmmov %vm25349_vm2 }
 0x4ff   :  { %17797 = vmatmul.mubr.msk.f32.gmra.mxu1 %vm25333_vm13, %v22044_v13  ;;  %6091 = vmatprep.mubr.f32.mxu0 %v24783_v7  ;;  %v22176_v49 = vpop.f32.mrf.mxu0  ;;  %vm22178_vm0 = vcmp.eq.s32.totalorder %v6393_v32, 1  ;;  %v22194_v63 = vpop.permute.xlu0 %7096  ;;  %vm25352_vm13 = vmmov %vm25349_vm2 }
 0x500   :  { %6014 = vmatprep.mubr.f32.mxu1 %v24783_v7  ;;  %25340 = vst [vmem:[#allocation77_spill] sm:$0xff] %v22176_v49  ;;  %v22200_v33 = vpop.f32.mrf.mxu1  ;;  %v6385_v49 = vsel %vm87_vm9, %v21541_v47, %v21526_v14  ;;  %vm25354_vm1 = vmmov %vm25349_vm2 }
 0x501   :  { %25345 = vst [vmem:[#allocation76_spill] sm:$0xff] %v22200_v33  ;;  %v22202_v32 = vpop.f32.mrf.mxu0  ;;  %vm25358_vm5 = vmmov %vm25354_vm1 }
 0x502   :  { %17814 = vmatmul.mubr.msk.f32.vlgmr.msra.gmra.mxu0 %vm25336_vm4, %v22009_v24  ;;  %vm25359_vm14 = vmmov %vm25354_vm1 }
 0x503   :  { %17823 = vmatpush1.msk.msra.mxu0 %vm21879_vm6, %v5567_v22  ;;  %17808 = vmatmul.mubr.msk.f32.vlgmr.msra.gmra.mxu1 %vm25339_vm15, %v22009_v24  ;;  %v2710_v22 = vpop.f32.mrf.mxu1  ;;  %vm25361_vm15 = vmmov %vm25354_vm1 }
 0x504   :  { %17817 = vmatpush1.msk.msra.mxu1 %vm21879_vm6, %v5571_v59  ;;  %17824 = vmatprep.subr.msk.mxu0 %vm21879_vm6, %v5596_v25  ;;  %v6384_v25 = vsel %vm87_vm9, %v25346_v8, %v21512_v30  ;;  %v22224_v0 = vadd.f32 %v2710_v22, %v21850_v4  ;;  %v22231_v59 = vpop.permute.xlu1 %7100  ;;  %v6382_v4 = vsel %vm87_vm9, %v21512_v30, %v21458_v37  ;;  %vm25362_vm3 = vmmov %vm25354_vm1 }
 0x505   :  { %17818 = vmatprep.subr.msk.mxu1 %vm21879_vm6, %v5568_v23  ;;  %17825 = vmatpush1.msk.msra.mxu0 %vm21879_vm6, %v5566_v6  ;;  %v22233_v23 = vpop.f32.mrf.mxu1  ;;  %v22236_v6 = vpop.permute.xlu0 %7106  ;;  %v6379_v22 = vsel %vm87_vm9, %v21534_v3, %v21591_v35  ;;  %v6383_v30 = vsel %vm87_vm9, %v21526_v14, %v21437_v62  ;;  %vm25365_vm12 = vmmov %vm25354_vm1 }
 0x506   :  { %6097 = vmatprep.mubr.f32.mxu0 %v24783_v7  ;;  %17819 = vmatpush1.msk.msra.mxu1 %vm21879_vm6, %v21453_v39  ;;  %v22226_v39 = vpop.f32.mrf.mxu0  ;;  %vm25348_vm6 = vmmov %vm25336_vm4 }
 0x507   :  { %17834 = vmatprep.subr.msk.mxu0 %vm22178_vm0, %v6380_v52  ;;  %6020 = vmatprep.mubr.f32.mxu1 %v24783_v7  ;;  %v2716_v37 = vpop.f32.mrf.mxu1  ;;  %vm25355_vm4 = vmmov %vm25354_vm1 }
 0x508   :  { %17815 = vmatmul.mubr.msk.f32.gmra.mxu0 %vm25347_vm11, %v22044_v13  ;;  %17828 = vmatprep.subr.msk.mxu1 %vm22178_vm0, %v6384_v25  ;;  %v22244_v52 = vpop.f32.mrf.mxu0  ;;  %v6386_v25 = vsel %vm87_vm9, %v21412_v12, %v25346_v8  ;;  %v6381_v8 = vsel %vm87_vm9, %v21437_v62, %v21534_v3  ;;  %v22283_v62 = vpop.permute.xlu1 %7110  ;;  %vm25367_vm11 = vmmov %vm25354_vm1 }
 0x509   :  { %17809 = vmatmul.mubr.msk.f32.gmra.mxu1 %vm25348_vm6, %v22044_v13  ;;  %6245 = vmatprep.mubr.f32.mxu0 %v24783_v7  ;;  %v22285_v3 = vpop.f32.mrf.mxu1  ;;  %vm25368_vm6 = vmmov %vm25354_vm1 }
 0x50a   :  { %6168 = vmatprep.mubr.f32.mxu1 %v24783_v7 }
 0x50c   :  { %17826 = vmatmul.mubr.msk.f32.vlgmr.msra.gmra.mxu0 %vm25349_vm2, %v22009_v24  ;;  %v22322_v33 = vpop.permute.xlu1 %7108  ;;  %vm25369_vm2 = vmmov %vm25354_vm1 }
 0x50d   :  { %17835 = vmatpush1.msk.msra.mxu0 %vm22178_vm0, %v6382_v4  ;;  %17820 = vmatmul.mubr.msk.f32.vlgmr.msra.gmra.mxu1 %vm25350_vm7, %v22009_v24  ;;  %v22271_v4 = vadd.f32 %v2716_v37, %v21877_v41  ;;  %v22273_v24 = vpop.f32.mrf.mxu0  ;;  %v6372_v41 = vsel %vm87_vm9, %v21604_v51, %v21691_v9  ;;  %v22312_v37 = vld [vmem:[#allocation3 + $0x60] sm:$0xff] }
 0x50e   :  { %17829 = vmatpush1.msk.msra.mxu1 %vm22178_vm0, %v6386_v25  ;;  %17836 = vmatprep.subr.msk.mxu0 %vm22178_vm0, %v6379_v22  ;;  %v6376_v25 = vsel %vm87_vm9, %v21547_v54, %v21614_v42  ;;  %v22303_v22 = vpop.permute.xlu0 %7104 }
 0x50f   :  { %17830 = vmatprep.subr.msk.mxu1 %vm22178_vm0, %v6383_v30  ;;  %17837 = vmatpush1.msk.msra.mxu0 %vm22178_vm0, %v6381_v8  ;;  %v22294_v14 = vpop.f32.mrf.mxu0 }
 0x510   :  { %6251 = vmatprep.mubr.f32.mxu0 %v24783_v7  ;;  %17831 = vmatpush1.msk.msra.mxu1 %vm22178_vm0, %v6385_v49  ;;  %v2864_v49 = vpop.f32.mrf.mxu1 }
 0x511   :  { %17846 = vmatprep.subr.msk.mxu0 %vm22178_vm0, %v6372_v41  ;;  %6174 = vmatprep.mubr.f32.mxu1 %v24783_v7  ;;  %v22315_v30 = vadd.f32 %v2864_v49, %v21921_v36  ;;  %v22317_v8 = vpop.f32.mrf.mxu0  ;;  %v6378_v36 = vsel %vm87_vm9, %v21564_v1, %v21547_v54  ;;  %v6373_v54 = vsel %vm87_vm9, %v21667_v43, %v21642_v17 }
 0x512   :  { %17827 = vmatmul.mubr.msk.f32.gmra.mxu0 %vm25351_vm8, %v22044_v13  ;;  %17840 = vmatprep.subr.msk.mxu1 %vm22178_vm0, %v6376_v25  ;;  %25353 = vst [vmem:[#allocation73_spill] sm:$0xff] %v22317_v8  ;;  %v22320_v41 = vpop.f32.mrf.mxu1  ;;  %v6371_v25 = vsel %vm87_vm9, %v21642_v17, %v21741_v5  ;;  %v6375_v1 = vsel %vm87_vm9, %v21571_v20, %v21667_v43  ;;  %v22366_v17 = vld [vmem:[#allocation3 + $0x68] sm:$0xff] }
 0x513   :  { %17821 = vmatmul.mubr.msk.f32.gmra.mxu1 %vm25352_vm13, %v22044_v13  ;;  %6574 = vmatprep.mubr.f32.mxu0 %v24783_v7  ;;  %v6374_v13 = vsel %vm87_vm9, %v21614_v42, %v21604_v51  ;;  %v22342_v51 = vpop.permute.xlu0 %7114  ;;  %v22344_v42 = vpop.f32.mrf.mxu0 }
 0x514   :  { %6497 = vmatprep.mubr.f32.mxu1 %v24783_v7  ;;  %v2870_v49 = vpop.f32.mrf.mxu1 }
 0x515   :  { %v22369_v43 = vadd.f32 %v2870_v49, %v21950_v2  ;;  %v22389_v2 = vpop.permute.xlu1 %7118 }
 0x516   :  { %17838 = vmatmul.mubr.msk.f32.vlgmr.msra.gmra.mxu0 %vm25354_vm1, %v22312_v37 }
 0x517   :  { %17847 = vmatpush1.msk.msra.mxu0 %vm22178_vm0, %v6374_v13  ;;  %17832 = vmatmul.mubr.msk.f32.vlgmr.msra.gmra.mxu1 %vm25355_vm4, %v22312_v37  ;;  %v6377_v13 = vsel %vm87_vm9, %v21591_v35, %v21571_v20  ;;  %v22380_v20 = vpop.f32.mrf.mxu1  ;;  %v6368_v35 = vsel %vm87_vm9, %v21686_v55, %v21770_v28  ;;  %v22400_v49 = vpop.permute.xlu0 %7112 }
 0x518   :  { %17841 = vmatpush1.msk.msra.mxu1 %vm22178_vm0, %v6378_v36  ;;  %17848 = vmatprep.subr.msk.mxu0 %vm22178_vm0, %v6371_v25  ;;  %v22371_v36 = vpop.f32.mrf.mxu0  ;;  %v6364_v25 = vsel %vm87_vm9, %v21773_v11, %v21856_v44  ;;  %25357 = vst [vmem:[#allocation22_spill] sm:$0xff] %v22380_v20 }
 0x519   :  { %17842 = vmatprep.subr.msk.mxu1 %vm22178_vm0, %v6375_v1  ;;  %17849 = vmatpush1.msk.msra.mxu0 %vm22178_vm0, %v6373_v54  ;;  %25356 = vst [vmem:[#allocation71_spill] sm:$0xff] %v22371_v36  ;;  %v3018_v1 = vpop.f32.mrf.mxu1 }
 0x51a   :  { %6580 = vmatprep.mubr.f32.mxu0 %v24783_v7  ;;  %17843 = vmatpush1.msk.msra.mxu1 %vm22178_vm0, %v6377_v13  ;;  %v22391_v54 = vpop.f32.mrf.mxu0  ;;  %v22403_v13 = vadd.f32 %v3018_v1, %v22014_v58  ;;  %v6370_v58 = vsel %vm87_vm9, %v21691_v9, %v21686_v55  ;;  %v6363_v1 = vsel %vm87_vm9, %v21830_v31, %v21912_v46 }
 0x51b   :  { %17858 = vmatprep.subr.msk.mxu0 %vm22178_vm0, %v6364_v25  ;;  %6503 = vmatprep.mubr.f32.mxu1 %v24783_v7  ;;  %v22408_v8 = vpop.f32.mrf.mxu1  ;;  %v6365_v55 = vsel %vm87_vm9, %v21804_v45, %v21830_v31  ;;  %v6367_v9 = vsel %vm87_vm9, %v21731_v57, %v21804_v45  ;;  %v22459_v45 = vpop.permute.xlu0 %7122  ;;  %v6388_v31 = vsel %vm87_vm9, %v21973_v26, %v21412_v12 }
 0x51c   :  { %17839 = vmatmul.mubr.msk.f32.gmra.mxu0 %vm25358_vm5, %v22366_v17  ;;  %17852 = vmatprep.subr.msk.mxu1 %vm22178_vm0, %v6368_v35  ;;  %v22405_v25 = vpop.f32.mrf.mxu0  ;;  %25360 = vst [vmem:[#allocation51_spill] sm:$0xff] %v22408_v8  ;;  %v6366_v35 = vsel %vm87_vm9, %v21770_v28, %v21773_v11  ;;  %v22430_v28 = vpop.permute.xlu1 %7116 }
 0x51d   :  { %17833 = vmatmul.mubr.msk.f32.gmra.mxu1 %vm25359_vm14, %v22366_v17  ;;  %6728 = vmatprep.mubr.f32.mxu0 %v24783_v7  ;;  %v3024_v20 = vpop.f32.mrf.mxu1 }
 0x51e   :  { %6651 = vmatprep.mubr.f32.mxu1 %v24783_v7  ;;  %v22410_v36 = vpop.f32.mrf.mxu0  ;;  %v22433_v11 = vadd.f32 %v3024_v20, %v22071_v10  ;;  %v6369_v20 = vsel %vm87_vm9, %v21741_v5, %v21731_v57  ;;  %v7180_v57 = vsel %vm90_vm10, 1, %v24899_v38  ;;  %v25363_v5 = vld [vmem:[#allocation29_spill] sm:$0xff] }
 0x51f   :  { %v22449_v10 = vpop.f32.mrf.mxu1 }
 0x520   :  { %17850 = vmatmul.mubr.msk.f32.vlgmr.msra.gmra.mxu0 %vm25361_vm15, %v22312_v37  ;;  %v22435_v8 = vpop.f32.mrf.mxu0 }
 0x521   :  { %17859 = vmatpush1.msk.msra.mxu0 %vm22178_vm0, %v6366_v35  ;;  %17844 = vmatmul.mubr.msk.f32.vlgmr.msra.gmra.mxu1 %vm25362_vm3, %v22312_v37 }
 0x522   :  { %17853 = vmatpush1.msk.msra.mxu1 %vm22178_vm0, %v6370_v58  ;;  %17860 = vmatprep.subr.msk.mxu0 %vm22178_vm0, %v6363_v1  ;;  %v3249_v35 = vpop.f32.mrf.mxu0  ;;  %v25364_v58 = vld [vmem:[#allocation31_spill] sm:$0xff] }
 0x523   :  { %17854 = vmatprep.subr.msk.mxu1 %vm22178_vm0, %v6367_v9  ;;  %17861 = vmatpush1.msk.msra.mxu0 %vm22178_vm0, %v6365_v55  ;;  %v6360_v1 = vsel %vm87_vm9, %v25364_v58, %v25363_v5  ;;  %v22479_v12 = vadd.f32 %v3249_v35, %v22109_v60  ;;  %v3172_v55 = vpop.f32.mrf.mxu1  ;;  %v7184_v60 = vrot.slane %v7180_v57, %v20120_v18  ;;  %v22499_v35 = vpop.permute.xlu0 %7120 }
 0x524   :  { %6734 = vmatprep.mubr.f32.mxu0 %v24783_v7  ;;  %17855 = vmatpush1.msk.msra.mxu1 %vm22178_vm0, %v6369_v20  ;;  %v22486_v38 = vadd.f32 %v3172_v55, %v22125_v61  ;;  %v22488_v9 = vpop.f32.mrf.mxu0  ;;  %v22493_v20 = vpop.permute.xlu1 %7126  ;;  %v6358_v61 = vsel %vm87_vm9, %v25363_v5, %v21973_v26  ;;  %v6362_v57 = vsel %vm87_vm9, %v21856_v44, %v25364_v58  ;;  %v25372_v44 = vld [vmem:[#allocation53_spill] sm:$0xff] }
 0x525   :  { %17870 = vmatprep.subr.msk.mxu0 %vm22178_vm0, %v6388_v31  ;;  %6657 = vmatprep.mubr.f32.mxu1 %v24783_v7  ;;  %25366 = vst [vmem:[#allocation12_spill] sm:$0xff] %v22488_v9  ;;  %v22497_v31 = vpop.f32.mrf.mxu1  ;;  %v6387_v55 = vsel %vm87_vm9, %v22016_v56, %v21541_v47  ;;  %vm22522_vm7 = vcmp.eq.s32.totalorder %v7184_v60, 1  ;;  %v6359_v58 = vsel %vm87_vm9, %v25372_v44, %v21997_v21 }
 0x526   :  { %17851 = vmatmul.mubr.msk.f32.gmra.mxu0 %vm25365_vm12, %v22366_v17  ;;  %17864 = vmatprep.subr.msk.mxu1 %vm22178_vm0, %v6360_v1  ;;  %v3255_v1 = vpop.f32.mrf.mxu0  ;;  %v6357_v47 = vsel %vm87_vm9, %v21997_v21, %v22016_v56 }
 0x527   :  { %17845 = vmatmul.mubr.msk.f32.gmra.mxu1 %vm25367_vm11, %v22366_v17  ;;  %6882 = vmatprep.mubr.f32.mxu0 %v24783_v7  ;;  %v22520_v26 = vadd.f32 %v3255_v1, %v22152_v19  ;;  %v3178_v19 = vpop.f32.mrf.mxu1  ;;  %v7171_v1 = vsel %vm90_vm10, %v22143_v48, %v22160_v40 }
 0x528   :  { %6805 = vmatprep.mubr.f32.mxu1 %v24783_v7  ;;  %v22538_v60 = vpop.f32.mrf.mxu0  ;;  %v22551_v56 = vadd.f32 %v3178_v19, %v22174_v50 }
 0x529   :  { %25373 = vst [vmem:[#allocation25_spill] sm:$0xff] %v22538_v60  ;;  %v22548_v21 = vpop.permute.xlu1 %7124 }
 0x52a   :  { %17862 = vmatmul.mubr.msk.f32.vlgmr.msra.gmra.mxu0 %vm25368_vm6, %v22312_v37 }
 0x52b   :  { %17871 = vmatpush1.msk.msra.mxu0 %vm22178_vm0, %v6358_v61  ;;  %17856 = vmatmul.mubr.msk.f32.vlgmr.msra.gmra.mxu1 %vm25369_vm2, %v22312_v37  ;;  %v6361_v61 = vsel %vm87_vm9, %v21912_v46, %v25372_v44  ;;  %v25374_v46 = vld [vmem:[#allocation16_spill] sm:$0xff]  ;;  %v25375_v44 = vld [vmem:[#allocation23_spill] sm:$0xff]  ;;  %vm25376_vm9 = vmmov %vm25354_vm1 }
 0x52c   :  { %17865 = vmatpush1.msk.msra.mxu1 %vm22178_vm0, %v6362_v57  ;;  %17872 = vmatprep.subr.msk.mxu0 %vm22178_vm0, %v6387_v55  ;;  %v2788_v57 = vadd.f32 %v22202_v32, %v25374_v46  ;;  %v22562_v55 = vpop.f32.mrf.mxu1  ;;  %v7175_v50 = vsel %vm90_vm10, %v25375_v44, %v22065_v53 }
 0x52d   :  { %17866 = vmatprep.subr.msk.mxu1 %vm22178_vm0, %v6359_v58  ;;  %17873 = vmatpush1.msk.msra.mxu0 %vm22178_vm0, %v6357_v47  ;;  %v22571_v58 = vpop.permute.xlu0 %7130  ;;  %v3546_v47 = vpop.f32.mrf.mxu0 }
 0x52e   :  { %6888 = vmatprep.mubr.f32.mxu0 %v24783_v7  ;;  %17867 = vmatpush1.msk.msra.mxu1 %vm22178_vm0, %v6361_v61  ;;  %v22577_v34 = vadd.f32 %v3546_v47, %v2788_v57  ;;  %vm25377_vm0 = vmmov %vm25354_vm1  ;;  %v7173_v57 = vsel %vm90_vm10, %v22065_v53, %v22143_v48  ;;  %v25380_v53 = vld [vmem:[#allocation52_spill] sm:$0xff] }
 0x52f   :  { %17882 = vmatprep.subr.msk.mxu0 %vm22522_vm7, %v7171_v1  ;;  %6811 = vmatprep.mubr.f32.mxu1 %v24783_v7  ;;  %v3469_v32 = vpop.f32.mrf.mxu1  ;;  %v22586_v61 = vpop.f32.mrf.mxu0  ;;  %vm25378_vm8 = vmmov %vm25377_vm0  ;;  %v2794_v48 = vadd.f32 %v22244_v52, %v25380_v53  ;;  %v25381_v52 = vld [vmem:[#allocation58_spill] sm:$0xff] }
 0x530   :  { %17863 = vmatmul.mubr.msk.f32.gmra.mxu0 %vm25376_vm9, %v22366_v17  ;;  %17876 = vmatprep.subr.msk.mxu1 %vm22522_vm7, %v7175_v50  ;;  %v22584_v19 = vadd.f32 %v3469_v32, %v22224_v0  ;;  %v22588_v1 = vpop.permute.xlu1 %7134  ;;  %v7177_v0 = vsel %vm90_vm10, %v22054_v29, %v25375_v44  ;;  %v7170_v50 = vsel %vm90_vm10, %v22194_v63, %v22231_v59  ;;  %vm25379_vm13 = vmmov %vm25377_vm0 }
 0x531   :  { %17857 = vmatmul.mubr.msk.f32.gmra.mxu1 %vm25377_vm0, %v22366_v17  ;;  %7036 = vmatprep.mubr.f32.mxu0 %v24783_v7  ;;  %v22590_v46 = vpop.f32.mrf.mxu1  ;;  %v22612_v47 = vpop.permute.xlu0 %7128  ;;  %v7174_v44 = vsel %vm90_vm10, %v22079_v15, %v22083_v16  ;;  %v7172_v32 = vsel %vm90_vm10, %v22083_v16, %v22194_v63  ;;  %v7163_v63 = vsel %vm90_vm10, %v22342_v51, %v22389_v2  ;;  %vm25382_vm1 = vmmov %vm25377_vm0 }
 0x532   :  { %6959 = vmatprep.mubr.f32.mxu1 %v24783_v7  ;;  %vm25384_vm4 = vmmov %vm25377_vm0 }
 0x533   :  { %vm25385_vm5 = vmmov %vm25377_vm0 }
 0x534   :  { %17874 = vmatmul.mubr.msk.f32.vlgmr.msra.gmra.mxu0 %vm25378_vm8, %v22312_v37  ;;  %vm25387_vm14 = vmmov %vm25377_vm0 }
 0x535   :  { %17883 = vmatpush1.msk.msra.mxu0 %vm22522_vm7, %v7173_v57  ;;  %17868 = vmatmul.mubr.msk.f32.vlgmr.msra.gmra.mxu1 %vm25379_vm13, %v22312_v37  ;;  %v7176_v57 = vsel %vm90_vm10, %v25381_v52, %v22079_v15  ;;  %vm25389_vm15 = vmmov %vm25377_vm0 }
 0x536   :  { %17877 = vmatpush1.msk.msra.mxu1 %vm22522_vm7, %v7177_v0  ;;  %17884 = vmatprep.subr.msk.mxu0 %vm22522_vm7, %v7170_v50  ;;  %v3552_v37 = vpop.f32.mrf.mxu0  ;;  %v7167_v50 = vsel %vm90_vm10, %v22236_v6, %v22283_v62  ;;  %vm25390_vm3 = vmmov %vm25377_vm0 }
 0x537   :  { %17878 = vmatprep.subr.msk.mxu1 %vm22522_vm7, %v7174_v44  ;;  %17885 = vmatpush1.msk.msra.mxu0 %vm22522_vm7, %v7172_v32  ;;  %v22634_v53 = vadd.f32 %v3552_v37, %v2794_v48  ;;  %v3475_v16 = vpop.f32.mrf.mxu1  ;;  %v25383_v48 = vld [vmem:[#allocation45_spill] sm:$0xff]  ;;  %v22657_v32 = vpop.permute.xlu1 %7132  ;;  %vm25393_vm12 = vmmov %vm25377_vm0 }
 0x538   :  { %7042 = vmatprep.mubr.f32.mxu0 %v24783_v7  ;;  %17879 = vmatpush1.msk.msra.mxu1 %vm22522_vm7, %v7176_v57  ;;  %v22644_v15 = vadd.f32 %v3475_v16, %v22271_v4  ;;  %v22646_v0 = vpop.f32.mrf.mxu0  ;;  %v2942_v44 = vadd.f32 %v22294_v14, %v25383_v48  ;;  %v22665_v4 = vld [vmem:[#allocation3 + $0x70] sm:$0xff]  ;;  %v22670_v16 = vpop.permute.xlu0 %7138  ;;  %v7165_v48 = vsel %vm90_vm10, %v22283_v62, %v22342_v51  ;;  %vm25394_vm11 = vmmov %vm25377_vm0 }
 0x539   :  { %6965 = vmatprep.mubr.f32.mxu1 %v24783_v7  ;;  %17875 = vmatmul.mubr.msk.f32.gmra.mxu0 %vm25382_vm1, %v22366_v17  ;;  %v22659_v37 = vpop.f32.mrf.mxu1  ;;  %v7166_v51 = vsel %vm90_vm10, %v22303_v22, %v22322_v33  ;;  %vm25396_vm6 = vmmov %vm25377_vm0 }
 0x53a   :  { %17888 = vmatprep.subr.msk.mxu1 %vm22522_vm7, %v7167_v50  ;;  %17869 = vmatmul.mubr.msk.f32.gmra.mxu1 %vm25384_vm4, %v22366_v17  ;;  %v7162_v50 = vsel %vm90_vm10, %v22400_v49, %v22430_v28  ;;  %vm25397_vm2 = vmmov %vm25377_vm0 }
 0x53b   :  { %v3700_v57 = vpop.f32.mrf.mxu0  ;;  %17894 = vmatprep.subr.msk.mxu0 %vm22522_vm7, %v7163_v63  ;;  %7365 = vmatprep.mubr.f32.mxu0 %v24783_v7  ;;  %vm25398_vm9 = vmmov %vm25377_vm0 }
 0x53c   :  { %v22672_v14 = vadd.f32 %v3700_v57, %v2942_v44  ;;  %7288 = vmatprep.mubr.f32.mxu1 %v24783_v7  ;;  %v7169_v57 = vsel %vm90_vm10, %v22160_v40, %v22236_v6  ;;  %v22712_v40 = vld [vmem:[#allocation3 + $0x78] sm:$0xff]  ;;  %v7143_v6 = vpop.permute.xlu1 %7142  ;;  %vm25400_vm8 = vmmov %vm25377_vm0 }
 0x53d   :  { %17886 = vmatmul.mubr.msk.f32.vlgmr.msra.gmra.mxu0 %vm25385_vm5, %v22665_v4  ;;  %v22688_v44 = vpop.f32.mrf.mxu0  ;;  %vm25401_vm13 = vmmov %vm25377_vm0  ;;  %vm18405_vm5 = vmmov 0  }
 0x53e   :  { %25386 = vst [vmem:[#allocation85_spill] sm:$0xff] %v22688_v44  ;;  %17895 = vmatpush1.msk.msra.mxu0 %vm22522_vm7, %v7165_v48  ;;  %17880 = vmatmul.mubr.msk.f32.vlgmr.msra.gmra.mxu1 %vm25387_vm14, %v22665_v4  ;;  %v7155_v48 = vsel %vm90_vm10, %v22571_v58, %v22588_v1  ;;  %vm25403_vm1 = vmmov %vm25377_vm0 }
 0x53f   :  { %v3623_v17 = vpop.f32.mrf.mxu1  ;;  %17889 = vmatpush1.msk.msra.mxu1 %vm22522_vm7, %v7169_v57  ;;  %17896 = vmatprep.subr.msk.mxu0 %vm22522_vm7, %v7162_v50  ;;  %vm25406_vm4 = vmmov %vm25377_vm0 }
 0x540   :  { %v22686_v63 = vadd.f32 %v3623_v17, %v22315_v30  ;;  %v7164_v30 = vsel %vm90_vm10, %v22322_v33, %v22400_v49  ;;  %v7168_v17 = vsel %vm90_vm10, %v22231_v59, %v22303_v22  ;;  %17890 = vmatprep.subr.msk.mxu1 %vm22522_vm7, %v7166_v51  ;;  %v7159_v33 = vsel %vm90_vm10, %v22459_v45, %v22493_v20  ;;  %v25388_v49 = vld [vmem:[#allocation28_spill] sm:$0xff]  ;;  %v22731_v59 = vpop.permute.xlu0 %7136  ;;  %vm25419_vm14 = vmmov %vm25377_vm0 }
 0x541   :  { %v22698_v62 = vpop.f32.mrf.mxu1  ;;  %17897 = vmatpush1.msk.msra.mxu0 %vm22522_vm7, %v7164_v30  ;;  %v2948_v50 = vadd.f32 %v22344_v42, %v25388_v49  ;;  %7371 = vmatprep.mubr.f32.mxu0 %v24783_v7 }
 0x542   :  { %17891 = vmatpush1.msk.msra.mxu1 %vm22522_vm7, %v7168_v17  ;;  %7294 = vmatprep.mubr.f32.mxu1 %v24783_v7  ;;  %v25392_v17 = vld [vmem:[#allocation35_spill] sm:$0xff] }
 0x543   :  { %17887 = vmatmul.mubr.msk.f32.gmra.mxu0 %vm25389_vm15, %v22712_v40  ;;  %17881 = vmatmul.mubr.msk.f32.gmra.mxu1 %vm25390_vm3, %v22712_v40  ;;  %v3096_v49 = vadd.f32 %v22391_v54, %v25392_v17  ;;  %v7161_v54 = vsel %vm90_vm10, %v22389_v2, %v22459_v45  ;;  %v7154_v2 = vsel %vm90_vm10, %v22612_v47, %v22657_v32  ;;  %v25395_v45 = vld [vmem:[#allocation68_spill] sm:$0xff]  ;;  %vm25512_vm15 = vmmov %vm25377_vm0 }
 0x544   :  { %v3706_v22 = vpop.f32.mrf.mxu0  ;;  %17900 = vmatprep.subr.msk.mxu1 %vm22522_vm7, %v7159_v33  ;;  %7519 = vmatprep.mubr.f32.mxu0 %v24783_v7  ;;  %vm25514_vm3 = vmmov %vm25377_vm0 }
 0x545   :  { %v22740_v57 = vadd.f32 %v3706_v22, %v2948_v50  ;;  %7442 = vmatprep.mubr.f32.mxu1 %v24783_v7  ;;  %17906 = vmatprep.subr.msk.mxu0 %vm22522_vm7, %v7155_v48  ;;  %v7141_v22 = vpop.permute.xlu1 %7140  ;;  %v7147_v48 = vpop.permute.xlu0 %7146 }
 0x546   :  { %v22749_v51 = vpop.f32.mrf.mxu0 }
 0x547   :  { %v3629_v42 = vpop.f32.mrf.mxu1  ;;  %25391 = vst [vmem:[#allocation82_spill] sm:$0xff] %v22749_v51  ;;  %17898 = vmatmul.mubr.msk.f32.vlgmr.msra.gmra.mxu0 %vm25393_vm12, %v22665_v4  ;;  %17892 = vmatmul.mubr.msk.f32.vlgmr.msra.gmra.mxu1 %vm25394_vm11, %v22665_v4  ;;  %vm25526_vm12 = vmmov %vm25377_vm0 }
 0x548   :  { %v22747_v30 = vadd.f32 %v3629_v42, %v22369_v43  ;;  %v3854_v18 = vpop.f32.mrf.mxu0  ;;  %v7158_v43 = vsel %vm90_vm10, %v22499_v35, %v22548_v21  ;;  %7525 = vmatprep.mubr.f32.mxu0 %v24783_v7  ;;  %17901 = vmatpush1.msk.msra.mxu1 %vm22522_vm7, %v7161_v54  ;;  %vm25539_vm11 = vmmov %vm25377_vm0 }
 0x549   :  { %v22755_v50 = vpop.f32.mrf.mxu1  ;;  %v22765_v33 = vadd.f32 %v3854_v18, %v3096_v49  ;;  %v7157_v18 = vsel %vm90_vm10, %v22493_v20, %v22571_v58  ;;  %7448 = vmatprep.mubr.f32.mxu1 %v24783_v7  ;;  %v7160_v20 = vsel %vm90_vm10, %v22430_v28, %v22499_v35  ;;  %17902 = vmatprep.subr.msk.mxu1 %vm22522_vm7, %v7158_v43  ;;  %v7145_v54 = vpop.permute.xlu1 %7144 }
 0x54a   :  { %v22777_v9 = vpop.f32.mrf.mxu0  ;;  %17907 = vmatpush1.msk.msra.mxu0 %vm22522_vm7, %v7157_v18  ;;  %17903 = vmatpush1.msk.msra.mxu1 %vm22522_vm7, %v7160_v20  ;;  %v7156_v35 = vsel %vm90_vm10, %v22548_v21, %v22612_v47  ;;  %v7151_v43 = vsel %vm90_vm10, %v22670_v16, %v7143_v6  ;;  %v7149_v21 = vsel %vm90_vm10, %v7143_v6, %v7147_v48 }
 0x54b   :  { %v3777_v42 = vpop.f32.mrf.mxu1  ;;  %17899 = vmatmul.mubr.msk.f32.gmra.mxu0 %vm25396_vm6, %v22712_v40  ;;  %17893 = vmatmul.mubr.msk.f32.gmra.mxu1 %vm25397_vm2, %v22712_v40  ;;  %v7150_v6 = vsel %vm90_vm10, %v22731_v59, %v7141_v22  ;;  %vm25549_vm6 = vmmov %vm25377_vm0 }
 0x54c   :  { %v22775_v17 = vadd.f32 %v3777_v42, %v22403_v13  ;;  %v3102_v13 = vadd.f32 %v22410_v36, %v25395_v45  ;;  %v7179_v36 = vsel %vm90_vm10, %v7147_v48, %v22054_v29  ;;  %17908 = vmatprep.subr.msk.mxu0 %vm22522_vm7, %v7154_v2  ;;  %7596 = vmatprep.mubr.f32.mxu1 %v24783_v7  ;;  %vm25550_vm2 = vmmov %vm25377_vm0 }
 0x54d   :  { %v22792_v49 = vpop.f32.mrf.mxu1  ;;  %v3860_v58 = vpop.f32.mrf.mxu0  ;;  %17909 = vmatpush1.msk.msra.mxu0 %vm22522_vm7, %v7156_v35  ;;  %7673 = vmatprep.mubr.f32.mxu0 %v24783_v7 }
 0x54e   :  { %v22809_v42 = vadd.f32 %v3860_v58, %v3102_v13  ;;  %17918 = vmatprep.subr.msk.mxu0 %vm22522_vm7, %v7179_v36  ;;  %17912 = vmatprep.subr.msk.mxu1 %vm22522_vm7, %v7151_v43  ;;  %v7148_v13 = vsel %vm90_vm10, %v7141_v22, %v7145_v54 }
 0x54f   :  { %v3783_v28 = vpop.f32.mrf.mxu1  ;;  %v22825_v18 = vpop.f32.mrf.mxu0  ;;  %17910 = vmatmul.mubr.msk.f32.vlgmr.msra.gmra.mxu0 %vm25398_vm9, %v22665_v4  ;;  %17904 = vmatmul.mubr.msk.f32.vlgmr.msra.gmra.mxu1 %vm25377_vm0, %v22665_v4  ;;  %vm25551_vm9 = vmmov %vm25377_vm0 }
 0x550   :  { %v22823_v29 = vadd.f32 %v3783_v28, %v22433_v11  ;;  %v7178_v11 = vsel %vm90_vm10, %v7145_v54, %v25381_v52  ;;  %17919 = vmatpush1.msk.msra.mxu0 %vm22522_vm7, %v7149_v21  ;;  %v7153_v52 = vsel %vm90_vm10, %v22588_v1, %v22670_v16  ;;  %7602 = vmatprep.mubr.f32.mxu1 %v24783_v7 }
 0x551   :  { %v22832_v47 = vpop.f32.mrf.mxu1  ;;  %7679 = vmatprep.mubr.f32.mxu0 %v24783_v7  ;;  %17913 = vmatpush1.msk.msra.mxu1 %vm22522_vm7, %v7153_v52 }
 0x552   :  { %v4008_v2 = vpop.f32.mrf.mxu0  ;;  %17920 = vmatprep.subr.msk.mxu0 %vm22522_vm7, %v7178_v11  ;;  %17914 = vmatprep.subr.msk.mxu1 %vm22522_vm7, %v7150_v6 }
 0x553   :  { %v22852_v48 = vadd.f32 %v4008_v2, %v22479_v12  ;;  %v3931_v45 = vpop.f32.mrf.mxu1  ;;  %17911 = vmatmul.mubr.msk.f32.gmra.mxu0 %vm25400_vm8, %v22712_v40  ;;  %17905 = vmatmul.mubr.msk.f32.gmra.mxu1 %vm25401_vm13, %v22712_v40  ;;  %vm25552_vm8 = vmmov %vm25377_vm0 }
 0x554   :  { %v22863_v20 = vadd.f32 %v3931_v45, %v22486_v38  ;;  %v22865_v58 = vpop.f32.mrf.mxu0  ;;  %v7152_v38 = vsel %vm90_vm10, %v22657_v32, %v22731_v59  ;;  %17921 = vmatpush1.msk.msra.mxu0 %vm22522_vm7, %v7148_v13  ;;  %7750 = vmatprep.mubr.f32.mxu1 %v24783_v7  ;;  %vm25402_vm10 = vmmov %vm25377_vm0 }
 0x555   :  { %25399 = vst [vmem:[#allocation81_spill] sm:$0xff] %v22865_v58  ;;  %v22875_v12 = vpop.f32.mrf.mxu1  ;;  %17915 = vmatpush1.msk.msra.mxu1 %vm22522_vm7, %v7152_v38  ;;  %7827 = vmatprep.mubr.f32.mxu0 %v24783_v7  ;;  %vm25405_vm7 = vmmov %vm25377_vm0 }
 0x556   :  { %18138 = vmatprep.subr.mxu1 %v24783_v7  ;;  %vm25553_vm13 = vmmov %vm25377_vm0 }
 0x557   :  { %17922 = vmatmul.mubr.msk.f32.vlgmr.msra.gmra.mxu0 %vm25402_vm10, %v22665_v4  ;;  %17916 = vmatmul.mubr.msk.f32.vlgmr.msra.gmra.mxu1 %vm25403_vm1, %v22665_v4  ;;  %vm25554_vm10 = vmmov %vm25377_vm0 }
 0x558   :  { %v4014_v1 = vpop.f32.mrf.mxu0  ;;  %7833 = vmatprep.mubr.f32.mxu0 %v24783_v7  ;;  %7756 = vmatprep.mubr.f32.mxu1 %v24783_v7  ;;  %vm25555_vm1 = vmmov %vm25377_vm0 }
 0x559   :  { %v4049_v16 = vadd.f32 %v4014_v1, %v22520_v26  ;;  %v3937_v27 = vpop.f32.mrf.mxu1  ;;  %18139 = vmatpush3.msra.mxu1 %v24783_v7 }
 0x55a   :  { %v4047_v5 = vadd.f32 %v3937_v27, %v22551_v56  ;;  %v22897_v32 = vpop.f32.mrf.mxu0 }
 0x55b   :  { %25404 = vst [vmem:[#allocation79_spill] sm:$0xff] %v22897_v32  ;;  %v22900_v59 = vpop.f32.mrf.mxu1  ;;  %17923 = vmatmul.mubr.msk.f32.gmra.mxu0 %vm25405_vm7, %v22712_v40  ;;  %17917 = vmatmul.mubr.msk.f32.gmra.mxu1 %vm25406_vm4, %v22712_v40  ;;  %vm25556_vm7 = vmmov %vm25377_vm0 }
 0x55c   :  { %v4203_v26 = vpop.f32.mrf.mxu0  ;;  %8172 = vmatprep.mubr.f32.mxu0 %v24783_v7  ;;  %18140 = vmatprep.mubr.msk.f32.mxu1 %vm18405_vm5, %v24783_v7  ;;  %vm25557_vm4 = vmmov %vm25377_vm0 }
 0x55d   :  { %v4678_v22 = vadd.f32 %v4203_v26, %v22577_v34  ;;  %v4126_v4 = vpop.f32.mrf.mxu1 }
 0x55e   :  { %v4676_v56 = vadd.f32 %v4126_v4, %v22584_v19  ;;  %v22910_v36 = vpop.f32.mrf.mxu0 }
 0x55f   :  { %v22912_v28 = vpop.f32.mrf.mxu1 }
 0x562   :  { %v4209_v35 = vpop.f32.mrf.mxu0 }
 0x563   :  { %v4694_v43 = vadd.f32 %v4209_v35, %v22634_v53  ;;  %v4132_v54 = vpop.f32.mrf.mxu1 }
 0x564   :  { %v4692_v21 = vadd.f32 %v4132_v54, %v22644_v15  ;;  %v22916_v11 = vpop.f32.mrf.mxu0 }
 0x565   :  { %v22918_v34 = vpop.f32.mrf.mxu1 }
 0x566   :  { %v4357_v40 = vpop.f32.mrf.mxu0 }
 0x567   :  { %v4682_v2 = vadd.f32 %v4357_v40, %v22672_v14  ;;  %v4280_v6 = vpop.f32.mrf.mxu1 }
 0x568   :  { %v4680_v19 = vadd.f32 %v4280_v6, %v22686_v63  ;;  %v22922_v45 = vpop.f32.mrf.mxu0 }
 0x569   :  { %25407 = vst [vmem:[#allocation87_spill] sm:$0xff] %v22922_v45  ;;  %v22924_v52 = vpop.f32.mrf.mxu1 }
 0x56c   :  { %v4363_v13 = vpop.f32.mrf.mxu0 }
 0x56d   :  { %v4698_v53 = vadd.f32 %v4363_v13, %v22740_v57  ;;  %v4286_v38 = vpop.f32.mrf.mxu1 }
 0x56e   :  { %v4696_v15 = vadd.f32 %v4286_v38, %v22747_v30  ;;  %v22928_v1 = vpop.f32.mrf.mxu0 }
 0x56f   :  { %25408 = vst [vmem:[#allocation84_spill] sm:$0xff] %v22928_v1  ;;  %v22930_v27 = vpop.f32.mrf.mxu1 }
 0x570   :  { %25409 = vst [vmem:[#allocation83_spill] sm:$0xff] %v22930_v27  ;;  %v4511_v26 = vpop.f32.mrf.mxu0 }
 0x571   :  { %v4686_v14 = vadd.f32 %v4511_v26, %v22765_v33  ;;  %v4434_v4 = vpop.f32.mrf.mxu1 }
 0x572   :  { %v4684_v63 = vadd.f32 %v4434_v4, %v22775_v17  ;;  %v22934_v35 = vpop.f32.mrf.mxu0 }
 0x573   :  { %25410 = vst [vmem:[#allocation80_spill] sm:$0xff] %v22934_v35  ;;  %v22936_v54 = vpop.f32.mrf.mxu1 }
 0x574   :  { %25411 = vst [vmem:[#allocation41_spill] sm:$0xff] %v22936_v54 }
 0x576   :  { %v4517_v40 = vpop.f32.mrf.mxu0 }
 0x577   :  { %v4702_v57 = vadd.f32 %v4517_v40, %v22809_v42 }
 0x578   :  { %v4440_v6 = vpop.f32.mrf.mxu1  ;;  %v22940_v13 = vpop.f32.mrf.mxu0 }
 0x579   :  { %v4700_v30 = vadd.f32 %v4440_v6, %v22823_v29  ;;  %25412 = vst [vmem:[#allocation20_spill] sm:$0xff] %v22940_v13 }
 0x57a   :  { %v22942_v38 = vpop.f32.mrf.mxu1  ;;  %v4665_v58 = vpop.f32.mrf.mxu0 }
 0x57b   :  { %25413 = vst [vmem:[#allocation48_spill] sm:$0xff] %v22942_v38  ;;  %v4690_v33 = vadd.f32 %v4665_v58, %v22852_v48 }
 0x57c   :  { %v4588_v26 = vpop.f32.mrf.mxu1  ;;  %v22946_v4 = vpop.f32.mrf.mxu0 }
 0x57d   :  { %v4688_v17 = vadd.f32 %v4588_v26, %v22863_v20  ;;  %25414 = vst [vmem:[#allocation86_spill] sm:$0xff] %v22946_v4 }
 0x57e   :  { %v22948_v32 = vpop.f32.mrf.mxu1 }
 0x57f   :  { %25415 = vst [vmem:[#allocation26_spill] sm:$0xff] %v22948_v32 }
 0x581   :  { %v4671_v60 = vpop.f32.mrf.mxu0 }
 0x582   :  { %v4706_v45 = vadd.f32 %v4671_v60, %v4049_v16  ;;  %v4594_v42 = vpop.f32.mrf.mxu1  ;;  %v22963_v60 = vld [vmem:[%s24547_s7 + $0x8] sm:$0xff] }
 0x583   :  { %v4704_v40 = vadd.f32 %v4594_v42, %v4047_v5  ;;  %v22950_v1 = vpop.f32.mrf.mxu0  ;;  %25418 = vst [vmem:[#allocation19_spill] sm:$0xff] %v22963_v60  ;;  %18141 = vmatmul.mubr.msk.f32.vlgmr.msra.gmra.mxu1 %vm25419_vm14, %v22963_v60  ;;  %vm25558_vm14 = vmmov %vm25377_vm0 }
 0x584   :  { %25416 = vst [vmem:[#allocation37_spill] sm:$0xff] %v22950_v1  ;;  %v22952_v29 = vpop.f32.mrf.mxu1  ;;  %8101 = vmatprep.mubr.f32.mxu1 %v24783_v7 }
 0x585   :  { %25417 = vst [vmem:[#allocation14_spill] sm:$0xff] %v22952_v29  ;;  %v4994_v6 = vpop.f32.mrf.mxu0 }
 0x586   :  { %v5469_v44 = vadd.f32 %v4994_v6, %v4678_v22 }
 0x587   :  { %v4917_v51 = vpop.f32.mrf.mxu1  ;;  %v22954_v48 = vpop.f32.mrf.mxu0 }
 0x588   :  { %v5467_v38 = vadd.f32 %v4917_v51, %v4676_v56 }
 0x589   :  { %v22956_v58 = vpop.f32.mrf.mxu1 }
 0x58c   :  { %v5000_v20 = vpop.f32.mrf.mxu0 }
 0x58d   :  { %v22967_v16 = vadd.f32 %v5000_v20, %v4694_v43  ;;  %v4923_v51 = vpop.f32.mrf.mxu1 }
 0x58e   :  { %v22970_v5 = vadd.f32 %v4923_v51, %v4692_v21  ;;  %v22972_v22 = vpop.f32.mrf.mxu0 }
 0x58f   :  { %v22974_v56 = vpop.f32.mrf.mxu1 }
 0x590   :  { %v5148_v26 = vpop.f32.mrf.mxu0 }
 0x591   :  { %v5473_v42 = vadd.f32 %v5148_v26, %v4682_v2 }
 0x592   :  { %v5071_v6 = vpop.f32.mrf.mxu1  ;;  %v22976_v4 = vpop.f32.mrf.mxu0 }
 0x593   :  { %25420 = vst [vmem:[#allocation13_spill] sm:$0xff] %v22976_v4  ;;  %v5471_v1 = vadd.f32 %v5071_v6, %v4680_v19 }
 0x594   :  { %v22978_v29 = vpop.f32.mrf.mxu1 }
 0x595   :  { %25421 = vst [vmem:[#allocation33_spill] sm:$0xff] %v22978_v29 }
 0x596   :  { %v5154_v60 = vpop.f32.mrf.mxu0 }
 0x597   :  { %v5489_v43 = vadd.f32 %v5154_v60, %v4698_v53 }
 0x598   :  { %v5077_v20 = vpop.f32.mrf.mxu1  ;;  %v22980_v32 = vpop.f32.mrf.mxu0 }
 0x599   :  { %25422 = vst [vmem:[#allocation39_spill] sm:$0xff] %v22980_v32  ;;  %v22982_v7 = vadd.f32 %v5077_v20, %v4696_v15 }
 0x59a   :  { %v22984_v21 = vpop.f32.mrf.mxu1  ;;  %v5302_v51 = vpop.f32.mrf.mxu0 }
 0x59b   :  { %25423 = vst [vmem:[#allocation40_spill] sm:$0xff] %v22982_v7  ;;  %25424 = vst [vmem:[#allocation44_spill] sm:$0xff] %v22984_v21  ;;  %v5477_v13 = vadd.f32 %v5302_v51, %v4686_v14 }
 0x59c   :  { %v5225_v54 = vpop.f32.mrf.mxu1  ;;  %v22986_v35 = vpop.f32.mrf.mxu0 }
 0x59d   :  { %25425 = vst [vmem:[#allocation36_spill] sm:$0xff] %v22986_v35  ;;  %v5475_v2 = vadd.f32 %v5225_v54, %v4684_v63 }
 0x59e   :  { %v22988_v26 = vpop.f32.mrf.mxu1 }
 0x59f   :  { %25426 = vst [vmem:[#allocation46_spill] sm:$0xff] %v22988_v26 }
 0x5a0   :  { %v5308_v19 = vpop.f32.mrf.mxu0 }
 0x5a1   :  { %v22990_v6 = vadd.f32 %v5308_v19, %v4702_v57  ;;  %v5231_v4 = vpop.f32.mrf.mxu1 }
 0x5a2   :  { %v22992_v53 = vadd.f32 %v5231_v4, %v4700_v30  ;;  %v22994_v60 = vpop.f32.mrf.mxu0 }
 0x5a3   :  { %25427 = vst [vmem:[#allocation32_spill] sm:$0xff] %v22990_v6  ;;  %25429 = vst [vmem:[#allocation67_spill] sm:$0xff] %v22994_v60  ;;  %v22996_v15 = vpop.f32.mrf.mxu1 }
 0x5a4   :  { %25428 = vst [vmem:[#allocation24_spill] sm:$0xff] %v22992_v53  ;;  %25430 = vst [vmem:[#allocation34_spill] sm:$0xff] %v22996_v15  ;;  %v5456_v20 = vpop.f32.mrf.mxu0 }
 0x5a5   :  { %v5481_v32 = vadd.f32 %v5456_v20, %v4690_v33  ;;  %v5379_v7 = vpop.f32.mrf.mxu1 }
 0x5a6   :  { %v5479_v14 = vadd.f32 %v5379_v7, %v4688_v17  ;;  %v22998_v51 = vpop.f32.mrf.mxu0 }
 0x5a7   :  { %25431 = vst [vmem:[#allocation57_spill] sm:$0xff] %v22998_v51  ;;  %v23000_v35 = vpop.f32.mrf.mxu1 }
 0x5a8   :  { %25432 = vst [vmem:[#allocation63_spill] sm:$0xff] %v23000_v35 }
 0x5aa   :  { %v5462_v63 = vpop.f32.mrf.mxu0 }
 0x5ab   :  { %v5497_v54 = vadd.f32 %v5462_v63, %v4706_v45  ;;  %v5385_v26 = vpop.f32.mrf.mxu1 }
 0x5ac   :  { %v23002_v57 = vadd.f32 %v5385_v26, %v4704_v40  ;;  %v23004_v19 = vpop.f32.mrf.mxu0 }
 0x5ad   :  { %25434 = vst [vmem:[#allocation59_spill] sm:$0xff] %v23004_v19  ;;  %v23006_v30 = vpop.f32.mrf.mxu1 }
 0x5ae   :  { %25433 = vst [vmem:[#allocation65_spill] sm:$0xff] %v23002_v57  ;;  %25435 = vst [vmem:[#allocation75_spill] sm:$0xff] %v23006_v30  ;;  %v5785_v4 = vpop.f32.mrf.mxu0 }
 0x5af   :  { %v23008_v53 = vadd.f32 %v5785_v4, %v5469_v44  ;;  %v5708_v6 = vpop.f32.mrf.mxu1 }
 0x5b0   :  { %v23010_v33 = vadd.f32 %v5708_v6, %v5467_v38  ;;  %v23012_v7 = vpop.f32.mrf.mxu0 }
 0x5b1   :  { %v23014_v17 = vpop.f32.mrf.mxu1 }
 0x5b2   :  { %25436 = vst [vmem:[#allocation54_spill] sm:$0xff] %v23010_v33 }
 0x5b4   :  { %v23016_v20 = vpop.f32.mrf.mxu0 }
 0x5b5   :  { %v23018_v45 = vpop.f32.mrf.mxu1 }
 0x5b6   :  { %v23020_v40 = vpop.f32.mrf.mxu0 }
 0x5b7   :  { %v23022_v26 = vpop.f32.mrf.mxu1 }
 0x5b8   :  { %v5939_v63 = vpop.f32.mrf.mxu0 }
 0x5b9   :  { %v6264_v51 = vadd.f32 %v5939_v63, %v5473_v42  ;;  %v5862_v19 = vpop.f32.mrf.mxu1 }
 0x5ba   :  { %v23024_v44 = vadd.f32 %v5862_v19, %v5471_v1  ;;  %v23026_v4 = vpop.f32.mrf.mxu0 }
 0x5bb   :  { %25438 = vst [vmem:[#allocation62_spill] sm:$0xff] %v23026_v4  ;;  %v23028_v38 = vpop.f32.mrf.mxu1 }
 0x5bc   :  { %25437 = vst [vmem:[#allocation38_spill] sm:$0xff] %v23024_v44  ;;  %25439 = vst [vmem:[#allocation47_spill] sm:$0xff] %v23028_v38 }
 0x5be   :  { %v5945_v6 = vpop.f32.mrf.mxu0 }
 0x5bf   :  { %v6280_v57 = vadd.f32 %v5945_v6, %v5489_v43  ;;  %v23030_v30 = vpop.f32.mrf.mxu1 }
 0x5c0   :  { %25440 = vst [vmem:[#allocation74_spill] sm:$0xff] %v23030_v30  ;;  %v23032_v35 = vpop.f32.mrf.mxu0 }
 0x5c1   :  { %25441 = vst [vmem:[#allocation55_spill] sm:$0xff] %v23032_v35  ;;  %v23034_v15 = vpop.f32.mrf.mxu1 }
 0x5c2   :  { %25442 = vst [vmem:[#allocation72_spill] sm:$0xff] %v23034_v15  ;;  %v6093_v60 = vpop.f32.mrf.mxu0 }
 0x5c3   :  { %v23036_v21 = vadd.f32 %v6093_v60, %v5477_v13  ;;  %v6016_v29 = vpop.f32.mrf.mxu1 }
 0x5c4   :  { %v23038_v42 = vadd.f32 %v6016_v29, %v5475_v2  ;;  %v23040_v1 = vpop.f32.mrf.mxu0 }
 0x5c5   :  { %25443 = vst [vmem:[#allocation78_spill] sm:$0xff] %v23036_v21  ;;  %25445 = vst [vmem:[#allocation29_spill] sm:$0xff] %v23040_v1  ;;  %v23042_v19 = vpop.f32.mrf.mxu1 }
 0x5c6   :  { %25444 = vst [vmem:[#allocation69_spill] sm:$0xff] %v23038_v42  ;;  %25446 = vst [vmem:[#allocation31_spill] sm:$0xff] %v23042_v19 }
 0x5c8   :  { %v23044_v63 = vpop.f32.mrf.mxu0 }
 0x5c9   :  { %25447 = vst [vmem:[#allocation53_spill] sm:$0xff] %v23044_v63  ;;  %v23046_v4 = vpop.f32.mrf.mxu1 }
 0x5ca   :  { %25448 = vst [vmem:[#allocation16_spill] sm:$0xff] %v23046_v4  ;;  %v23048_v43 = vpop.f32.mrf.mxu0 }
 0x5cb   :  { %25449 = vst [vmem:[#allocation23_spill] sm:$0xff] %v23048_v43  ;;  %v23050_v6 = vpop.f32.mrf.mxu1 }
 0x5cc   :  { %25450 = vst [vmem:[#allocation52_spill] sm:$0xff] %v23050_v6  ;;  %v6247_v35 = vpop.f32.mrf.mxu0 }
 0x5cd   :  { %v6272_v44 = vadd.f32 %v6247_v35, %v5481_v32  ;;  %v6170_v15 = vpop.f32.mrf.mxu1 }
 0x5ce   :  { %v23052_v13 = vadd.f32 %v6170_v15, %v5479_v14  ;;  %v23054_v60 = vpop.f32.mrf.mxu0 }
 0x5cf   :  { %25452 = vst [vmem:[#allocation45_spill] sm:$0xff] %v23054_v60  ;;  %v23056_v29 = vpop.f32.mrf.mxu1 }
 0x5d0   :  { %25451 = vst [vmem:[#allocation58_spill] sm:$0xff] %v23052_v13  ;;  %25453 = vst [vmem:[#allocation28_spill] sm:$0xff] %v23056_v29 }
 0x5d2   :  { %v6253_v2 = vpop.f32.mrf.mxu0 }
 0x5d3   :  { %v6288_v42 = vadd.f32 %v6253_v2, %v5497_v54  ;;  %v23058_v21 = vpop.f32.mrf.mxu1 }
 0x5d4   :  { %25454 = vst [vmem:[#allocation35_spill] sm:$0xff] %v23058_v21  ;;  %v23060_v19 = vpop.f32.mrf.mxu0 }
 0x5d5   :  { %25455 = vst [vmem:[#allocation68_spill] sm:$0xff] %v23060_v19  ;;  %v23062_v4 = vpop.f32.mrf.mxu1 }
 0x5d6   :  { %25456 = vst [vmem:[#allocation88_spill] sm:$0xff] %v23062_v4  ;;  %v23064_v43 = vpop.f32.mrf.mxu0 }
 0x5d7   :  { %v23066_v6 = vpop.f32.mrf.mxu1 }
 0x5d8   :  { %25457 = vst [vmem:[#allocation89_spill] sm:$0xff] %v23066_v6  ;;  %v23068_v32 = vpop.f32.mrf.mxu0 }
 0x5d9   :  { %v23070_v35 = vpop.f32.mrf.mxu1 }
 0x5dc   :  { %v23072_v15 = vpop.f32.mrf.mxu0 }
 0x5dd   :  { %v23074_v14 = vpop.f32.mrf.mxu1 }
 0x5de   :  { %v23076_v60 = vpop.f32.mrf.mxu0 }
 0x5df   :  { %v23078_v54 = vpop.f32.mrf.mxu1 }
 0x5e0   :  { %v6730_v2 = vpop.f32.mrf.mxu0 }
 0x5e1   :  { %v23080_v19 = vadd.f32 %v6730_v2, %v6264_v51  ;;  %v23082_v13 = vpop.f32.mrf.mxu1 }
 0x5e2   :  { %25459 = vst [vmem:[#allocation91_spill] sm:$0xff] %v23082_v13  ;;  %v23084_v4 = vpop.f32.mrf.mxu0 }
 0x5e3   :  { %25458 = vst [vmem:[#allocation90_spill] sm:$0xff] %v23080_v19  ;;  %25460 = vst [vmem:[#allocation92_spill] sm:$0xff] %v23084_v4  ;;  %v23086_v21 = vpop.f32.mrf.mxu1 }
 0x5e4   :  { %25461 = vst [vmem:[#allocation93_spill] sm:$0xff] %v23086_v21  ;;  %v25481_v21 = vld [vmem:[#allocation30_spill] sm:$0xff] }
 0x5e6   :  { %v6736_v29 = vpop.f32.mrf.mxu0 }
 0x5e7   :  { %v23088_v63 = vadd.f32 %v6736_v29, %v6280_v57  ;;  %v23090_v1 = vpop.f32.mrf.mxu1 }
 0x5e8   :  { %25463 = vst [vmem:[#allocation95_spill] sm:$0xff] %v23090_v1  ;;  %v23092_v30 = vpop.f32.mrf.mxu0 }
 0x5e9   :  { %25462 = vst [vmem:[#allocation94_spill] sm:$0xff] %v23088_v63  ;;  %25464 = vst [vmem:[#allocation96_spill] sm:$0xff] %v23092_v30  ;;  %v23094_v38 = vpop.f32.mrf.mxu1 }
 0x5ea   :  { %25465 = vst [vmem:[#allocation97_spill] sm:$0xff] %v23094_v38  ;;  %v23096_v27 = vpop.f32.mrf.mxu0  ;;  %v25479_v38 = vld [vmem:[#allocation18_spill] sm:$0xff] }
 0x5eb   :  { %25466 = vst [vmem:[#allocation98_spill] sm:$0xff] %v23096_v27  ;;  %v23098_v6 = vpop.f32.mrf.mxu1 }
 0x5ec   :  { %25467 = vst [vmem:[#allocation99_spill] sm:$0xff] %v23098_v6  ;;  %v23100_v51 = vpop.f32.mrf.mxu0 }
 0x5ed   :  { %25468 = vst [vmem:[#allocation100_spill] sm:$0xff] %v23100_v51  ;;  %v23102_v2 = vpop.f32.mrf.mxu1  ;;  %v25478_v51 = vld [vmem:[#allocation50_spill] sm:$0xff] }
 0x5ee   :  { %25469 = vst [vmem:[#allocation101_spill] sm:$0xff] %v23102_v2  ;;  %v2790_v2 = vadd.f32 %v22226_v39, %v25478_v51 }
 0x5f0   :  { %v23104_v4 = vpop.f32.mrf.mxu0 }
 0x5f1   :  { %25470 = vst [vmem:[#allocation102_spill] sm:$0xff] %v23104_v4  ;;  %v23106_v19 = vpop.f32.mrf.mxu1  ;;  %v2713_v4 = vadd.f32 %v22233_v23, %v25479_v38  ;;  %v25486_v23 = vld [vmem:[#allocation66_spill] sm:$0xff]  ;;  %v25487_v38 = vld [vmem:[#allocation51_spill] sm:$0xff] }
 0x5f2   :  { %25471 = vst [vmem:[#allocation103_spill] sm:$0xff] %v23106_v19  ;;  %v23108_v57 = vpop.f32.mrf.mxu0  ;;  %v25480_v19 = vld [vmem:[#allocation15_spill] sm:$0xff] }
 0x5f3   :  { %25472 = vst [vmem:[#allocation104_spill] sm:$0xff] %v23108_v57  ;;  %v23110_v29 = vpop.f32.mrf.mxu1  ;;  %v2796_v57 = vadd.f32 %v22273_v24, %v25480_v19  ;;  %v3021_v24 = vadd.f32 %v25487_v38, %v25486_v23  ;;  %v25488_v19 = vld [vmem:[#allocation64_spill] sm:$0xff] }
 0x5f4   :  { %25473 = vst [vmem:[#allocation105_spill] sm:$0xff] %v23110_v29  ;;  %v7038_v63 = vpop.f32.mrf.mxu0  ;;  %v2719_v29 = vadd.f32 %v22285_v3, %v25481_v21  ;;  %v3104_v3 = vadd.f32 %v22435_v8, %v25488_v19  ;;  %v4022_v21 = vadd.f32 %v22586_v61, %v2790_v2  ;;  %v25491_v38 = vld [vmem:[#allocation76_spill] sm:$0xff] }
 0x5f5   :  { %v23112_v30 = vadd.f32 %v7038_v63, %v6272_v44  ;;  %v23114_v13 = vpop.f32.mrf.mxu1  ;;  %v25482_v63 = vld [vmem:[#allocation43_spill] sm:$0xff]  ;;  %v3181_v8 = vadd.f32 %v22562_v55, %v25491_v38 }
 0x5f6   :  { %25475 = vst [vmem:[#allocation107_spill] sm:$0xff] %v23114_v13  ;;  %v23116_v27 = vpop.f32.mrf.mxu0  ;;  %v25483_v13 = vld [vmem:[#allocation27_spill] sm:$0xff]  ;;  %v4046_v55 = vadd.f32 %v22825_v18, %v3104_v3 }
 0x5f7   :  { %25474 = vst [vmem:[#allocation106_spill] sm:$0xff] %v23112_v30  ;;  %25476 = vst [vmem:[#allocation108_spill] sm:$0xff] %v23116_v27  ;;  %v23118_v6 = vpop.f32.mrf.mxu1  ;;  %v2867_v30 = vadd.f32 %v22320_v41, %v25482_v63  ;;  %v25484_v27 = vld [vmem:[#allocation22_spill] sm:$0xff]  ;;  %v4038_v41 = vadd.f32 %v22646_v0, %v2796_v57  ;;  %v4679_v0 = vadd.f32 %v22910_v36, %v4022_v21 }
 0x5f8   :  { %25477 = vst [vmem:[#allocation109_spill] sm:$0xff] %v23118_v6  ;;  %v2873_v1 = vadd.f32 %v25484_v27, %v25483_v13  ;;  %v25485_v6 = vld [vmem:[#allocation70_spill] sm:$0xff]  ;;  %v25489_v27 = vld [vmem:[#allocation61_spill] sm:$0xff] }
 0x5f9   :  { %v7044_v44 = vpop.f32.mrf.mxu0  ;;  %v3098_v33 = vadd.f32 %v22405_v25, %v25485_v6  ;;  %v3027_v13 = vadd.f32 %v22449_v10, %v25489_v27  ;;  %v25490_v25 = vld [vmem:[#allocation56_spill] sm:$0xff]  ;;  %v4020_v6 = vadd.f32 %v22590_v46, %v2713_v4  ;;  %v4024_v61 = vadd.f32 %v22698_v62, %v2867_v30 }
 0x5fa   :  { %v23134_v39 = vadd.f32 %v7044_v44, %v6288_v42  ;;  %v23136_v51 = vpop.f32.mrf.mxu1  ;;  %v3175_v42 = vadd.f32 %v22497_v31, %v25490_v25  ;;  %v4036_v44 = vadd.f32 %v22659_v37, %v2719_v29  ;;  %v4695_v2 = vadd.f32 %v22916_v11, %v4038_v41  ;;  %v25496_v25 = vld [vmem:[#allocation33_spill] sm:$0xff] }
 0x5fb   :  { %v23144_v63 = vpop.f32.mrf.mxu0  ;;  %v4040_v10 = vadd.f32 %v22755_v50, %v2873_v1  ;;  %v4030_v31 = vadd.f32 %v22777_v9, %v3098_v33  ;;  %v4677_v46 = vadd.f32 %v22912_v28, %v4020_v6  ;;  %v4028_v29 = vadd.f32 %v22792_v49, %v3021_v24  ;;  %v25493_v24 = vld [vmem:[#allocation89_spill] sm:$0xff] }
 0x5fc   :  { %v23152_v23 = vpop.f32.mrf.mxu1  ;;  %v4693_v37 = vadd.f32 %v22918_v34, %v4036_v44  ;;  %v5470_v62 = vadd.f32 %v22954_v48, %v4679_v0  ;;  %v5486_v36 = vadd.f32 %v22972_v22, %v4695_v2  ;;  %v23168_v11 = vadd.f32 %v22832_v47, %v3027_v13  ;;  %v25498_v2 = vld [vmem:[#allocation44_spill] sm:$0xff] }
 0x5fd   :  { %v7367_v57 = vpop.f32.mrf.mxu0  ;;  %v5468_v50 = vadd.f32 %v22956_v58, %v4677_v46  ;;  %v6276_v28 = vadd.f32 %v23016_v20, %v22967_v16  ;;  %v23175_v49 = vadd.f32 %v22875_v12, %v3175_v42  ;;  %v6274_v48 = vadd.f32 %v23018_v45, %v22970_v5 }
 0x5fe   :  { %v7290_v4 = vpop.f32.mrf.mxu1  ;;  %v5484_v9 = vadd.f32 %v22974_v56, %v4693_v37  ;;  %v6261_v18 = vadd.f32 %v23012_v7, %v5470_v62  ;;  %v6277_v22 = vadd.f32 %v23020_v40, %v5486_v36  ;;  %v23182_v47 = vadd.f32 %v22900_v59, %v3181_v8  ;;  %v23207_v8 = vpop.permute.xlu1 %7876  ;;  %v25499_v37 = vld [vmem:[#allocation47_spill] sm:$0xff]  ;;  %v25500_v62 = vld [vmem:[#allocation40_spill] sm:$0xff]  ;;  %v25501_v36 = vld [vmem:[#allocation74_spill] sm:$0xff] }
 0x5ff   :  { %v7369_v30 = vpop.f32.mrf.mxu0  ;;  %v6259_v58 = vadd.f32 %v23014_v17, %v5468_v50  ;;  %v7067_v16 = vadd.f32 %v23072_v15, %v6276_v28  ;;  %v4681_v12 = vadd.f32 %v22924_v52, %v4024_v61  ;;  %v7065_v7 = vadd.f32 %v23074_v14, %v6274_v48  ;;  %v25492_v15 = vld [vmem:[#allocation54_spill] sm:$0xff]  ;;  %v23197_v14 = vpop.permute.xlu0 %7881  ;;  %v25497_v61 = vld [vmem:[#allocation41_spill] sm:$0xff]  ;;  %v25502_v28 = vld [vmem:[#allocation72_spill] sm:$0xff] }
 0x600   :  { %v7292_v34 = vpop.f32.mrf.mxu1  ;;  %v6275_v56 = vadd.f32 %v23022_v26, %v5484_v9  ;;  %v7052_v20 = vadd.f32 %v23068_v32, %v6261_v18  ;;  %v7068_v5 = vadd.f32 %v23076_v60, %v6277_v22  ;;  %v7051_v59 = vadd.f32 %v23064_v43, %v23008_v53  ;;  %v25494_v60 = vld [vmem:[#allocation83_spill] sm:$0xff] }
 0x601   :  { %v7050_v40 = vadd.f32 %v23070_v35, %v6259_v58  ;;  %v7049_v19 = vadd.f32 %v25493_v24, %v25492_v15  ;;  %v4697_v41 = vadd.f32 %v25494_v60, %v4040_v10  ;;  %v25495_v35 = vld [vmem:[#allocation80_spill] sm:$0xff]  ;;  %v5472_v42 = vadd.f32 %v25496_v25, %v4681_v12  ;;  %v25509_v15 = vld [vmem:[#allocation38_spill] sm:$0xff]  ;;  %v25510_v24 = vld [vmem:[#allocation91_spill] sm:$0xff] }
 0x602   :  { %v7066_v17 = vadd.f32 %v23078_v54, %v6275_v56  ;;  %v7843_v52 = vadd.f32 %v7369_v30, %v7052_v20  ;;  %v7842_v27 = vadd.f32 %v7367_v57, %v7051_v59  ;;  %v4687_v54 = vadd.f32 %v25495_v35, %v4030_v31  ;;  %v25503_v58 = vld [vmem:[#allocation20_spill] sm:$0xff]  ;;  %v25517_v35 = vld [vmem:[#allocation67_spill] sm:$0xff] }
 0x603   :  { %v7373_v33 = vpop.f32.mrf.mxu0  ;;  %v7296_v45 = vpop.f32.mrf.mxu1  ;;  %v7841_v13 = vadd.f32 %v7292_v34, %v7050_v40  ;;  %v7840_v6 = vadd.f32 %v7290_v4, %v7049_v19  ;;  %v4685_v0 = vadd.f32 %v25497_v61, %v4028_v29  ;;  %v5488_v10 = vadd.f32 %v25498_v2, %v4697_v41  ;;  %v25507_v40 = vld [vmem:[#allocation97_spill] sm:$0xff]  ;;  %v25518_v61 = vld [vmem:[#allocation34_spill] sm:$0xff] }
 0x604   :  { %v7858_v26 = vadd.f32 %v7373_v33, %v7067_v16  ;;  %v7856_v3 = vadd.f32 %v7296_v45, %v7065_v7  ;;  %v6263_v4 = vadd.f32 %v25499_v37, %v5472_v42  ;;  %v6278_v30 = vadd.f32 %v25501_v36, %v25500_v62  ;;  %v25504_v16 = vld [vmem:[#allocation95_spill] sm:$0xff]  ;;  %v25505_v7 = vld [vmem:[#allocation48_spill] sm:$0xff]  ;;  %v25506_v45 = vld [vmem:[#allocation93_spill] sm:$0xff] }
 0x605   :  { %v7375_v1 = vpop.f32.mrf.mxu0  ;;  %v7298_v21 = vpop.f32.mrf.mxu1  ;;  %v23223_v50 = vadd.f32 %v23207_v8, %v7843_v52  ;;  %v6279_v34 = vadd.f32 %v25502_v28, %v5488_v10  ;;  %v23231_v18 = vadd.f32 %v23207_v8, %v7842_v27  ;;  %v23234_v48 = vadd.f32 %v23207_v8, %v7841_v13  ;;  %v25519_v2 = vld [vmem:[#allocation29_spill] sm:$0xff]  ;;  %v25520_v37 = vld [vmem:[#allocation32_spill] sm:$0xff] }
 0x606   :  { %v7859_v32 = vadd.f32 %v7375_v1, %v7068_v5  ;;  %v7857_v53 = vadd.f32 %v7298_v21, %v7066_v17  ;;  %v23212_v57 = vadd.f32 %v23197_v14, %v7858_v26  ;;  %v23226_v29 = vadd.f32 %v23197_v14, %v7856_v3  ;;  %v25524_v28 = vld [vmem:[#allocation16_spill] sm:$0xff] }
 0x607   :  { %v23200_v43 = vpop.f32.mrf.mxu0  ;;  %v7444_v38 = vpop.f32.mrf.mxu1  ;;  %v4703_v56 = vadd.f32 %v25503_v58, %v4046_v55  ;;  %v7069_v33 = vadd.f32 %v25504_v16, %v6278_v30  ;;  %v23243_v12 = vadd.f32 %v23207_v8, %v7840_v6  ;;  %v4701_v5 = vadd.f32 %v25505_v7, %v23168_v11  ;;  %v25508_v55 = vld [vmem:[#allocation26_spill] sm:$0xff]  ;;  %v25511_v11 = vld [vmem:[#allocation19_spill] sm:$0xff] }
 0x608   :  { %v23205_v44 = vadd.f32 %v23197_v14, %v7859_v32  ;;  %v23215_v46 = vadd.f32 %v23197_v14, %v7857_v53  ;;  %v7054_v59 = vadd.f32 %v25506_v45, %v6263_v4  ;;  %v7070_v17 = vadd.f32 %v25507_v40, %v6279_v34  ;;  %v25513_v32 = vld [vmem:[#allocation36_spill] sm:$0xff]  ;;  %v25521_v4 = vld [vmem:[#allocation53_spill] sm:$0xff]  ;;  %v25525_v58 = vld [vmem:[#allocation23_spill] sm:$0xff] }
 0x609   :  { %v23217_v31 = vpop.f32.mrf.mxu0  ;;  %v7446_v9 = vpop.f32.mrf.mxu1  ;;  %v4689_v1 = vadd.f32 %v25508_v55, %v23175_v49  ;;  %v7053_v19 = vadd.f32 %v25510_v24, %v25509_v15  ;;  %v5478_v21 = vadd.f32 %v25513_v32, %v4687_v54  ;;  %v25515_v13 = vmov 0.0   ;;  %v25516_v49 = vld [vmem:[#allocation46_spill] sm:$0xff]  ;;  %v25530_v15 = vld [vmem:[#allocation103_spill] sm:$0xff] }
 0x60a   :  { %8136 = vmatprep.subr.mxu0 %v23205_v44  ;;  %8065 = vmatprep.subr.mxu1 %v23215_v46  ;;  %v7845_v60 = vadd.f32 %v7446_v9, %v7054_v59  ;;  %v5476_v53 = vadd.f32 %v25516_v49, %v4685_v0  ;;  %v5494_v25 = vadd.f32 %v25517_v35, %v4703_v56  ;;  %v25523_v9 = vld [vmem:[#allocation24_spill] sm:$0xff]  ;;  %v25534_v49 = vld [vmem:[#allocation101_spill] sm:$0xff] }
 0x60b   :  { %v23236_v22 = vpop.f32.mrf.mxu0  ;;  %8137 = vmatpush1.msra.mxu0 %v23212_v57  ;;  %v7450_v20 = vpop.f32.mrf.mxu1  ;;  %8066 = vmatpush1.msra.mxu1 %v23226_v29  ;;  %v7844_v42 = vadd.f32 %v7444_v38, %v7053_v19  ;;  %v5492_v54 = vadd.f32 %v25518_v61, %v4701_v5  ;;  %v6269_v10 = vadd.f32 %v25519_v2, %v5478_v21  ;;  %v25522_v38 = vld [vmem:[#allocation31_spill] sm:$0xff]  ;;  %v25528_v5 = vld [vmem:[#allocation102_spill] sm:$0xff]  ;;  %v25531_v19 = vld [vmem:[#allocation104_spill] sm:$0xff] }
 0x60c   :  { %8138 = vmatprep.subr.mxu0 %v23223_v50  ;;  %8067 = vmatprep.subr.mxu1 %v23234_v48  ;;  %v7860_v52 = vadd.f32 %v7450_v20, %v7069_v33  ;;  %v6284_v62 = vadd.f32 %v25521_v4, %v25520_v37  ;;  %v6267_v0 = vadd.f32 %v25522_v38, %v5476_v53  ;;  %v25527_v20 = vld [vmem:[#allocation52_spill] sm:$0xff]  ;;  %v25532_v21 = vld [vmem:[#allocation78_spill] sm:$0xff]  ;;  %v25535_v35 = vld [vmem:[#allocation105_spill] sm:$0xff] }
 0x60d   :  { %v23251_v26 = vpop.f32.mrf.mxu0  ;;  %8139 = vmatpush1.msra.mxu0 %v23231_v18  ;;  %v7452_v3 = vpop.f32.mrf.mxu1  ;;  %8068 = vmatpush1.msra.mxu1 %v23243_v12  ;;  %v6282_v34 = vadd.f32 %v25524_v28, %v25523_v9  ;;  %v6285_v56 = vadd.f32 %v25525_v58, %v5494_v25  ;;  %v6283_v7 = vadd.f32 %v25527_v20, %v5492_v54  ;;  %v25536_v2 = vld [vmem:[#allocation69_spill] sm:$0xff]  ;;  %v25538_v9 = vld [vmem:[#allocation14_spill] sm:$0xff] }
 0x60e   :  { %17927 = vmatmul.mubr.msk.f32.vlgmr.msra.gmra.mxu0 %vm25512_vm15, %v25511_v11  ;;  %v7861_v41 = vadd.f32 %v7452_v3, %v7070_v17  ;;  %17926 = vmatmul.mubr.msk.f32.vlgmr.msra.gmra.mxu1 %vm25514_vm3, %v25511_v11  ;;  %v23284_v16 = vadd.f32 %v23197_v14, %v7860_v52  ;;  %v7075_v45 = vadd.f32 %v25528_v5, %v6284_v62  ;;  %v25529_v17 = vld [vmem:[#allocation100_spill] sm:$0xff]  ;;  %vm25559_vm15 = vmmov %vm25377_vm0 }
 0x60f   :  { %v7675_v27 = vpop.f32.mrf.mxu0  ;;  %18143 = vmatprep.subr.mxu0 %v25515_v13  ;;  %v7598_v6 = vpop.f32.mrf.mxu1  ;;  %8243 = vmatprep.mubr.f32.mxu1 %v25515_v13  ;;  %v23291_v59 = vadd.f32 %v23207_v8, %v7845_v60  ;;  %v7060_v55 = vadd.f32 %v25529_v17, %v6269_v10  ;;  %v7073_v24 = vadd.f32 %v25530_v15, %v6282_v34  ;;  %v25533_v60 = vld [vmem:[#allocation98_spill] sm:$0xff]  ;;  %v25537_v10 = vld [vmem:[#allocation99_spill] sm:$0xff]  ;;  %vm25561_vm3 = vmmov %vm25377_vm0 }
 0x610   :  { %18144 = vmatpush3.msra.mxu0 %v25515_v13  ;;  %v23275_v36 = vadd.f32 %v23197_v14, %v7861_v41  ;;  %18145 = vmatprep.mubr.msk.f32.mxu0 %vm18405_vm5, %v25515_v13  ;;  %v7076_v52 = vadd.f32 %v25531_v19, %v6285_v56  ;;  %v23299_v3 = vadd.f32 %v23207_v8, %v7844_v42  ;;  %v25540_v56 = vld [vmem:[#allocation63_spill] sm:$0xff] }
 0x611   :  { %v7677_v30 = vpop.f32.mrf.mxu0  ;;  %v7600_v33 = vpop.f32.mrf.mxu1  ;;  %v7059_v41 = vadd.f32 %v25533_v60, %v25532_v21  ;;  %v7058_v53 = vadd.f32 %v25534_v49, %v6267_v0  ;;  %v7074_v25 = vadd.f32 %v25535_v35, %v6283_v7  ;;  %v7057_v37 = vadd.f32 %v25537_v10, %v25536_v2  ;;  %v25544_v15 = vld [vmem:[#allocation35_spill] sm:$0xff]  ;;  %v25546_v35 = vld [vmem:[#allocation109_spill] sm:$0xff] }
 0x612   :  { %18146 = vmatmul.mubr.msk.f32.vlgmr.msra.gmra.mxu0 %vm25526_vm12, %v25511_v11  ;;  %8207 = vmatprep.subr.mxu1 %v23275_v36  ;;  %v7851_v42 = vadd.f32 %v7677_v30, %v7060_v55  ;;  %v4705_v28 = vadd.f32 %v25538_v9, %v23182_v47  ;;  %v5480_v20 = vadd.f32 %v25540_v56, %v4689_v1  ;;  %v25543_v55 = vld [vmem:[#allocation65_spill] sm:$0xff]  ;;  %v25548_v2 = vld [vmem:[#allocation107_spill] sm:$0xff]  ;;  %vm25563_vm12 = vmmov %vm25377_vm0 }
 0x613   :  { %v7681_v40 = vpop.f32.mrf.mxu0  ;;  %8456 = vmatprep.mubr.f32.mxu0 %v25515_v13  ;;  %v7604_v32 = vpop.f32.mrf.mxu1  ;;  %8208 = vmatpush1.msra.mxu1 %v23284_v16  ;;  %v7849_v34 = vadd.f32 %v7600_v33, %v7058_v53  ;;  %v7850_v0 = vadd.f32 %v7675_v27, %v7059_v41  ;;  %v7848_v7 = vadd.f32 %v7598_v6, %v7057_v37  ;;  %v25542_v27 = vld [vmem:[#allocation28_spill] sm:$0xff] }
 0x614   :  { %8209 = vmatprep.subr.mxu1 %v23291_v59  ;;  %v7866_v61 = vadd.f32 %v7681_v40, %v7075_v45  ;;  %v7864_v4 = vadd.f32 %v7604_v32, %v7073_v24  ;;  %v25541_v45 = vld [vmem:[#allocation75_spill] sm:$0xff]  ;;  %v6271_v33 = vadd.f32 %v25542_v27, %v5480_v20  ;;  %v6286_v1 = vadd.f32 %v25544_v15, %v25543_v55  ;;  %v25562_v20 = vld [vmem:[#allocation90_spill] sm:$0xff] }
 0x615   :  { %v7683_v54 = vpop.f32.mrf.mxu0  ;;  %v7606_v62 = vpop.f32.mrf.mxu1  ;;  %8210 = vmatpush1.msra.mxu1 %v23299_v3  ;;  %v5496_v40 = vadd.f32 %v25541_v45, %v4705_v28  ;;  %v23333_v24 = vadd.f32 %v23207_v8, %v7851_v42  ;;  %v23338_v21 = vadd.f32 %v23207_v8, %v7849_v34  ;;  %v23341_v60 = vadd.f32 %v23207_v8, %v7850_v0  ;;  %v25560_v0 = vld [vmem:[#allocation94_spill] sm:$0xff]  ;;  %v25567_v27 = vld [vmem:[#allocation71_spill] sm:$0xff] }
 0x616   :  { %v7867_v38 = vadd.f32 %v7683_v54, %v7076_v52  ;;  %v7865_v58 = vadd.f32 %v7606_v62, %v7074_v25  ;;  %17928 = vmatmul.mubr.msk.f32.vlgmr.msra.gmra.mxu1 %vm25539_vm11, %v25511_v11  ;;  %v23324_v47 = vadd.f32 %v23197_v14, %v7866_v61  ;;  %v23330_v6 = vadd.f32 %v23197_v14, %v7864_v4  ;;  %v25545_v52 = vld [vmem:[#allocation88_spill] sm:$0xff]  ;;  %v25547_v54 = vld [vmem:[#allocation58_spill] sm:$0xff]  ;;  %vm25564_vm11 = vmmov %vm25377_vm0 }
 0x617   :  { %v7752_v30 = vpop.f32.mrf.mxu1  ;;  %8385 = vmatprep.mubr.f32.mxu1 %v25515_v13  ;;  %v6287_v32 = vadd.f32 %v25545_v52, %v5496_v40  ;;  %v7077_v41 = vadd.f32 %v23136_v51, %v6286_v1  ;;  %v23347_v49 = vadd.f32 %v23207_v8, %v7848_v7  ;;  %v7062_v25 = vadd.f32 %v25546_v35, %v6271_v33  ;;  %v7829_v56 = vpop.f32.mrf.mxu0  ;;  %v25566_v40 = vld [vmem:[#allocation21_spill] sm:$0xff]  ;;  %v25569_v15 = vld [vmem:[#allocation42_spill] sm:$0xff] }
 0x618   :  { %v23316_v5 = vadd.f32 %v23197_v14, %v7867_v38  ;;  %v23321_v17 = vadd.f32 %v23197_v14, %v7865_v58  ;;  %v7061_v10 = vadd.f32 %v25548_v2, %v25547_v54  ;;  %v7862_v58 = vadd.f32 %v23236_v22, %v25560_v0  ;;  %v25570_v1 = vld [vmem:[#allocation73_spill] sm:$0xff]  ;;  %v25571_v52 = vld [vmem:[#allocation82_spill] sm:$0xff]  ;;  %v25579_v0 = vld [vmem:[#allocation55_spill] sm:$0xff] }
 0x619   :  { %v7754_v19 = vpop.f32.mrf.mxu1  ;;  %v7078_v61 = vadd.f32 %v23152_v23, %v6287_v32  ;;  %v23366_v23 = vld [vmem:[%s24547_s7] sm:$0xff]  ;;  %v7846_v7 = vadd.f32 %v23200_v43, %v25562_v20  ;;  %v2950_v33 = vadd.f32 %v25567_v27, %v25566_v40 }
 0x61a   :  { %8420 = vmatprep.subr.mxu0 %v23316_v5  ;;  %8349 = vmatprep.subr.mxu1 %v23321_v17  ;;  %v7853_v4 = vadd.f32 %v7754_v19, %v7062_v25  ;;  %v7852_v62 = vadd.f32 %v7752_v30, %v7061_v10  ;;  %v23472_v22 = vadd.f32 %v23197_v14, %v7862_v58  ;;  %v23476_v30 = vpop.f32.mrf.mxu0  ;;  %v25573_v35 = vld [vmem:[#allocation85_spill] sm:$0xff] }
 0x61b   :  { %8421 = vmatpush1.msra.mxu0 %v23324_v47  ;;  %8350 = vmatpush1.msra.mxu1 %v23330_v6  ;;  %v7758_v53 = vpop.f32.mrf.mxu1  ;;  %v23482_v43 = vadd.f32 %v23207_v8, %v7846_v7  ;;  %v2944_v19 = vadd.f32 %v25570_v1, %v25569_v15  ;;  %v4042_v32 = vadd.f32 %v25571_v52, %v2950_v33  ;;  %v25581_v7 = vld [vmem:[#allocation96_spill] sm:$0xff]  ;;  %v25583_v40 = vld [vmem:[#allocation77_spill] sm:$0xff] }
 0x61c   :  { %8422 = vmatprep.subr.mxu0 %v23333_v24  ;;  %8351 = vmatprep.subr.mxu1 %v23338_v21  ;;  %v7868_v51 = vadd.f32 %v7758_v53, %v7077_v41  ;;  %v23382_v28 = vadd.f32 %v23207_v8, %v7853_v4  ;;  %v23387_v34 = vadd.f32 %v23207_v8, %v7852_v62  ;;  %v7835_v45 = vpop.f32.mrf.mxu0  ;;  %v25572_v41 = vld [vmem:[#allocation106_spill] sm:$0xff]  ;;  %v25584_v27 = vld [vmem:[#allocation25_spill] sm:$0xff]  ;;  %v25588_v52 = vld [vmem:[#allocation12_spill] sm:$0xff] }
 0x61d   :  { %8423 = vmatpush1.msra.mxu0 %v23341_v60  ;;  %8352 = vmatpush1.msra.mxu1 %v23347_v49  ;;  %v7760_v37 = vpop.f32.mrf.mxu1  ;;  %v7870_v55 = vadd.f32 %v7835_v45, %v23134_v39  ;;  %v7854_v53 = vadd.f32 %v7829_v56, %v25572_v41  ;;  %v4026_v25 = vadd.f32 %v25573_v35, %v2944_v19  ;;  %v25580_v56 = vld [vmem:[#allocation62_spill] sm:$0xff]  ;;  %v25587_v19 = vld [vmem:[#allocation60_spill] sm:$0xff] }
 0x61e   :  { %17931 = vmatmul.mubr.msk.f32.vlgmr.msra.gmra.mxu0 %vm25549_vm6, %v25511_v11  ;;  %v7869_v42 = vadd.f32 %v7760_v37, %v7078_v61  ;;  %18148 = vmatprep.subr.mxu0 %v25515_v13  ;;  %v23377_v9 = vadd.f32 %v23197_v14, %v7868_v51  ;;  %vm25565_vm6 = vmmov %vm25377_vm0  ;;  %v25574_v61 = vld [vmem:[#allocation84_spill] sm:$0xff]  ;;  %v25577_v37 = vld [vmem:[#allocation39_spill] sm:$0xff]  ;;  %v3258_v33 = vadd.f32 %v25584_v27, %v25583_v40 }
 0x61f   :  { %17930 = vmatmul.mubr.msk.f32.vlgmr.msra.gmra.mxu1 %vm25550_vm2, %v25511_v11  ;;  %18149 = vmatpush3.msra.mxu0 %v25515_v13  ;;  %vm25568_vm2 = vmmov %vm25377_vm0  ;;  %v4699_v54 = vadd.f32 %v25574_v61, %v4042_v32  ;;  %v23524_v2 = vadd.f32 %v23197_v14, %v7870_v55  ;;  %v25585_v55 = vld [vmem:[#allocation92_spill] sm:$0xff]  ;;  %v3252_v32 = vadd.f32 %v25588_v52, %v25587_v19 }
 0x620   :  { %18150 = vmatprep.mubr.msk.f32.mxu0 %vm18405_vm5, %v25515_v13  ;;  %v23372_v38 = vadd.f32 %v23197_v14, %v7869_v42  ;;  %8707 = vmatprep.subr.mxu0 %v23212_v57  ;;  %v23534_v42 = vadd.f32 %v23207_v8, %v7854_v53  ;;  %v23618_v40 = vld [vmem:[%s24547_s7 + $0x20] sm:$0xff] }
 0x621   :  { %8527 = vmatprep.mubr.f32.mxu1 %v25515_v13  ;;  %v5490_v4 = vadd.f32 %v25577_v37, %v4699_v54  ;;  %v25594_v54 = vld [vmem:[#allocation59_spill] sm:$0xff] }
 0x622   :  { %18151 = vmatmul.mubr.msk.f32.vlgmr.msra.gmra.mxu0 %vm25551_vm9, %v23366_v23  ;;  %8491 = vmatprep.subr.mxu1 %v23372_v38  ;;  %vm25575_vm9 = vmmov %vm25377_vm0 }
 0x623   :  { %8708 = vmatpush1.msra.mxu0 %v23215_v46  ;;  %8492 = vmatpush1.msra.mxu1 %v23377_v9  ;;  %v6281_v58 = vadd.f32 %v25579_v0, %v5490_v4  ;;  %v25597_v4 = vld [vmem:[#allocation68_spill] sm:$0xff]  ;;  %v25598_v0 = vld [vmem:[#allocation45_spill] sm:$0xff] }
 0x624   :  { %8709 = vmatprep.subr.mxu0 %v23231_v18  ;;  %8493 = vmatprep.subr.mxu1 %v23382_v28 }
 0x625   :  { %8710 = vmatpush1.msra.mxu0 %v23234_v48  ;;  %8494 = vmatpush1.msra.mxu1 %v23387_v34  ;;  %v7072_v45 = vadd.f32 %v25581_v7, %v6281_v58 }
 0x626   :  { %8743 = vmatprep.mubr.f32.mxu0 %v25515_v13  ;;  %18153 = vmatprep.subr.mxu0 %v25515_v13 }
 0x627   :  { %17932 = vmatmul.mubr.msk.f32.vlgmr.msra.gmra.mxu1 %vm25377_vm0, %v25511_v11  ;;  %8636 = vmatprep.subr.mxu1 %v23226_v29  ;;  %v23437_v11 = vld [vmem:[%s24547_s7 + $0x10] sm:$0xff]  ;;  %v7863_v1 = vadd.f32 %v23251_v26, %v7072_v45  ;;  %v25590_v26 = vld [vmem:[#allocation81_spill] sm:$0xff] }
 0x628   :  { %17935 = vmatmul.mubr.msk.f32.vlgmr.msra.gmra.mxu0 %vm25552_vm8, %v23366_v23  ;;  %8637 = vmatpush1.msra.mxu1 %v25515_v13  ;;  %vm25582_vm8 = vmmov %vm25377_vm0  ;;  %v4034_v35 = vadd.f32 %v25590_v26, %v3252_v32 }
 0x629   :  { %18154 = vmatpush3.msra.mxu0 %v25515_v13  ;;  %8638 = vmatprep.subr.mxu1 %v23243_v12  ;;  %v23574_v61 = vadd.f32 %v23197_v14, %v7863_v1 }
 0x62a   :  { %8991 = vmatprep.subr.mxu0 %v23324_v47  ;;  %8639 = vmatpush1.msra.mxu1 %v25515_v13 }
 0x62b   :  { %8672 = vmatprep.mubr.f32.mxu1 %v25515_v13  ;;  %18155 = vmatprep.mubr.msk.f32.mxu0 %vm18405_vm5, %v25515_v13 }
 0x62c   :  { %17934 = vmatmul.mubr.msk.f32.vlgmr.msra.gmra.mxu1 %vm25553_vm13, %v23366_v23  ;;  %8778 = vmatprep.subr.mxu1 %v23284_v16  ;;  %vm25586_vm13 = vmmov %vm25377_vm0 }
 0x62d   :  { %18156 = vmatmul.mubr.msk.f32.vlgmr.msra.gmra.mxu0 %vm25554_vm10, %v23366_v23  ;;  %8779 = vmatpush1.msra.mxu1 %v23205_v44  ;;  %vm25592_vm10 = vmmov %vm25377_vm0 }
 0x62e   :  { %8992 = vmatpush1.msra.mxu0 %v23321_v17  ;;  %8780 = vmatprep.subr.mxu1 %v23299_v3 }
 0x62f   :  { %8993 = vmatprep.subr.mxu0 %v23341_v60  ;;  %8781 = vmatpush1.msra.mxu1 %v23223_v50 }
 0x630   :  { %8994 = vmatpush1.msra.mxu0 %v23338_v21  ;;  %8814 = vmatprep.mubr.f32.mxu1 %v25515_v13 }
 0x631   :  { %9027 = vmatprep.mubr.f32.mxu0 %v25515_v13  ;;  %9142 = vmatprep.subr.mxu0 %v23226_v29 }
 0x632   :  { %17936 = vmatmul.mubr.msk.f32.vlgmr.msra.gmra.mxu1 %vm25555_vm1, %v23366_v23  ;;  %8920 = vmatprep.subr.mxu1 %v23330_v6  ;;  %vm25595_vm1 = vmmov %vm25377_vm0 }
 0x633   :  { %17939 = vmatmul.mubr.msk.f32.vlgmr.msra.gmra.mxu0 %vm25556_vm7, %v23366_v23  ;;  %8921 = vmatpush1.msra.mxu1 %v25515_v13  ;;  %vm25599_vm7 = vmmov %vm25377_vm0 }
 0x634   :  { %9143 = vmatpush1.msra.mxu0 %v25515_v13  ;;  %8922 = vmatprep.subr.mxu1 %v23347_v49 }
 0x635   :  { %9144 = vmatprep.subr.mxu0 %v23243_v12  ;;  %8923 = vmatpush1.msra.mxu1 %v25515_v13 }
 0x636   :  { %9145 = vmatpush1.msra.mxu0 %v25515_v13  ;;  %8956 = vmatprep.mubr.f32.mxu1 %v25515_v13 }
 0x637   :  { %9178 = vmatprep.mubr.f32.mxu0 %v25515_v13  ;;  %9284 = vmatprep.subr.mxu0 %v23284_v16 }
 0x638   :  { %17938 = vmatmul.mubr.msk.f32.vlgmr.msra.gmra.mxu1 %vm25557_vm4, %v23366_v23  ;;  %9062 = vmatprep.subr.mxu1 %v23377_v9  ;;  %vm25601_vm4 = vmmov %vm25377_vm0 }
 0x639   :  { %17942 = vmatmul.mubr.msk.f32.vlgmr.msra.gmra.mxu0 %vm25558_vm14, %v23437_v11  ;;  %9063 = vmatpush1.msra.mxu1 %v23316_v5  ;;  %vm25602_vm14 = vmmov %vm25377_vm0 }
 0x63a   :  { %9285 = vmatpush1.msra.mxu0 %v23205_v44  ;;  %9064 = vmatprep.subr.mxu1 %v23387_v34 }
 0x63b   :  { %9286 = vmatprep.subr.mxu0 %v23299_v3  ;;  %9065 = vmatpush1.msra.mxu1 %v23333_v24 }
 0x63c   :  { %9287 = vmatpush1.msra.mxu0 %v23223_v50  ;;  %9098 = vmatprep.mubr.f32.mxu1 %v25515_v13 }
 0x63d   :  { %9320 = vmatprep.mubr.f32.mxu0 %v25515_v13  ;;  %9426 = vmatprep.subr.mxu0 %v23330_v6 }
 0x63e   :  { %17940 = vmatmul.mubr.msk.f32.vlgmr.msra.gmra.mxu1 %vm25559_vm15, %v23366_v23  ;;  %9213 = vmatprep.subr.mxu1 %v23212_v57  ;;  %v25578_v23 = vld [vmem:[#allocation13_spill] sm:$0xff]  ;;  %vm25603_vm15 = vmmov %vm25377_vm0 }
 0x63f   :  { %17944 = vmatmul.mubr.msk.f32.vlgmr.msra.gmra.mxu0 %vm25561_vm3, %v23437_v11  ;;  %9214 = vmatpush1.msra.mxu1 %v23215_v46  ;;  %vm25604_vm3 = vmmov %vm25377_vm0 }
 0x640   :  { %9427 = vmatpush1.msra.mxu0 %v25515_v13  ;;  %9215 = vmatprep.subr.mxu1 %v23231_v18 }
 0x641   :  { %9428 = vmatprep.subr.mxu0 %v23347_v49  ;;  %9216 = vmatpush1.msra.mxu1 %v23234_v48 }
 0x642   :  { %9429 = vmatpush1.msra.mxu0 %v25515_v13  ;;  %9249 = vmatprep.mubr.f32.mxu1 %v25515_v13 }
 0x643   :  { %9462 = vmatprep.mubr.f32.mxu0 %v25515_v13  ;;  %9568 = vmatprep.subr.mxu0 %v23377_v9  ;;  %v23512_v39 = vpop.f32.mrf.mxu1 }
 0x644   :  { %17943 = vmatmul.mubr.msk.f32.vlgmr.msra.gmra.mxu1 %vm25563_vm12, %v23437_v11  ;;  %9355 = vmatprep.subr.mxu1 %v23472_v22  ;;  %vm25605_vm12 = vmmov %vm25377_vm0 }
 0x645   :  { %17946 = vmatmul.mubr.msk.f32.vlgmr.msra.gmra.mxu0 %vm25564_vm11, %v23437_v11  ;;  %9356 = vmatpush1.msra.mxu1 %v23275_v36  ;;  %v18142_v10 = vpop.f32.mrf.mxu1  ;;  %vm25606_vm11 = vmmov %vm25377_vm0 }
 0x646   :  { %9569 = vmatpush1.msra.mxu0 %v23316_v5  ;;  %9357 = vmatprep.subr.mxu1 %v23482_v43 }
 0x647   :  { %9570 = vmatprep.subr.mxu0 %v23387_v34  ;;  %9358 = vmatpush1.msra.mxu1 %v23291_v59 }
 0x648   :  { %9571 = vmatpush1.msra.mxu0 %v23333_v24  ;;  %9391 = vmatprep.mubr.f32.mxu1 %v25515_v13 }
 0x649   :  { %9604 = vmatprep.mubr.f32.mxu0 %v25515_v13  ;;  %9731 = vmatprep.subr.mxu0 %v23215_v46 }
 0x64a   :  { %17945 = vmatmul.mubr.msk.f32.vlgmr.msra.gmra.mxu1 %vm25565_vm6, %v23437_v11  ;;  %9497 = vmatprep.subr.mxu1 %v23324_v47  ;;  %vm25607_vm6 = vmmov %vm25377_vm0 }
 0x64b   :  { %17948 = vmatmul.mubr.msk.f32.vlgmr.msra.gmra.mxu0 %vm25568_vm2, %v23437_v11  ;;  %9498 = vmatpush1.msra.mxu1 %v23321_v17  ;;  %vm25608_vm2 = vmmov %vm25377_vm0 }
 0x64c   :  { %9732 = vmatpush1.msra.mxu0 %v23226_v29  ;;  %9499 = vmatprep.subr.mxu1 %v23341_v60  ;;  %v23519_v29 = vld [vmem:[%s24547_s7 + $0x18] sm:$0xff] }
 0x64d   :  { %9733 = vmatprep.subr.mxu0 %v23234_v48  ;;  %9500 = vmatpush1.msra.mxu1 %v23338_v21 }
 0x64e   :  { %9734 = vmatpush1.msra.mxu0 %v23243_v12  ;;  %9533 = vmatprep.mubr.f32.mxu1 %v25515_v13  ;;  %v25576_v12 = vld [vmem:[#allocation87_spill] sm:$0xff] }
 0x64f   :  { %9767 = vmatprep.mubr.f32.mxu0 %v25515_v13  ;;  %9873 = vmatprep.subr.mxu0 %v23275_v36  ;;  %v4683_v51 = vadd.f32 %v25576_v12, %v4026_v25 }
 0x650   :  { %17947 = vmatmul.mubr.msk.f32.vlgmr.msra.gmra.mxu1 %vm25575_vm9, %v23437_v11  ;;  %9639 = vmatprep.subr.mxu1 %v23524_v2  ;;  %vm25609_vm9 = vmmov %vm25377_vm0 }
 0x651   :  { %17951 = vmatmul.mubr.msk.f32.vlgmr.msra.gmra.mxu0 %vm25377_vm0, %v23519_v29  ;;  %9640 = vmatpush1.msra.mxu1 %v23372_v38  ;;  %v5474_v62 = vadd.f32 %v25578_v23, %v4683_v51  ;;  %v25596_v51 = vld [vmem:[#allocation57_spill] sm:$0xff] }
 0x652   :  { %9874 = vmatpush1.msra.mxu0 %v23284_v16  ;;  %9641 = vmatprep.subr.mxu1 %v23534_v42 }
 0x653   :  { %9875 = vmatprep.subr.mxu0 %v23291_v59  ;;  %9642 = vmatpush1.msra.mxu1 %v23382_v28  ;;  %v6265_v20 = vadd.f32 %v25580_v56, %v5474_v62  ;;  %v7837_v62 = vpop.f32.mrf.mxu0 }
 0x654   :  { %9876 = vmatpush1.msra.mxu0 %v23299_v3  ;;  %9675 = vmatprep.mubr.f32.mxu1 %v25515_v13 }
 0x655   :  { %9909 = vmatprep.mubr.f32.mxu0 %v25515_v13  ;;  %10015 = vmatprep.subr.mxu0 %v23321_v17  ;;  %v7056_v15 = vadd.f32 %v25585_v55, %v6265_v20  ;;  %v25600_v20 = vld [vmem:[#allocation108_spill] sm:$0xff] }
 0x656   :  { %17949 = vmatmul.mubr.msk.f32.vlgmr.msra.gmra.mxu1 %vm25582_vm8, %v23437_v11  ;;  %9802 = vmatprep.subr.mxu1 %v23205_v44  ;;  %v25589_v11 = vld [vmem:[#allocation79_spill] sm:$0xff]  ;;  %vm25610_vm8 = vmmov %vm25377_vm0 }
 0x657   :  { %17953 = vmatmul.mubr.msk.f32.vlgmr.msra.gmra.mxu0 %vm25586_vm13, %v23519_v29  ;;  %9803 = vmatpush1.msra.mxu1 %v23212_v57  ;;  %v4050_v41 = vadd.f32 %v25589_v11, %v3258_v33  ;;  %v7847_v53 = vadd.f32 %v23217_v31, %v7056_v15  ;;  %v25593_v31 = vld [vmem:[#allocation86_spill] sm:$0xff]  ;;  %vm25611_vm13 = vmmov %vm25377_vm0 }
 0x658   :  { %10016 = vmatpush1.msra.mxu0 %v23330_v6  ;;  %9804 = vmatprep.subr.mxu1 %v23223_v50  ;;  %v25591_v6 = vld [vmem:[#allocation37_spill] sm:$0xff] }
 0x659   :  { %10017 = vmatprep.subr.mxu0 %v23338_v21  ;;  %9805 = vmatpush1.msra.mxu1 %v23231_v18  ;;  %v4707_v25 = vadd.f32 %v25591_v6, %v4050_v41  ;;  %v23584_v12 = vadd.f32 %v23207_v8, %v7847_v53  ;;  %v23857_v53 = vld [vmem:[#allocation6 + $0x1] sm:$0x1] }
 0x65a   :  { %10018 = vmatpush1.msra.mxu0 %v23347_v49  ;;  %9838 = vmatprep.mubr.f32.mxu1 %v25515_v13  ;;  %v4691_v49 = vadd.f32 %v25593_v31, %v4034_v35 }
 0x65b   :  { %10051 = vmatprep.mubr.f32.mxu0 %v25515_v13  ;;  %10157 = vmatprep.subr.mxu0 %v23372_v38  ;;  %v5498_v10 = vadd.f32 %v25594_v54, %v4707_v25 }
 0x65c   :  { %17952 = vmatmul.mubr.msk.f32.vlgmr.msra.gmra.mxu1 %vm25592_vm10, %v23519_v29  ;;  %9944 = vmatprep.subr.mxu1 %v23574_v61  ;;  %v5482_v37 = vadd.f32 %v25596_v51, %v4691_v49  ;;  %vm25612_vm10 = vmmov %vm25377_vm0 }
 0x65d   :  { %17955 = vmatmul.mubr.msk.f32.vlgmr.msra.gmra.mxu0 %vm25595_vm1, %v23519_v29  ;;  %9945 = vmatpush1.msra.mxu1 %v23472_v22  ;;  %v6289_v23 = vadd.f32 %v25597_v4, %v5498_v10  ;;  %vm25613_vm1 = vmmov %vm25377_vm0 }
 0x65e   :  { %10158 = vmatpush1.msra.mxu0 %v23377_v9  ;;  %9946 = vmatprep.subr.mxu1 %v23584_v12  ;;  %v6273_v58 = vadd.f32 %v25598_v0, %v5482_v37 }
 0x65f   :  { %10159 = vmatprep.subr.mxu0 %v23382_v28  ;;  %9947 = vmatpush1.msra.mxu1 %v23482_v43  ;;  %v7080_v56 = vadd.f32 %v23144_v63, %v6289_v23 }
 0x660   :  { %10160 = vmatpush1.msra.mxu0 %v23387_v34  ;;  %9980 = vmatprep.mubr.f32.mxu1 %v25515_v13  ;;  %v7064_v7 = vadd.f32 %v25600_v20, %v6273_v58 }
 0x661   :  { %10193 = vmatprep.mubr.f32.mxu0 %v25515_v13  ;;  %10328 = vmatprep.subr.mxu0 %v23212_v57  ;;  %v7871_v45 = vadd.f32 %v7837_v62, %v7080_v56 }
 0x662   :  { %17954 = vmatmul.mubr.msk.f32.vlgmr.msra.gmra.mxu1 %vm25599_vm7, %v23519_v29  ;;  %10086 = vmatprep.subr.mxu1 %v23316_v5  ;;  %v7855_v63 = vadd.f32 %v23476_v30, %v7064_v7  ;;  %vm25614_vm7 = vmmov %vm25377_vm0 }
 0x663   :  { %17957 = vmatmul.mubr.msk.f32.vlgmr.msra.gmra.mxu0 %vm25601_vm4, %v23519_v29  ;;  %10087 = vmatpush1.msra.mxu1 %v23324_v47  ;;  %v23621_v27 = vadd.f32 %v23197_v14, %v7871_v45  ;;  %v17968_v14 = vld [vmem:[%s24547_s7 + $0x28] sm:$0xff]  ;;  %vm25615_vm4 = vmmov %vm25377_vm0 }
 0x664   :  { %10329 = vmatpush1.msra.mxu0 %v23215_v46  ;;  %10088 = vmatprep.subr.mxu1 %v23333_v24  ;;  %v23629_v46 = vadd.f32 %v23207_v8, %v7855_v63  ;;  %v17977_v8 = vld [vmem:[%s24547_s7 + $0x30] sm:$0xff] }
 0x665   :  { %10330 = vmatprep.subr.mxu0 %v23231_v18  ;;  %10089 = vmatpush1.msra.mxu1 %v23341_v60 }
 0x666   :  { %10331 = vmatpush1.msra.mxu0 %v23234_v48  ;;  %10122 = vmatprep.mubr.f32.mxu1 %v25515_v13 }
 0x667   :  { %10364 = vmatprep.mubr.f32.mxu0 %v25515_v13  ;;  %10470 = vmatprep.subr.mxu0 %v23472_v22 }
 0x668   :  { %17956 = vmatmul.mubr.msk.f32.vlgmr.msra.gmra.mxu1 %vm25602_vm14, %v23519_v29  ;;  %10228 = vmatprep.subr.mxu1 %v23621_v27  ;;  %vm25616_vm14 = vmmov %vm25377_vm0 }
 0x669   :  { %17960 = vmatmul.mubr.msk.f32.vlgmr.msra.gmra.mxu0 %vm25603_vm15, %v23618_v40  ;;  %10229 = vmatpush1.msra.mxu1 %v23524_v2  ;;  %vm25617_vm15 = vmmov %vm25377_vm0 }
 0x66a   :  { %10471 = vmatpush1.msra.mxu0 %v23275_v36  ;;  %10230 = vmatprep.subr.mxu1 %v23629_v46 }
 0x66b   :  { %10472 = vmatprep.subr.mxu0 %v23482_v43  ;;  %10231 = vmatpush1.msra.mxu1 %v23534_v42 }
 0x66c   :  { %10473 = vmatpush1.msra.mxu0 %v23291_v59  ;;  %10264 = vmatprep.mubr.f32.mxu1 %v25515_v13 }
 0x66d   :  { %10506 = vmatprep.mubr.f32.mxu0 %v25515_v13  ;;  %10612 = vmatprep.subr.mxu0 %v23324_v47 }
 0x66e   :  { %17958 = vmatmul.mubr.msk.f32.vlgmr.msra.gmra.mxu1 %vm25604_vm3, %v23519_v29  ;;  %10399 = vmatprep.subr.mxu1 %v23284_v16  ;;  %vm25618_vm3 = vmmov %vm25377_vm0 }
 0x66f   :  { %17962 = vmatmul.mubr.msk.f32.vlgmr.msra.gmra.mxu0 %vm25605_vm12, %v23618_v40  ;;  %10400 = vmatpush1.msra.mxu1 %v23205_v44  ;;  %vm25619_vm12 = vmmov %vm25377_vm0 }
 0x670   :  { %10613 = vmatpush1.msra.mxu0 %v23321_v17  ;;  %10401 = vmatprep.subr.mxu1 %v23299_v3 }
 0x671   :  { %10614 = vmatprep.subr.mxu0 %v23341_v60  ;;  %10402 = vmatpush1.msra.mxu1 %v23223_v50 }
 0x672   :  { %10615 = vmatpush1.msra.mxu0 %v23338_v21  ;;  %10435 = vmatprep.mubr.f32.mxu1 %v25515_v13 }
 0x673   :  { %10648 = vmatprep.mubr.f32.mxu0 %v25515_v13  ;;  %10754 = vmatprep.subr.mxu0 %v23524_v2 }
 0x674   :  { %17961 = vmatmul.mubr.msk.f32.vlgmr.msra.gmra.mxu1 %vm25606_vm11, %v23618_v40  ;;  %18158 = vmatprep.subr.mxu1 %v25515_v13  ;;  %vm25620_vm11 = vmmov %vm25377_vm0 }
 0x675   :  { %17964 = vmatmul.mubr.msk.f32.vlgmr.msra.gmra.mxu0 %vm25607_vm6, %v23618_v40  ;;  %18159 = vmatpush3.msra.mxu1 %v23574_v61  ;;  %vm25621_vm6 = vmmov %vm25377_vm0 }
 0x676   :  { %10755 = vmatpush1.msra.mxu0 %v23372_v38  ;;  %18160 = vmatprep.subr.mxu1 %v25515_v13 }
 0x677   :  { %10756 = vmatprep.subr.mxu0 %v23534_v42  ;;  %18161 = vmatpush3.msra.mxu1 %v23584_v12 }
 0x678   :  { %10757 = vmatpush1.msra.mxu0 %v23382_v28  ;;  %18162 = vmatprep.mubr.msk.f32.mxu1 %vm18405_vm5, %v25515_v13 }
 0x679   :  { %10790 = vmatprep.mubr.f32.mxu0 %v25515_v13  ;;  %10921 = vmatprep.subr.mxu0 %v23205_v44 }
 0x67a   :  { %18163 = vmatmul.mubr.msk.f32.vlgmr.msra.gmra.mxu1 %vm25608_vm2, %v23618_v40  ;;  %10683 = vmatprep.subr.mxu1 %v23377_v9  ;;  %vm25622_vm2 = vmmov %vm25377_vm0 }
 0x67b   :  { %17966 = vmatmul.mubr.msk.f32.vlgmr.msra.gmra.mxu0 %vm25609_vm9, %v23618_v40  ;;  %10684 = vmatpush1.msra.mxu1 %v23316_v5  ;;  %vm25623_vm9 = vmmov %vm25377_vm0 }
 0x67c   :  { %10922 = vmatpush1.msra.mxu0 %v23212_v57  ;;  %10685 = vmatprep.subr.mxu1 %v23387_v34 }
 0x67d   :  { %10923 = vmatprep.subr.mxu0 %v23223_v50  ;;  %10686 = vmatpush1.msra.mxu1 %v23333_v24 }
 0x67e   :  { %10924 = vmatpush1.msra.mxu0 %v23231_v18  ;;  %10719 = vmatprep.mubr.f32.mxu1 %v25515_v13 }
 0x67f   :  { %10957 = vmatprep.mubr.f32.mxu0 %v25515_v13  ;;  %11063 = vmatprep.subr.mxu0 %v23574_v61 }
 0x680   :  { %17965 = vmatmul.mubr.msk.f32.vlgmr.msra.gmra.mxu1 %vm25377_vm0, %v23618_v40  ;;  %18165 = vmatprep.subr.mxu1 %v25515_v13 }
 0x681   :  { %17969 = vmatmul.mubr.msk.f32.vlgmr.msra.gmra.mxu0 %vm25610_vm8, %v17968_v14  ;;  %18166 = vmatpush3.msra.mxu1 %v23621_v27  ;;  %vm25624_vm8 = vmmov %vm25377_vm0 }
 0x682   :  { %11064 = vmatpush1.msra.mxu0 %v23472_v22  ;;  %18167 = vmatprep.subr.mxu1 %v25515_v13 }
 0x683   :  { %11065 = vmatprep.subr.mxu0 %v23584_v12  ;;  %18168 = vmatpush3.msra.mxu1 %v23629_v46 }
 0x684   :  { %11066 = vmatpush1.msra.mxu0 %v23482_v43  ;;  %18169 = vmatprep.mubr.msk.f32.mxu1 %vm18405_vm5, %v25515_v13 }
 0x685   :  { %11099 = vmatprep.mubr.f32.mxu0 %v25515_v13  ;;  %11205 = vmatprep.subr.mxu0 %v23316_v5 }
 0x686   :  { %18170 = vmatmul.mubr.msk.f32.vlgmr.msra.gmra.mxu1 %vm25611_vm13, %v23618_v40  ;;  %10992 = vmatprep.subr.mxu1 %v23275_v36  ;;  %vm25625_vm13 = vmmov %vm25377_vm0 }
 0x687   :  { %17971 = vmatmul.mubr.msk.f32.vlgmr.msra.gmra.mxu0 %vm25612_vm10, %v17968_v14  ;;  %10993 = vmatpush1.msra.mxu1 %v23284_v16  ;;  %vm25626_vm10 = vmmov %vm25377_vm0 }
 0x688   :  { %11206 = vmatpush1.msra.mxu0 %v23324_v47  ;;  %10994 = vmatprep.subr.mxu1 %v23291_v59 }
 0x689   :  { %11207 = vmatprep.subr.mxu0 %v23333_v24  ;;  %10995 = vmatpush1.msra.mxu1 %v23299_v3 }
 0x68a   :  { %11208 = vmatpush1.msra.mxu0 %v23341_v60  ;;  %11028 = vmatprep.mubr.f32.mxu1 %v25515_v13 }
 0x68b   :  { %11241 = vmatprep.mubr.f32.mxu0 %v25515_v13  ;;  %11347 = vmatprep.subr.mxu0 %v23621_v27 }
 0x68c   :  { %17970 = vmatmul.mubr.msk.f32.vlgmr.msra.gmra.mxu1 %vm25613_vm1, %v17968_v14  ;;  %18172 = vmatprep.subr.mxu1 %v25515_v13  ;;  %vm25627_vm1 = vmmov %vm25377_vm0 }
 0x68d   :  { %17973 = vmatmul.mubr.msk.f32.vlgmr.msra.gmra.mxu0 %vm25614_vm7, %v17968_v14  ;;  %18173 = vmatpush3.msra.mxu1 %v25515_v13  ;;  %vm25628_vm7 = vmmov %vm25377_vm0 }
 0x68e   :  { %11348 = vmatpush1.msra.mxu0 %v23524_v2  ;;  %11276 = vmatprep.subr.mxu1 %v23372_v38 }
 0x68f   :  { %11349 = vmatprep.subr.mxu0 %v23629_v46  ;;  %18174 = vmatprep.mubr.msk.f32.mxu1 %vm18405_vm5, %v25515_v13 }
 0x690   :  { %11350 = vmatpush1.msra.mxu0 %v23534_v42  ;;  %11383 = vmatprep.mubr.f32.mxu0 %v25515_v13 }
 0x691   :  { %11514 = vmatprep.subr.mxu0 %v23284_v16  ;;  %18175 = vmatmul.mubr.msk.f32.vlgmr.msra.gmra.mxu1 %vm25615_vm4, %v17968_v14  ;;  %vm25629_vm4 = vmmov %vm25377_vm0 }
 0x692   :  { %17975 = vmatmul.mubr.msk.f32.vlgmr.msra.gmra.mxu0 %vm25616_vm14, %v17968_v14  ;;  %11277 = vmatpush1.msra.mxu1 %v23377_v9  ;;  %vm25630_vm14 = vmmov %vm25377_vm0 }
 0x693   :  { %11515 = vmatpush1.msra.mxu0 %v23205_v44  ;;  %11278 = vmatprep.subr.mxu1 %v23382_v28  ;;  %v17986_v44 = vld [vmem:[%s24547_s7 + $0x38] sm:$0xff]  ;;  %s18407_s7 = smov [#allocation8]  }
 0x694   :  { %11516 = vmatprep.subr.mxu0 %v23299_v3  ;;  %11279 = vmatpush1.msra.mxu1 %v23387_v34  ;;  %s17544_s26 = sshll.u32 %s18407_s7, 4  ;;  %s17545_s26 = int_to_ptr.vmem [resolvable:$true] %s17544_s26 }
 0x695   :  { %11517 = vmatpush1.msra.mxu0 %v23223_v50  ;;  %11312 = vmatprep.mubr.f32.mxu1 %v25515_v13  ;;  %s18365_s27 = scalar_lea.vmem %s17545_s26, 256  ;;  %p18370_p11 = scmp.lt.s32.totalorder %s17545_s26, %s17545_s26 }
 0x696   :  { %18177 = vmatprep.subr.mxu1 %v25515_v13  ;;  %11550 = vmatprep.mubr.f32.mxu0 %v25515_v13  ;;  %p18366_p10 = scmp.ne.s32.totalorder %s17545_s26, %s18365_s27  ;;  %p18371_p12 = scmp.lt.s32.totalorder %s18365_s27, %s18365_s27 }
 0x697   :  { %18182 = vmatprep.subr.mxu0 %v25515_v13  ;;  %17974 = vmatmul.mubr.msk.f32.vlgmr.msra.gmra.mxu1 %vm25617_vm15, %v17968_v14  ;;  %vm25631_vm15 = vmmov %vm25377_vm0 }
 0x698   :  { %17978 = vmatmul.mubr.msk.f32.vlgmr.msra.gmra.mxu0 %vm25618_vm3, %v17977_v8  ;;  %18178 = vmatpush3.msra.mxu1 %v25515_v13  ;;  %vm25632_vm3 = vmmov %vm25377_vm0  ;;  %p18372_p13 = por %p18371_p12, %p18370_p11 }
 0x699   :  { %18183 = vmatpush3.msra.mxu0 %v23574_v61  ;;  %11585 = vmatprep.subr.mxu1 %v23472_v22 }
 0x69a   :  { %18184 = vmatprep.subr.mxu0 %v25515_v13  ;;  %18179 = vmatprep.mubr.msk.f32.mxu1 %vm18405_vm5, %v25515_v13  ;;  %p18373_p0 = pnand %p18372_p13, %p18366_p10 }
 0x69b   :  { %18185 = vmatpush3.msra.mxu0 %v23584_v12  ;;  %18186 = vmatprep.mubr.msk.f32.mxu0 %vm18405_vm5, %v25515_v13 }
 0x69c   :  { %11798 = vmatprep.subr.mxu0 %v23377_v9  ;;  %18180 = vmatmul.mubr.msk.f32.vlgmr.msra.gmra.mxu1 %vm25619_vm12, %v17968_v14  ;;  %vm25633_vm12 = vmmov %vm25377_vm0 }
 0x69d   :  { %18187 = vmatmul.mubr.msk.f32.vlgmr.msra.gmra.mxu0 %vm25620_vm11, %v17977_v8  ;;  %11586 = vmatpush1.msra.mxu1 %v23275_v36  ;;  %vm25634_vm11 = vcmask 64512  }
 0x69e   :  { %11799 = vmatpush1.msra.mxu0 %v23316_v5  ;;  %11587 = vmatprep.subr.mxu1 %v23482_v43 }
 0x69f   :  { %11800 = vmatprep.subr.mxu0 %v23387_v34  ;;  %11588 = vmatpush1.msra.mxu1 %v23291_v59 }
 0x6a0   :  { %11801 = vmatpush1.msra.mxu0 %v23333_v24  ;;  %11621 = vmatprep.mubr.f32.mxu1 %v25515_v13 }
 0x6a1   :  { %18189 = vmatprep.subr.mxu1 %v25515_v13  ;;  %11834 = vmatprep.mubr.f32.mxu0 %v25515_v13 }
 0x6a2   :  { %18194 = vmatprep.subr.mxu0 %v25515_v13  ;;  %17979 = vmatmul.mubr.msk.f32.vlgmr.msra.gmra.mxu1 %vm25621_vm6, %v17977_v8  ;;  %vm25643_vm6 = vmmov %vm25634_vm11 }
 0x6a3   :  { %17982 = vmatmul.mubr.msk.f32.vlgmr.msra.gmra.mxu0 %vm25622_vm2, %v17977_v8  ;;  %18190 = vmatpush3.msra.mxu1 %v25515_v13  ;;  %vm25644_vm2 = vmmov %vm25643_vm6 }
 0x6a4   :  { %18195 = vmatpush3.msra.mxu0 %v23621_v27  ;;  %11869 = vmatprep.subr.mxu1 %v23524_v2 }
 0x6a5   :  { %18196 = vmatprep.subr.mxu0 %v25515_v13  ;;  %18191 = vmatprep.mubr.msk.f32.mxu1 %vm18405_vm5, %v25515_v13 }
 0x6a6   :  { %18197 = vmatpush3.msra.mxu0 %v23629_v46  ;;  %18198 = vmatprep.mubr.msk.f32.mxu0 %vm18405_vm5, %v25515_v13 }
 0x6a7   :  { %12107 = vmatprep.subr.mxu0 %v23275_v36  ;;  %18192 = vmatmul.mubr.msk.f32.vlgmr.msra.gmra.mxu1 %vm25623_vm9, %v17977_v8  ;;  %vm25646_vm9 = vmmov %vm25644_vm2 }
 0x6a8   :  { %18199 = vmatmul.mubr.msk.f32.vlgmr.msra.gmra.mxu0 %vm25377_vm0, %v17977_v8  ;;  %11870 = vmatpush1.msra.mxu1 %v23372_v38  ;;  %vm25647_vm0 = vmmov %vm25644_vm2 }
 0x6a9   :  { %12108 = vmatpush1.msra.mxu0 %v23284_v16  ;;  %11871 = vmatprep.subr.mxu1 %v23534_v42 }
 0x6aa   :  { %12109 = vmatprep.subr.mxu0 %v23291_v59  ;;  %11872 = vmatpush1.msra.mxu1 %v23382_v28 }
 0x6ab   :  { %12110 = vmatpush1.msra.mxu0 %v23299_v3  ;;  %11905 = vmatprep.mubr.f32.mxu1 %v25515_v13 }
 0x6ac   :  { %18201 = vmatprep.subr.mxu1 %v25515_v13  ;;  %12143 = vmatprep.mubr.f32.mxu0 %v25515_v13 }
 0x6ad   :  { %18206 = vmatprep.subr.mxu0 %v25515_v13  ;;  %17983 = vmatmul.mubr.msk.f32.vlgmr.msra.gmra.mxu1 %vm25624_vm8, %v17977_v8  ;;  %vm25648_vm8 = vmmov %vm25647_vm0 }
 0x6ae   :  { %17987 = vmatmul.mubr.msk.f32.vlgmr.msra.gmra.mxu0 %vm25625_vm13, %v17986_v44  ;;  %18202 = vmatpush3.msra.mxu1 %v25515_v13  ;;  %vm25649_vm13 = vmmov %vm25647_vm0 }
 0x6af   :  { %18207 = vmatpush3.msra.mxu0 %v25515_v13  ;;  %12178 = vmatprep.subr.mxu1 %v23574_v61 }
 0x6b0   :  { %12391 = vmatprep.subr.mxu0 %v23372_v38  ;;  %18203 = vmatprep.mubr.msk.f32.mxu1 %vm18405_vm5, %v25515_v13 }
 0x6b1   :  { %18208 = vmatprep.mubr.msk.f32.mxu0 %vm18405_vm5, %v25515_v13  ;;  %18204 = vmatmul.mubr.msk.f32.vlgmr.msra.gmra.mxu1 %vm25626_vm10, %v17977_v8  ;;  %vm25650_vm10 = vmmov %vm25647_vm0 }
 0x6b2   :  { %18209 = vmatmul.mubr.msk.f32.vlgmr.msra.gmra.mxu0 %vm25627_vm1, %v17986_v44  ;;  %12179 = vmatpush1.msra.mxu1 %v23472_v22  ;;  %vm25651_vm1 = vmmov %vm25647_vm0 }
 0x6b3   :  { %12392 = vmatpush1.msra.mxu0 %v23377_v9  ;;  %12180 = vmatprep.subr.mxu1 %v23584_v12 }
 0x6b4   :  { %12393 = vmatprep.subr.mxu0 %v23382_v28  ;;  %12181 = vmatpush1.msra.mxu1 %v23482_v43 }
 0x6b5   :  { %12394 = vmatpush1.msra.mxu0 %v23387_v34  ;;  %12214 = vmatprep.mubr.f32.mxu1 %v25515_v13 }
 0x6b6   :  { %18211 = vmatprep.subr.mxu1 %v25515_v13  ;;  %12427 = vmatprep.mubr.f32.mxu0 %v25515_v13 }
 0x6b7   :  { %17988 = vmatmul.mubr.msk.f32.vlgmr.msra.gmra.mxu1 %vm25628_vm7, %v17986_v44  ;;  %17991 = vmatmul.mubr.msk.f32.vlgmr.msra.gmra.mxu0 %vm25629_vm4, %v17986_v44  ;;  %vm25652_vm7 = vmmov %vm25647_vm0 }
 0x6b8   :  { %18212 = vmatpush3.msra.mxu1 %v25515_v13  ;;  %18216 = vmatprep.subr.mxu0 %v25515_v13  ;;  %vm25655_vm4 = vmmov %vm25647_vm0 }
 0x6b9   :  { %12462 = vmatprep.subr.mxu1 %v23621_v27  ;;  %18213 = vmatprep.mubr.msk.f32.mxu1 %vm18405_vm5, %v25515_v13 }
 0x6ba   :  { %18217 = vmatpush3.msra.mxu0 %v25515_v13  ;;  %18218 = vmatprep.mubr.msk.f32.mxu0 %vm18405_vm5, %v25515_v13 }
 0x6bb   :  { %18214 = vmatmul.mubr.msk.f32.vlgmr.msra.gmra.mxu1 %vm25630_vm14, %v17986_v44  ;;  %18219 = vmatmul.mubr.msk.f32.vlgmr.msra.gmra.mxu0 %vm25631_vm15, %v17986_v44  ;;  %vm25657_vm14 = vmmov %vm25647_vm0 }
 0x6bc   :  { %12463 = vmatpush1.msra.mxu1 %v23524_v2  ;;  %12498 = vmatprep.mubr.f32.mxu1 %v25515_v13  ;;  %vm25658_vm15 = vmmov %vm25647_vm0 }
 0x6bd   :  { %12464 = vmatprep.subr.mxu1 %v23629_v46  ;;  %18226 = vmatprep.subr.mxu0 %v25515_v13 }
 0x6be   :  { %12465 = vmatpush1.msra.mxu1 %v23534_v42  ;;  %18227 = vmatpush3.msra.mxu0 %v25515_v13 }
 0x6bf   :  { %17992 = vmatmul.mubr.msk.f32.vlgmr.msra.gmra.mxu1 %vm25632_vm3, %v17986_v44  ;;  %18221 = vmatprep.subr.mxu1 %v25515_v13  ;;  %vm25659_vm3 = vmmov %vm25647_vm0 }
 0x6c0   :  { %18222 = vmatpush3.msra.mxu1 %v25515_v13  ;;  %18223 = vmatprep.mubr.msk.f32.mxu1 %vm18405_vm5, %v25515_v13 }
 0x6c1   :  { %18228 = vmatprep.mubr.msk.f32.mxu0 %vm18405_vm5, %v25515_v13 }
 0x6c2   :  { %18229 = vmatmul.mubr.msk.f32.vlgmr.msra.gmra.mxu0 %vm25634_vm11, %v23857_v53  ;;  %vm25663_vm11 = vmmov %vm25647_vm0 }
 0x6c3   :  { %18224 = vmatmul.mubr.msk.f32.vlgmr.msra.gmra.mxu1 %vm25633_vm12, %v17986_v44  ;;  %12915 = vmatprep.mubr.f32.mxu0 %v25515_v13  ;;  %vm25662_vm12 = vmmov %vm25647_vm0 }
 0x6c4   :  { %12844 = vmatprep.mubr.f32.mxu1 %v25515_v13 }
 0x6ce   :  { %v8174_v57 = vpop.f32.mrf.mxu0  ;;  %v8103_v18 = vpop.f32.mrf.mxu1 }
 0x6d0   :  { %v23842_v50 = vpop.f32.mrf.mxu0  ;;  %v23844_v16 = vpop.f32.mrf.mxu1 }
 0x6d2   :  { %v8316_v48 = vpop.f32.mrf.mxu0 }
 0x6d4   :  { %v18147_v36 = vpop.f32.mrf.mxu0 }
 0x6d6   :  { %v8245_v59 = vpop.f32.mrf.mxu1 }
 0x6d8   :  { %v23846_v3 = vpop.f32.mrf.mxu1 }
 0x6de   :  { %v8458_v5 = vpop.f32.mrf.mxu0 }
 0x6df   :  { %v8387_v47 = vpop.f32.mrf.mxu1 }
 0x6e0   :  { %v23848_v17 = vpop.f32.mrf.mxu0 }
 0x6e1   :  { %v23850_v60 = vpop.f32.mrf.mxu1 }
 0x6e2   :  { %v8603_v24 = vpop.f32.mrf.mxu0 }
 0x6e3   :  { %v8604_v11 = vadd.f32 %v8603_v24, %v23512_v39 }
 0x6e4   :  { %v18152_v21 = vpop.f32.mrf.mxu0 }
 0x6e7   :  { %v8529_v38 = vpop.f32.mrf.mxu1 }
 0x6e8   :  { %v8745_v9 = vpop.f32.mrf.mxu0 }
 0x6e9   :  { %v8746_v28 = vadd.f32 %v8745_v9, %v8174_v57  ;;  %v23852_v34 = vpop.f32.mrf.mxu1 }
 0x6ea   :  { %v23854_v22 = vpop.f32.mrf.mxu0 }
 0x6ec   :  { %v8674_v30 = vpop.f32.mrf.mxu1 }
 0x6ed   :  { %v8675_v43 = vadd.f32 %v8674_v30, %v8103_v18  ;;  %v8887_v29 = vpop.f32.mrf.mxu0 }
 0x6ee   :  { %v8888_v2 = vadd.f32 %v8887_v29, %v8316_v48  ;;  %v8676_v42 = vpop.f32.mrf.mxu1 }
 0x6ef   :  { %v18157_v33 = vpop.f32.mrf.mxu0 }
 0x6f2   :  { %v8816_v55 = vpop.f32.mrf.mxu1 }
 0x6f3   :  { %v8817_v15 = vadd.f32 %v8816_v55, %v8245_v59  ;;  %v9029_v1 = vpop.f32.mrf.mxu0 }
 0x6f4   :  { %v9030_v19 = vadd.f32 %v9029_v1, %v8458_v5  ;;  %v8818_v52 = vpop.f32.mrf.mxu1  ;;  %v8677_v5 = vadd.f32 %v8676_v42, %v23844_v16 }
 0x6f5   :  { %v9031_v32 = vpop.f32.mrf.mxu0  ;;  %v8819_v29 = vadd.f32 %v8818_v52, %v23846_v3 }
 0x6f8   :  { %v8958_v41 = vpop.f32.mrf.mxu1 }
 0x6f9   :  { %v8959_v26 = vadd.f32 %v8958_v41, %v8387_v47  ;;  %v9180_v35 = vpop.f32.mrf.mxu0 }
 0x6fa   :  { %v9682_v6 = vadd.f32 %v9180_v35, %v8604_v11  ;;  %v8960_v25 = vpop.f32.mrf.mxu1 }
 0x6fb   :  { %v23862_v61 = vpop.f32.mrf.mxu0  ;;  %v8961_v35 = vadd.f32 %v8960_v25, %v23850_v60 }
 0x6fe   :  { %v9100_v31 = vpop.f32.mrf.mxu1 }
 0x6ff   :  { %v9101_v49 = vadd.f32 %v9100_v31, %v8529_v38  ;;  %v9322_v54 = vpop.f32.mrf.mxu0 }
 0x700   :  { %v23864_v10 = vadd.f32 %v9322_v54, %v8746_v28  ;;  %v9102_v39 = vpop.f32.mrf.mxu1 }
 0x701   :  { %v23866_v12 = vpop.f32.mrf.mxu0  ;;  %v9103_v54 = vadd.f32 %v9102_v39, %v23852_v34 }
 0x704   :  { %v9251_v51 = vpop.f32.mrf.mxu1 }
 0x705   :  { %v9684_v37 = vadd.f32 %v9251_v51, %v8675_v43  ;;  %v9464_v4 = vpop.f32.mrf.mxu0 }
 0x706   :  { %v9690_v23 = vadd.f32 %v9464_v4, %v8888_v2  ;;  %v9253_v62 = vpop.f32.mrf.mxu1  ;;  %v9032_v2 = vadd.f32 %v9031_v32, %v23848_v17 }
 0x707   :  { %v23868_v0 = vpop.f32.mrf.mxu0  ;;  %v9685_v24 = vadd.f32 %v9253_v62, %v8677_v5 }
 0x70a   :  { %v9393_v58 = vpop.f32.mrf.mxu1 }
 0x70b   :  { %v9688_v56 = vadd.f32 %v9393_v58, %v8817_v15  ;;  %v9606_v20 = vpop.f32.mrf.mxu0 }
 0x70c   :  { %v9694_v7 = vadd.f32 %v9606_v20, %v9030_v19  ;;  %v9395_v45 = vpop.f32.mrf.mxu1 }
 0x70d   :  { %v9608_v63 = vpop.f32.mrf.mxu0  ;;  %v9689_v55 = vadd.f32 %v9395_v45, %v8819_v29 }
 0x70e   :  { %v9695_v42 = vadd.f32 %v9608_v63, %v9032_v2 }
 0x710   :  { %v9535_v40 = vpop.f32.mrf.mxu1 }
 0x711   :  { %v9692_v27 = vadd.f32 %v9535_v40, %v8959_v26  ;;  %v9769_v46 = vpop.f32.mrf.mxu0 }
 0x712   :  { %v23870_v14 = vadd.f32 %v9769_v46, %v9682_v6  ;;  %v9537_v8 = vpop.f32.mrf.mxu1 }
 0x713   :  { %v23872_v44 = vpop.f32.mrf.mxu0  ;;  %v9693_v31 = vadd.f32 %v9537_v8, %v8961_v35 }
 0x716   :  { %v9677_v57 = vpop.f32.mrf.mxu1 }
 0x717   :  { %v9696_v18 = vadd.f32 %v9677_v57, %v9101_v49  ;;  %v23874_v48 = vpop.f32.mrf.mxu0 }
 0x718   :  { %v9679_v36 = vpop.f32.mrf.mxu1 }
 0x719   :  { %v23876_v59 = vpop.f32.mrf.mxu0 }
 0x71c   :  { %v9840_v47 = vpop.f32.mrf.mxu1 }
 0x71d   :  { %v23879_v21 = vadd.f32 %v9840_v47, %v9684_v37  ;;  %v10053_v38 = vpop.f32.mrf.mxu0  ;;  %v9697_v37 = vadd.f32 %v9679_v36, %v9103_v54 }
 0x71e   :  { %v23881_v9 = vadd.f32 %v10053_v38, %v9690_v23  ;;  %v9842_v28 = vpop.f32.mrf.mxu1 }
 0x71f   :  { %v23883_v30 = vadd.f32 %v9842_v28, %v9685_v24  ;;  %v23885_v43 = vpop.f32.mrf.mxu0 }
 0x722   :  { %v9982_v33 = vpop.f32.mrf.mxu1 }
 0x723   :  { %v10277_v15 = vadd.f32 %v9982_v33, %v9688_v56  ;;  %v10195_v16 = vpop.f32.mrf.mxu0 }
 0x724   :  { %v23889_v1 = vadd.f32 %v10195_v16, %v9694_v7  ;;  %v9984_v19 = vpop.f32.mrf.mxu1 }
 0x725   :  { %v23891_v11 = vadd.f32 %v9984_v19, %v9689_v55  ;;  %v10197_v41 = vpop.f32.mrf.mxu0 }
 0x726   :  { %v23893_v26 = vadd.f32 %v10197_v41, %v9695_v42 }
 0x727   :  { %25635 = vst [vmem:[#allocation50_spill] sm:$0xff] %v23891_v11 }
 0x728   :  { %v10124_v6 = vpop.f32.mrf.mxu1 }
 0x729   :  { %v23896_v3 = vadd.f32 %v10124_v6, %v9692_v27  ;;  %v10366_v17 = vpop.f32.mrf.mxu0 }
 0x72a   :  { %v10126_v52 = vpop.f32.mrf.mxu1 }
 0x72b   :  { %v23898_v32 = vadd.f32 %v10126_v52, %v9693_v31  ;;  %v10368_v49 = vpop.f32.mrf.mxu0 }
 0x72e   :  { %v10266_v51 = vpop.f32.mrf.mxu1 }
 0x72f   :  { %v10285_v4 = vadd.f32 %v10266_v51, %v9696_v18  ;;  %v10508_v23 = vpop.f32.mrf.mxu0 }
 0x730   :  { %v10268_v62 = vpop.f32.mrf.mxu1 }
 0x731   :  { %v23901_v58 = vadd.f32 %v10268_v62, %v9697_v37  ;;  %v10510_v56 = vpop.f32.mrf.mxu0 }
 0x733   :  { %25636 = vst [vmem:[#allocation18_spill] sm:$0xff] %v23901_v58 }
 0x734   :  { %v23903_v60 = vpop.f32.mrf.mxu1 }
 0x735   :  { %v23905_v25 = vpop.f32.mrf.mxu0 }
 0x736   :  { %v23907_v20 = vpop.f32.mrf.mxu1 }
 0x737   :  { %v23909_v7 = vpop.f32.mrf.mxu0 }
 0x73a   :  { %v10579_v45 = vpop.f32.mrf.mxu1 }
 0x73b   :  { %v23911_v63 = vadd.f32 %v10579_v45, %v10277_v15  ;;  %v23913_v34 = vpop.f32.mrf.mxu0 }
 0x73c   :  { %v18164_v39 = vpop.f32.mrf.mxu1 }
 0x73d   :  { %25637 = vst [vmem:[#allocation15_spill] sm:$0xff] %v23911_v63  ;;  %v23915_v40 = vpop.f32.mrf.mxu0 }
 0x740   :  { %v23917_v27 = vpop.f32.mrf.mxu1 }
 0x741   :  { %v10959_v46 = vpop.f32.mrf.mxu0 }
 0x742   :  { %v23919_v8 = vpop.f32.mrf.mxu1 }
 0x743   :  { %v10961_v57 = vpop.f32.mrf.mxu0 }
 0x746   :  { %v10863_v18 = vpop.f32.mrf.mxu1 }
 0x747   :  { %v23921_v36 = vadd.f32 %v10863_v18, %v10285_v4  ;;  %v11101_v5 = vpop.f32.mrf.mxu0  ;;  %v8748_v18 = vadd.f32 %v23854_v22, %v23842_v50 }
 0x748   :  { %v18171_v47 = vpop.f32.mrf.mxu1 }
 0x749   :  { %25638 = vst [vmem:[#allocation30_spill] sm:$0xff] %v23921_v36  ;;  %v11103_v24 = vpop.f32.mrf.mxu0  ;;  %v10272_v47 = vadd.f32 %v23872_v44, %v23862_v61 }
 0x74c   :  { %v11030_v38 = vpop.f32.mrf.mxu1 }
 0x74d   :  { %v11243_v28 = vpop.f32.mrf.mxu0 }
 0x74e   :  { %v11032_v29 = vpop.f32.mrf.mxu1 }
 0x74f   :  { %v23923_v2 = vpop.f32.mrf.mxu0 }
 0x751   :  { %v23925_v33 = vpop.f32.mrf.mxu1 }
 0x752   :  { %25639 = vst [vmem:[#allocation43_spill] sm:$0xff] %v23925_v33  ;;  %v23927_v55 = vpop.f32.mrf.mxu0 }
 0x753   :  { %v18176_v15 = vpop.f32.mrf.mxu1 }
 0x754   :  { %v23929_v16 = vpop.f32.mrf.mxu0  ;;  %v10868_v15 = vadd.f32 %v10366_v17, %v23870_v14 }
 0x756   :  { %v11461_v36 = vadd.f32 %v10959_v46, %v10868_v15 }
 0x757   :  { %v23931_v42 = vpop.f32.mrf.mxu1 }
 0x758   :  { %v11552_v19 = vpop.f32.mrf.mxu0 }
 0x759   :  { %v23933_v41 = vpop.f32.mrf.mxu1 }
 0x75a   :  { %25640 = vst [vmem:[#allocation27_spill] sm:$0xff] %v23933_v41  ;;  %v11554_v35 = vpop.f32.mrf.mxu0  ;;  %v12054_v41 = vadd.f32 %v11552_v19, %v11461_v36  ;;  %v10876_v36 = vadd.f32 %v23905_v25, %v23881_v9 }
 0x75c   :  { %v23935_v6 = vpop.f32.mrf.mxu1  ;;  %v11469_v9 = vadd.f32 %v11243_v28, %v10876_v36  ;;  %v10881_v28 = vadd.f32 %v23915_v40, %v23893_v26  ;;  %v10879_v26 = vadd.f32 %v23919_v8, %v23898_v32 }
 0x75d   :  { %25641 = vst [vmem:[#allocation22_spill] sm:$0xff] %v23935_v6  ;;  %v11694_v31 = vpop.f32.mrf.mxu0  ;;  %v10869_v6 = vadd.f32 %v10368_v49, %v10272_v47 }
 0x75e   :  { %v18181_v52 = vpop.f32.mrf.mxu1 }
 0x75f   :  { %v18188_v54 = vpop.f32.mrf.mxu0  ;;  %v9687_v52 = vadd.f32 %v23866_v12, %v8748_v18  ;;  %v11462_v63 = vadd.f32 %v10961_v57, %v10869_v6 }
 0x760   :  { %v10275_v54 = vadd.f32 %v23874_v48, %v23864_v10 }
 0x761   :  { %v12055_v14 = vadd.f32 %v11554_v35, %v11462_v63 }
 0x762   :  { %v11623_v51 = vpop.f32.mrf.mxu1  ;;  %v10872_v33 = vadd.f32 %v10508_v23, %v10275_v54  ;;  %v10280_v23 = vadd.f32 %v23885_v43, %v23868_v0 }
 0x763   :  { %v11836_v37 = vpop.f32.mrf.mxu0 }
 0x764   :  { %v11625_v4 = vpop.f32.mrf.mxu1  ;;  %v11465_v44 = vadd.f32 %v11101_v5, %v10872_v33  ;;  %v10871_v5 = vadd.f32 %v23907_v20, %v23883_v30  ;;  %v10877_v0 = vadd.f32 %v23909_v7, %v10280_v23  ;;  %v10880_v30 = vadd.f32 %v23913_v34, %v23889_v1  ;;  %v25654_v23 = vld [vmem:[#allocation43_spill] sm:$0xff] }
 0x765   :  { %v11838_v62 = vpop.f32.mrf.mxu0 }
 0x766   :  { %v12058_v48 = vadd.f32 %v11694_v31, %v11465_v44  ;;  %v11464_v25 = vadd.f32 %v11032_v29, %v10871_v5  ;;  %v11470_v20 = vadd.f32 %v23923_v2, %v10877_v0  ;;  %v11473_v1 = vadd.f32 %v23927_v55, %v10880_v30 }
 0x767   :  { %v23937_v45 = vpop.f32.mrf.mxu1 }
 0x768   :  { %25642 = vst [vmem:[#allocation70_spill] sm:$0xff] %v23937_v45  ;;  %v23939_v39 = vpop.f32.mrf.mxu0  ;;  %v10276_v45 = vadd.f32 %v23876_v59, %v9687_v52  ;;  %v12057_v35 = vadd.f32 %v11625_v4, %v11464_v25  ;;  %v12063_v34 = vadd.f32 %v11838_v62, %v11470_v20  ;;  %v11474_v4 = vadd.f32 %v23929_v16, %v10881_v28  ;;  %v25645_v52 = vld [vmem:[#allocation27_spill] sm:$0xff]  ;;  %v25669_v20 = vld [vmem:[#allocation50_spill] sm:$0xff]  ;;  %v16213_v28 = vld [vmem:[#allocation6 + $0x6] sm:$0x1] }
 0x769   :  { %v18193_v58 = vpop.f32.mrf.mxu1  ;;  %v12066_v18 = vadd.f32 %v23939_v39, %v11473_v1  ;;  %v11472_v54 = vadd.f32 %v25645_v52, %v10879_v26  ;;  %v16804_v1 = vld [vmem:[#allocation6 + $0x7] sm:$0x1] }
 0x76a   :  { %v18200_v11 = vpop.f32.mrf.mxu0  ;;  %v10873_v61 = vadd.f32 %v10510_v56, %v10276_v45  ;;  %v23954_v58 = vpop.permute.xlu0 %12666  ;;  %v10870_v56 = vadd.f32 %v23903_v60, %v23879_v21 }
 0x76c   :  { %v11466_v10 = vadd.f32 %v11103_v24, %v10873_v61  ;;  %v11463_v21 = vadd.f32 %v11030_v38, %v10870_v56  ;;  %v12062_v38 = vadd.f32 %v11836_v37, %v11469_v9  ;;  %v10878_v37 = vadd.f32 %v23917_v27, %v23896_v3  ;;  %v13849_v9 = vld [vmem:[#allocation6 + $0x2] sm:$0x1] }
 0x76d   :  { %v23950_v50 = vpop.f32.mrf.mxu1 }
 0x76e   :  { %v12145_v22 = vpop.f32.mrf.mxu0  ;;  %v23974_v43 = vadd.f32 %v23954_v58, %v11466_v10  ;;  %v11471_v3 = vadd.f32 %v23931_v42, %v10878_v37 }
 0x76f   :  { %v12647_v17 = vadd.f32 %v12145_v22, %v12054_v41  ;;  %v23952_v11 = vpop.f32.mrf.mxu1  ;;  %v12056_v41 = vadd.f32 %v11623_v51, %v11463_v21  ;;  %v24019_v22 = vadd.f32 %v23954_v58, %v11474_v4 }
 0x770   :  { %v12147_v12 = vpop.f32.mrf.mxu0  ;;  %v12064_v42 = vadd.f32 %v23950_v50, %v11471_v3 }
 0x771   :  { %v12648_v49 = vadd.f32 %v12147_v12, %v12055_v14  ;;  %v23956_v46 = vpop.f32.mrf.mxu1  ;;  %v23970_v24 = vadd.f32 %v23954_v58, %v12647_v17  ;;  %v12065_v14 = vadd.f32 %v23952_v11, %v11472_v54 }
 0x772   :  { %v12287_v59 = vpop.f32.mrf.mxu0 }
 0x773   :  { %v23963_v63 = vadd.f32 %v23954_v58, %v12648_v49  ;;  %v12651_v57 = vadd.f32 %v12287_v59, %v12058_v48  ;;  %v18205_v33 = vpop.f32.mrf.mxu1  ;;  %v12685_v59 = vld [vmem:[#allocation6] sm:$0x1] }
 0x774   :  { %v18210_v19 = vpop.f32.mrf.mxu0  ;;  %v25660_v33 = vld [vmem:[#allocation30_spill] sm:$0xff] }
 0x775   :  { %v23977_v60 = vadd.f32 %v23954_v58, %v12651_v57  ;;  %12810 = vmatprep.subr.mxu1 %v23963_v63  ;;  %v25656_v57 = vld [vmem:[#allocation70_spill] sm:$0xff] }
 0x776   :  { %12811 = vmatpush1.msra.mxu1 %v23970_v24  ;;  %v25661_v19 = vld [vmem:[#allocation22_spill] sm:$0xff] }
 0x777   :  { %v12216_v7 = vpop.f32.mrf.mxu1  ;;  %17996 = vmatmul.mubr.msk.f32.vlgmr.msra.gmra.mxu1 %vm25643_vm6, %v23857_v53  ;;  %12952 = vmatprep.subr.mxu1 %v23974_v43  ;;  %v12429_v6 = vpop.f32.mrf.mxu0  ;;  %v11475_v0 = vadd.f32 %v25661_v19, %v25660_v33  ;;  %vm25664_vm6 = vmmov %vm25647_vm0 }
 0x778   :  { %12953 = vmatpush1.msra.mxu1 %v23977_v60  ;;  %12986 = vmatprep.mubr.f32.mxu1 %v25515_v13  ;;  %v12649_v29 = vadd.f32 %v12216_v7, %v12056_v41  ;;  %v12655_v31 = vadd.f32 %v12429_v6, %v12062_v38  ;;  %v24133_v41 = vadd.f32 %v23954_v58, %v25669_v20  ;;  %v14440_v7 = vld [vmem:[#allocation6 + $0x3] sm:$0x1]  ;;  %v25674_v38 = vld [vmem:[#allocation18_spill] sm:$0xff] }
 0x779   :  { %v12218_v2 = vpop.f32.mrf.mxu1  ;;  %v12431_v45 = vpop.f32.mrf.mxu0  ;;  %v12068_v25 = vadd.f32 %v23956_v46, %v11475_v0 }
 0x77a   :  { %v12650_v51 = vadd.f32 %v12218_v2, %v12057_v35  ;;  %v12656_v47 = vadd.f32 %v12431_v45, %v12063_v34  ;;  %v24008_v27 = vadd.f32 %v23954_v58, %v12649_v29  ;;  %v24015_v32 = vadd.f32 %v23954_v58, %v12655_v31 }
 0x77b   :  { %v23996_v15 = vpop.f32.mrf.mxu1  ;;  %17998 = vmatmul.mubr.msk.f32.vlgmr.msra.gmra.mxu1 %vm25644_vm2, %v23857_v53  ;;  %v12571_v55 = vpop.f32.mrf.mxu0  ;;  %vm25665_vm2 = vmmov %vm25647_vm0  ;;  %v24153_v35 = vadd.f32 %v23954_v58, %v25674_v38 }
 0x77c   :  { %v24003_v40 = vadd.f32 %v23954_v58, %v12650_v51  ;;  %13128 = vmatprep.mubr.f32.mxu1 %v25515_v13  ;;  %v24011_v16 = vadd.f32 %v23954_v58, %v12656_v47  ;;  %v12659_v62 = vadd.f32 %v12571_v55, %v12066_v18 }
 0x77d   :  { %v18215_v39 = vpop.f32.mrf.mxu1  ;;  %v18220_v8 = vpop.f32.mrf.mxu0 }
 0x77e   :  { %12881 = vmatprep.subr.mxu0 %v24003_v40  ;;  %v24023_v61 = vadd.f32 %v23954_v58, %v12659_v62  ;;  %13094 = vmatprep.subr.mxu1 %v24011_v16 }
 0x77f   :  { %v12500_v44 = vpop.f32.mrf.mxu1  ;;  %12882 = vmatpush1.msra.mxu0 %v24008_v27  ;;  %13095 = vmatpush1.msra.mxu1 %v24015_v32 }
 0x780   :  { %17997 = vmatmul.mubr.msk.f32.vlgmr.msra.gmra.mxu0 %vm25646_vm9, %v23857_v53  ;;  %v12657_v17 = vadd.f32 %v12500_v44, %v12064_v42  ;;  %18000 = vmatmul.mubr.msk.f32.vlgmr.msra.gmra.mxu1 %vm25647_vm0, %v23857_v53  ;;  %vm25666_vm9 = vmmov %vm25647_vm0 }
 0x781   :  { %13236 = vmatprep.subr.mxu1 %v24019_v22  ;;  %v12502_v50 = vpop.f32.mrf.mxu1  ;;  %18231 = vmatprep.subr.mxu0 %v25515_v13 }
 0x782   :  { %v12658_v12 = vadd.f32 %v12502_v50, %v12065_v14  ;;  %13237 = vmatpush1.msra.mxu1 %v24023_v61  ;;  %18232 = vmatpush3.msra.mxu0 %v25515_v13  ;;  %v24045_v48 = vadd.f32 %v23954_v58, %v12657_v17 }
 0x783   :  { %13381 = vmatprep.subr.mxu1 %v23970_v24  ;;  %v12642_v11 = vpop.f32.mrf.mxu1  ;;  %18233 = vmatprep.mubr.msk.f32.mxu0 %vm18405_vm5, %v25515_v13 }
 0x784   :  { %v24039_v10 = vadd.f32 %v23954_v58, %v12658_v12  ;;  %13270 = vmatprep.mubr.f32.mxu1 %v25515_v13  ;;  %18234 = vmatmul.mubr.msk.f32.vlgmr.msra.gmra.mxu0 %vm25648_vm8, %v23857_v53  ;;  %v12661_v30 = vadd.f32 %v12642_v11, %v12068_v25  ;;  %vm25667_vm8 = vmmov %vm25647_vm0 }
 0x785   :  { %18002 = vmatmul.mubr.msk.f32.vlgmr.msra.gmra.mxu1 %vm25649_vm13, %v23857_v53  ;;  %v18225_v49 = vpop.f32.mrf.mxu1  ;;  %13199 = vmatprep.mubr.f32.mxu0 %v25515_v13  ;;  %vm25668_vm13 = vmmov %vm25647_vm0 }
 0x786   :  { %13382 = vmatpush1.msra.mxu1 %v25515_v13  ;;  %13165 = vmatprep.subr.mxu0 %v24039_v10  ;;  %v24113_v46 = vadd.f32 %v23954_v58, %v12661_v30 }
 0x787   :  { %13523 = vmatprep.subr.mxu1 %v23977_v60  ;;  %13166 = vmatpush1.msra.mxu0 %v24045_v48 }
 0x788   :  { %13415 = vmatprep.mubr.f32.mxu1 %v25515_v13  ;;  %18001 = vmatmul.mubr.msk.f32.vlgmr.msra.gmra.mxu0 %vm25650_vm10, %v23857_v53  ;;  %v25653_v53 = vld [vmem:[#allocation15_spill] sm:$0xff]  ;;  %vm25670_vm10 = vmmov %vm25647_vm0 }
 0x789   :  { %18236 = vmatprep.subr.mxu0 %v25515_v13  ;;  %18004 = vmatmul.mubr.msk.f32.vlgmr.msra.gmra.mxu1 %vm25651_vm1, %v12685_v59  ;;  %v11467_v56 = vadd.f32 %v25654_v23, %v25653_v53  ;;  %vm25671_vm1 = vmmov %vm25647_vm0 }
 0x78a   :  { %18237 = vmatpush3.msra.mxu0 %v25515_v13  ;;  %13524 = vmatpush1.msra.mxu1 %v24003_v40 }
 0x78b   :  { %13452 = vmatprep.subr.mxu0 %v24008_v27  ;;  %13665 = vmatprep.subr.mxu1 %v24015_v32  ;;  %v12060_v36 = vadd.f32 %v25656_v57, %v11467_v56 }
 0x78c   :  { %18238 = vmatprep.mubr.msk.f32.mxu0 %vm18405_vm5, %v25515_v13  ;;  %13557 = vmatprep.mubr.f32.mxu1 %v25515_v13 }
 0x78d   :  { %18239 = vmatmul.mubr.msk.f32.vlgmr.msra.gmra.mxu0 %vm25652_vm7, %v12685_v59  ;;  %18006 = vmatmul.mubr.msk.f32.vlgmr.msra.gmra.mxu1 %vm25655_vm4, %v12685_v59  ;;  %v12653_v5 = vadd.f32 %v23996_v15, %v12060_v36  ;;  %vm25672_vm7 = vmmov %vm25647_vm0 }
 0x78e   :  { %13453 = vmatpush1.msra.mxu0 %v23963_v63  ;;  %13666 = vmatpush1.msra.mxu1 %v25515_v13  ;;  %vm25673_vm4 = vmmov %vm25647_vm0 }
 0x78f   :  { %13486 = vmatprep.mubr.f32.mxu0 %v25515_v13  ;;  %13807 = vmatprep.subr.mxu1 %v24023_v61  ;;  %v24093_v21 = vadd.f32 %v23954_v58, %v12653_v5  ;;  %v15029_v58 = vld [vmem:[#allocation6 + $0x4] sm:$0x1] }
 0x790   :  { %18241 = vmatprep.subr.mxu0 %v25515_v13  ;;  %13699 = vmatprep.mubr.f32.mxu1 %v25515_v13 }
 0x791   :  { %18005 = vmatmul.mubr.msk.f32.vlgmr.msra.gmra.mxu0 %vm25657_vm14, %v12685_v59  ;;  %18008 = vmatmul.mubr.msk.f32.vlgmr.msra.gmra.mxu1 %vm25658_vm15, %v12685_v59  ;;  %vm25675_vm14 = vmmov %vm25647_vm0 }
 0x792   :  { %18242 = vmatpush3.msra.mxu0 %v25515_v13  ;;  %13808 = vmatpush1.msra.mxu1 %v24039_v10  ;;  %vm25676_vm15 = vmmov %vm25647_vm0 }
 0x793   :  { %13736 = vmatprep.subr.mxu0 %v24045_v48  ;;  %13956 = vmatprep.subr.mxu1 %v24008_v27 }
 0x794   :  { %18243 = vmatprep.mubr.msk.f32.mxu0 %vm18405_vm5, %v25515_v13  ;;  %13841 = vmatprep.mubr.f32.mxu1 %v25515_v13 }
 0x795   :  { %18244 = vmatmul.mubr.msk.f32.vlgmr.msra.gmra.mxu0 %vm25659_vm3, %v12685_v59  ;;  %18010 = vmatmul.mubr.msk.f32.vlgmr.msra.gmra.mxu1 %vm25662_vm12, %v12685_v59  ;;  %vm25677_vm3 = vmmov %vm25647_vm0 }
 0x796   :  { %13737 = vmatpush1.msra.mxu0 %v24011_v16  ;;  %13957 = vmatpush1.msra.mxu1 %v23963_v63  ;;  %vm25678_vm12 = vmmov %vm25647_vm0 }
 0x797   :  { %13885 = vmatprep.subr.mxu0 %v23970_v24  ;;  %14098 = vmatprep.subr.mxu1 %v24093_v21 }
 0x798   :  { %13770 = vmatprep.mubr.f32.mxu0 %v25515_v13  ;;  %13990 = vmatprep.mubr.f32.mxu1 %v25515_v13 }
 0x799   :  { %18009 = vmatmul.mubr.msk.f32.vlgmr.msra.gmra.mxu0 %vm25663_vm11, %v12685_v59  ;;  %18012 = vmatmul.mubr.msk.f32.vlgmr.msra.gmra.mxu1 %vm25664_vm6, %v13849_v9  ;;  %vm25679_vm11 = vmmov %vm25647_vm0 }
 0x79a   :  { %13886 = vmatpush1.msra.mxu0 %v25515_v13  ;;  %14099 = vmatpush1.msra.mxu1 %v23974_v43  ;;  %vm25680_vm6 = vmmov %vm25647_vm0 }
 0x79b   :  { %14027 = vmatprep.subr.mxu0 %v23977_v60  ;;  %14240 = vmatprep.subr.mxu1 %v24045_v48 }
 0x79c   :  { %13919 = vmatprep.mubr.f32.mxu0 %v25515_v13  ;;  %14132 = vmatprep.mubr.f32.mxu1 %v25515_v13 }
 0x79d   :  { %18011 = vmatmul.mubr.msk.f32.vlgmr.msra.gmra.mxu0 %vm25665_vm2, %v13849_v9  ;;  %18014 = vmatmul.mubr.msk.f32.vlgmr.msra.gmra.mxu1 %vm25666_vm9, %v13849_v9  ;;  %vm25681_vm2 = vmmov %vm25647_vm0 }
 0x79e   :  { %14028 = vmatpush1.msra.mxu0 %v24003_v40  ;;  %14241 = vmatpush1.msra.mxu1 %v24011_v16  ;;  %vm25682_vm9 = vmmov %vm25647_vm0 }
 0x79f   :  { %14169 = vmatprep.subr.mxu0 %v24015_v32  ;;  %14382 = vmatprep.subr.mxu1 %v24113_v46 }
 0x7a0   :  { %14061 = vmatprep.mubr.f32.mxu0 %v25515_v13  ;;  %14274 = vmatprep.mubr.f32.mxu1 %v25515_v13 }
 0x7a1   :  { %18013 = vmatmul.mubr.msk.f32.vlgmr.msra.gmra.mxu0 %vm25647_vm0, %v13849_v9  ;;  %18016 = vmatmul.mubr.msk.f32.vlgmr.msra.gmra.mxu1 %vm25667_vm8, %v13849_v9  ;;  %vm25683_vm8 = vmmov %vm25647_vm0 }
 0x7a2   :  { %14170 = vmatpush1.msra.mxu0 %v25515_v13  ;;  %14383 = vmatpush1.msra.mxu1 %v24019_v22 }
 0x7a3   :  { %14311 = vmatprep.subr.mxu0 %v24023_v61  ;;  %14545 = vmatprep.subr.mxu1 %v24003_v40 }
 0x7a4   :  { %14203 = vmatprep.mubr.f32.mxu0 %v25515_v13  ;;  %14416 = vmatprep.mubr.f32.mxu1 %v25515_v13 }
 0x7a5   :  { %18015 = vmatmul.mubr.msk.f32.vlgmr.msra.gmra.mxu0 %vm25668_vm13, %v13849_v9  ;;  %18018 = vmatmul.mubr.msk.f32.vlgmr.msra.gmra.mxu1 %vm25670_vm10, %v13849_v9  ;;  %vm25684_vm13 = vmmov %vm25647_vm0 }
 0x7a6   :  { %14312 = vmatpush1.msra.mxu0 %v24039_v10  ;;  %14546 = vmatpush1.msra.mxu1 %v24008_v27  ;;  %vm25685_vm10 = vmmov %vm25647_vm0 }
 0x7a7   :  { %14474 = vmatprep.subr.mxu0 %v23963_v63  ;;  %14687 = vmatprep.subr.mxu1 %v24133_v41 }
 0x7a8   :  { %14345 = vmatprep.mubr.f32.mxu0 %v25515_v13  ;;  %14579 = vmatprep.mubr.f32.mxu1 %v25515_v13 }
 0x7a9   :  { %18017 = vmatmul.mubr.msk.f32.vlgmr.msra.gmra.mxu0 %vm25671_vm1, %v13849_v9  ;;  %18020 = vmatmul.mubr.msk.f32.vlgmr.msra.gmra.mxu1 %vm25672_vm7, %v14440_v7  ;;  %vm25686_vm1 = vmmov %vm25647_vm0 }
 0x7aa   :  { %14475 = vmatpush1.msra.mxu0 %v23970_v24  ;;  %14688 = vmatpush1.msra.mxu1 %v24093_v21  ;;  %v24179_v24 = vpop.f32.mrf.mxu0  ;;  %vm25687_vm7 = vmmov %vm25647_vm0 }
 0x7ab   :  { %14616 = vmatprep.subr.mxu0 %v23974_v43  ;;  %14829 = vmatprep.subr.mxu1 %v24039_v10 }
 0x7ac   :  { %14508 = vmatprep.mubr.f32.mxu0 %v25515_v13  ;;  %14721 = vmatprep.mubr.f32.mxu1 %v25515_v13  ;;  %v18230_v6 = vpop.f32.mrf.mxu0 }
 0x7ad   :  { %18019 = vmatmul.mubr.msk.f32.vlgmr.msra.gmra.mxu0 %vm25673_vm4, %v14440_v7  ;;  %18022 = vmatmul.mubr.msk.f32.vlgmr.msra.gmra.mxu1 %vm25675_vm14, %v14440_v7  ;;  %vm25688_vm4 = vmmov %vm25647_vm0 }
 0x7ae   :  { %14617 = vmatpush1.msra.mxu0 %v23977_v60  ;;  %14830 = vmatpush1.msra.mxu1 %v24045_v48  ;;  %vm25689_vm14 = vmmov %vm25647_vm0 }
 0x7af   :  { %14758 = vmatprep.subr.mxu0 %v24011_v16  ;;  %14971 = vmatprep.subr.mxu1 %v24153_v35 }
 0x7b0   :  { %14650 = vmatprep.mubr.f32.mxu0 %v25515_v13  ;;  %14863 = vmatprep.mubr.f32.mxu1 %v25515_v13 }
 0x7b1   :  { %18021 = vmatmul.mubr.msk.f32.vlgmr.msra.gmra.mxu0 %vm25676_vm15, %v14440_v7  ;;  %18024 = vmatmul.mubr.msk.f32.vlgmr.msra.gmra.mxu1 %vm25677_vm3, %v14440_v7  ;;  %vm25690_vm15 = vmmov %vm25647_vm0 }
 0x7b2   :  { %14759 = vmatpush1.msra.mxu0 %v24015_v32  ;;  %14972 = vmatpush1.msra.mxu1 %v24113_v46  ;;  %vm25691_vm3 = vmmov %vm25647_vm0 }
 0x7b3   :  { %14900 = vmatprep.subr.mxu0 %v24019_v22  ;;  %15138 = vmatprep.subr.mxu1 %v23977_v60 }
 0x7b4   :  { %14792 = vmatprep.mubr.f32.mxu0 %v25515_v13  ;;  %15005 = vmatprep.mubr.f32.mxu1 %v25515_v13 }
 0x7b5   :  { %18023 = vmatmul.mubr.msk.f32.vlgmr.msra.gmra.mxu0 %vm25678_vm12, %v14440_v7  ;;  %18026 = vmatmul.mubr.msk.f32.vlgmr.msra.gmra.mxu1 %vm25679_vm11, %v14440_v7  ;;  %vm25692_vm12 = vmmov %vm25647_vm0 }
 0x7b6   :  { %14901 = vmatpush1.msra.mxu0 %v24023_v61  ;;  %15139 = vmatpush1.msra.mxu1 %v24003_v40  ;;  %vm25693_vm11 = vmmov %vm25647_vm0 }
 0x7b7   :  { %15067 = vmatprep.subr.mxu0 %v24008_v27  ;;  %14934 = vmatprep.mubr.f32.mxu0 %v25515_v13 }
 0x7b8   :  { %15172 = vmatprep.mubr.f32.mxu1 %v25515_v13  ;;  %18246 = vmatprep.subr.mxu1 %v25515_v13 }
 0x7b9   :  { %18025 = vmatmul.mubr.msk.f32.vlgmr.msra.gmra.mxu0 %vm25680_vm6, %v14440_v7  ;;  %18028 = vmatmul.mubr.msk.f32.vlgmr.msra.gmra.mxu1 %vm25681_vm2, %v15029_v58  ;;  %vm25694_vm6 = vmmov %vm25647_vm0 }
 0x7ba   :  { %15068 = vmatpush1.msra.mxu0 %v23963_v63  ;;  %18247 = vmatpush3.msra.mxu1 %v24133_v41  ;;  %v15622_v63 = vld [vmem:[#allocation6 + $0x5] sm:$0x1]  ;;  %vm25695_vm2 = vmmov %vm25647_vm0 }
 0x7bb   :  { %15209 = vmatprep.subr.mxu0 %v24093_v21  ;;  %15422 = vmatprep.subr.mxu1 %v24023_v61 }
 0x7bc   :  { %15101 = vmatprep.mubr.f32.mxu0 %v25515_v13  ;;  %18248 = vmatprep.mubr.msk.f32.mxu1 %vm18405_vm5, %v25515_v13 }
 0x7bd   :  { %18027 = vmatmul.mubr.msk.f32.vlgmr.msra.gmra.mxu0 %vm25682_vm9, %v15029_v58  ;;  %18249 = vmatmul.mubr.msk.f32.vlgmr.msra.gmra.mxu1 %vm25647_vm0, %v15029_v58  ;;  %vm25696_vm9 = vmmov %vm25647_vm0 }
 0x7be   :  { %15210 = vmatpush1.msra.mxu0 %v23974_v43  ;;  %15423 = vmatpush1.msra.mxu1 %v24039_v10 }
 0x7bf   :  { %15351 = vmatprep.subr.mxu0 %v24045_v48  ;;  %15243 = vmatprep.mubr.f32.mxu0 %v25515_v13 }
 0x7c0   :  { %15456 = vmatprep.mubr.f32.mxu1 %v25515_v13  ;;  %18251 = vmatprep.subr.mxu1 %v25515_v13 }
 0x7c1   :  { %18029 = vmatmul.mubr.msk.f32.vlgmr.msra.gmra.mxu0 %vm25683_vm8, %v15029_v58  ;;  %18032 = vmatmul.mubr.msk.f32.vlgmr.msra.gmra.mxu1 %vm25684_vm13, %v15029_v58  ;;  %vm25697_vm8 = vmmov %vm25647_vm0 }
 0x7c2   :  { %15352 = vmatpush1.msra.mxu0 %v24011_v16  ;;  %18252 = vmatpush3.msra.mxu1 %v24153_v35  ;;  %vm25698_vm13 = vmmov %vm25647_vm0 }
 0x7c3   :  { %15493 = vmatprep.subr.mxu0 %v24113_v46  ;;  %15729 = vmatprep.subr.mxu1 %v23974_v43 }
 0x7c4   :  { %15385 = vmatprep.mubr.f32.mxu0 %v25515_v13  ;;  %18253 = vmatprep.mubr.msk.f32.mxu1 %vm18405_vm5, %v25515_v13 }
 0x7c5   :  { %18031 = vmatmul.mubr.msk.f32.vlgmr.msra.gmra.mxu0 %vm25685_vm10, %v15029_v58  ;;  %18254 = vmatmul.mubr.msk.f32.vlgmr.msra.gmra.mxu1 %vm25686_vm1, %v15029_v58  ;;  %vm25699_vm10 = vmmov %vm25647_vm0 }
 0x7c6   :  { %15494 = vmatpush1.msra.mxu0 %v24019_v22  ;;  %15730 = vmatpush1.msra.mxu1 %v23977_v60  ;;  %vm25700_vm1 = vmmov %vm25647_vm0 }
 0x7c7   :  { %15658 = vmatprep.subr.mxu0 %v24003_v40  ;;  %15527 = vmatprep.mubr.f32.mxu0 %v25515_v13 }
 0x7c8   :  { %15763 = vmatprep.mubr.f32.mxu1 %v25515_v13  ;;  %18256 = vmatprep.subr.mxu1 %v25515_v13 }
 0x7c9   :  { %18033 = vmatmul.mubr.msk.f32.vlgmr.msra.gmra.mxu0 %vm25687_vm7, %v15029_v58  ;;  %18036 = vmatmul.mubr.msk.f32.vlgmr.msra.gmra.mxu1 %vm25688_vm4, %v15622_v63  ;;  %vm25701_vm7 = vmmov %vm25647_vm0 }
 0x7ca   :  { %15659 = vmatpush1.msra.mxu0 %v24008_v27  ;;  %18257 = vmatpush3.msra.mxu1 %v25515_v13  ;;  %vm25702_vm4 = vmmov %vm25647_vm0 }
 0x7cb   :  { %15800 = vmatprep.subr.mxu0 %v24133_v41  ;;  %16013 = vmatprep.subr.mxu1 %v24019_v22 }
 0x7cc   :  { %15692 = vmatprep.mubr.f32.mxu0 %v25515_v13  ;;  %18258 = vmatprep.mubr.msk.f32.mxu1 %vm18405_vm5, %v25515_v13 }
 0x7cd   :  { %18035 = vmatmul.mubr.msk.f32.vlgmr.msra.gmra.mxu0 %vm25689_vm14, %v15622_v63  ;;  %18259 = vmatmul.mubr.msk.f32.vlgmr.msra.gmra.mxu1 %vm25690_vm15, %v15622_v63  ;;  %vm25703_vm14 = vmmov %vm25647_vm0 }
 0x7ce   :  { %15801 = vmatpush1.msra.mxu0 %v24093_v21  ;;  %16014 = vmatpush1.msra.mxu1 %v24023_v61  ;;  %vm25704_vm15 = vmmov %vm25647_vm0 }
 0x7cf   :  { %15942 = vmatprep.subr.mxu0 %v24039_v10  ;;  %15834 = vmatprep.mubr.f32.mxu0 %v25515_v13 }
 0x7d0   :  { %16047 = vmatprep.mubr.f32.mxu1 %v25515_v13  ;;  %18261 = vmatprep.subr.mxu1 %v25515_v13 }
 0x7d1   :  { %18037 = vmatmul.mubr.msk.f32.vlgmr.msra.gmra.mxu0 %vm25691_vm3, %v15622_v63  ;;  %18040 = vmatmul.mubr.msk.f32.vlgmr.msra.gmra.mxu1 %vm25692_vm12, %v15622_v63  ;;  %vm25705_vm3 = vmmov %vm25647_vm0 }
 0x7d2   :  { %15943 = vmatpush1.msra.mxu0 %v24045_v48  ;;  %18262 = vmatpush3.msra.mxu1 %v25515_v13  ;;  %vm25706_vm12 = vmmov %vm25647_vm0 }
 0x7d3   :  { %16084 = vmatprep.subr.mxu0 %v24153_v35  ;;  %16320 = vmatprep.subr.mxu1 %v24093_v21 }
 0x7d4   :  { %15976 = vmatprep.mubr.f32.mxu0 %v25515_v13  ;;  %18263 = vmatprep.mubr.msk.f32.mxu1 %vm18405_vm5, %v25515_v13 }
 0x7d5   :  { %18039 = vmatmul.mubr.msk.f32.vlgmr.msra.gmra.mxu0 %vm25693_vm11, %v15622_v63  ;;  %18264 = vmatmul.mubr.msk.f32.vlgmr.msra.gmra.mxu1 %vm25694_vm6, %v15622_v63  ;;  %vm25707_vm11 = vmmov %vm25647_vm0 }
 0x7d6   :  { %16085 = vmatpush1.msra.mxu0 %v24113_v46  ;;  %16321 = vmatpush1.msra.mxu1 %v23974_v43  ;;  %vm25708_vm6 = vmmov %vm25647_vm0 }
 0x7d7   :  { %16249 = vmatprep.subr.mxu0 %v23977_v60  ;;  %16118 = vmatprep.mubr.f32.mxu0 %v25515_v13 }
 0x7d8   :  { %16354 = vmatprep.mubr.f32.mxu1 %v25515_v13  ;;  %18271 = vmatprep.subr.mxu1 %v25515_v13 }
 0x7d9   :  { %18041 = vmatmul.mubr.msk.f32.vlgmr.msra.gmra.mxu0 %vm25695_vm2, %v15622_v63  ;;  %18044 = vmatmul.mubr.msk.f32.vlgmr.msra.gmra.mxu1 %vm25696_vm9, %v16213_v28  ;;  %vm25709_vm2 = vmmov %vm25647_vm0 }
 0x7da   :  { %16250 = vmatpush1.msra.mxu0 %v24003_v40  ;;  %18272 = vmatpush3.msra.mxu1 %v25515_v13  ;;  %vm25710_vm9 = vmmov %vm25647_vm0 }
 0x7db   :  { %16283 = vmatprep.mubr.f32.mxu0 %v25515_v13  ;;  %16604 = vmatprep.subr.mxu1 %v24113_v46 }
 0x7dc   :  { %18266 = vmatprep.subr.mxu0 %v25515_v13  ;;  %18273 = vmatprep.mubr.msk.f32.mxu1 %vm18405_vm5, %v25515_v13 }
 0x7dd   :  { %18043 = vmatmul.mubr.msk.f32.vlgmr.msra.gmra.mxu0 %vm25647_vm0, %v16213_v28  ;;  %18274 = vmatmul.mubr.msk.f32.vlgmr.msra.gmra.mxu1 %vm25697_vm8, %v16213_v28 }
 0x7de   :  { %18267 = vmatpush3.msra.mxu0 %v24133_v41  ;;  %16605 = vmatpush1.msra.mxu1 %v24019_v22 }
 0x7df   :  { %16533 = vmatprep.subr.mxu0 %v24023_v61  ;;  %18268 = vmatprep.mubr.msk.f32.mxu0 %vm18405_vm5, %v25515_v13 }
 0x7e0   :  { %16638 = vmatprep.mubr.f32.mxu1 %v25515_v13  ;;  %18281 = vmatprep.subr.mxu1 %v25515_v13 }
 0x7e1   :  { %18269 = vmatmul.mubr.msk.f32.vlgmr.msra.gmra.mxu0 %vm25698_vm13, %v16213_v28  ;;  %18048 = vmatmul.mubr.msk.f32.vlgmr.msra.gmra.mxu1 %vm25699_vm10, %v16213_v28 }
 0x7e2   :  { %16534 = vmatpush1.msra.mxu0 %v24039_v10  ;;  %18282 = vmatpush3.msra.mxu1 %v25515_v13 }
 0x7e3   :  { %16567 = vmatprep.mubr.f32.mxu0 %v25515_v13  ;;  %16911 = vmatprep.subr.mxu1 %v24133_v41 }
 0x7e4   :  { %18276 = vmatprep.subr.mxu0 %v25515_v13  ;;  %18283 = vmatprep.mubr.msk.f32.mxu1 %vm18405_vm5, %v25515_v13 }
 0x7e5   :  { %18047 = vmatmul.mubr.msk.f32.vlgmr.msra.gmra.mxu0 %vm25700_vm1, %v16213_v28  ;;  %18284 = vmatmul.mubr.msk.f32.vlgmr.msra.gmra.mxu1 %vm25701_vm7, %v16213_v28 }
 0x7e6   :  { %18277 = vmatpush3.msra.mxu0 %v24153_v35  ;;  %16912 = vmatpush1.msra.mxu1 %v24093_v21 }
 0x7e7   :  { %16840 = vmatprep.subr.mxu0 %v23974_v43  ;;  %18278 = vmatprep.mubr.msk.f32.mxu0 %vm18405_vm5, %v25515_v13 }
 0x7e8   :  { %16945 = vmatprep.mubr.f32.mxu1 %v25515_v13  ;;  %18291 = vmatprep.subr.mxu1 %v25515_v13 }
 0x7e9   :  { %18279 = vmatmul.mubr.msk.f32.vlgmr.msra.gmra.mxu0 %vm25702_vm4, %v16213_v28  ;;  %18052 = vmatmul.mubr.msk.f32.vlgmr.msra.gmra.mxu1 %vm25703_vm14, %v16804_v1 }
 0x7ea   :  { %16841 = vmatpush1.msra.mxu0 %v23977_v60  ;;  %18292 = vmatpush3.msra.mxu1 %v25515_v13 }
 0x7eb   :  { %16874 = vmatprep.mubr.f32.mxu0 %v25515_v13  ;;  %17195 = vmatprep.subr.mxu1 %v24153_v35 }
 0x7ec   :  { %18286 = vmatprep.subr.mxu0 %v25515_v13  ;;  %18293 = vmatprep.mubr.msk.f32.mxu1 %vm18405_vm5, %v25515_v13 }
 0x7ed   :  { %18051 = vmatmul.mubr.msk.f32.vlgmr.msra.gmra.mxu0 %vm25704_vm15, %v16804_v1  ;;  %18294 = vmatmul.mubr.msk.f32.vlgmr.msra.gmra.mxu1 %vm25705_vm3, %v16804_v1 }
 0x7ee   :  { %18287 = vmatpush3.msra.mxu0 %v25515_v13  ;;  %17196 = vmatpush1.msra.mxu1 %v24113_v46 }
 0x7ef   :  { %17124 = vmatprep.subr.mxu0 %v24019_v22  ;;  %18288 = vmatprep.mubr.msk.f32.mxu0 %vm18405_vm5, %v25515_v13 }
 0x7f0   :  { %17229 = vmatprep.mubr.f32.mxu1 %v25515_v13  ;;  %18301 = vmatprep.subr.mxu1 %v25515_v13 }
 0x7f1   :  { %18289 = vmatmul.mubr.msk.f32.vlgmr.msra.gmra.mxu0 %vm25706_vm12, %v16804_v1  ;;  %18056 = vmatmul.mubr.msk.f32.vlgmr.msra.gmra.mxu1 %vm25707_vm11, %v16804_v1 }
 0x7f2   :  { %17125 = vmatpush1.msra.mxu0 %v24023_v61  ;;  %17158 = vmatprep.mubr.f32.mxu0 %v25515_v13 }
 0x7f3   :  { %18302 = vmatpush3.msra.mxu1 %v25515_v13  ;;  %18303 = vmatprep.mubr.msk.f32.mxu1 %vm18405_vm5, %v25515_v13 }
 0x7f4   :  { %18296 = vmatprep.subr.mxu0 %v25515_v13 }
 0x7f5   :  { %18055 = vmatmul.mubr.msk.f32.vlgmr.msra.gmra.mxu0 %vm25708_vm6, %v16804_v1  ;;  %18304 = vmatmul.mubr.msk.f32.vlgmr.msra.gmra.mxu1 %vm25709_vm2, %v16804_v1 }
 0x7f6   :  { %18297 = vmatpush3.msra.mxu0 %v25515_v13  ;;  %18298 = vmatprep.mubr.msk.f32.mxu0 %vm18405_vm5, %v25515_v13 }
 0x7f9   :  { %18299 = vmatmul.mubr.msk.f32.vlgmr.msra.gmra.mxu0 %vm25710_vm9, %v16804_v1 }
 0x837   :  { %v12846_v43 = vpop.f32.mrf.mxu1 }
 0x839   :  { %v12848_v60 = vpop.f32.mrf.mxu1 }
 0x83b   :  { %v12988_v34 = vpop.f32.mrf.mxu1 }
 0x83d   :  { %v12990_v29 = vpop.f32.mrf.mxu1 }
 0x840   :  { %v12917_v2 = vpop.f32.mrf.mxu0  ;;  %v13130_v31 = vpop.f32.mrf.mxu1 }
 0x842   :  { %v12919_v51 = vpop.f32.mrf.mxu0  ;;  %v13132_v45 = vpop.f32.mrf.mxu1 }
 0x844   :  { %v13059_v37 = vpop.f32.mrf.mxu0 }
 0x845   :  { %v13272_v4 = vpop.f32.mrf.mxu1 }
 0x846   :  { %v18235_v18 = vpop.f32.mrf.mxu0 }
 0x847   :  { %v13274_v47 = vpop.f32.mrf.mxu1 }
 0x848   :  { %v13201_v15 = vpop.f32.mrf.mxu0 }
 0x849   :  { %v13417_v26 = vpop.f32.mrf.mxu1 }
 0x84a   :  { %v13418_v40 = vadd.f32 %v13417_v26, %v12846_v43  ;;  %v13203_v55 = vpop.f32.mrf.mxu0 }
 0x84b   :  { %v13419_v3 = vpop.f32.mrf.mxu1 }
 0x84c   :  { %v13420_v13 = vadd.f32 %v13419_v3, %v12848_v60 }
 0x84d   :  { %v13346_v27 = vpop.f32.mrf.mxu0  ;;  %v13559_v16 = vpop.f32.mrf.mxu1 }
 0x84e   :  { %v13560_v62 = vadd.f32 %v13559_v16, %v12988_v34  ;;  %v13347_v5 = vadd.f32 %v13346_v27, %v24179_v24 }
 0x84f   :  { %v18240_v39 = vpop.f32.mrf.mxu0  ;;  %v13561_v52 = vpop.f32.mrf.mxu1 }
 0x850   :  { %v13562_v54 = vadd.f32 %v13561_v52, %v12990_v29 }
 0x851   :  { %v13488_v32 = vpop.f32.mrf.mxu0  ;;  %v13701_v22 = vpop.f32.mrf.mxu1 }
 0x852   :  { %v13489_v8 = vadd.f32 %v13488_v32, %v12917_v2  ;;  %v13702_v42 = vadd.f32 %v13701_v22, %v13130_v31 }
 0x853   :  { %v13490_v61 = vpop.f32.mrf.mxu0  ;;  %v13703_v14 = vpop.f32.mrf.mxu1 }
 0x854   :  { %v13491_v44 = vadd.f32 %v13490_v61, %v12919_v51  ;;  %v13704_v17 = vadd.f32 %v13703_v14, %v13132_v45 }
 0x855   :  { %v13630_v50 = vpop.f32.mrf.mxu0  ;;  %v13843_v11 = vpop.f32.mrf.mxu1 }
 0x856   :  { %v13631_v12 = vadd.f32 %v13630_v50, %v13059_v37  ;;  %v13844_v10 = vadd.f32 %v13843_v11, %v13272_v4 }
 0x857   :  { %v18245_v48 = vpop.f32.mrf.mxu0  ;;  %v13845_v49 = vpop.f32.mrf.mxu1 }
 0x858   :  { %v13846_v59 = vadd.f32 %v13845_v49, %v13274_v47 }
 0x859   :  { %v13772_v53 = vpop.f32.mrf.mxu0  ;;  %v13992_v56 = vpop.f32.mrf.mxu1 }
 0x85a   :  { %v13773_v23 = vadd.f32 %v13772_v53, %v13201_v15  ;;  %v24316_v57 = vadd.f32 %v13992_v56, %v13418_v40 }
 0x85b   :  { %v13774_v36 = vpop.f32.mrf.mxu0  ;;  %v13994_v19 = vpop.f32.mrf.mxu1 }
 0x85c   :  { %v13775_v33 = vadd.f32 %v13774_v36, %v13203_v55  ;;  %v24319_v0 = vadd.f32 %v13994_v19, %v13420_v13 }
 0x85d   :  { %v13921_v21 = vpop.f32.mrf.mxu0  ;;  %v14134_v25 = vpop.f32.mrf.mxu1 }
 0x85e   :  { %v24321_v9 = vadd.f32 %v13921_v21, %v13347_v5  ;;  %v24323_v30 = vadd.f32 %v14134_v25, %v13560_v62 }
 0x85f   :  { %v24325_v46 = vpop.f32.mrf.mxu0  ;;  %v14136_v20 = vpop.f32.mrf.mxu1 }
 0x860   :  { %v14430_v41 = vadd.f32 %v14136_v20, %v13562_v54 }
 0x861   :  { %v14063_v7 = vpop.f32.mrf.mxu0  ;;  %v14276_v35 = vpop.f32.mrf.mxu1 }
 0x862   :  { %v24327_v38 = vadd.f32 %v14063_v7, %v13489_v8  ;;  %v24329_v58 = vadd.f32 %v14276_v35, %v13702_v42 }
 0x863   :  { %v14065_v24 = vpop.f32.mrf.mxu0  ;;  %v14278_v63 = vpop.f32.mrf.mxu1 }
 0x864   :  { %v24331_v6 = vadd.f32 %v14065_v24, %v13491_v44  ;;  %v24333_v28 = vadd.f32 %v14278_v63, %v13704_v17 }
 0x865   :  { %v14205_v1 = vpop.f32.mrf.mxu0  ;;  %v14418_v60 = vpop.f32.mrf.mxu1 }
 0x866   :  { %v24335_v43 = vadd.f32 %v14205_v1, %v13631_v12  ;;  %v24337_v34 = vadd.f32 %v14418_v60, %v13844_v10 }
 0x867   :  { %v24339_v29 = vpop.f32.mrf.mxu0  ;;  %v14420_v2 = vpop.f32.mrf.mxu1 }
 0x868   :  { %v14438_v31 = vadd.f32 %v14420_v2, %v13846_v59 }
 0x869   :  { %v14347_v51 = vpop.f32.mrf.mxu0  ;;  %v24343_v37 = vpop.f32.mrf.mxu1 }
 0x86a   :  { %v24341_v45 = vadd.f32 %v14347_v51, %v13773_v23 }
 0x86b   :  { %v14349_v4 = vpop.f32.mrf.mxu0  ;;  %v24347_v47 = vpop.f32.mrf.mxu1 }
 0x86c   :  { %v24345_v18 = vadd.f32 %v14349_v4, %v13775_v33 }
 0x86d   :  { %v24349_v15 = vpop.f32.mrf.mxu0  ;;  %v24351_v26 = vpop.f32.mrf.mxu1 }
 0x86f   :  { %v24353_v40 = vpop.f32.mrf.mxu0  ;;  %v14725_v55 = vpop.f32.mrf.mxu1 }
 0x870   :  { %v24355_v3 = vadd.f32 %v14725_v55, %v14430_v41 }
 0x871   :  { %v24357_v13 = vpop.f32.mrf.mxu0  ;;  %v24359_v27 = vpop.f32.mrf.mxu1 }
 0x873   :  { %v24361_v16 = vpop.f32.mrf.mxu0  ;;  %v24363_v62 = vpop.f32.mrf.mxu1 }
 0x875   :  { %v24365_v39 = vpop.f32.mrf.mxu0  ;;  %v24367_v52 = vpop.f32.mrf.mxu1 }
 0x877   :  { %v24369_v54 = vpop.f32.mrf.mxu0  ;;  %v15009_v32 = vpop.f32.mrf.mxu1 }
 0x878   :  { %v24371_v8 = vadd.f32 %v15009_v32, %v14438_v31  ;;  %v18406_v32 = vmov 1966171168  }
 0x879   :  { %v24373_v22 = vpop.f32.mrf.mxu0  ;;  %v15174_v42 = vpop.f32.mrf.mxu1 }
 0x87a   :  { %25711 = vst [vmem:[#allocation66_spill] sm:$0xff] %v24371_v8 }
 0x87b   :  { %v24375_v61 = vpop.f32.mrf.mxu0  ;;  %v24377_v44 = vpop.f32.mrf.mxu1 }
 0x87d   :  { %v24379_v14 = vpop.f32.mrf.mxu0  ;;  %v24381_v17 = vpop.f32.mrf.mxu1 }
 0x87f   :  { %v24383_v50 = vpop.f32.mrf.mxu0  ;;  %v18250_v12 = vpop.f32.mrf.mxu1 }
 0x880   :  { %v17441_v12 = vunpack.c.l.s4 %v18406_v32 }
 0x881   :  { %v24385_v11 = vpop.f32.mrf.mxu0  ;;  %v24387_v10 = vpop.f32.mrf.mxu1 }
 0x883   :  { %v24389_v48 = vpop.f32.mrf.mxu0  ;;  %v24391_v49 = vpop.f32.mrf.mxu1 }
 0x885   :  { %v24393_v59 = vpop.f32.mrf.mxu0  ;;  %v24395_v53 = vpop.f32.mrf.mxu1 }
 0x887   :  { %v24397_v23 = vpop.f32.mrf.mxu0  ;;  %v18255_v56 = vpop.f32.mrf.mxu1 }
 0x888   :  { %25712 = vst [vmem:[#allocation51_spill] sm:$0xff] %v24397_v23  ;;  %v15015_v23 = vadd.f32 %v24347_v47, %v24319_v0  ;;  %v15023_v47 = vadd.f32 %v24363_v62, %v24333_v28  ;;  %v15025_v28 = vadd.f32 %v24375_v61, %v24345_v18 }
 0x889   :  { %v24399_v36 = vpop.f32.mrf.mxu0  ;;  %v15765_v5 = vpop.f32.mrf.mxu1 }
 0x88a   :  { %25713 = vst [vmem:[#allocation64_spill] sm:$0xff] %v24399_v36  ;;  %v25725_v36 = vld [vmem:[#allocation49_spill] sm:$0xff] }
 0x88b   :  { %v24401_v33 = vpop.f32.mrf.mxu0  ;;  %v15767_v19 = vpop.f32.mrf.mxu1 }
 0x88c   :  { %25714 = vst [vmem:[#allocation61_spill] sm:$0xff] %v24401_v33 }
 0x88d   :  { %v15694_v21 = vpop.f32.mrf.mxu0  ;;  %v24403_v25 = vpop.f32.mrf.mxu1 }
 0x88f   :  { %v24405_v20 = vpop.f32.mrf.mxu0  ;;  %v18260_v41 = vpop.f32.mrf.mxu1 }
 0x891   :  { %v24407_v7 = vpop.f32.mrf.mxu0  ;;  %v24409_v35 = vpop.f32.mrf.mxu1 }
 0x892   :  { %25715 = vst [vmem:[#allocation56_spill] sm:$0xff] %v24407_v7  ;;  %25716 = vst [vmem:[#allocation76_spill] sm:$0xff] %v24409_v35  ;;  %v17442_v7 = vunpack.c.0.s8 %v17441_v12  ;;  %v15018_v12 = vadd.f32 %v24351_v26, %v24323_v30  ;;  %v15017_v30 = vadd.f32 %v24361_v16, %v24331_v6  ;;  %v15021_v26 = vadd.f32 %v24369_v54, %v24339_v29 }
 0x893   :  { %v24411_v24 = vpop.f32.mrf.mxu0  ;;  %v24413_v63 = vpop.f32.mrf.mxu1  ;;  %v15024_v6 = vadd.f32 %v24373_v22, %v24341_v45  ;;  %v15616_v54 = vadd.f32 %v24391_v49, %v15023_v47  ;;  %v25727_v49 = vld [vmem:[#allocation64_spill] sm:$0xff] }
 0x894   :  { %25717 = vst [vmem:[#allocation54_spill] sm:$0xff] %v24413_v63  ;;  %v17398_v63 = vpop.permute.xlu1 %17397  ;;  %v24435_v32 = vsub.s32 %v17442_v7, %v25725_v36  ;;  %v15610_v45 = vadd.f32 %v24389_v48, %v15017_v30  ;;  %v25726_v48 = vld [vmem:[#allocation51_spill] sm:$0xff] }
 0x895   :  { %v24415_v1 = vpop.f32.mrf.mxu0  ;;  %v24417_v60 = vpop.f32.mrf.mxu1 }
 0x896   :  { %25718 = vst [vmem:[#allocation89_spill] sm:$0xff] %v24415_v1  ;;  %25719 = vst [vmem:[#allocation83_spill] sm:$0xff] %v24417_v60 }
 0x897   :  { %v24419_v2 = vpop.f32.mrf.mxu0  ;;  %v18265_v31 = vpop.f32.mrf.mxu1 }
 0x898   :  { %25720 = vst [vmem:[#allocation80_spill] sm:$0xff] %v24419_v2  ;;  %v25724_v2 = vld [vmem:[#allocation17_spill] sm:$0xff] }
 0x899   :  { %v24421_v51 = vpop.f32.mrf.mxu0  ;;  %v16356_v4 = vpop.f32.mrf.mxu1  ;;  %v24430_v31 = vrot.slane %v17398_v63, %v25724_v2  ;;  %v15013_v63 = vadd.f32 %v24353_v40, %v24325_v46  ;;  %v15020_v46 = vadd.f32 %v24365_v39, %v24335_v43  ;;  %v15608_v40 = vadd.f32 %v24377_v44, %v15015_v23 }
 0x89a   :  { %25721 = vst [vmem:[#allocation33_spill] sm:$0xff] %v24421_v51  ;;  %v15014_v51 = vadd.f32 %v24343_v37, %v24316_v57  ;;  %v15016_v37 = vadd.f32 %v24357_v13, %v24327_v38  ;;  %v15026_v38 = vadd.f32 %v24367_v52, %v24337_v34  ;;  %v15611_v13 = vadd.f32 %v24381_v17, %v15018_v12  ;;  %v25730_v12 = vld [vmem:[#allocation76_spill] sm:$0xff] }
 0x89b   :  { %v24423_v55 = vpop.f32.mrf.mxu0  ;;  %v16358_v56 = vpop.f32.mrf.mxu1  ;;  %v24449_v57 = vadd.f32 %v24430_v31, %v24355_v3  ;;  %v15606_v34 = vadd.f32 %v24383_v50, %v15013_v63  ;;  %v16199_v16 = vadd.f32 %v15767_v19, %v15608_v40  ;;  %v16201_v23 = vadd.f32 %v24411_v24, %v15610_v45 }
 0x89c   :  { %25722 = vst [vmem:[#allocation41_spill] sm:$0xff] %v24423_v55  ;;  %v15607_v36 = vadd.f32 %v15174_v42, %v15014_v51  ;;  %v15609_v29 = vadd.f32 %v24385_v11, %v15016_v37  ;;  %v15613_v42 = vadd.f32 %v24393_v59, %v15020_v46  ;;  %v16202_v61 = vadd.f32 %v24403_v25, %v15611_v13  ;;  %v25728_v51 = vld [vmem:[#allocation61_spill] sm:$0xff] }
 0x89d   :  { %v16285_v41 = vpop.f32.mrf.mxu0  ;;  %v16498_v8 = vpop.f32.mrf.mxu1  ;;  %v16790_v44 = vadd.f32 %v16358_v56, %v16199_v16  ;;  %v15619_v50 = vadd.f32 %v24395_v53, %v15026_v38  ;;  %v16197_v11 = vadd.f32 %v24405_v20, %v15606_v34  ;;  %v15614_v19 = vadd.f32 %v25726_v48, %v15021_v26  ;;  %v25732_v38 = vld [vmem:[#allocation89_spill] sm:$0xff] }
 0x89e   :  { %v16793_v7 = vadd.f32 %v16498_v8, %v16202_v61  ;;  %v15618_v25 = vadd.f32 %v25728_v51, %v15025_v28  ;;  %v25731_v8 = vld [vmem:[#allocation54_spill] sm:$0xff] }
 0x89f   :  { %v16287_v35 = vpop.f32.mrf.mxu0  ;;  %v18275_v33 = vpop.f32.mrf.mxu1 }
 0x8a0   :  { %v15012_v33 = vadd.f32 %v24349_v15, %v24321_v9  ;;  %v15022_v9 = vadd.f32 %v24359_v27, %v24329_v58  ;;  %v16198_v58 = vadd.f32 %v15765_v5, %v15607_v36  ;;  %v16788_v56 = vadd.f32 %v16287_v35, %v16197_v11 }
 0x8a1   :  { %v24425_v1 = vpop.f32.mrf.mxu0  ;;  %v24427_v60 = vpop.f32.mrf.mxu1  ;;  %v17409_v36 = vadd.f32 %v24430_v31, %v16201_v23  ;;  %v16204_v35 = vadd.f32 %v25732_v38, %v15613_v42 }
 0x8a2   :  { %25723 = vst [vmem:[#allocation44_spill] sm:$0xff] %v24427_v60  ;;  %v15605_v43 = vadd.f32 %v24379_v14, %v15012_v33  ;;  %v16789_v62 = vadd.f32 %v16356_v4, %v16198_v58  ;;  %v15615_v52 = vadd.f32 %v24387_v10, %v15022_v9  ;;  %v25729_v4 = vld [vmem:[#allocation56_spill] sm:$0xff]  ;;  %v16207_v9 = vadd.f32 %v25731_v8, %v15616_v54 }
 0x8a3   :  { %v18270_v55 = vpop.f32.mrf.mxu0  ;;  %v24443_v60 = vpop.f32.mrf.mxu1 }
 0x8a4   :  { %v16196_v18 = vadd.f32 %v15694_v21, %v15605_v43  ;;  %v15617_v21 = vadd.f32 %v25727_v49, %v15024_v6  ;;  %v16200_v55 = vadd.f32 %v25729_v4, %v15609_v29  ;;  %v16206_v20 = vadd.f32 %v25730_v12, %v15615_v52  ;;  %v25734_v43 = vld [vmem:[#allocation83_spill] sm:$0xff] }
 0x8a5   :  { %v24453_v0 = vpop.f32.mrf.mxu0  ;;  %v24463_v15 = vpop.f32.mrf.mxu1  ;;  %v16210_v13 = vadd.f32 %v25734_v43, %v15619_v50 }
 0x8a6   :  { %v16787_v10 = vadd.f32 %v16285_v41, %v16196_v18  ;;  %v16791_v30 = vadd.f32 %v24425_v1, %v16200_v55  ;;  %v16798_v1 = vadd.f32 %v24443_v60, %v16207_v9  ;;  %v25735_v18 = vld [vmem:[#allocation80_spill] sm:$0xff]  ;;  %v16795_v42 = vadd.f32 %v24453_v0, %v16204_v35  ;;  %v25737_v0 = vld [vmem:[#allocation41_spill] sm:$0xff] }
 0x8a7   :  { %v24470_v3 = vpop.f32.mrf.mxu0  ;;  %v18285_v27 = vpop.f32.mrf.mxu1  ;;  %v16801_v11 = vadd.f32 %v24463_v15, %v16210_v13 }
 0x8a9   :  { %v24480_v39 = vpop.f32.mrf.mxu0  ;;  %v16947_v22 = vpop.f32.mrf.mxu1  ;;  %v25733_v26 = vld [vmem:[#allocation44_spill] sm:$0xff] }
 0x8aa   :  { %v17380_v14 = vadd.f32 %v16947_v22, %v16789_v62  ;;  %v16797_v40 = vadd.f32 %v25733_v26, %v16206_v20  ;;  %v16205_v22 = vadd.f32 %v25735_v18, %v15614_v19 }
 0x8ab   :  { %v18280_v17 = vpop.f32.mrf.mxu0  ;;  %v16949_v5 = vpop.f32.mrf.mxu1 }
 0x8ac   :  { %v17381_v2 = vadd.f32 %v16949_v5, %v16790_v44  ;;  %v17406_v24 = vadd.f32 %v24430_v31, %v17380_v14  ;;  %v25736_v17 = vld [vmem:[#allocation33_spill] sm:$0xff] }
 0x8ad   :  { %v16876_v59 = vpop.f32.mrf.mxu0  ;;  %v17089_v53 = vpop.f32.mrf.mxu1  ;;  %v16208_v50 = vadd.f32 %v25736_v17, %v15617_v21 }
 0x8ae   :  { %v17378_v33 = vadd.f32 %v16876_v59, %v16787_v10  ;;  %v17407_v41 = vadd.f32 %v24430_v31, %v17381_v2  ;;  %v17384_v63 = vadd.f32 %v17089_v53, %v16793_v7  ;;  %v16209_v7 = vadd.f32 %v25737_v0, %v15618_v25 }
 0x8af   :  { %v16878_v37 = vpop.f32.mrf.mxu0  ;;  %v18295_v46 = vpop.f32.mrf.mxu1  ;;  %v16799_v15 = vadd.f32 %v24480_v39, %v16208_v50 }
 0x8b0   :  { %v17379_v47 = vadd.f32 %v16878_v37, %v16788_v56  ;;  %v17437_v58 = vcombine.low %v17406_v24, %v17407_v41  ;;  %v17410_v6 = vadd.f32 %v24430_v31, %v17384_v63  ;;  %v17404_v27 = vadd.f32 %v24430_v31, %v17378_v33  ;;  %v25738_v33 = vld [vmem:[#allocation66_spill] sm:$0xff] }
 0x8b1   :  { %v17018_v28 = vpop.f32.mrf.mxu0  ;;  %v17231_v16 = vpop.f32.mrf.mxu1  ;;  %v17419_v53 = vadd.f32 %v24430_v31, %v25738_v33 }
 0x8b2   :  { %v17405_v34 = vadd.f32 %v24430_v31, %v17379_v47  ;;  %v17382_v29 = vadd.f32 %v17018_v28, %v16791_v30  ;;  %v17453_v62 = vrot.slane %v17437_v58, %v24435_v32  ;;  %v17439_v52 = vcombine.low %v17410_v6, %v24449_v57 }
 0x8b3   :  { %v17388_v45 = vadd.f32 %v17231_v16, %v16797_v40  ;;  %v18290_v54 = vpop.f32.mrf.mxu0  ;;  %v17233_v14 = vpop.f32.mrf.mxu1  ;;  %v16796_v57 = vadd.f32 %v24470_v3, %v16205_v22  ;;  %v17417_v30 = vadd.f32 %v24430_v31, %v16209_v7 }
 0x8b4   :  { %v17436_v61 = vcombine.low %v17404_v27, %v17405_v34  ;;  %v17408_v44 = vadd.f32 %v24430_v31, %v17382_v29  ;;  %v17467_v60 = vrot.slane %v17439_v52, %v24435_v32  ;;  %v17389_v23 = vadd.f32 %v17233_v14, %v16798_v1 }
 0x8b5   :  { %v17160_v10 = vpop.f32.mrf.mxu0  ;;  %v17373_v49 = vpop.f32.mrf.mxu1  ;;  %v17414_v2 = vadd.f32 %v24430_v31, %v17388_v45 }
 0x8b6   :  { %v17446_v5 = vrot.slane %v17436_v61, %v24435_v32  ;;  %v17438_v48 = vcombine.low %v17408_v44, %v17409_v36  ;;  %v17386_v19 = vadd.f32 %v17160_v10, %v16795_v42  ;;  %v17415_v59 = vadd.f32 %v24430_v31, %v17389_v23 }
 0x8b7   :  { %v17392_v21 = vadd.f32 %v17373_v49, %v16801_v11  ;;  %v17162_v51 = vpop.f32.mrf.mxu0  ;;  %v18305_v3 = vpop.f32.mrf.mxu1 }
 0x8b8   :  { %v17468_v4 = vcombine.low %v17446_v5, %v17453_v62  ;;  %v17460_v55 = vrot.slane %v17438_v48, %v24435_v32  ;;  %v17387_v56 = vadd.f32 %v17162_v51, %v16796_v57  ;;  %v17486_v12 = vcombine.low %v17414_v2, %v17415_v59 }
 0x8b9   :  { %v17412_v20 = vadd.f32 %v24430_v31, %v17386_v19  ;;  %v17418_v25 = vadd.f32 %v24430_v31, %v17392_v21  ;;  %v17302_v24 = vpop.f32.mrf.mxu0 }
 0x8ba   :  { %v17469_v41 = vcombine.low %v17460_v55, %v17467_v60  ;;  %v17413_v63 = vadd.f32 %v24430_v31, %v17387_v56  ;;  %v17390_v37 = vadd.f32 %v17302_v24, %v16799_v15  ;;  %v17476_v39 = vrot.slane %v17468_v4, %v24435_v32 }
 0x8bb   :  { %v17502_v36 = vrot.slane %v17486_v12, %v24435_v32  ;;  %v17488_v8 = vcombine.low %v17418_v25, %v17419_v53  ;;  %v18300_v9 = vpop.f32.mrf.mxu0 }
 0x8bc   :  { %v17485_v47 = vcombine.low %v17412_v20, %v17413_v63  ;;  %v17416_v46 = vadd.f32 %v24430_v31, %v17390_v37  ;;  %v17483_v38 = vrot.slane %v17469_v41, %v24435_v32 }
 0x8bd   :  { %v17516_v35 = vrot.slane %v17488_v8, %v24435_v32 }
 0x8be   :  { %v17495_v26 = vrot.slane %v17485_v47, %v24435_v32  ;;  %v17487_v40 = vcombine.low %v17416_v46, %v17417_v30  ;;  %v17484_v58 = vcombine.low %v17476_v39, %v17483_v38 }
 0x8c0   :  { %v17517_v6 = vcombine.low %v17495_v26, %v17502_v36  ;;  %v17509_v28 = vrot.slane %v17487_v40, %v24435_v32  ;;  %17536 = vst [vmem:[#allocation8] sm:$0xff] %v17484_v58 }
 0x8c2   :  { %v17518_v43 = vcombine.low %v17509_v28, %v17516_v35  ;;  %v17525_v13 = vrot.slane %v17517_v6, %v24435_v32 }
 0x8c4   :  { %v17532_v27 = vrot.slane %v17518_v43, %v24435_v32 }
 0x8c6   :  { %v17533_v31 = vcombine.low %v17525_v13, %v17532_v27 }
 0x8c8   :  { %17537 = vst [vmem:[#allocation8 + $0x8] sm:$0xff] %v17533_v31 }
 0x8c9   :  { %18376 = shalt.err (!%p18373_p0)
}
 0x8ca   :  { %17547 = dma.vmem_to_hbm [thread:$0]  %s17545_s26, 256, %s24551_s11, [#allocation5]  }
 0x8cb   :  { %18389 = dma.done.wait [#allocation5], 256  }
 0x8cc   :  { %18390 = vsyncadd [#allocation5], 4294967040 }
 0x8cd   :  { %17551 = vsyncpa [#allocation4], 1 }
 0x8ce   :  { %17552 = vsyncpa [#allocation7], 1 }
 0x8cf   :  { %17553 = vsyncpa [#allocation5], 1 }

</bundles_post_ra>
